<compile_context>
chip_gen: v5e
topology: v5e:2x2
jax: 0.10.0
libtpu: 0.0.40
codegen_flags: <defaults>
</compile_context>

<pallas_src>
import jax
import jax.numpy as jnp
from jax.experimental import pallas as pl
from jax.experimental.pallas import tpu as pltpu

BN_EPS = 1e-5
LANES = 128


def _round_up(x, m):
    return ((x + m - 1) // m) * m


# ----------------------------------------------------------------------- compiler knobs
_VMEM_LIMIT_CACHE = []


def _vmem_limit_bytes():
    """Generation-aware scoped-VMEM limit: ~48 MiB on 64 MiB parts (v7x), ~96 MiB on
    128 MiB parts (v5e/v6e); conservative 48 MiB fallback if the query fails."""
    if not _VMEM_LIMIT_CACHE:
        try:
            cap = int(pltpu.get_tpu_info().vmem_capacity_bytes)
        except Exception:
            cap = 64 * 1024 * 1024
        _VMEM_LIMIT_CACHE.append(min(cap * 3 // 4, 100 * 1024 * 1024))
    return _VMEM_LIMIT_CACHE[0]


def _mosaic_params():
    return pltpu.CompilerParams(dimension_semantics=("parallel",),
                                vmem_limit_bytes=_vmem_limit_bytes())


def _const_spec(shape):
    """BlockSpec for a grid-invariant operand; single-buffered when supported."""
    index_map = lambda n: (0,) * len(shape)
    try:
        return pl.BlockSpec(shape, index_map, pipeline_mode=pl.Buffered(1))
    except Exception:
        return pl.BlockSpec(shape, index_map)


# ------------------------------------------------------------------------ kernel bodies
def _conv3x3_and_stats(tap, w_ref, b_ref, conv_ref, stats_ref, col_ref, H, W, Cp):
    """Stage 9 shifted taps (bf16) into the im2col scratch once, contract as ONE deep-K
    MXU matmul (H*W, 9*Cp) x (9*Cp, Cp) with f32 accumulate, emit conv + BN partials."""
    for kh in range(3):
        for kw in range(3):
            k = kh * 3 + kw
            col_ref[:, :, k * Cp:(k + 1) * Cp] = tap(kh, kw)

    # Layout-free reshape (W is a multiple of the sublane tile at these sizes; for other
    # W this is still correct, just relayouts).
    patches = col_ref[...].reshape(H * W, 9 * Cp)
    conv = jnp.dot(patches, w_ref[...], preferred_element_type=jnp.float32)
    conv = conv + b_ref[0]                                        # (H*W, Cp) f32

    conv_ref[0] = conv.reshape(H, W, Cp).astype(conv_ref.dtype)   # bf16 HBM stream
    # Per-image [sum, sum_sq] partials in f32; summed over N in the wrapper.
    stats_ref[0, 0:1, :] = jnp.sum(conv, axis=0, keepdims=True)
    stats_ref[0, 1:2, :] = jnp.sum(conv * conv, axis=0, keepdims=True)


def _conv_stats_kernel(xpad_ref, w_ref, b_ref, conv_ref, stats_ref, col_ref):
    """Layer 0: conv3x3 + bias + per-image BN partials (no epilogue yet).

    xpad_ref : (1, H+2, W+2, Cp) f32   zero-padded activation (NHWC, lane-dense C)
    w_ref    : (9*Cp, Cp)        bf16  im2col-folded conv weights
    b_ref    : (1, Cp)           f32   conv bias
    conv_ref : (1, H, W, Cp)     bf16  conv output
    stats_ref: (1, 2, Cp)        f32   [sum, sum_sq] over this image's pixels
    col_ref  : (H, W, 9*Cp)      bf16  im2col staging scratch
    """
    _, H, W, Cp = conv_ref.shape
    tap = lambda kh, kw: xpad_ref[0, kh:kh + H, kw:kw + W, :].astype(jnp.bfloat16)
    _conv3x3_and_stats(tap, w_ref, b_ref, conv_ref, stats_ref, col_ref, H, W, Cp)


def _fused_kernel(xpad_ref, convp_ref, scale_ref, shift_ref, w_ref, b_ref,
                  xpad_out_ref, conv_ref, stats_ref, col_ref):
    """Layers d>=1: fused [BN+ReLU+residual of layer d-1] -> [conv3x3 + BN partials of d].

    The new padded activation is materialised exactly once (interior + thin halo stores,
    hidden under the following MXU matmul) and the next conv's im2col is staged straight
    from the VMEM-resident output block, so the activation makes a single HBM round trip
    per depth layer.  xpad_out is HBM-aliased with xpad (input_output_aliases).
    """
    _, H, W, Cp = conv_ref.shape
    Wp2 = W + 2

    # ---- epilogue of the previous layer: folded-affine BN + ReLU + residual (f32 VPU) ----
    act = jnp.maximum(convp_ref[0].astype(jnp.float32) * scale_ref[0] + shift_ref[0], 0.0)
    new = xpad_ref[0, 1:H + 1, 1:W + 1, :] + act                  # (H, W, Cp) f32

    # ---- write the new padded activation once: interior + thin halo stores ----
    xpad_out_ref[0, 1:H + 1, 1:W + 1, :] = new
    zrow = jnp.zeros((1, Wp2, Cp), jnp.float32)
    xpad_out_ref[0, 0:1, :, :] = zrow
    xpad_out_ref[0, H + 1:H + 2, :, :] = zrow
    zcol = jnp.zeros((H, 1, Cp), jnp.float32)
    xpad_out_ref[0, 1:H + 1, 0:1, :] = zcol
    xpad_out_ref[0, 1:H + 1, W + 1:W + 2, :] = zcol

    # ---- this layer's conv, staged from the freshly written (VMEM-resident) block ----
    tap = lambda kh, kw: xpad_out_ref[0, kh:kh + H, kw:kw + W, :].astype(jnp.bfloat16)
    _conv3x3_and_stats(tap, w_ref, b_ref, conv_ref, stats_ref, col_ref, H, W, Cp)


def _final_kernel(xpad_ref, convp_ref, scale_ref, shift_ref, o_ref):
    """Last layer's epilogue: one aligned full-block store of the UNPADDED activation."""
    _, H, W, Cp = o_ref.shape
    act = jnp.maximum(convp_ref[0].astype(jnp.float32) * scale_ref[0] + shift_ref[0], 0.0)
    o_ref[0] = xpad_ref[0, 1:H + 1, 1:W + 1, :] + act


# ------------------------------------------------------------------------- pallas_calls
def _conv_stats(xpad, w9, b, N, H, W, Cp):
    return pl.pallas_call(
        _conv_stats_kernel,
        grid=(N,),
        in_specs=[
            pl.BlockSpec((1, H + 2, W + 2, Cp), lambda n: (n, 0, 0, 0)),
            _const_spec((9 * Cp, Cp)),
            _const_spec((1, Cp)),
        ],
        out_specs=(
            pl.BlockSpec((1, H, W, Cp), lambda n: (n, 0, 0, 0)),
            pl.BlockSpec((1, 2, Cp), lambda n: (n, 0, 0)),
        ),
        out_shape=(
            jax.ShapeDtypeStruct((N, H, W, Cp), jnp.bfloat16),
            jax.ShapeDtypeStruct((N, 2, Cp), jnp.float32),
        ),
        scratch_shapes=[pltpu.VMEM((H, W, 9 * Cp), jnp.bfloat16)],
        compiler_params=_mosaic_params(),
    )(xpad, w9, b)


def _fused_step(xpad, conv_prev, scale, shift, w9, b, N, H, W, Cp):
    return pl.pallas_call(
        _fused_kernel,
        grid=(N,),
        in_specs=[
            pl.BlockSpec((1, H + 2, W + 2, Cp), lambda n: (n, 0, 0, 0)),
            pl.BlockSpec((1, H, W, Cp), lambda n: (n, 0, 0, 0)),
            _const_spec((1, Cp)),
            _const_spec((1, Cp)),
            _const_spec((9 * Cp, Cp)),
            _const_spec((1, Cp)),
        ],
        out_specs=(
            pl.BlockSpec((1, H + 2, W + 2, Cp), lambda n: (n, 0, 0, 0)),
            pl.BlockSpec((1, H, W, Cp), lambda n: (n, 0, 0, 0)),
            pl.BlockSpec((1, 2, Cp), lambda n: (n, 0, 0)),
        ),
        out_shape=(
            jax.ShapeDtypeStruct((N, H + 2, W + 2, Cp), jnp.float32),
            jax.ShapeDtypeStruct((N, H, W, Cp), jnp.bfloat16),
            jax.ShapeDtypeStruct((N, 2, Cp), jnp.float32),
        ),
        scratch_shapes=[pltpu.VMEM((H, W, 9 * Cp), jnp.bfloat16)],
        input_output_aliases={0: 0},   # reuse the padded-activation HBM buffer in place
        compiler_params=_mosaic_params(),
    )(xpad, conv_prev, scale, shift, w9, b)


def _final_step(xpad, conv_prev, scale, shift, N, H, W, Cp):
    return pl.pallas_call(
        _final_kernel,
        grid=(N,),
        in_specs=[
            pl.BlockSpec((1, H + 2, W + 2, Cp), lambda n: (n, 0, 0, 0)),
            pl.BlockSpec((1, H, W, Cp), lambda n: (n, 0, 0, 0)),
            _const_spec((1, Cp)),
            _const_spec((1, Cp)),
        ],
        out_specs=pl.BlockSpec((1, H, W, Cp), lambda n: (n, 0, 0, 0)),
        out_shape=jax.ShapeDtypeStruct((N, H, W, Cp), jnp.float32),
        compiler_params=_mosaic_params(),
    )(xpad, conv_prev, scale, shift)


# ----------------------------------------------------------------------------- wrapper
def respath_forward(x_nchw, params):
    """params: list of (w_oihw, bias, gamma, beta) per depth block (PyTorch layouts)."""
    N, C, H, W = x_nchw.shape
    Cp = _round_up(C, LANES)
    count = N * H * W

    # NCHW -> NHWC (lane-dense channels), pad C to the lane width and add the halo once.
    x = jnp.transpose(x_nchw, (0, 2, 3, 1)).astype(jnp.float32)
    xpad = jnp.pad(x, ((0, 0), (1, 1), (1, 1), (0, Cp - C)))

    # Parameter prep (tiny, plain JAX): fold the 9 conv taps into the matmul K dim,
    # cast MXU operands to bf16, keep bias / BN affine in f32.
    prepped = []
    for (w_oihw, b, gamma, beta) in params:
        wt = jnp.transpose(w_oihw, (2, 3, 1, 0)).astype(jnp.float32)   # (3,3,Cin,Cout)
        wt = jnp.pad(wt, ((0, 0), (0, 0), (0, Cp - C), (0, Cp - C)))
        w9 = wt.reshape(9 * Cp, Cp).astype(jnp.bfloat16)
        b_p = jnp.pad(b.astype(jnp.float32), (0, Cp - C)).reshape(1, Cp)
        gamma_p = jnp.pad(gamma.astype(jnp.float32), (0, Cp - C))
        beta_p = jnp.pad(beta.astype(jnp.float32), (0, Cp - C))
        prepped.append((w9, b_p, gamma_p, beta_p))

    def finalize(stats, gamma_p, beta_p):
        # Train-mode (biased) batch statistics; fold BN into one scale/shift per channel.
        tot = jnp.sum(stats, axis=0)                      # (2, Cp)
        mean = tot[0] / count
        var = jnp.maximum(tot[1] / count - mean * mean, 0.0)
        scale = gamma_p * jax.lax.rsqrt(var + BN_EPS)
        shift = beta_p - mean * scale
        return scale.reshape(1, Cp), shift.reshape(1, Cp)

    # Layer 0: conv + per-image BN partials.
    w9, b_p, gamma_p, beta_p = prepped[0]
    conv, stats = _conv_stats(xpad, w9, b_p, N, H, W, Cp)
    scale, shift = finalize(stats, gamma_p, beta_p)

    # Layers 1..depth-1: fused [epilogue of d-1] + [conv of d].
    for d in range(1, len(prepped)):
        w9, b_p, gamma_p, beta_p = prepped[d]
        xpad, conv, stats = _fused_step(xpad, conv, scale, shift, w9, b_p, N, H, W, Cp)
        scale, shift = finalize(stats, gamma_p, beta_p)

    # Epilogue of the last layer -> unpadded NHWC output.
    out = _final_step(xpad, conv, scale, shift, N, H, W, Cp)
    return jnp.transpose(out[:, :, :, :C], (0, 3, 1, 2))          # NHWC -> NCHW


# ----------------------------------------------------------------------------- reference
def respath_reference(x_nchw, params):
    """Pure-JAX reference mirroring the PyTorch module (train-mode BN)."""
    x = x_nchw.astype(jnp.float32)
    for (w_oihw, b, gamma, beta) in params:
        conv = jax.lax.conv_general_dilated(
            x, w_oihw, window_strides=(1, 1), padding="SAME",
            dimension_numbers=("NCHW", "OIHW", "NCHW"),
            precision=jax.lax.Precision.HIGHEST)
        conv = conv + b[None, :, None, None]
        mean = conv.mean(axis=(0, 2, 3), keepdims=True)
        var = ((conv - mean) ** 2).mean(axis=(0, 2, 3), keepdims=True)
        bn = (gamma[None, :, None, None] * (conv - mean) * jax.lax.rsqrt(var + BN_EPS)
              + beta[None, :, None, None])
        x = x + jnp.maximum(bn, 0.0)
    return x


def make_params(key, channels, depth):
    params = []
    for _ in range(depth):
        k_w, k_b, k_g, k_bt, key = jax.random.split(key, 5)
        w = 0.2 * jax.random.normal(k_w, (channels, channels, 3, 3), jnp.float32)
        b = 0.1 * jax.random.normal(k_b, (channels,), jnp.float32)
        gamma = 1.0 + 0.1 * jax.random.normal(k_g, (channels,), jnp.float32)
        beta = 0.1 * jax.random.normal(k_bt, (channels,), jnp.float32)
        params.append((w, b, gamma, beta))
    return params


if __name__ == "__main__":
    N, C, H, W = 2, 4, 16, 16
    depth = 2

    key = jax.random.PRNGKey(0)
    k_x, k_p = jax.random.split(key)
    x = jax.random.normal(k_x, (N, C, H, W), jnp.float32)          # PyTorch NCHW input
    params = make_params(k_p, C, depth)

    fwd = jax.jit(respath_forward)
    out = jax.block_until_ready(fwd(x, params))

    ref = respath_reference(x, params)
    assert out.shape == (N, C, H, W)
    assert bool(jnp.all(jnp.isfinite(out)))
    # bf16 MXU operands + bf16 conv intermediate vs. an f32 HIGHEST-precision reference:
    # tight relative-RMS check plus a loose max-abs bound.
    rel_rms = float(jnp.sqrt(jnp.mean((out - ref) ** 2) / (jnp.mean(ref ** 2) + 1e-12)))
    max_abs = float(jnp.max(jnp.abs(out - ref)))
    assert rel_rms < 2e-2, (rel_rms, max_abs)
    assert max_abs < 1.5e-1, (rel_rms, max_abs)

    print("KERNEL_OK")
</pallas_src>

<mosaic_0001>
module attributes {stable_mosaic.version = 11 : i64} {
  func.func @_conv_stats_kernel(%arg0: i32, %arg1: memref<1x18x18x128xf32, #tpu.memory_space<vmem>>, %arg2: memref<1152x128xbf16, #tpu.memory_space<vmem>>, %arg3: memref<1x128xf32, #tpu.memory_space<vmem>>, %arg4: memref<1x16x16x128xbf16, #tpu.memory_space<vmem>>, %arg5: memref<1x2x128xf32, #tpu.memory_space<vmem>>, %arg6: memref<16x16x1152xbf16, #tpu.memory_space<vmem>>) attributes {dimension_semantics = [#tpu.dimension_semantics<parallel>], iteration_bounds = array<i64: 2>, scalar_prefetch = 0 : i64, scratch_operands = 1 : i64, tpu.core_type = #tpu.core_type<tc>, window_params = [{transform_indices = @transform_0, window_bounds = array<i64: 1, 18, 18, 128>}, {pipeline_mode = #tpu.pipeline_mode<synchronous>, transform_indices = @transform_1, window_bounds = array<i64: 1152, 128>}, {pipeline_mode = #tpu.pipeline_mode<synchronous>, transform_indices = @transform_2, window_bounds = array<i64: 1, 128>}, {transform_indices = @transform_3, window_bounds = array<i64: 1, 16, 16, 128>}, {transform_indices = @transform_4, window_bounds = array<i64: 1, 2, 128>}]} {
    %c0 = arith.constant 0 : index
    %c0_0 = arith.constant 0 : index
    %c0_1 = arith.constant 0 : index
    %c0_2 = arith.constant 0 : index
    %0 = vector.load %arg1[%c0, %c0_0, %c0_1, %c0_2] : memref<1x18x18x128xf32, #tpu.memory_space<vmem>>, vector<1x16x16x128xf32>
    %1 = vector.shape_cast %0 : vector<1x16x16x128xf32> to vector<16x16x128xf32>
    %2 = arith.truncf %1 : vector<16x16x128xf32> to vector<16x16x128xbf16>
    %c0_3 = arith.constant 0 : index
    %c0_4 = arith.constant 0 : index
    %c0_5 = arith.constant 0 : index
    %3 = vector.load %arg6[%c0_3, %c0_4, %c0_5] : memref<16x16x1152xbf16, #tpu.memory_space<vmem>>, vector<16x16x128xbf16>
    tpu.vector_store %arg6[%c0_3, %c0_4, %c0_5], %2 {strides = array<i32>} : memref<16x16x1152xbf16, #tpu.memory_space<vmem>>, vector<16x16x128xbf16>,
    %c0_6 = arith.constant 0 : index
    %c0_7 = arith.constant 0 : index
    %c1 = arith.constant 1 : index
    %c0_8 = arith.constant 0 : index
    %4 = vector.load %arg1[%c0_6, %c0_7, %c1, %c0_8] : memref<1x18x18x128xf32, #tpu.memory_space<vmem>>, vector<1x16x16x128xf32>
    %5 = vector.shape_cast %4 : vector<1x16x16x128xf32> to vector<16x16x128xf32>
    %6 = arith.truncf %5 : vector<16x16x128xf32> to vector<16x16x128xbf16>
    %c0_9 = arith.constant 0 : index
    %c0_10 = arith.constant 0 : index
    %c128 = arith.constant 128 : index
    %7 = vector.load %arg6[%c0_9, %c0_10, %c128] : memref<16x16x1152xbf16, #tpu.memory_space<vmem>>, vector<16x16x128xbf16>
    tpu.vector_store %arg6[%c0_9, %c0_10, %c128], %6 {strides = array<i32>} : memref<16x16x1152xbf16, #tpu.memory_space<vmem>>, vector<16x16x128xbf16>,
    %c0_11 = arith.constant 0 : index
    %c0_12 = arith.constant 0 : index
    %c2 = arith.constant 2 : index
    %c0_13 = arith.constant 0 : index
    %8 = vector.load %arg1[%c0_11, %c0_12, %c2, %c0_13] : memref<1x18x18x128xf32, #tpu.memory_space<vmem>>, vector<1x16x16x128xf32>
    %9 = vector.shape_cast %8 : vector<1x16x16x128xf32> to vector<16x16x128xf32>
    %10 = arith.truncf %9 : vector<16x16x128xf32> to vector<16x16x128xbf16>
    %c0_14 = arith.constant 0 : index
    %c0_15 = arith.constant 0 : index
    %c256 = arith.constant 256 : index
    %11 = vector.load %arg6[%c0_14, %c0_15, %c256] : memref<16x16x1152xbf16, #tpu.memory_space<vmem>>, vector<16x16x128xbf16>
    tpu.vector_store %arg6[%c0_14, %c0_15, %c256], %10 {strides = array<i32>} : memref<16x16x1152xbf16, #tpu.memory_space<vmem>>, vector<16x16x128xbf16>,
    %c0_16 = arith.constant 0 : index
    %c1_17 = arith.constant 1 : index
    %c0_18 = arith.constant 0 : index
    %c0_19 = arith.constant 0 : index
    %12 = vector.load %arg1[%c0_16, %c1_17, %c0_18, %c0_19] : memref<1x18x18x128xf32, #tpu.memory_space<vmem>>, vector<1x16x16x128xf32>
    %13 = vector.shape_cast %12 : vector<1x16x16x128xf32> to vector<16x16x128xf32>
    %14 = arith.truncf %13 : vector<16x16x128xf32> to vector<16x16x128xbf16>
    %c0_20 = arith.constant 0 : index
    %c0_21 = arith.constant 0 : index
    %c384 = arith.constant 384 : index
    %15 = vector.load %arg6[%c0_20, %c0_21, %c384] : memref<16x16x1152xbf16, #tpu.memory_space<vmem>>, vector<16x16x128xbf16>
    tpu.vector_store %arg6[%c0_20, %c0_21, %c384], %14 {strides = array<i32>} : memref<16x16x1152xbf16, #tpu.memory_space<vmem>>, vector<16x16x128xbf16>,
    %c0_22 = arith.constant 0 : index
    %c1_23 = arith.constant 1 : index
    %c1_24 = arith.constant 1 : index
    %c0_25 = arith.constant 0 : index
    %16 = vector.load %arg1[%c0_22, %c1_23, %c1_24, %c0_25] : memref<1x18x18x128xf32, #tpu.memory_space<vmem>>, vector<1x16x16x128xf32>
    %17 = vector.shape_cast %16 : vector<1x16x16x128xf32> to vector<16x16x128xf32>
    %18 = arith.truncf %17 : vector<16x16x128xf32> to vector<16x16x128xbf16>
    %c0_26 = arith.constant 0 : index
    %c0_27 = arith.constant 0 : index
    %c512 = arith.constant 512 : index
    %19 = vector.load %arg6[%c0_26, %c0_27, %c512] : memref<16x16x1152xbf16, #tpu.memory_space<vmem>>, vector<16x16x128xbf16>
    tpu.vector_store %arg6[%c0_26, %c0_27, %c512], %18 {strides = array<i32>} : memref<16x16x1152xbf16, #tpu.memory_space<vmem>>, vector<16x16x128xbf16>,
    %c0_28 = arith.constant 0 : index
    %c1_29 = arith.constant 1 : index
    %c2_30 = arith.constant 2 : index
    %c0_31 = arith.constant 0 : index
    %20 = vector.load %arg1[%c0_28, %c1_29, %c2_30, %c0_31] : memref<1x18x18x128xf32, #tpu.memory_space<vmem>>, vector<1x16x16x128xf32>
    %21 = vector.shape_cast %20 : vector<1x16x16x128xf32> to vector<16x16x128xf32>
    %22 = arith.truncf %21 : vector<16x16x128xf32> to vector<16x16x128xbf16>
    %c0_32 = arith.constant 0 : index
    %c0_33 = arith.constant 0 : index
    %c640 = arith.constant 640 : index
    %23 = vector.load %arg6[%c0_32, %c0_33, %c640] : memref<16x16x1152xbf16, #tpu.memory_space<vmem>>, vector<16x16x128xbf16>
    tpu.vector_store %arg6[%c0_32, %c0_33, %c640], %22 {strides = array<i32>} : memref<16x16x1152xbf16, #tpu.memory_space<vmem>>, vector<16x16x128xbf16>,
    %c0_34 = arith.constant 0 : index
    %c2_35 = arith.constant 2 : index
    %c0_36 = arith.constant 0 : index
    %c0_37 = arith.constant 0 : index
    %24 = vector.load %arg1[%c0_34, %c2_35, %c0_36, %c0_37] : memref<1x18x18x128xf32, #tpu.memory_space<vmem>>, vector<1x16x16x128xf32>
    %25 = vector.shape_cast %24 : vector<1x16x16x128xf32> to vector<16x16x128xf32>
    %26 = arith.truncf %25 : vector<16x16x128xf32> to vector<16x16x128xbf16>
    %c0_38 = arith.constant 0 : index
    %c0_39 = arith.constant 0 : index
    %c768 = arith.constant 768 : index
    %27 = vector.load %arg6[%c0_38, %c0_39, %c768] : memref<16x16x1152xbf16, #tpu.memory_space<vmem>>, vector<16x16x128xbf16>
    tpu.vector_store %arg6[%c0_38, %c0_39, %c768], %26 {strides = array<i32>} : memref<16x16x1152xbf16, #tpu.memory_space<vmem>>, vector<16x16x128xbf16>,
    %c0_40 = arith.constant 0 : index
    %c2_41 = arith.constant 2 : index
    %c1_42 = arith.constant 1 : index
    %c0_43 = arith.constant 0 : index
    %28 = vector.load %arg1[%c0_40, %c2_41, %c1_42, %c0_43] : memref<1x18x18x128xf32, #tpu.memory_space<vmem>>, vector<1x16x16x128xf32>
    %29 = vector.shape_cast %28 : vector<1x16x16x128xf32> to vector<16x16x128xf32>
    %30 = arith.truncf %29 : vector<16x16x128xf32> to vector<16x16x128xbf16>
    %c0_44 = arith.constant 0 : index
    %c0_45 = arith.constant 0 : index
    %c896 = arith.constant 896 : index
    %31 = vector.load %arg6[%c0_44, %c0_45, %c896] : memref<16x16x1152xbf16, #tpu.memory_space<vmem>>, vector<16x16x128xbf16>
    tpu.vector_store %arg6[%c0_44, %c0_45, %c896], %30 {strides = array<i32>} : memref<16x16x1152xbf16, #tpu.memory_space<vmem>>, vector<16x16x128xbf16>,
    %c0_46 = arith.constant 0 : index
    %c2_47 = arith.constant 2 : index
    %c2_48 = arith.constant 2 : index
    %c0_49 = arith.constant 0 : index
    %32 = vector.load %arg1[%c0_46, %c2_47, %c2_48, %c0_49] : memref<1x18x18x128xf32, #tpu.memory_space<vmem>>, vector<1x16x16x128xf32>
    %33 = vector.shape_cast %32 : vector<1x16x16x128xf32> to vector<16x16x128xf32>
    %34 = arith.truncf %33 : vector<16x16x128xf32> to vector<16x16x128xbf16>
    %c0_50 = arith.constant 0 : index
    %c0_51 = arith.constant 0 : index
    %c1024 = arith.constant 1024 : index
    %35 = vector.load %arg6[%c0_50, %c0_51, %c1024] : memref<16x16x1152xbf16, #tpu.memory_space<vmem>>, vector<16x16x128xbf16>
    tpu.vector_store %arg6[%c0_50, %c0_51, %c1024], %34 {strides = array<i32>} : memref<16x16x1152xbf16, #tpu.memory_space<vmem>>, vector<16x16x128xbf16>,
    %c0_52 = arith.constant 0 : index
    %c0_53 = arith.constant 0 : index
    %c0_54 = arith.constant 0 : index
    %36 = vector.load %arg6[%c0_52, %c0_53, %c0_54] : memref<16x16x1152xbf16, #tpu.memory_space<vmem>>, vector<16x16x1152xbf16>
    %37 = vector.shape_cast %36 : vector<16x16x1152xbf16> to vector<256x1152xbf16>
    %c0_55 = arith.constant 0 : index
    %c0_56 = arith.constant 0 : index
    %38 = vector.load %arg2[%c0_55, %c0_56] : memref<1152x128xbf16, #tpu.memory_space<vmem>>, vector<1152x128xbf16>
    %cst = arith.constant dense<0.000000e+00> : vector<256x128xf32>
    %39 = tpu.matmul %37, %38, %cst {dimension_numbers = #tpu.dot_dimension_numbers<[1], [0], [0], [1], [0, 0, 1, 1], [], []>} : vector<256x1152xbf16>, vector<1152x128xbf16>, vector<256x128xf32> -> vector<256x128xf32>
    %c0_57 = arith.constant 0 : index
    %c0_58 = arith.constant 0 : index
    %40 = vector.load %arg3[%c0_57, %c0_58] : memref<1x128xf32, #tpu.memory_space<vmem>>, vector<1x128xf32>
    %41 = vector.shape_cast %40 : vector<1x128xf32> to vector<128xf32>
    %42 = vector.shape_cast %41 : vector<128xf32> to vector<1x128xf32>
    %43 = vector.broadcast %42 : vector<1x128xf32> to vector<256x128xf32>
    %44 = arith.addf %39, %43 : vector<256x128xf32>
    %45 = vector.shape_cast %44 : vector<256x128xf32> to vector<16x16x128xf32>
    %46 = arith.truncf %45 : vector<16x16x128xf32> to vector<16x16x128xbf16>
    %c0_59 = arith.constant 0 : index
    %c0_60 = arith.constant 0 : index
    %c0_61 = arith.constant 0 : index
    %c0_62 = arith.constant 0 : index
    %47 = vector.load %arg4[%c0_59, %c0_60, %c0_61, %c0_62] : memref<1x16x16x128xbf16, #tpu.memory_space<vmem>>, vector<1x16x16x128xbf16>
    %48 = vector.shape_cast %47 : vector<1x16x16x128xbf16> to vector<16x16x128xbf16>
    %49 = vector.shape_cast %46 : vector<16x16x128xbf16> to vector<1x16x16x128xbf16>
    tpu.vector_store %arg4[%c0_59, %c0_60, %c0_61, %c0_62], %49 {strides = array<i32>} : memref<1x16x16x128xbf16, #tpu.memory_space<vmem>>, vector<1x16x16x128xbf16>,
    %cst_63 = arith.constant dense<0.000000e+00> : vector<128xf32>
    %50 = vector.multi_reduction <add>, %44, %cst_63 [0] : vector<256x128xf32> to vector<128xf32>
    %51 = vector.shape_cast %50 : vector<128xf32> to vector<1x128xf32>
    %c0_64 = arith.constant 0 : index
    %c0_65 = arith.constant 0 : index
    %c0_66 = arith.constant 0 : index
    %52 = vector.load %arg5[%c0_64, %c0_65, %c0_66] : memref<1x2x128xf32, #tpu.memory_space<vmem>>, vector<1x1x128xf32>
    %53 = vector.shape_cast %52 : vector<1x1x128xf32> to vector<1x128xf32>
    %54 = vector.shape_cast %51 : vector<1x128xf32> to vector<1x1x128xf32>
    tpu.vector_store %arg5[%c0_64, %c0_65, %c0_66], %54 {strides = array<i32>} : memref<1x2x128xf32, #tpu.memory_space<vmem>>, vector<1x1x128xf32>,
    %55 = arith.mulf %44, %44 : vector<256x128xf32>
    %cst_67 = arith.constant dense<0.000000e+00> : vector<128xf32>
    %56 = vector.multi_reduction <add>, %55, %cst_67 [0] : vector<256x128xf32> to vector<128xf32>
    %57 = vector.shape_cast %56 : vector<128xf32> to vector<1x128xf32>
    %c0_68 = arith.constant 0 : index
    %c1_69 = arith.constant 1 : index
    %c0_70 = arith.constant 0 : index
    %58 = vector.load %arg5[%c0_68, %c1_69, %c0_70] : memref<1x2x128xf32, #tpu.memory_space<vmem>>, vector<1x1x128xf32>
    %59 = vector.shape_cast %58 : vector<1x1x128xf32> to vector<1x128xf32>
    %60 = vector.shape_cast %57 : vector<1x128xf32> to vector<1x1x128xf32>
    tpu.vector_store %arg5[%c0_68, %c1_69, %c0_70], %60 {strides = array<i32>} : memref<1x2x128xf32, #tpu.memory_space<vmem>>, vector<1x1x128xf32>,
    return
  }
  func.func @transform_0(%arg0: i32) -> (i32, i32, i32, i32) {
    %c0_i32 = arith.constant 0 : i32
    %c0_i32_0 = arith.constant 0 : i32
    %c0_i32_1 = arith.constant 0 : i32
    %c0_i32_2 = arith.constant 0 : i32
    return %arg0, %c0_i32, %c0_i32_0, %c0_i32_1 : i32, i32, i32, i32
  }
  func.func @transform_1(%arg0: i32) -> (i32, i32) {
    %c0_i32 = arith.constant 0 : i32
    %c0_i32_0 = arith.constant 0 : i32
    %c0_i32_1 = arith.constant 0 : i32
    return %c0_i32, %c0_i32_0 : i32, i32
  }
  func.func @transform_2(%arg0: i32) -> (i32, i32) {
    %c0_i32 = arith.constant 0 : i32
    %c0_i32_0 = arith.constant 0 : i32
    %c0_i32_1 = arith.constant 0 : i32
    return %c0_i32, %c0_i32_0 : i32, i32
  }
  func.func @transform_3(%arg0: i32) -> (i32, i32, i32, i32) {
    %c0_i32 = arith.constant 0 : i32
    %c0_i32_0 = arith.constant 0 : i32
    %c0_i32_1 = arith.constant 0 : i32
    %c0_i32_2 = arith.constant 0 : i32
    return %arg0, %c0_i32, %c0_i32_0, %c0_i32_1 : i32, i32, i32, i32
  }
  func.func @transform_4(%arg0: i32) -> (i32, i32, i32) {
    %c0_i32 = arith.constant 0 : i32
    %c0_i32_0 = arith.constant 0 : i32
    %c0_i32_1 = arith.constant 0 : i32
    return %arg0, %c0_i32, %c0_i32_0 : i32, i32, i32
  }
}

module attributes {stable_mosaic.version = 11 : i64} {
  func.func @_final_kernel(%arg0: i32, %arg1: memref<1x18x18x128xf32, #tpu.memory_space<vmem>>, %arg2: memref<1x16x16x128xbf16, #tpu.memory_space<vmem>>, %arg3: memref<1x128xf32, #tpu.memory_space<vmem>>, %arg4: memref<1x128xf32, #tpu.memory_space<vmem>>, %arg5: memref<1x16x16x128xf32, #tpu.memory_space<vmem>>) attributes {dimension_semantics = [#tpu.dimension_semantics<parallel>], iteration_bounds = array<i64: 2>, scalar_prefetch = 0 : i64, scratch_operands = 0 : i64, tpu.core_type = #tpu.core_type<tc>, window_params = [{transform_indices = @transform_0, window_bounds = array<i64: 1, 18, 18, 128>}, {transform_indices = @transform_1, window_bounds = array<i64: 1, 16, 16, 128>}, {pipeline_mode = #tpu.pipeline_mode<synchronous>, transform_indices = @transform_2, window_bounds = array<i64: 1, 128>}, {pipeline_mode = #tpu.pipeline_mode<synchronous>, transform_indices = @transform_3, window_bounds = array<i64: 1, 128>}, {transform_indices = @transform_4, window_bounds = array<i64: 1, 16, 16, 128>}]} {
    %c0 = arith.constant 0 : index
    %c0_0 = arith.constant 0 : index
    %c0_1 = arith.constant 0 : index
    %c0_2 = arith.constant 0 : index
    %0 = vector.load %arg2[%c0, %c0_0, %c0_1, %c0_2] : memref<1x16x16x128xbf16, #tpu.memory_space<vmem>>, vector<1x16x16x128xbf16>
    %1 = vector.shape_cast %0 : vector<1x16x16x128xbf16> to vector<16x16x128xbf16>
    %2 = arith.extf %1 : vector<16x16x128xbf16> to vector<16x16x128xf32>
    %c0_3 = arith.constant 0 : index
    %c0_4 = arith.constant 0 : index
    %3 = vector.load %arg3[%c0_3, %c0_4] : memref<1x128xf32, #tpu.memory_space<vmem>>, vector<1x128xf32>
    %4 = vector.shape_cast %3 : vector<1x128xf32> to vector<128xf32>
    %5 = vector.shape_cast %4 : vector<128xf32> to vector<1x1x128xf32>
    %6 = vector.broadcast %5 : vector<1x1x128xf32> to vector<16x16x128xf32>
    %7 = arith.mulf %2, %6 : vector<16x16x128xf32>
    %c0_5 = arith.constant 0 : index
    %c0_6 = arith.constant 0 : index
    %8 = vector.load %arg4[%c0_5, %c0_6] : memref<1x128xf32, #tpu.memory_space<vmem>>, vector<1x128xf32>
    %9 = vector.shape_cast %8 : vector<1x128xf32> to vector<128xf32>
    %10 = vector.shape_cast %9 : vector<128xf32> to vector<1x1x128xf32>
    %11 = vector.broadcast %10 : vector<1x1x128xf32> to vector<16x16x128xf32>
    %12 = arith.addf %7, %11 : vector<16x16x128xf32>
    %cst = arith.constant 0.000000e+00 : f32
    %13 = vector.broadcast %cst : f32 to vector<16x16x128xf32>
    %14 = arith.maximumf %12, %13 : vector<16x16x128xf32>
    %c0_7 = arith.constant 0 : index
    %c1 = arith.constant 1 : index
    %c1_8 = arith.constant 1 : index
    %c0_9 = arith.constant 0 : index
    %15 = vector.load %arg1[%c0_7, %c1, %c1_8, %c0_9] : memref<1x18x18x128xf32, #tpu.memory_space<vmem>>, vector<1x16x16x128xf32>
    %16 = vector.shape_cast %15 : vector<1x16x16x128xf32> to vector<16x16x128xf32>
    %17 = arith.addf %16, %14 : vector<16x16x128xf32>
    %c0_10 = arith.constant 0 : index
    %c0_11 = arith.constant 0 : index
    %c0_12 = arith.constant 0 : index
    %c0_13 = arith.constant 0 : index
    %18 = vector.load %arg5[%c0_10, %c0_11, %c0_12, %c0_13] : memref<1x16x16x128xf32, #tpu.memory_space<vmem>>, vector<1x16x16x128xf32>
    %19 = vector.shape_cast %18 : vector<1x16x16x128xf32> to vector<16x16x128xf32>
    %20 = vector.shape_cast %17 : vector<16x16x128xf32> to vector<1x16x16x128xf32>
    tpu.vector_store %arg5[%c0_10, %c0_11, %c0_12, %c0_13], %20 {strides = array<i32>} : memref<1x16x16x128xf32, #tpu.memory_space<vmem>>, vector<1x16x16x128xf32>,
    return
  }
  func.func @transform_0(%arg0: i32) -> (i32, i32, i32, i32) {
    %c0_i32 = arith.constant 0 : i32
    %c0_i32_0 = arith.constant 0 : i32
    %c0_i32_1 = arith.constant 0 : i32
    %c0_i32_2 = arith.constant 0 : i32
    return %arg0, %c0_i32, %c0_i32_0, %c0_i32_1 : i32, i32, i32, i32
  }
  func.func @transform_1(%arg0: i32) -> (i32, i32, i32, i32) {
    %c0_i32 = arith.constant 0 : i32
    %c0_i32_0 = arith.constant 0 : i32
    %c0_i32_1 = arith.constant 0 : i32
    %c0_i32_2 = arith.constant 0 : i32
    return %arg0, %c0_i32, %c0_i32_0, %c0_i32_1 : i32, i32, i32, i32
  }
  func.func @transform_2(%arg0: i32) -> (i32, i32) {
    %c0_i32 = arith.constant 0 : i32
    %c0_i32_0 = arith.constant 0 : i32
    %c0_i32_1 = arith.constant 0 : i32
    return %c0_i32, %c0_i32_0 : i32, i32
  }
  func.func @transform_3(%arg0: i32) -> (i32, i32) {
    %c0_i32 = arith.constant 0 : i32
    %c0_i32_0 = arith.constant 0 : i32
    %c0_i32_1 = arith.constant 0 : i32
    return %c0_i32, %c0_i32_0 : i32, i32
  }
  func.func @transform_4(%arg0: i32) -> (i32, i32, i32, i32) {
    %c0_i32 = arith.constant 0 : i32
    %c0_i32_0 = arith.constant 0 : i32
    %c0_i32_1 = arith.constant 0 : i32
    %c0_i32_2 = arith.constant 0 : i32
    return %arg0, %c0_i32, %c0_i32_0, %c0_i32_1 : i32, i32, i32, i32
  }
}

module attributes {stable_mosaic.version = 11 : i64} {
  func.func @_fused_kernel(%arg0: i32, %arg1: memref<1x18x18x128xf32, #tpu.memory_space<vmem>>, %arg2: memref<1x16x16x128xbf16, #tpu.memory_space<vmem>>, %arg3: memref<1x128xf32, #tpu.memory_space<vmem>>, %arg4: memref<1x128xf32, #tpu.memory_space<vmem>>, %arg5: memref<1152x128xbf16, #tpu.memory_space<vmem>>, %arg6: memref<1x128xf32, #tpu.memory_space<vmem>>, %arg7: memref<1x18x18x128xf32, #tpu.memory_space<vmem>>, %arg8: memref<1x16x16x128xbf16, #tpu.memory_space<vmem>>, %arg9: memref<1x2x128xf32, #tpu.memory_space<vmem>>, %arg10: memref<16x16x1152xbf16, #tpu.memory_space<vmem>>) attributes {dimension_semantics = [#tpu.dimension_semantics<parallel>], iteration_bounds = array<i64: 2>, scalar_prefetch = 0 : i64, scratch_operands = 1 : i64, tpu.core_type = #tpu.core_type<tc>, window_params = [{transform_indices = @transform_0, window_bounds = array<i64: 1, 18, 18, 128>}, {transform_indices = @transform_1, window_bounds = array<i64: 1, 16, 16, 128>}, {pipeline_mode = #tpu.pipeline_mode<synchronous>, transform_indices = @transform_2, window_bounds = array<i64: 1, 128>}, {pipeline_mode = #tpu.pipeline_mode<synchronous>, transform_indices = @transform_3, window_bounds = array<i64: 1, 128>}, {pipeline_mode = #tpu.pipeline_mode<synchronous>, transform_indices = @transform_4, window_bounds = array<i64: 1152, 128>}, {pipeline_mode = #tpu.pipeline_mode<synchronous>, transform_indices = @transform_5, window_bounds = array<i64: 1, 128>}, {transform_indices = @transform_6, window_bounds = array<i64: 1, 18, 18, 128>}, {transform_indices = @transform_7, window_bounds = array<i64: 1, 16, 16, 128>}, {transform_indices = @transform_8, window_bounds = array<i64: 1, 2, 128>}]} {
    %c0 = arith.constant 0 : index
    %c0_0 = arith.constant 0 : index
    %c0_1 = arith.constant 0 : index
    %c0_2 = arith.constant 0 : index
    %0 = vector.load %arg2[%c0, %c0_0, %c0_1, %c0_2] : memref<1x16x16x128xbf16, #tpu.memory_space<vmem>>, vector<1x16x16x128xbf16>
    %1 = vector.shape_cast %0 : vector<1x16x16x128xbf16> to vector<16x16x128xbf16>
    %2 = arith.extf %1 : vector<16x16x128xbf16> to vector<16x16x128xf32>
    %c0_3 = arith.constant 0 : index
    %c0_4 = arith.constant 0 : index
    %3 = vector.load %arg3[%c0_3, %c0_4] : memref<1x128xf32, #tpu.memory_space<vmem>>, vector<1x128xf32>
    %4 = vector.shape_cast %3 : vector<1x128xf32> to vector<128xf32>
    %5 = vector.shape_cast %4 : vector<128xf32> to vector<1x1x128xf32>
    %6 = vector.broadcast %5 : vector<1x1x128xf32> to vector<16x16x128xf32>
    %7 = arith.mulf %2, %6 : vector<16x16x128xf32>
    %c0_5 = arith.constant 0 : index
    %c0_6 = arith.constant 0 : index
    %8 = vector.load %arg4[%c0_5, %c0_6] : memref<1x128xf32, #tpu.memory_space<vmem>>, vector<1x128xf32>
    %9 = vector.shape_cast %8 : vector<1x128xf32> to vector<128xf32>
    %10 = vector.shape_cast %9 : vector<128xf32> to vector<1x1x128xf32>
    %11 = vector.broadcast %10 : vector<1x1x128xf32> to vector<16x16x128xf32>
    %12 = arith.addf %7, %11 : vector<16x16x128xf32>
    %cst = arith.constant 0.000000e+00 : f32
    %13 = vector.broadcast %cst : f32 to vector<16x16x128xf32>
    %14 = arith.maximumf %12, %13 : vector<16x16x128xf32>
    %c0_7 = arith.constant 0 : index
    %c1 = arith.constant 1 : index
    %c1_8 = arith.constant 1 : index
    %c0_9 = arith.constant 0 : index
    %15 = vector.load %arg1[%c0_7, %c1, %c1_8, %c0_9] : memref<1x18x18x128xf32, #tpu.memory_space<vmem>>, vector<1x16x16x128xf32>
    %16 = vector.shape_cast %15 : vector<1x16x16x128xf32> to vector<16x16x128xf32>
    %17 = arith.addf %16, %14 : vector<16x16x128xf32>
    %c0_10 = arith.constant 0 : index
    %c1_11 = arith.constant 1 : index
    %c1_12 = arith.constant 1 : index
    %c0_13 = arith.constant 0 : index
    %18 = vector.load %arg7[%c0_10, %c1_11, %c1_12, %c0_13] : memref<1x18x18x128xf32, #tpu.memory_space<vmem>>, vector<1x16x16x128xf32>
    %19 = vector.shape_cast %18 : vector<1x16x16x128xf32> to vector<16x16x128xf32>
    %20 = vector.shape_cast %17 : vector<16x16x128xf32> to vector<1x16x16x128xf32>
    tpu.vector_store %arg7[%c0_10, %c1_11, %c1_12, %c0_13], %20 {strides = array<i32>} : memref<1x18x18x128xf32, #tpu.memory_space<vmem>>, vector<1x16x16x128xf32>,
    %cst_14 = arith.constant 0.000000e+00 : f32
    %21 = vector.broadcast %cst_14 : f32 to vector<1x18x128xf32>
    %c0_15 = arith.constant 0 : index
    %c0_16 = arith.constant 0 : index
    %c0_17 = arith.constant 0 : index
    %c0_18 = arith.constant 0 : index
    %22 = vector.load %arg7[%c0_15, %c0_16, %c0_17, %c0_18] : memref<1x18x18x128xf32, #tpu.memory_space<vmem>>, vector<1x1x18x128xf32>
    %23 = vector.shape_cast %22 : vector<1x1x18x128xf32> to vector<1x18x128xf32>
    %24 = vector.shape_cast %21 : vector<1x18x128xf32> to vector<1x1x18x128xf32>
    tpu.vector_store %arg7[%c0_15, %c0_16, %c0_17, %c0_18], %24 {strides = array<i32>} : memref<1x18x18x128xf32, #tpu.memory_space<vmem>>, vector<1x1x18x128xf32>,
    %c0_19 = arith.constant 0 : index
    %c17 = arith.constant 17 : index
    %c0_20 = arith.constant 0 : index
    %c0_21 = arith.constant 0 : index
    %25 = vector.load %arg7[%c0_19, %c17, %c0_20, %c0_21] : memref<1x18x18x128xf32, #tpu.memory_space<vmem>>, vector<1x1x18x128xf32>
    %26 = vector.shape_cast %25 : vector<1x1x18x128xf32> to vector<1x18x128xf32>
    %27 = vector.shape_cast %21 : vector<1x18x128xf32> to vector<1x1x18x128xf32>
    tpu.vector_store %arg7[%c0_19, %c17, %c0_20, %c0_21], %27 {strides = array<i32>} : memref<1x18x18x128xf32, #tpu.memory_space<vmem>>, vector<1x1x18x128xf32>,
    %cst_22 = arith.constant 0.000000e+00 : f32
    %28 = vector.broadcast %cst_22 : f32 to vector<16x1x128xf32>
    %c0_23 = arith.constant 0 : index
    %c1_24 = arith.constant 1 : index
    %c0_25 = arith.constant 0 : index
    %c0_26 = arith.constant 0 : index
    %29 = vector.load %arg7[%c0_23, %c1_24, %c0_25, %c0_26] : memref<1x18x18x128xf32, #tpu.memory_space<vmem>>, vector<1x16x1x128xf32>
    %30 = vector.shape_cast %29 : vector<1x16x1x128xf32> to vector<16x1x128xf32>
    %31 = vector.shape_cast %28 : vector<16x1x128xf32> to vector<1x16x1x128xf32>
    tpu.vector_store %arg7[%c0_23, %c1_24, %c0_25, %c0_26], %31 {strides = array<i32>} : memref<1x18x18x128xf32, #tpu.memory_space<vmem>>, vector<1x16x1x128xf32>,
    %c0_27 = arith.constant 0 : index
    %c1_28 = arith.constant 1 : index
    %c17_29 = arith.constant 17 : index
    %c0_30 = arith.constant 0 : index
    %32 = vector.load %arg7[%c0_27, %c1_28, %c17_29, %c0_30] : memref<1x18x18x128xf32, #tpu.memory_space<vmem>>, vector<1x16x1x128xf32>
    %33 = vector.shape_cast %32 : vector<1x16x1x128xf32> to vector<16x1x128xf32>
    %34 = vector.shape_cast %28 : vector<16x1x128xf32> to vector<1x16x1x128xf32>
    tpu.vector_store %arg7[%c0_27, %c1_28, %c17_29, %c0_30], %34 {strides = array<i32>} : memref<1x18x18x128xf32, #tpu.memory_space<vmem>>, vector<1x16x1x128xf32>,
    %c0_31 = arith.constant 0 : index
    %c0_32 = arith.constant 0 : index
    %c0_33 = arith.constant 0 : index
    %c0_34 = arith.constant 0 : index
    %35 = vector.load %arg7[%c0_31, %c0_32, %c0_33, %c0_34] : memref<1x18x18x128xf32, #tpu.memory_space<vmem>>, vector<1x16x16x128xf32>
    %36 = vector.shape_cast %35 : vector<1x16x16x128xf32> to vector<16x16x128xf32>
    %37 = arith.truncf %36 : vector<16x16x128xf32> to vector<16x16x128xbf16>
    %c0_35 = arith.constant 0 : index
    %c0_36 = arith.constant 0 : index
    %c0_37 = arith.constant 0 : index
    %38 = vector.load %arg10[%c0_35, %c0_36, %c0_37] : memref<16x16x1152xbf16, #tpu.memory_space<vmem>>, vector<16x16x128xbf16>
    tpu.vector_store %arg10[%c0_35, %c0_36, %c0_37], %37 {strides = array<i32>} : memref<16x16x1152xbf16, #tpu.memory_space<vmem>>, vector<16x16x128xbf16>,
    %c0_38 = arith.constant 0 : index
    %c0_39 = arith.constant 0 : index
    %c1_40 = arith.constant 1 : index
    %c0_41 = arith.constant 0 : index
    %39 = vector.load %arg7[%c0_38, %c0_39, %c1_40, %c0_41] : memref<1x18x18x128xf32, #tpu.memory_space<vmem>>, vector<1x16x16x128xf32>
    %40 = vector.shape_cast %39 : vector<1x16x16x128xf32> to vector<16x16x128xf32>
    %41 = arith.truncf %40 : vector<16x16x128xf32> to vector<16x16x128xbf16>
    %c0_42 = arith.constant 0 : index
    %c0_43 = arith.constant 0 : index
    %c128 = arith.constant 128 : index
    %42 = vector.load %arg10[%c0_42, %c0_43, %c128] : memref<16x16x1152xbf16, #tpu.memory_space<vmem>>, vector<16x16x128xbf16>
    tpu.vector_store %arg10[%c0_42, %c0_43, %c128], %41 {strides = array<i32>} : memref<16x16x1152xbf16, #tpu.memory_space<vmem>>, vector<16x16x128xbf16>,
    %c0_44 = arith.constant 0 : index
    %c0_45 = arith.constant 0 : index
    %c2 = arith.constant 2 : index
    %c0_46 = arith.constant 0 : index
    %43 = vector.load %arg7[%c0_44, %c0_45, %c2, %c0_46] : memref<1x18x18x128xf32, #tpu.memory_space<vmem>>, vector<1x16x16x128xf32>
    %44 = vector.shape_cast %43 : vector<1x16x16x128xf32> to vector<16x16x128xf32>
    %45 = arith.truncf %44 : vector<16x16x128xf32> to vector<16x16x128xbf16>
    %c0_47 = arith.constant 0 : index
    %c0_48 = arith.constant 0 : index
    %c256 = arith.constant 256 : index
    %46 = vector.load %arg10[%c0_47, %c0_48, %c256] : memref<16x16x1152xbf16, #tpu.memory_space<vmem>>, vector<16x16x128xbf16>
    tpu.vector_store %arg10[%c0_47, %c0_48, %c256], %45 {strides = array<i32>} : memref<16x16x1152xbf16, #tpu.memory_space<vmem>>, vector<16x16x128xbf16>,
    %c0_49 = arith.constant 0 : index
    %c1_50 = arith.constant 1 : index
    %c0_51 = arith.constant 0 : index
    %c0_52 = arith.constant 0 : index
    %47 = vector.load %arg7[%c0_49, %c1_50, %c0_51, %c0_52] : memref<1x18x18x128xf32, #tpu.memory_space<vmem>>, vector<1x16x16x128xf32>
    %48 = vector.shape_cast %47 : vector<1x16x16x128xf32> to vector<16x16x128xf32>
    %49 = arith.truncf %48 : vector<16x16x128xf32> to vector<16x16x128xbf16>
    %c0_53 = arith.constant 0 : index
    %c0_54 = arith.constant 0 : index
    %c384 = arith.constant 384 : index
    %50 = vector.load %arg10[%c0_53, %c0_54, %c384] : memref<16x16x1152xbf16, #tpu.memory_space<vmem>>, vector<16x16x128xbf16>
    tpu.vector_store %arg10[%c0_53, %c0_54, %c384], %49 {strides = array<i32>} : memref<16x16x1152xbf16, #tpu.memory_space<vmem>>, vector<16x16x128xbf16>,
    %c0_55 = arith.constant 0 : index
    %c1_56 = arith.constant 1 : index
    %c1_57 = arith.constant 1 : index
    %c0_58 = arith.constant 0 : index
    %51 = vector.load %arg7[%c0_55, %c1_56, %c1_57, %c0_58] : memref<1x18x18x128xf32, #tpu.memory_space<vmem>>, vector<1x16x16x128xf32>
    %52 = vector.shape_cast %51 : vector<1x16x16x128xf32> to vector<16x16x128xf32>
    %53 = arith.truncf %52 : vector<16x16x128xf32> to vector<16x16x128xbf16>
    %c0_59 = arith.constant 0 : index
    %c0_60 = arith.constant 0 : index
    %c512 = arith.constant 512 : index
    %54 = vector.load %arg10[%c0_59, %c0_60, %c512] : memref<16x16x1152xbf16, #tpu.memory_space<vmem>>, vector<16x16x128xbf16>
    tpu.vector_store %arg10[%c0_59, %c0_60, %c512], %53 {strides = array<i32>} : memref<16x16x1152xbf16, #tpu.memory_space<vmem>>, vector<16x16x128xbf16>,
    %c0_61 = arith.constant 0 : index
    %c1_62 = arith.constant 1 : index
    %c2_63 = arith.constant 2 : index
    %c0_64 = arith.constant 0 : index
    %55 = vector.load %arg7[%c0_61, %c1_62, %c2_63, %c0_64] : memref<1x18x18x128xf32, #tpu.memory_space<vmem>>, vector<1x16x16x128xf32>
    %56 = vector.shape_cast %55 : vector<1x16x16x128xf32> to vector<16x16x128xf32>
    %57 = arith.truncf %56 : vector<16x16x128xf32> to vector<16x16x128xbf16>
    %c0_65 = arith.constant 0 : index
    %c0_66 = arith.constant 0 : index
    %c640 = arith.constant 640 : index
    %58 = vector.load %arg10[%c0_65, %c0_66, %c640] : memref<16x16x1152xbf16, #tpu.memory_space<vmem>>, vector<16x16x128xbf16>
    tpu.vector_store %arg10[%c0_65, %c0_66, %c640], %57 {strides = array<i32>} : memref<16x16x1152xbf16, #tpu.memory_space<vmem>>, vector<16x16x128xbf16>,
    %c0_67 = arith.constant 0 : index
    %c2_68 = arith.constant 2 : index
    %c0_69 = arith.constant 0 : index
    %c0_70 = arith.constant 0 : index
    %59 = vector.load %arg7[%c0_67, %c2_68, %c0_69, %c0_70] : memref<1x18x18x128xf32, #tpu.memory_space<vmem>>, vector<1x16x16x128xf32>
    %60 = vector.shape_cast %59 : vector<1x16x16x128xf32> to vector<16x16x128xf32>
    %61 = arith.truncf %60 : vector<16x16x128xf32> to vector<16x16x128xbf16>
    %c0_71 = arith.constant 0 : index
    %c0_72 = arith.constant 0 : index
    %c768 = arith.constant 768 : index
    %62 = vector.load %arg10[%c0_71, %c0_72, %c768] : memref<16x16x1152xbf16, #tpu.memory_space<vmem>>, vector<16x16x128xbf16>
    tpu.vector_store %arg10[%c0_71, %c0_72, %c768], %61 {strides = array<i32>} : memref<16x16x1152xbf16, #tpu.memory_space<vmem>>, vector<16x16x128xbf16>,
    %c0_73 = arith.constant 0 : index
    %c2_74 = arith.constant 2 : index
    %c1_75 = arith.constant 1 : index
    %c0_76 = arith.constant 0 : index
    %63 = vector.load %arg7[%c0_73, %c2_74, %c1_75, %c0_76] : memref<1x18x18x128xf32, #tpu.memory_space<vmem>>, vector<1x16x16x128xf32>
    %64 = vector.shape_cast %63 : vector<1x16x16x128xf32> to vector<16x16x128xf32>
    %65 = arith.truncf %64 : vector<16x16x128xf32> to vector<16x16x128xbf16>
    %c0_77 = arith.constant 0 : index
    %c0_78 = arith.constant 0 : index
    %c896 = arith.constant 896 : index
    %66 = vector.load %arg10[%c0_77, %c0_78, %c896] : memref<16x16x1152xbf16, #tpu.memory_space<vmem>>, vector<16x16x128xbf16>
    tpu.vector_store %arg10[%c0_77, %c0_78, %c896], %65 {strides = array<i32>} : memref<16x16x1152xbf16, #tpu.memory_space<vmem>>, vector<16x16x128xbf16>,
    %c0_79 = arith.constant 0 : index
    %c2_80 = arith.constant 2 : index
    %c2_81 = arith.constant 2 : index
    %c0_82 = arith.constant 0 : index
    %67 = vector.load %arg7[%c0_79, %c2_80, %c2_81, %c0_82] : memref<1x18x18x128xf32, #tpu.memory_space<vmem>>, vector<1x16x16x128xf32>
    %68 = vector.shape_cast %67 : vector<1x16x16x128xf32> to vector<16x16x128xf32>
    %69 = arith.truncf %68 : vector<16x16x128xf32> to vector<16x16x128xbf16>
    %c0_83 = arith.constant 0 : index
    %c0_84 = arith.constant 0 : index
    %c1024 = arith.constant 1024 : index
    %70 = vector.load %arg10[%c0_83, %c0_84, %c1024] : memref<16x16x1152xbf16, #tpu.memory_space<vmem>>, vector<16x16x128xbf16>
    tpu.vector_store %arg10[%c0_83, %c0_84, %c1024], %69 {strides = array<i32>} : memref<16x16x1152xbf16, #tpu.memory_space<vmem>>, vector<16x16x128xbf16>,
    %c0_85 = arith.constant 0 : index
    %c0_86 = arith.constant 0 : index
    %c0_87 = arith.constant 0 : index
    %71 = vector.load %arg10[%c0_85, %c0_86, %c0_87] : memref<16x16x1152xbf16, #tpu.memory_space<vmem>>, vector<16x16x1152xbf16>
    %72 = vector.shape_cast %71 : vector<16x16x1152xbf16> to vector<256x1152xbf16>
    %c0_88 = arith.constant 0 : index
    %c0_89 = arith.constant 0 : index
    %73 = vector.load %arg5[%c0_88, %c0_89] : memref<1152x128xbf16, #tpu.memory_space<vmem>>, vector<1152x128xbf16>
    %cst_90 = arith.constant dense<0.000000e+00> : vector<256x128xf32>
    %74 = tpu.matmul %72, %73, %cst_90 {dimension_numbers = #tpu.dot_dimension_numbers<[1], [0], [0], [1], [0, 0, 1, 1], [], []>} : vector<256x1152xbf16>, vector<1152x128xbf16>, vector<256x128xf32> -> vector<256x128xf32>
    %c0_91 = arith.constant 0 : index
    %c0_92 = arith.constant 0 : index
    %75 = vector.load %arg6[%c0_91, %c0_92] : memref<1x128xf32, #tpu.memory_space<vmem>>, vector<1x128xf32>
    %76 = vector.shape_cast %75 : vector<1x128xf32> to vector<128xf32>
    %77 = vector.shape_cast %76 : vector<128xf32> to vector<1x128xf32>
    %78 = vector.broadcast %77 : vector<1x128xf32> to vector<256x128xf32>
    %79 = arith.addf %74, %78 : vector<256x128xf32>
    %80 = vector.shape_cast %79 : vector<256x128xf32> to vector<16x16x128xf32>
    %81 = arith.truncf %80 : vector<16x16x128xf32> to vector<16x16x128xbf16>
    %c0_93 = arith.constant 0 : index
    %c0_94 = arith.constant 0 : index
    %c0_95 = arith.constant 0 : index
    %c0_96 = arith.constant 0 : index
    %82 = vector.load %arg8[%c0_93, %c0_94, %c0_95, %c0_96] : memref<1x16x16x128xbf16, #tpu.memory_space<vmem>>, vector<1x16x16x128xbf16>
    %83 = vector.shape_cast %82 : vector<1x16x16x128xbf16> to vector<16x16x128xbf16>
    %84 = vector.shape_cast %81 : vector<16x16x128xbf16> to vector<1x16x16x128xbf16>
    tpu.vector_store %arg8[%c0_93, %c0_94, %c0_95, %c0_96], %84 {strides = array<i32>} : memref<1x16x16x128xbf16, #tpu.memory_space<vmem>>, vector<1x16x16x128xbf16>,
    %cst_97 = arith.constant dense<0.000000e+00> : vector<128xf32>
    %85 = vector.multi_reduction <add>, %79, %cst_97 [0] : vector<256x128xf32> to vector<128xf32>
    %86 = vector.shape_cast %85 : vector<128xf32> to vector<1x128xf32>
    %c0_98 = arith.constant 0 : index
    %c0_99 = arith.constant 0 : index
    %c0_100 = arith.constant 0 : index
    %87 = vector.load %arg9[%c0_98, %c0_99, %c0_100] : memref<1x2x128xf32, #tpu.memory_space<vmem>>, vector<1x1x128xf32>
    %88 = vector.shape_cast %87 : vector<1x1x128xf32> to vector<1x128xf32>
    %89 = vector.shape_cast %86 : vector<1x128xf32> to vector<1x1x128xf32>
    tpu.vector_store %arg9[%c0_98, %c0_99, %c0_100], %89 {strides = array<i32>} : memref<1x2x128xf32, #tpu.memory_space<vmem>>, vector<1x1x128xf32>,
    %90 = arith.mulf %79, %79 : vector<256x128xf32>
    %cst_101 = arith.constant dense<0.000000e+00> : vector<128xf32>
    %91 = vector.multi_reduction <add>, %90, %cst_101 [0] : vector<256x128xf32> to vector<128xf32>
    %92 = vector.shape_cast %91 : vector<128xf32> to vector<1x128xf32>
    %c0_102 = arith.constant 0 : index
    %c1_103 = arith.constant 1 : index
    %c0_104 = arith.constant 0 : index
    %93 = vector.load %arg9[%c0_102, %c1_103, %c0_104] : memref<1x2x128xf32, #tpu.memory_space<vmem>>, vector<1x1x128xf32>
    %94 = vector.shape_cast %93 : vector<1x1x128xf32> to vector<1x128xf32>
    %95 = vector.shape_cast %92 : vector<1x128xf32> to vector<1x1x128xf32>
    tpu.vector_store %arg9[%c0_102, %c1_103, %c0_104], %95 {strides = array<i32>} : memref<1x2x128xf32, #tpu.memory_space<vmem>>, vector<1x1x128xf32>,
    return
  }
  func.func @transform_0(%arg0: i32) -> (i32, i32, i32, i32) {
    %c0_i32 = arith.constant 0 : i32
    %c0_i32_0 = arith.constant 0 : i32
    %c0_i32_1 = arith.constant 0 : i32
    %c0_i32_2 = arith.constant 0 : i32
    return %arg0, %c0_i32, %c0_i32_0, %c0_i32_1 : i32, i32, i32, i32
  }
  func.func @transform_1(%arg0: i32) -> (i32, i32, i32, i32) {
    %c0_i32 = arith.constant 0 : i32
    %c0_i32_0 = arith.constant 0 : i32
    %c0_i32_1 = arith.constant 0 : i32
    %c0_i32_2 = arith.constant 0 : i32
    return %arg0, %c0_i32, %c0_i32_0, %c0_i32_1 : i32, i32, i32, i32
  }
  func.func @transform_2(%arg0: i32) -> (i32, i32) {
    %c0_i32 = arith.constant 0 : i32
    %c0_i32_0 = arith.constant 0 : i32
    %c0_i32_1 = arith.constant 0 : i32
    return %c0_i32, %c0_i32_0 : i32, i32
  }
  func.func @transform_3(%arg0: i32) -> (i32, i32) {
    %c0_i32 = arith.constant 0 : i32
    %c0_i32_0 = arith.constant 0 : i32
    %c0_i32_1 = arith.constant 0 : i32
    return %c0_i32, %c0_i32_0 : i32, i32
  }
  func.func @transform_4(%arg0: i32) -> (i32, i32) {
    %c0_i32 = arith.constant 0 : i32
    %c0_i32_0 = arith.constant 0 : i32
    %c0_i32_1 = arith.constant 0 : i32
    return %c0_i32, %c0_i32_0 : i32, i32
  }
  func.func @transform_5(%arg0: i32) -> (i32, i32) {
    %c0_i32 = arith.constant 0 : i32
    %c0_i32_0 = arith.constant 0 : i32
    %c0_i32_1 = arith.constant 0 : i32
    return %c0_i32, %c0_i32_0 : i32, i32
  }
  func.func @transform_6(%arg0: i32) -> (i32, i32, i32, i32) {
    %c0_i32 = arith.constant 0 : i32
    %c0_i32_0 = arith.constant 0 : i32
    %c0_i32_1 = arith.constant 0 : i32
    %c0_i32_2 = arith.constant 0 : i32
    return %arg0, %c0_i32, %c0_i32_0, %c0_i32_1 : i32, i32, i32, i32
  }
  func.func @transform_7(%arg0: i32) -> (i32, i32, i32, i32) {
    %c0_i32 = arith.constant 0 : i32
    %c0_i32_0 = arith.constant 0 : i32
    %c0_i32_1 = arith.constant 0 : i32
    %c0_i32_2 = arith.constant 0 : i32
    return %arg0, %c0_i32, %c0_i32_0, %c0_i32_1 : i32, i32, i32, i32
  }
  func.func @transform_8(%arg0: i32) -> (i32, i32, i32) {
    %c0_i32 = arith.constant 0 : i32
    %c0_i32_0 = arith.constant 0 : i32
    %c0_i32_1 = arith.constant 0 : i32
    return %arg0, %c0_i32, %c0_i32_0 : i32, i32, i32
  }
}

</mosaic_0001>

<bundles_post_ra>
// kernel: respath_forward.5
= control target key start
LH: loop header
LB: loop body
LE: loop exit
PB: predicated region body
PF: predicated region fallthrough
CT: control target
= control target key end

     0   :  { %s719_s15 = smov 0   ;;  %s904_s0 = inlined_call_operand.vmem [shape: f32[2,18,18,128], index: 0, kind: input, shape index: {}]   ;;  %s905_s1 = inlined_call_operand.vmem [shape: bf16[2,16,16,128], index: 1, kind: input, shape index: {}]   ;;  %s906_s2 = inlined_call_operand.vmem [shape: f32[1,128], index: 2, kind: input, shape index: {}]   ;;  %s907_s3 = inlined_call_operand.vmem [shape: f32[1,128], index: 3, kind: input, shape index: {}]   ;;  %s908_s4 = inlined_call_operand.vmem [shape: f32[2,16,16,128], index: 4, kind: output, shape index: {}]  }
   0x1 LB: > { %s550_s16 = sadd.s32 4294967295, %s692_s15   ;;  %p554_p0 = scmp.ge.s32.totalorder %s692_s15, 1  ;;  %s692_s15 = sphi %s719_s15, %s14_s15  }
   0x2   : > { %p172_p1 = scmp.lt.s32.totalorder %s692_s15, 3 }
   0x4   : > { %p173_p2 = pnand %p554_p0, %p172_p1 }
   0x5   : > { %p203_p3 = scmp.lt.s32.totalorder (!%p173_p2), %s550_s16, 1 }
   0x6   : > { %176 = sbr.rel (%p173_p2) target bundleno = 62 (0x3e), region = 36 }
   0xb   : > { %s910_s16 = smov (!%p203_p3, %s550_s16), 1  ;;  %v739_v0 = vld [vmem:[%s906_s2] ss:$0 sm:$0xff] }
   0xc   : > { %s675_s17 = smul.u32 432, %s910_s16  ;;  %s594_s18 = sshll.u32 %s910_s16, 7  ;;  %v747_v5 = vld [vmem:[%s907_s3] ss:$0 sm:$0xff] }
   0xd   : > { %s734_s21 = scalar_lea.vmem %s905_s1, %s594_s18  ;;  %s595_s29 = sshll.u32 %s910_s16, 8 }
   0xe   : > { %v597_v1 = vld [vmem:[%s734_s21] sm:$0xff]   ;;  %v660_v2 = vld [vmem:[%s734_s21 + $0x8] sm:$0xff]   ;;  %v661_v3 = vld [vmem:[%s734_s21 + $0x10] sm:$0xff]   ;;  %s752_s28 = scalar_lea.vmem %s904_s0, %s675_s17  ;;  %s779_s6 = scalar_lea.vmem %s908_s4, %s595_s29 }
   0xf   : > { %v598_v4 = vunpack.c.l.bf16 %v597_v1  ;;  %v599_v6 = vunpack.c.h.bf16 %v597_v1  ;;  %v602_v7 = vunpack.c.l.bf16 %v660_v2  ;;  %v603_v8 = vunpack.c.h.bf16 %v660_v2  ;;  %v662_v15 = vld [vmem:[%s734_s21 + $0x18] sm:$0xff]   ;;  %v561_v25 = vld [vmem:[%s752_s28 + $0x21] sm:$0xff]  ;;  %v564_v36 = vld [vmem:[%s752_s28 + $0x49] sm:$0xff] }
  0x10   : > { %v606_v9 = vunpack.c.l.bf16 %v661_v3  ;;  %v607_v10 = vunpack.c.h.bf16 %v661_v3  ;;  %v610_v18 = vunpack.c.l.bf16 %v662_v15  ;;  %v611_v19 = vunpack.c.h.bf16 %v662_v15  ;;  %v560_v21 = vld [vmem:[%s752_s28 + $0x19] sm:$0xff]  ;;  %v562_v26 = vld [vmem:[%s752_s28 + $0x31] sm:$0xff]  ;;  %v664_v43 = vld [vmem:[%s734_s21 + $0x28] sm:$0xff]  }
  0x11   : > { %v286_v11 = vmul.f32 %v739_v0, %v598_v4  ;;  %v287_v12 = vmul.f32 %v739_v0, %v599_v6  ;;  %v288_v13 = vmul.f32 %v739_v0, %v602_v7  ;;  %v289_v14 = vmul.f32 %v739_v0, %v603_v8  ;;  %v563_v27 = vld [vmem:[%s752_s28 + $0x39] sm:$0xff]  ;;  %v565_v37 = vld [vmem:[%s752_s28 + $0x51] sm:$0xff]  ;;  %v566_v48 = vld [vmem:[%s752_s28 + $0x61] sm:$0xff] }
  0x12   : > { %v290_v16 = vmul.f32 %v739_v0, %v606_v9  ;;  %v291_v17 = vmul.f32 %v739_v0, %v607_v10  ;;  %v292_v30 = vmul.f32 %v739_v0, %v610_v18  ;;  %v293_v31 = vmul.f32 %v739_v0, %v611_v19  ;;  %v663_v42 = vld [vmem:[%s734_s21 + $0x20] sm:$0xff]   ;;  %v567_v49 = vld [vmem:[%s752_s28 + $0x69] sm:$0xff]  ;;  %v666_v59 = vld [vmem:[%s734_s21 + $0x38] sm:$0xff]  }
  0x13   : > { %v322_v20 = vadd.f32 %v747_v5, %v286_v11  ;;  %v323_v22 = vadd.f32 %v747_v5, %v287_v12  ;;  %v324_v23 = vadd.f32 %v747_v5, %v288_v13  ;;  %v325_v24 = vadd.f32 %v747_v5, %v289_v14  ;;  %v665_v50 = vld [vmem:[%s734_s21 + $0x30] sm:$0xff]   ;;  %v568_v11 = vld [vmem:[%s752_s28 + $0x79] sm:$0xff]  ;;  %v569_v13 = vld [vmem:[%s752_s28 + $0x81] sm:$0xff] }
  0x14   : > { %v326_v28 = vadd.f32 %v747_v5, %v290_v16  ;;  %v327_v29 = vadd.f32 %v747_v5, %v291_v17  ;;  %v328_v40 = vadd.f32 %v747_v5, %v292_v30  ;;  %v329_v41 = vadd.f32 %v747_v5, %v293_v31  ;;  %v570_v16 = vld [vmem:[%s752_s28 + $0x91] sm:$0xff]  ;;  %v571_v17 = vld [vmem:[%s752_s28 + $0x99] sm:$0xff]  ;;  %v572_v19 = vld [vmem:[%s752_s28 + $0xa9] sm:$0xff] }
  0x15   : > { %v354_v32 = vmax.f32 %v322_v20, 0.0  ;;  %v355_v33 = vmax.f32 %v323_v22, 0.0  ;;  %v356_v34 = vmax.f32 %v324_v23, 0.0  ;;  %v357_v35 = vmax.f32 %v325_v24, 0.0 }
  0x16   : > { %v358_v38 = vmax.f32 %v326_v28, 0.0  ;;  %v359_v39 = vmax.f32 %v327_v29, 0.0  ;;  %v360_v53 = vmax.f32 %v328_v40, 0.0  ;;  %v361_v54 = vmax.f32 %v329_v41, 0.0  ;;  %v669_v40 = vld [vmem:[%s734_s21 + $0x50] sm:$0xff]  }
  0x17   : > { %v419_v44 = vadd.f32 %v560_v21, %v354_v32  ;;  %v420_v45 = vadd.f32 %v561_v25, %v355_v33  ;;  %v421_v46 = vadd.f32 %v562_v26, %v356_v34  ;;  %v422_v47 = vadd.f32 %v563_v27, %v357_v35  ;;  %v573_v27 = vld [vmem:[%s752_s28 + $0xb1] sm:$0xff]  ;;  %v667_v32 = vld [vmem:[%s734_s21 + $0x40] sm:$0xff]   ;;  %v668_v33 = vld [vmem:[%s734_s21 + $0x48] sm:$0xff]  }
  0x18   : > { %v423_v51 = vadd.f32 %v564_v36, %v358_v38  ;;  %v424_v52 = vadd.f32 %v565_v37, %v359_v39  ;;  %v614_v55 = vunpack.c.l.bf16 %v663_v42  ;;  %v615_v56 = vunpack.c.h.bf16 %v663_v42  ;;  %v574_v38 = vld [vmem:[%s752_s28 + $0xc1] sm:$0xff]  ;;  %v575_v39 = vld [vmem:[%s752_s28 + $0xc9] sm:$0xff] }
  0x19   : > { %451 = vst [vmem:[%s779_s6] sm:$0xff] %v419_v44  ;;  %v618_v57 = vunpack.c.l.bf16 %v664_v43  ;;  %v619_v58 = vunpack.c.h.bf16 %v664_v43  ;;  %v425_v60 = vadd.f32 %v566_v48, %v360_v53  ;;  %v426_v61 = vadd.f32 %v567_v49, %v361_v54  ;;  %v670_v49 = vld [vmem:[%s734_s21 + $0x58] sm:$0xff]  }
  0x1a   : > { %452 = vst [vmem:[%s779_s6 + $0x8] sm:$0xff] %v420_v45  ;;  %v622_v62 = vunpack.c.l.bf16 %v665_v50  ;;  %v623_v63 = vunpack.c.h.bf16 %v665_v50  ;;  %v294_v1 = vmul.f32 %v739_v0, %v614_v55  ;;  %v295_v2 = vmul.f32 %v739_v0, %v615_v56 }
  0x1b   : > { %453 = vst [vmem:[%s779_s6 + $0x10] sm:$0xff] %v421_v46  ;;  %v296_v3 = vmul.f32 %v739_v0, %v618_v57  ;;  %v297_v4 = vmul.f32 %v739_v0, %v619_v58  ;;  %v626_v8 = vunpack.c.l.bf16 %v666_v59  ;;  %v627_v9 = vunpack.c.h.bf16 %v666_v59 }
  0x1c   : > { %454 = vst [vmem:[%s779_s6 + $0x18] sm:$0xff] %v422_v47  ;;  %v298_v6 = vmul.f32 %v739_v0, %v622_v62  ;;  %v299_v7 = vmul.f32 %v739_v0, %v623_v63  ;;  %v330_v10 = vadd.f32 %v747_v5, %v294_v1  ;;  %v331_v12 = vadd.f32 %v747_v5, %v295_v2  ;;  %v576_v63 = vld [vmem:[%s752_s28 + $0xd9] sm:$0xff]  ;;  %v577_v2 = vld [vmem:[%s752_s28 + $0xe1] sm:$0xff] }
  0x1d   : > { %455 = vst [vmem:[%s779_s6 + $0x20] sm:$0xff] %v423_v51  ;;  %v332_v14 = vadd.f32 %v747_v5, %v296_v3  ;;  %v333_v15 = vadd.f32 %v747_v5, %v297_v4  ;;  %v300_v21 = vmul.f32 %v739_v0, %v626_v8  ;;  %v301_v22 = vmul.f32 %v739_v0, %v627_v9  ;;  %v580_v9 = vld [vmem:[%s752_s28 + $0x109] sm:$0xff] }
  0x1e   : > { %456 = vst [vmem:[%s779_s6 + $0x28] sm:$0xff] %v424_v52  ;;  %v334_v18 = vadd.f32 %v747_v5, %v298_v6  ;;  %v335_v20 = vadd.f32 %v747_v5, %v299_v7  ;;  %v362_v23 = vmax.f32 %v330_v10, 0.0  ;;  %v363_v24 = vmax.f32 %v331_v12, 0.0  ;;  %v578_v6 = vld [vmem:[%s752_s28 + $0xf1] sm:$0xff]  ;;  %v579_v7 = vld [vmem:[%s752_s28 + $0xf9] sm:$0xff] }
  0x1f   : > { %457 = vst [vmem:[%s779_s6 + $0x30] sm:$0xff] %v425_v60  ;;  %v364_v25 = vmax.f32 %v332_v14, 0.0  ;;  %v365_v26 = vmax.f32 %v333_v15, 0.0  ;;  %v336_v30 = vadd.f32 %v747_v5, %v300_v21  ;;  %v337_v31 = vadd.f32 %v747_v5, %v301_v22  ;;  %v671_v22 = vld [vmem:[%s734_s21 + $0x60] sm:$0xff]  }
  0x20   : > { %458 = vst [vmem:[%s779_s6 + $0x38] sm:$0xff] %v426_v61  ;;  %v366_v28 = vmax.f32 %v334_v18, 0.0  ;;  %v367_v29 = vmax.f32 %v335_v20, 0.0  ;;  %v427_v34 = vadd.f32 %v568_v11, %v362_v23  ;;  %v428_v35 = vadd.f32 %v569_v13, %v363_v24  ;;  %v672_v23 = vld [vmem:[%s734_s21 + $0x68] sm:$0xff]  }
  0x21   : > { %v429_v36 = vadd.f32 %v570_v16, %v364_v25  ;;  %v430_v37 = vadd.f32 %v571_v17, %v365_v26  ;;  %v368_v43 = vmax.f32 %v336_v30, 0.0  ;;  %v369_v44 = vmax.f32 %v337_v31, 0.0  ;;  %v581_v17 = vld [vmem:[%s752_s28 + $0x111] sm:$0xff] }
  0x22   : > { %v431_v41 = vadd.f32 %v572_v19, %v366_v28  ;;  %v432_v42 = vadd.f32 %v573_v27, %v367_v29  ;;  %459 = vst [vmem:[%s779_s6 + $0x40] sm:$0xff] %v427_v34  ;;  %v630_v45 = vunpack.c.l.bf16 %v667_v32  ;;  %v631_v46 = vunpack.c.h.bf16 %v667_v32  ;;  %v582_v28 = vld [vmem:[%s752_s28 + $0x121] sm:$0xff]  ;;  %v583_v29 = vld [vmem:[%s752_s28 + $0x129] sm:$0xff] }
  0x23   : > { %v634_v47 = vunpack.c.l.bf16 %v668_v33  ;;  %v635_v48 = vunpack.c.h.bf16 %v668_v33  ;;  %460 = vst [vmem:[%s779_s6 + $0x48] sm:$0xff] %v428_v35  ;;  %v433_v50 = vadd.f32 %v574_v38, %v368_v43  ;;  %v434_v51 = vadd.f32 %v575_v39, %v369_v44  ;;  %v673_v30 = vld [vmem:[%s734_s21 + $0x70] sm:$0xff]   ;;  %v674_v39 = vld [vmem:[%s734_s21 + $0x78] sm:$0xff]  }
  0x24   : > { %v638_v52 = vunpack.c.l.bf16 %v669_v40  ;;  %v639_v53 = vunpack.c.h.bf16 %v669_v40  ;;  %461 = vst [vmem:[%s779_s6 + $0x50] sm:$0xff] %v429_v36  ;;  %v302_v54 = vmul.f32 %v739_v0, %v630_v45  ;;  %v303_v55 = vmul.f32 %v739_v0, %v631_v46 }
  0x25   : > { %v304_v56 = vmul.f32 %v739_v0, %v634_v47  ;;  %v305_v57 = vmul.f32 %v739_v0, %v635_v48  ;;  %462 = vst [vmem:[%s779_s6 + $0x58] sm:$0xff] %v430_v37  ;;  %v642_v60 = vunpack.c.l.bf16 %v670_v49  ;;  %v643_v61 = vunpack.c.h.bf16 %v670_v49 }
  0x26   : > { %v306_v58 = vmul.f32 %v739_v0, %v638_v52  ;;  %v307_v59 = vmul.f32 %v739_v0, %v639_v53  ;;  %463 = vst [vmem:[%s779_s6 + $0x60] sm:$0xff] %v431_v41  ;;  %v338_v62 = vadd.f32 %v747_v5, %v302_v54  ;;  %v339_v1 = vadd.f32 %v747_v5, %v303_v55 }
  0x27   : > { %v340_v3 = vadd.f32 %v747_v5, %v304_v56  ;;  %v341_v4 = vadd.f32 %v747_v5, %v305_v57  ;;  %464 = vst [vmem:[%s779_s6 + $0x68] sm:$0xff] %v432_v42  ;;  %v308_v11 = vmul.f32 %v739_v0, %v642_v60  ;;  %v309_v12 = vmul.f32 %v739_v0, %v643_v61  ;;  %v584_v56 = vld [vmem:[%s752_s28 + $0x139] sm:$0xff]  ;;  %v585_v57 = vld [vmem:[%s752_s28 + $0x141] sm:$0xff] }
  0x28   : > { %v342_v8 = vadd.f32 %v747_v5, %v306_v58  ;;  %v343_v10 = vadd.f32 %v747_v5, %v307_v59  ;;  %465 = vst [vmem:[%s779_s6 + $0x70] sm:$0xff] %v433_v50  ;;  %v370_v13 = vmax.f32 %v338_v62, 0.0  ;;  %v371_v14 = vmax.f32 %v339_v1, 0.0  ;;  %v586_v58 = vld [vmem:[%s752_s28 + $0x151] sm:$0xff] }
  0x29   : > { %v372_v15 = vmax.f32 %v340_v3, 0.0  ;;  %v373_v16 = vmax.f32 %v341_v4, 0.0  ;;  %466 = vst [vmem:[%s779_s6 + $0x78] sm:$0xff] %v434_v51  ;;  %v344_v20 = vadd.f32 %v747_v5, %v308_v11  ;;  %v345_v21 = vadd.f32 %v747_v5, %v309_v12  ;;  %v587_v4 = vld [vmem:[%s752_s28 + $0x159] sm:$0xff] }
  0x2a   : > { %v374_v18 = vmax.f32 %v342_v8, 0.0  ;;  %v375_v19 = vmax.f32 %v343_v10, 0.0  ;;  %v435_v24 = vadd.f32 %v576_v63, %v370_v13  ;;  %v436_v25 = vadd.f32 %v577_v2, %v371_v14  ;;  %v589_v13 = vld [vmem:[%s752_s28 + $0x171] sm:$0xff] }
  0x2b   : > { %v437_v26 = vadd.f32 %v578_v6, %v372_v15  ;;  %v438_v27 = vadd.f32 %v579_v7, %v373_v16  ;;  %v376_v33 = vmax.f32 %v344_v20, 0.0  ;;  %v377_v34 = vmax.f32 %v345_v21, 0.0  ;;  %v588_v7 = vld [vmem:[%s752_s28 + $0x169] sm:$0xff]  ;;  %v590_v16 = vld [vmem:[%s752_s28 + $0x181] sm:$0xff] }
  0x2c   : > { %v439_v31 = vadd.f32 %v580_v9, %v374_v18  ;;  %v440_v32 = vadd.f32 %v581_v17, %v375_v19  ;;  %467 = vst [vmem:[%s779_s6 + $0x80] sm:$0xff] %v435_v24  ;;  %v646_v35 = vunpack.c.l.bf16 %v671_v22  ;;  %v647_v36 = vunpack.c.h.bf16 %v671_v22  ;;  %v591_v19 = vld [vmem:[%s752_s28 + $0x189] sm:$0xff] }
  0x2d   : > { %v650_v37 = vunpack.c.l.bf16 %v672_v23  ;;  %v651_v38 = vunpack.c.h.bf16 %v672_v23  ;;  %468 = vst [vmem:[%s779_s6 + $0x88] sm:$0xff] %v436_v25  ;;  %v441_v40 = vadd.f32 %v582_v28, %v376_v33  ;;  %v442_v41 = vadd.f32 %v583_v29, %v377_v34 }
  0x2e   : > { %v654_v42 = vunpack.c.l.bf16 %v673_v30  ;;  %v655_v43 = vunpack.c.h.bf16 %v673_v30  ;;  %469 = vst [vmem:[%s779_s6 + $0x90] sm:$0xff] %v437_v26  ;;  %v310_v44 = vmul.f32 %v739_v0, %v646_v35  ;;  %v311_v45 = vmul.f32 %v739_v0, %v647_v36 }
  0x2f   : > { %v312_v46 = vmul.f32 %v739_v0, %v650_v37  ;;  %v313_v47 = vmul.f32 %v739_v0, %v651_v38  ;;  %470 = vst [vmem:[%s779_s6 + $0x98] sm:$0xff] %v438_v27  ;;  %v658_v50 = vunpack.c.l.bf16 %v674_v39  ;;  %v659_v51 = vunpack.c.h.bf16 %v674_v39 }
  0x30   : > { %v314_v48 = vmul.f32 %v739_v0, %v654_v42  ;;  %v315_v49 = vmul.f32 %v739_v0, %v655_v43  ;;  %471 = vst [vmem:[%s779_s6 + $0xa0] sm:$0xff] %v439_v31  ;;  %v346_v52 = vadd.f32 %v747_v5, %v310_v44  ;;  %v347_v53 = vadd.f32 %v747_v5, %v311_v45 }
  0x31   : > { %v348_v54 = vadd.f32 %v747_v5, %v312_v46  ;;  %v349_v55 = vadd.f32 %v747_v5, %v313_v47  ;;  %472 = vst [vmem:[%s779_s6 + $0xa8] sm:$0xff] %v440_v32  ;;  %v316_v61 = vmul.f32 %v739_v0, %v658_v50  ;;  %v317_v62 = vmul.f32 %v739_v0, %v659_v51 }
  0x32   : > { %v350_v59 = vadd.f32 %v747_v5, %v314_v48  ;;  %v351_v60 = vadd.f32 %v747_v5, %v315_v49  ;;  %473 = vst [vmem:[%s779_s6 + $0xb0] sm:$0xff] %v441_v40  ;;  %v378_v63 = vmax.f32 %v346_v52, 0.0  ;;  %v379_v1 = vmax.f32 %v347_v53, 0.0 }
  0x33   : > { %v380_v2 = vmax.f32 %v348_v54, 0.0  ;;  %v381_v3 = vmax.f32 %v349_v55, 0.0  ;;  %474 = vst [vmem:[%s779_s6 + $0xb8] sm:$0xff] %v442_v41  ;;  %v352_v9 = vadd.f32 %v747_v5, %v316_v61  ;;  %v353_v0 = vadd.f32 %v747_v5, %v317_v62 }
  0x34   : > { %v382_v6 = vmax.f32 %v350_v59, 0.0  ;;  %v383_v8 = vmax.f32 %v351_v60, 0.0  ;;  %v443_v10 = vadd.f32 %v584_v56, %v378_v63  ;;  %v444_v11 = vadd.f32 %v585_v57, %v379_v1 }
  0x35   : > { %v445_v12 = vadd.f32 %v586_v58, %v380_v2  ;;  %v446_v14 = vadd.f32 %v587_v4, %v381_v3  ;;  %v384_v15 = vmax.f32 %v352_v9, 0.0  ;;  %v385_v17 = vmax.f32 %v353_v0, 0.0 }
  0x36   : > { %475 = vst [vmem:[%s779_s6 + $0xc0] sm:$0xff] %v443_v10  ;;  %v447_v18 = vadd.f32 %v588_v7, %v382_v6  ;;  %v448_v20 = vadd.f32 %v589_v13, %v383_v8 }
  0x37   : > { %476 = vst [vmem:[%s779_s6 + $0xc8] sm:$0xff] %v444_v11  ;;  %v449_v5 = vadd.f32 %v590_v16, %v384_v15  ;;  %v450_v21 = vadd.f32 %v591_v19, %v385_v17 }
  0x38   : > { %477 = vst [vmem:[%s779_s6 + $0xd0] sm:$0xff] %v445_v12 }
  0x39   : > { %478 = vst [vmem:[%s779_s6 + $0xd8] sm:$0xff] %v446_v14 }
  0x3a   : > { %479 = vst [vmem:[%s779_s6 + $0xe0] sm:$0xff] %v447_v18 }
  0x3b   : > { %480 = vst [vmem:[%s779_s6 + $0xe8] sm:$0xff] %v448_v20 }
  0x3c   : > { %481 = vst [vmem:[%s779_s6 + $0xf0] sm:$0xff] %v449_v5 }
  0x3d   : > { %482 = vst [vmem:[%s779_s6 + $0xf8] sm:$0xff] %v450_v21 }
  0x3e PF: > { %s14_s15 = sadd.s32 1, %s692_s15  }
  0x3f   : > { %p11_p4 = scmp.ge.s32.totalorder %s14_s15, 4  }
  0x41   :  { %13 = sbr.rel (!%p11_p4) target bundleno = 1 (0x1), region = 70 }

// kernel: respath_forward.3
= control target key start
LH: loop header
LB: loop body
LE: loop exit
PB: predicated region body
PF: predicated region fallthrough
CT: control target
= control target key end

     0   :  { %s5056_s15 = smov 0   ;;  %s5800_s0 = inlined_call_operand.vmem [shape: f32[2,18,18,128], index: 0, kind: input, shape index: {}]   ;;  %s5801_s1 = inlined_call_operand.vmem [shape: bf16[1152,128], index: 1, kind: input, shape index: {}]   ;;  %s5802_s2 = inlined_call_operand.vmem [shape: f32[1,128], index: 2, kind: input, shape index: {}]   ;;  %s5803_s3 = inlined_call_operand.vmem [shape: bf16[2,16,16,128], index: 3, kind: output, shape index: {0}]   ;;  %s5804_s4 = inlined_call_operand.vmem [shape: f32[2,2,128], index: 4, kind: output, shape index: {1}]  }
   0x1 LB: > { %s3610_s16 = sadd.s32 4294967295, %s5029_s15   ;;  %p3614_p0 = scmp.ge.s32.totalorder %s5029_s15, 1  ;;  %s5029_s15 = sphi %s5056_s15, %s15_s15  }
   0x2   : > { %p165_p1 = scmp.lt.s32.totalorder %s5029_s15, 3 }
   0x4   : > { %p166_p2 = pnand %p3614_p0, %p165_p1 }
   0x5   : > { %p195_p3 = scmp.lt.s32.totalorder (!%p166_p2), %s3610_s16, 1 }
   0x6   : > { %169 = sbr.rel (%p166_p2) target bundleno = 766 (0x2fe), region = 32 }
   0xb   : > { %v4829_v0 = vld [vmem:[%s5801_s1 + $0x38] sm:$0xff]  ;;  %v4828_v1 = vld [vmem:[%s5801_s1 + $0x30] sm:$0xff]  ;;  %s5806_s16 = smov (!%p195_p3, %s3610_s16), 1  ;;  %v4827_v2 = vld [vmem:[%s5801_s1 + $0x28] sm:$0xff] }
   0xc   : > { %4989 = vmatpush.bf16.msra.mxu1 %v4829_v0  ;;  %4990 = vmatpush.bf16.msra.mxu2 %v4829_v0  ;;  %s5013_s21 = smul.u32 432, %s5806_s16  ;;  %v4826_v14 = vld [vmem:[%s5801_s1 + $0x20] sm:$0xff]  ;;  %v4825_v23 = vld [vmem:[%s5801_s1 + $0x18] sm:$0xff]  ;;  %v4824_v32 = vld [vmem:[%s5801_s1 + $0x10] sm:$0xff]  ;;  %s4677_s29 = sshll.u32 %s5806_s16, 7 }
   0xd   : > { %4991 = vmatpush.bf16.msra.mxu3 %v4829_v0  ;;  %2551 = vmatpush.bf16.msra.mxu0 %v4829_v0  ;;  %v4823_v38 = vld [vmem:[%s5801_s1 + $0x8] sm:$0xff]  ;;  %v4822_v55 = vld [vmem:[%s5801_s1] sm:$0xff]  ;;  %v4845_v62 = vld [vmem:[%s5801_s1 + $0xb8] sm:$0xff]  ;;  %s5721_s6 = scalar_lea.vmem %s5803_s3, %s4677_s29 }
   0xe   : > { %s5079_s26 = scalar_lea.vmem %s5800_s0, %s5013_s21  ;;  %v4853_v63 = vld [vmem:[%s5801_s1 + $0xf8] sm:$0xff] }
   0xf   : > { %v217_v3 = vld [vmem:[%s5079_s26 + $0x60] sm:$0xff]  ;;  %v218_v4 = vld [vmem:[%s5079_s26 + $0x68] sm:$0xff]  ;;  %v219_v18 = vld [vmem:[%s5079_s26 + $0x78] sm:$0xff] }
  0x10   : > { %4992 = vmatpush.bf16.msra.mxu1 %v4828_v1  ;;  %4993 = vmatpush.bf16.msra.mxu2 %v4828_v1  ;;  %v225_v5 = vld [vmem:[%s5079_s26 + $0xc0] sm:$0xff]  ;;  %v5084_v6 = vpack.c.bf16 %v217_v3, %v217_v3  ;;  %v5086_v7 = vpack.c.bf16 %v218_v4, %v218_v4  ;;  %v226_v8 = vld [vmem:[%s5079_s26 + $0xc8] sm:$0xff]  ;;  %v227_v22 = vld [vmem:[%s5079_s26 + $0xd8] sm:$0xff]  ;;  %v5104_v24 = vpack.c.bf16 %v219_v18, %v219_v18 }
  0x11   : > { %4994 = vmatpush.bf16.msra.mxu3 %v4828_v1  ;;  %2552 = vmatpush.bf16.msra.mxu0 %v4828_v1  ;;  %v257_v9 = vpack.c.bf16 %v225_v5, %v225_v5  ;;  %v233_v10 = vld [vmem:[%s5079_s26 + $0x120] sm:$0xff]  ;;  %v234_v11 = vld [vmem:[%s5079_s26 + $0x128] sm:$0xff]  ;;  %v258_v12 = vpack.c.bf16 %v226_v8, %v226_v8  ;;  %v235_v27 = vld [vmem:[%s5079_s26 + $0x138] sm:$0xff]  ;;  %v259_v28 = vpack.c.bf16 %v227_v22, %v227_v22 }
  0x12   : > { %v209_v13 = vld [vmem:[%s5079_s26] sm:$0xff]  ;;  %281 = vst [vmem:[#allocation2 + $0x120] sm:$0xf] %v5084_v6  ;;  %v265_v15 = vpack.c.bf16 %v233_v10, %v233_v10  ;;  %v210_v16 = vld [vmem:[%s5079_s26 + $0x8] sm:$0xff]  ;;  %v266_v17 = vpack.c.bf16 %v234_v11, %v234_v11  ;;  %v211_v31 = vld [vmem:[%s5079_s26 + $0x18] sm:$0xff]  ;;  %v267_v33 = vpack.c.bf16 %v235_v27, %v235_v27 }
  0x13   : > { %282 = vst [vmem:[#allocation2 + $0x144] sm:$0xf] %v5086_v7  ;;  %v241_v19 = vpack.c.bf16 %v209_v13, %v209_v13  ;;  %v220_v20 = vld [vmem:[%s5079_s26 + $0x80] sm:$0xff]  ;;  %v242_v21 = vpack.c.bf16 %v210_v16, %v210_v16  ;;  %v5118_v36 = vpack.c.bf16 %v211_v31, %v211_v31  ;;  %v221_v39 = vld [vmem:[%s5079_s26 + $0x90] sm:$0xff]  ;;  %v222_v40 = vld [vmem:[%s5079_s26 + $0x98] sm:$0xff] }
  0x14   : > { %4995 = vmatpush.bf16.msra.mxu1 %v4827_v2  ;;  %4996 = vmatpush.bf16.msra.mxu2 %v4827_v2  ;;  %289 = vst [vmem:[#allocation2 + $0x240] sm:$0xf] %v257_v9  ;;  %v228_v25 = vld [vmem:[%s5079_s26 + $0xe0] sm:$0xff]  ;;  %v5107_v26 = vpack.c.bf16 %v220_v20, %v220_v20  ;;  %v5127_v41 = vpack.c.bf16 %v221_v39, %v221_v39  ;;  %v229_v43 = vld [vmem:[%s5079_s26 + $0xf0] sm:$0xff]  ;;  %v230_v44 = vld [vmem:[%s5079_s26 + $0xf8] sm:$0xff] }
  0x15   : > { %4997 = vmatpush.bf16.msra.mxu3 %v4827_v2  ;;  %2553 = vmatpush.bf16.msra.mxu0 %v4827_v2  ;;  %290 = vst [vmem:[#allocation2 + $0x264] sm:$0xf] %v258_v12  ;;  %v236_v29 = vld [vmem:[%s5079_s26 + $0x140] sm:$0xff]  ;;  %v260_v30 = vpack.c.bf16 %v228_v25, %v228_v25  ;;  %v5129_v42 = vpack.c.bf16 %v222_v40, %v222_v40  ;;  %v237_v50 = vld [vmem:[%s5079_s26 + $0x150] sm:$0xff]  ;;  %v238_v51 = vld [vmem:[%s5079_s26 + $0x158] sm:$0xff] }
  0x16   : > { %297 = vst [vmem:[#allocation2 + $0x360] sm:$0xf] %v265_v15  ;;  %v212_v34 = vld [vmem:[%s5079_s26 + $0x20] sm:$0xff]  ;;  %v268_v35 = vpack.c.bf16 %v236_v29, %v236_v29  ;;  %v261_v49 = vpack.c.bf16 %v229_v43, %v229_v43  ;;  %v262_v53 = vpack.c.bf16 %v230_v44, %v230_v44  ;;  %v213_v54 = vld [vmem:[%s5079_s26 + $0x30] sm:$0xff]  ;;  %v269_v57 = vpack.c.bf16 %v237_v50, %v237_v50  ;;  %v214_v58 = vld [vmem:[%s5079_s26 + $0x38] sm:$0xff] }
  0x17   : > { %298 = vst [vmem:[#allocation2 + $0x384] sm:$0xf] %v266_v17  ;;  %v5120_v37 = vpack.c.bf16 %v212_v34, %v212_v34  ;;  %v270_v61 = vpack.c.bf16 %v238_v51, %v238_v51  ;;  %v245_v0 = vpack.c.bf16 %v213_v54, %v213_v54  ;;  %v246_v3 = vpack.c.bf16 %v214_v58, %v214_v58  ;;  %v4837_v8 = vld [vmem:[%s5801_s1 + $0x78] sm:$0xff]  ;;  %v4844_v10 = vld [vmem:[%s5801_s1 + $0xb0] sm:$0xff]  ;;  %v4851_v15 = vld [vmem:[%s5801_s1 + $0xe8] sm:$0xff] }
  0x18   : > { %4998 = vmatpush.bf16.msra.mxu1 %v4826_v14  ;;  %4999 = vmatpush.bf16.msra.mxu2 %v4826_v14  ;;  %273 = vst [vmem:[#allocation2] sm:$0xf] %v241_v19  ;;  %v4861_v9 = vld [vmem:[%s5801_s1 + $0x138] sm:$0xff]  ;;  %v4852_v11 = vld [vmem:[%s5801_s1 + $0xf0] sm:$0xff]  ;;  %v4835_v16 = vld [vmem:[%s5801_s1 + $0x68] sm:$0xff] }
  0x19   : > { %5000 = vmatpush.bf16.msra.mxu3 %v4826_v14  ;;  %2554 = vmatpush.bf16.msra.mxu0 %v4826_v14  ;;  %274 = vst [vmem:[#allocation2 + $0x24] sm:$0xf] %v242_v21  ;;  %v3957_v45 = vld [vmem:[#allocation2 + $0x120] sm:$0xf]  ;;  %v4836_v12 = vld [vmem:[%s5801_s1 + $0x70] sm:$0xff]  ;;  %v4843_v14 = vld [vmem:[%s5801_s1 + $0xa8] sm:$0xff] }
  0x1a   : > { %283 = vst [vmem:[#allocation2 + $0x168] sm:$0xf] %v5104_v24  ;;  %v4718_v46 = vld [vmem:[#allocation2 + $0x140] sm:$0xf0]  ;;  %v4860_v13 = vld [vmem:[%s5801_s1 + $0x130] sm:$0xff]  ;;  %v223_v19 = vld [vmem:[%s5079_s26 + $0xa8] sm:$0xff] }
  0x1b   : > { %284 = vst [vmem:[#allocation2 + $0x18c] sm:$0xf] %v5107_v26  ;;  %v4101_v47 = vld [vmem:[#allocation2 + $0x240] sm:$0xf]  ;;  %v3958_v1 = vor.u32 %v4718_v46, %v3957_v45  ;;  %v224_v20 = vld [vmem:[%s5079_s26 + $0xb0] sm:$0xff]  ;;  %v4859_v21 = vld [vmem:[%s5801_s1 + $0x128] sm:$0xff]  ;;  %v5191_v22 = vpack.c.bf16 %v223_v19, %v223_v19 }
  0x1c   : > { %5001 = vmatpush.bf16.msra.mxu1 %v4825_v23  ;;  %5002 = vmatpush.bf16.msra.mxu2 %v4825_v23  ;;  %291 = vst [vmem:[#allocation2 + $0x288] sm:$0xf] %v259_v28  ;;  %v4754_v48 = vld [vmem:[#allocation2 + $0x260] sm:$0xf0]  ;;  %v231_v25 = vld [vmem:[%s5079_s26 + $0x108] sm:$0xff]  ;;  %v232_v27 = vld [vmem:[%s5079_s26 + $0x110] sm:$0xff] }
  0x1d   : > { %5003 = vmatpush.bf16.msra.mxu3 %v4825_v23  ;;  %2555 = vmatpush.bf16.msra.mxu0 %v4825_v23  ;;  %292 = vst [vmem:[#allocation2 + $0x2ac] sm:$0xf] %v260_v30  ;;  %v4245_v52 = vld [vmem:[#allocation2 + $0x360] sm:$0xf]  ;;  %v4102_v2 = vor.u32 %v4754_v48, %v4101_v47  ;;  %v5193_v23 = vpack.c.bf16 %v224_v20, %v224_v20  ;;  %v240_v34 = vld [vmem:[%s5079_s26 + $0x170] sm:$0xff]  ;;  %v4841_v46 = vld [vmem:[%s5801_s1 + $0x98] sm:$0xff] }
  0x1e   : > { %299 = vst [vmem:[#allocation2 + $0x3a8] sm:$0xf] %v267_v33  ;;  %v4790_v56 = vld [vmem:[#allocation2 + $0x380] sm:$0xf0]  ;;  %v263_v31 = vpack.c.bf16 %v231_v25, %v231_v25  ;;  %v239_v33 = vld [vmem:[%s5079_s26 + $0x168] sm:$0xff]  ;;  %v272_v40 = vpack.c.bf16 %v240_v34, %v240_v34  ;;  %v4849_v47 = vld [vmem:[%s5801_s1 + $0xd8] sm:$0xff] }
  0x1f   : > { %300 = vst [vmem:[#allocation2 + $0x3cc] sm:$0xf] %v268_v35  ;;  %v3813_v59 = vld [vmem:[#allocation2] sm:$0xf]  ;;  %v4246_v4 = vor.u32 %v4790_v56, %v4245_v52  ;;  %v4857_v54 = vld [vmem:[%s5801_s1 + $0x118] sm:$0xff]  ;;  %v4848_v56 = vld [vmem:[%s5801_s1 + $0xd0] sm:$0xff] }
  0x20   : > { %5004 = vmatpush.bf16.msra.mxu1 %v4824_v32  ;;  %5005 = vmatpush.bf16.msra.mxu2 %v4824_v32  ;;  %275 = vst [vmem:[#allocation2 + $0x48] sm:$0xf] %v5118_v36  ;;  %v4682_v60 = vld [vmem:[#allocation2 + $0x20] sm:$0xf0]  ;;  %v4856_v58 = vld [vmem:[%s5801_s1 + $0x110] sm:$0xff] }
  0x21   : > { %5006 = vmatpush.bf16.msra.mxu3 %v4824_v32  ;;  %2556 = vmatpush.bf16.msra.mxu0 %v4824_v32  ;;  %276 = vst [vmem:[#allocation2 + $0x6c] sm:$0xf] %v5120_v37  ;;  %v3814_v5 = vor.u32 %v4682_v60, %v3813_v59  ;;  %v4842_v17 = vld [vmem:[%s5801_s1 + $0xa0] sm:$0xff]  ;;  %v3993_v28 = vld [vmem:[#allocation2 + $0x168] sm:$0xf]  ;;  %v264_v32 = vpack.c.bf16 %v232_v27, %v232_v27 }
  0x22   : > { %285 = vst [vmem:[#allocation2 + $0x1b0] sm:$0xf] %v5127_v41  ;;  %v4850_v18 = vld [vmem:[%s5801_s1 + $0xe0] sm:$0xff]  ;;  %v4839_v59 = vld [vmem:[%s5801_s1 + $0x88] sm:$0xff] }
  0x23   : > { %286 = vst [vmem:[#allocation2 + $0x1d4] sm:$0xf] %v5129_v42  ;;  %v4137_v29 = vld [vmem:[#allocation2 + $0x288] sm:$0xf]  ;;  %v4834_v44 = vld [vmem:[%s5801_s1 + $0x60] sm:$0xff] }
  0x24   : > { %5007 = vmatpush.bf16.msra.mxu1 %v4823_v38  ;;  %5008 = vmatpush.bf16.msra.mxu2 %v4823_v38  ;;  %293 = vst [vmem:[#allocation2 + $0x2d0] sm:$0xf] %v261_v49  ;;  %v4763_v30 = vld [vmem:[#allocation2 + $0x2a8] sm:$0xf0]  ;;  %v4830_v20 = vld [vmem:[%s5801_s1 + $0x40] sm:$0xff] }
  0x25   : > { %5009 = vmatpush.bf16.msra.mxu3 %v4823_v38  ;;  %2557 = vmatpush.bf16.msra.mxu0 %v4823_v38  ;;  %294 = vst [vmem:[#allocation2 + $0x2f4] sm:$0xf] %v262_v53  ;;  %v4281_v35 = vld [vmem:[#allocation2 + $0x3a8] sm:$0xf]  ;;  %v216_v38 = vld [vmem:[%s5079_s26 + $0x50] sm:$0xff]  ;;  %v4138_v50 = vor.u32 %v4763_v30, %v4137_v29  ;;  %v4833_v53 = vld [vmem:[%s5801_s1 + $0x58] sm:$0xff] }
  0x26   : > { %301 = vst [vmem:[#allocation2 + $0x3f0] sm:$0xf] %v269_v57  ;;  %v248_v48 = vpack.c.bf16 %v216_v38, %v216_v38  ;;  %v4832_v57 = vld [vmem:[%s5801_s1 + $0x50] sm:$0xff]  ;;  %v4847_v60 = vld [vmem:[%s5801_s1 + $0xc8] sm:$0xff]  ;;  %v4869_v29 = vld [vmem:[%s5801_s1 + $0x178] sm:$0xff] }
  0x27   : > { %302 = vst [vmem:[#allocation2 + $0x414] sm:$0xf] %v270_v61  ;;  %v3849_v39 = vld [vmem:[#allocation2 + $0x48] sm:$0xf]  ;;  %v4893_v30 = vld [vmem:[%s5801_s1 + $0x238] sm:$0xff] }
  0x28   : > { %5010 = vmatpush.bf16.msra.mxu1 %v4822_v55  ;;  %5011 = vmatpush.bf16.msra.mxu2 %v4822_v55  ;;  %277 = vst [vmem:[#allocation2 + $0x90] sm:$0xf] %v245_v0  ;;  %v4691_v43 = vld [vmem:[#allocation2 + $0x68] sm:$0xf0] }
  0x29   : > { %5012 = vmatpush.bf16.msra.mxu3 %v4822_v55  ;;  %2558 = vmatpush.bf16.msra.mxu0 %v4822_v55  ;;  %278 = vst [vmem:[#allocation2 + $0xb4] sm:$0xf] %v246_v3  ;;  %v3850_v52 = vor.u32 %v4691_v43, %v3849_v39  ;;  %v4840_v55 = vld [vmem:[%s5801_s1 + $0x90] sm:$0xff]  ;;  %v4831_v61 = vld [vmem:[%s5801_s1 + $0x48] sm:$0xff] }
  0x2a   : > { %562 = vst [vmem:[#allocation2 + $0xc] sm:$0xf] %v5118_v36  ;;  %v271_v36 = vpack.c.bf16 %v239_v33, %v239_v33 }
  0x2b   : > { %2579 = vmatmul.bf16.vlgmr.msra.gmra.mxu1 %v3958_v1  ;;  %2599 = vmatmul.bf16.vlgmr.msra.gmra.mxu2 %v4102_v2  ;;  %563 = vst [vmem:[#allocation2 + $0x30] sm:$0xf] %v5120_v37  ;;  %v215_v37 = vld [vmem:[%s5079_s26 + $0x48] sm:$0xff]  ;;  %v4029_v2 = vld [vmem:[#allocation2 + $0x1b0] sm:$0xf] }
  0x2c   : > { %2729 = vmatpush.bf16.msrb.mxu2 %v4845_v62  ;;  %2619 = vmatmul.bf16.vlgmr.msra.gmra.mxu3 %v4246_v4  ;;  %564 = vst [vmem:[#allocation2 + $0x54] sm:$0xf] %v245_v0  ;;  %v247_v45 = vpack.c.bf16 %v215_v37, %v215_v37  ;;  %v4846_v62 = vld [vmem:[%s5801_s1 + $0xc0] sm:$0xff]  ;;  %v4173_v4 = vld [vmem:[#allocation2 + $0x2d0] sm:$0xf] }
  0x2d   : > { %2818 = vmatpush.bf16.msrb.mxu3 %v4853_v63  ;;  %2559 = vmatmul.bf16.vlgmr.msra.gmra.mxu0 %v3814_v5  ;;  %565 = vst [vmem:[#allocation2 + $0x78] sm:$0xf] %v246_v3  ;;  %v305_v63 = vld [vmem:[%s5079_s26 + $0x1] sm:$0xff]  ;;  %v4736_v3 = vld [vmem:[#allocation2 + $0x1d0] sm:$0xf0] }
  0x2e   : > { %2640 = vmatpush.bf16.msrb.mxu1 %v4837_v8  ;;  %2907 = vmatpush.bf16.msrb.mxu0 %v4861_v9  ;;  %568 = vst [vmem:[#allocation2 + $0xe4] sm:$0xf] %v5084_v6  ;;  %v4727_v6 = vld [vmem:[#allocation2 + $0x188] sm:$0xf0]  ;;  %v337_v0 = vpack.c.bf16 %v305_v63, %v305_v63  ;;  %v401_v1 = vld [vmem:[%s5079_s26 + $0x2] sm:$0xff] }
  0x2f   : > { %569 = vst [vmem:[#allocation2 + $0x108] sm:$0xf] %v5086_v7  ;;  %v4799_v7 = vld [vmem:[#allocation2 + $0x3c8] sm:$0xf0]  ;;  %v3994_v49 = vor.u32 %v4727_v6, %v3993_v28  ;;  %v433_v9 = vpack.c.bf16 %v401_v1, %v401_v1  ;;  %v4877_v28 = vld [vmem:[%s5801_s1 + $0x1b8] sm:$0xff] }
  0x30   : > { %2730 = vmatpush.bf16.msrb.mxu2 %v4844_v10  ;;  %570 = vst [vmem:[#allocation2 + $0x12c] sm:$0xf] %v5104_v24  ;;  %v4858_v24 = vld [vmem:[%s5801_s1 + $0x120] sm:$0xff]  ;;  %v4282_v51 = vor.u32 %v4799_v7, %v4281_v35  ;;  %v402_v8 = vld [vmem:[%s5079_s26 + $0xa] sm:$0xff]  ;;  %v4700_v19 = vld [vmem:[#allocation2 + $0xb0] sm:$0xf0] }
  0x31   : > { %2819 = vmatpush.bf16.msrb.mxu3 %v4852_v11  ;;  %287 = vst [vmem:[#allocation2 + $0x1f8] sm:$0xf] %v5191_v22  ;;  %v3651_v10 = vld [vmem:[%s5079_s26 + $0x19] sm:$0xff]  ;;  %v3652_v11 = vld [vmem:[%s5079_s26 + $0x21] sm:$0xff]  ;;  %v3653_v35 = vld [vmem:[%s5079_s26 + $0x31] sm:$0xff] }
  0x32   : > { %2641 = vmatpush.bf16.msrb.mxu1 %v4836_v12  ;;  %2908 = vmatpush.bf16.msrb.mxu0 %v4860_v13  ;;  %288 = vst [vmem:[#allocation2 + $0x21c] sm:$0xf] %v5193_v23  ;;  %v4772_v12 = vld [vmem:[#allocation2 + $0x2f0] sm:$0xf0]  ;;  %v4317_v13 = vld [vmem:[#allocation2 + $0x3f0] sm:$0xf]  ;;  %v628_v7 = vpack.c.bf16 %v3653_v35, %v3653_v35 }
  0x33   : > { %295 = vst [vmem:[#allocation2 + $0x318] sm:$0xf] %v263_v31  ;;  %v4885_v6 = vld [vmem:[%s5801_s1 + $0x1f8] sm:$0xff] }
  0x34   : > { %2731 = vmatpush.bf16.msrb.mxu2 %v4843_v14  ;;  %296 = vst [vmem:[#allocation2 + $0x33c] sm:$0xf] %v264_v32  ;;  %v434_v14 = vpack.c.bf16 %v402_v8, %v402_v8  ;;  %v403_v31 = vld [vmem:[%s5079_s26 + $0x1a] sm:$0xff]  ;;  %v404_v32 = vld [vmem:[%s5079_s26 + $0x22] sm:$0xff]  ;;  %v4868_v8 = vld [vmem:[%s5801_s1 + $0x170] sm:$0xff] }
  0x35   : > { %2820 = vmatpush.bf16.msrb.mxu3 %v4851_v15  ;;  %303 = vst [vmem:[#allocation2 + $0x438] sm:$0xf] %v271_v36  ;;  %v626_v15 = vpack.c.bf16 %v3651_v10, %v3651_v10  ;;  %v435_v33 = vpack.c.bf16 %v403_v31, %v403_v31  ;;  %v436_v34 = vpack.c.bf16 %v404_v32, %v404_v32  ;;  %v3654_v36 = vld [vmem:[%s5079_s26 + $0x39] sm:$0xff]  ;;  %v407_v10 = vld [vmem:[%s5079_s26 + $0x4a] sm:$0xff]  ;;  %v409_v31 = vld [vmem:[%s5079_s26 + $0x62] sm:$0xff] }
  0x36   : > { %2642 = vmatpush.bf16.msrb.mxu1 %v4835_v16  ;;  %2909 = vmatpush.bf16.msrb.mxu0 %v4859_v21  ;;  %304 = vst [vmem:[#allocation2 + $0x45c] sm:$0xf] %v272_v40  ;;  %v4808_v16 = vld [vmem:[#allocation2 + $0x410] sm:$0xf0]  ;;  %v4854_v21 = vld [vmem:[%s5801_s1 + $0x100] sm:$0xff]  ;;  %v629_v39 = vpack.c.bf16 %v3654_v36, %v3654_v36  ;;  %v410_v32 = vld [vmem:[%s5079_s26 + $0x6a] sm:$0xff] }
  0x37   : > { %279 = vst [vmem:[#allocation2 + $0xd8] sm:$0xf] %v247_v45  ;;  %v4318_v25 = vor.u32 %v4808_v16, %v4317_v13  ;;  %v3659_v35 = vld [vmem:[%s5079_s26 + $0x79] sm:$0xff]  ;;  %v3660_v36 = vld [vmem:[%s5079_s26 + $0x81] sm:$0xff] }
  0x38   : > { %2732 = vmatpush.bf16.msrb.mxu2 %v4842_v17  ;;  %280 = vst [vmem:[#allocation2 + $0xfc] sm:$0xf] %v248_v48  ;;  %v3885_v17 = vld [vmem:[#allocation2 + $0x90] sm:$0xf]  ;;  %v4065_v37 = vld [vmem:[#allocation2 + $0x1f8] sm:$0xf] }
  0x39   : > { %2821 = vmatpush.bf16.msrb.mxu3 %v4850_v18  ;;  %566 = vst [vmem:[#allocation2 + $0x9c] sm:$0xf] %v247_v45  ;;  %v627_v18 = vpack.c.bf16 %v3652_v11, %v3652_v11  ;;  %v3886_v27 = vor.u32 %v4700_v19, %v3885_v17  ;;  %v4745_v38 = vld [vmem:[#allocation2 + $0x218] sm:$0xf0]  ;;  %v408_v11 = vld [vmem:[%s5079_s26 + $0x52] sm:$0xff] }
  0x3a   : > { %2643 = vmatpush.bf16.msrb.mxu1 %v4834_v44  ;;  %2910 = vmatpush.bf16.msrb.mxu0 %v4858_v24  ;;  %567 = vst [vmem:[#allocation2 + $0xc0] sm:$0xf] %v248_v48  ;;  %v4209_v40 = vld [vmem:[#allocation2 + $0x318] sm:$0xf]  ;;  %v440_v13 = vpack.c.bf16 %v408_v11, %v408_v11 }
  0x3b   : > { %2584 = vmatmul.bf16.gmra.mxu1 %v3994_v49  ;;  %2604 = vmatmul.bf16.gmra.mxu2 %v4138_v50  ;;  %571 = vst [vmem:[#allocation2 + $0x150] sm:$0xf] %v5107_v26  ;;  %v4838_v26 = vld [vmem:[%s5801_s1 + $0x80] sm:$0xff]  ;;  %v4781_v43 = vld [vmem:[#allocation2 + $0x338] sm:$0xf0] }
  0x3c   : > { %2733 = vmatpush.bf16.msrb.mxu2 %v4841_v46  ;;  %2624 = vmatmul.bf16.gmra.mxu3 %v4282_v51  ;;  %572 = vst [vmem:[#allocation2 + $0x174] sm:$0xf] %v5127_v41  ;;  %v4855_v41 = vld [vmem:[%s5801_s1 + $0x108] sm:$0xff]  ;;  %v4353_v44 = vld [vmem:[#allocation2 + $0x438] sm:$0xf]  ;;  %v4210_v48 = vor.u32 %v4781_v43, %v4209_v40 }
  0x3d   : > { %2822 = vmatpush.bf16.msrb.mxu3 %v4849_v47  ;;  %2564 = vmatmul.bf16.gmra.mxu0 %v3850_v52  ;;  %573 = vst [vmem:[#allocation2 + $0x198] sm:$0xf] %v5129_v42  ;;  %v306_v42 = vld [vmem:[%s5079_s26 + $0x9] sm:$0xff]  ;;  %v4817_v24 = vld [vmem:[#allocation2 + $0x458] sm:$0xf0]  ;;  %v4066_v47 = vor.u32 %v4745_v38, %v4065_v37  ;;  %v405_v51 = vld [vmem:[%s5079_s26 + $0x32] sm:$0xff] }
  0x3e   : > { %2644 = vmatpush.bf16.msrb.mxu1 %v4833_v53  ;;  %2911 = vmatpush.bf16.msrb.mxu0 %v4857_v54  ;;  %574 = vst [vmem:[#allocation2 + $0x1bc] sm:$0xf] %v5191_v22  ;;  %v338_v5 = vpack.c.bf16 %v306_v42, %v306_v42  ;;  %v4030_v22 = vor.u32 %v4736_v3, %v4029_v2  ;;  %v3921_v45 = vld [vmem:[#allocation2 + $0xd8] sm:$0xf] }
  0x3f   : > { %575 = vst [vmem:[#allocation2 + $0x1e0] sm:$0xf] %v5193_v23  ;;  %v4174_v23 = vor.u32 %v4772_v12, %v4173_v4  ;;  %v4709_v46 = vld [vmem:[#allocation2 + $0xf8] sm:$0xf0]  ;;  %v4354_v49 = vor.u32 %v4817_v24, %v4353_v44  ;;  %v437_v53 = vpack.c.bf16 %v405_v51, %v405_v51  ;;  %v4876_v4 = vld [vmem:[%s5801_s1 + $0x1b0] sm:$0xff]  ;;  %v439_v12 = vpack.c.bf16 %v407_v10, %v407_v10  ;;  %v4875_v51 = vld [vmem:[%s5801_s1 + $0x1a8] sm:$0xff] }
  0x40   : > { %2734 = vmatpush.bf16.msrb.mxu2 %v4840_v55  ;;  %369 = vst [vmem:[#allocation2 + $0x4] sm:$0xf] %v337_v0  ;;  %v3922_v50 = vor.u32 %v4709_v46, %v3921_v45  ;;  %v406_v52 = vld [vmem:[%s5079_s26 + $0x3a] sm:$0xff]  ;;  %v3655_v55 = vld [vmem:[%s5079_s26 + $0x49] sm:$0xff]  ;;  %v413_v10 = vld [vmem:[%s5079_s26 + $0x92] sm:$0xff] }
  0x41   : > { %2823 = vmatpush.bf16.msrb.mxu3 %v4848_v56  ;;  %370 = vst [vmem:[#allocation2 + $0x28] sm:$0xf] %v338_v5  ;;  %v438_v54 = vpack.c.bf16 %v406_v52, %v406_v52  ;;  %v3656_v56 = vld [vmem:[%s5079_s26 + $0x51] sm:$0xff]  ;;  %v4697_v43 = vld [vmem:[#allocation2 + $0x9c] sm:$0xf]  ;;  %v4883_v52 = vld [vmem:[%s5801_s1 + $0x1e8] sm:$0xff] }
  0x42   : > { %2645 = vmatpush.bf16.msrb.mxu1 %v4832_v57  ;;  %2912 = vmatpush.bf16.msrb.mxu0 %v4856_v58  ;;  %465 = vst [vmem:[#allocation2 + $0x8] sm:$0xf] %v433_v9  ;;  %v630_v57 = vpack.c.bf16 %v3655_v55, %v3655_v55  ;;  %v631_v58 = vpack.c.bf16 %v3656_v56, %v3656_v56  ;;  %v4884_v5 = vld [vmem:[%s5801_s1 + $0x1f0] sm:$0xff]  ;;  %v3895_v24 = vld [vmem:[#allocation2 + $0xbc] sm:$0xf0]  ;;  %v4867_v55 = vld [vmem:[%s5801_s1 + $0x168] sm:$0xff] }
  0x43   : > { %466 = vst [vmem:[#allocation2 + $0x2c] sm:$0xf] %v434_v14  ;;  %v4892_v9 = vld [vmem:[%s5801_s1 + $0x230] sm:$0xff]  ;;  %v3657_v14 = vld [vmem:[%s5079_s26 + $0x61] sm:$0xff] }
  0x44   : > { %2735 = vmatpush.bf16.msrb.mxu2 %v4839_v59  ;;  %658 = vst [vmem:[#allocation2 + $0x10] sm:$0xf] %v626_v15  ;;  %v414_v11 = vld [vmem:[%s5079_s26 + $0x9a] sm:$0xff] }
  0x45   : > { %2824 = vmatpush.bf16.msrb.mxu3 %v4847_v60  ;;  %659 = vst [vmem:[#allocation2 + $0x34] sm:$0xf] %v627_v18 }
  0x46   : > { %2646 = vmatpush.bf16.msrb.mxu1 %v4831_v61  ;;  %2913 = vmatpush.bf16.msrb.mxu0 %v4855_v41  ;;  %371 = vst [vmem:[#allocation2 + $0x4c] sm:$0xf] %v626_v15  ;;  %v4679_v61 = vld [vmem:[#allocation2 + $0xc] sm:$0xf] }
  0x47   : > { %372 = vst [vmem:[#allocation2 + $0x70] sm:$0xf] %v627_v18  ;;  %v4678_v59 = vld [vmem:[#allocation2 + $0x4] sm:$0xf]  ;;  %v3658_v15 = vld [vmem:[%s5079_s26 + $0x69] sm:$0xff]  ;;  %v632_v18 = vpack.c.bf16 %v3657_v14, %v3657_v14 }
  0x48   : > { %2736 = vmatpush.bf16.msrb.mxu2 %v4838_v26  ;;  %467 = vst [vmem:[#allocation2 + $0x50] sm:$0xf] %v435_v33  ;;  %v3815_v60 = vld [vmem:[#allocation2 + $0x24] sm:$0xf0]  ;;  %v3823_v26 = vld [vmem:[#allocation2 + $0x2c] sm:$0xf0]  ;;  %v633_v19 = vpack.c.bf16 %v3658_v15, %v3658_v15  ;;  %v441_v33 = vpack.c.bf16 %v409_v31, %v409_v31 }
  0x49   : > { %2825 = vmatpush.bf16.msrb.mxu3 %v4846_v62  ;;  %468 = vst [vmem:[#allocation2 + $0x74] sm:$0xf] %v436_v34  ;;  %v3821_v62 = vld [vmem:[#allocation2 + $0x8] sm:$0xf]  ;;  %v3818_v0 = vor.u32 %v4678_v59, %v3815_v60  ;;  %v3826_v2 = vor.u32 %v4679_v61, %v3823_v26  ;;  %v442_v34 = vpack.c.bf16 %v410_v32, %v410_v32  ;;  %v3662_v59 = vld [vmem:[%s5079_s26 + $0x99] sm:$0xff]  ;;  %v3664_v15 = vld [vmem:[%s5079_s26 + $0xb1] sm:$0xff] }
  0x4a   : > { %2647 = vmatpush.bf16.msrb.mxu1 %v4830_v20  ;;  %2914 = vmatpush.bf16.msrb.mxu0 %v4854_v21  ;;  %660 = vst [vmem:[#allocation2 + $0x58] sm:$0xf] %v628_v7  ;;  %v4683_v63 = vld [vmem:[#allocation2 + $0x28] sm:$0xf0]  ;;  %v4688_v21 = vld [vmem:[#allocation2 + $0x54] sm:$0xf] }
  0x4b   : > { %2589 = vmatmul.bf16.gmra.mxu1 %v4030_v22  ;;  %2609 = vmatmul.bf16.gmra.mxu2 %v4174_v23  ;;  %661 = vst [vmem:[#allocation2 + $0x7c] sm:$0xf] %v629_v39  ;;  %v3829_v41 = vld [vmem:[#allocation2 + $0x10] sm:$0xf]  ;;  %v3822_v1 = vor.u32 %v4683_v63, %v3821_v62  ;;  %v3859_v23 = vld [vmem:[#allocation2 + $0x74] sm:$0xf0]  ;;  %v637_v63 = vpack.c.bf16 %v3662_v59, %v3662_v59 }
  0x4c   : > { %2629 = vmatmul.bf16.gmra.mxu3 %v4318_v25  ;;  %3085 = vmatpush.bf16.msra.mxu2 %v4877_v28  ;;  %373 = vst [vmem:[#allocation2 + $0x94] sm:$0xf] %v628_v7  ;;  %v4684_v42 = vld [vmem:[#allocation2 + $0x30] sm:$0xf0]  ;;  %v634_v7 = vpack.c.bf16 %v3659_v35, %v3659_v35  ;;  %v4891_v26 = vld [vmem:[%s5801_s1 + $0x228] sm:$0xff]  ;;  %v4874_v35 = vld [vmem:[%s5801_s1 + $0x1a0] sm:$0xff] }
  0x4d   : > { %2569 = vmatmul.bf16.gmra.mxu0 %v3886_v27  ;;  %3174 = vmatpush.bf16.msra.mxu3 %v4885_v6  ;;  %374 = vst [vmem:[#allocation2 + $0xb8] sm:$0xf] %v629_v39  ;;  %v3830_v3 = vor.u32 %v4684_v42, %v3829_v41  ;;  %v4687_v16 = vld [vmem:[#allocation2 + $0x4c] sm:$0xf]  ;;  %v635_v39 = vpack.c.bf16 %v3660_v36, %v3660_v36  ;;  %v4706_v42 = vld [vmem:[#allocation2 + $0xe4] sm:$0xf] }
  0x4e   : > { %2996 = vmatpush.bf16.msra.mxu1 %v4869_v29  ;;  %3263 = vmatpush.bf16.msra.mxu0 %v4893_v30  ;;  %469 = vst [vmem:[#allocation2 + $0x98] sm:$0xf] %v437_v53  ;;  %v3851_v17 = vld [vmem:[#allocation2 + $0x6c] sm:$0xf0]  ;;  %v3862_v29 = vor.u32 %v4688_v21, %v3859_v23  ;;  %v411_v53 = vld [vmem:[%s5079_s26 + $0x7a] sm:$0xff] }
  0x4f   : > { %470 = vst [vmem:[#allocation2 + $0xbc] sm:$0xf] %v438_v54  ;;  %v3857_v20 = vld [vmem:[#allocation2 + $0x50] sm:$0xf]  ;;  %v3854_v28 = vor.u32 %v4687_v16, %v3851_v17  ;;  %v412_v54 = vld [vmem:[%s5079_s26 + $0x82] sm:$0xff]  ;;  %v443_v56 = vpack.c.bf16 %v411_v53, %v411_v53 }
  0x50   : > { %662 = vst [vmem:[#allocation2 + $0xa0] sm:$0xf] %v630_v57  ;;  %3086 = vmatpush.bf16.msra.mxu2 %v4876_v4  ;;  %v4692_v22 = vld [vmem:[#allocation2 + $0x70] sm:$0xf0]  ;;  %v3663_v14 = vld [vmem:[%s5079_s26 + $0xa9] sm:$0xff]  ;;  %v4882_v36 = vld [vmem:[%s5801_s1 + $0x1e0] sm:$0xff] }
  0x51   : > { %663 = vst [vmem:[#allocation2 + $0xc4] sm:$0xf] %v631_v58  ;;  %3175 = vmatpush.bf16.msra.mxu3 %v4884_v5  ;;  %v3865_v25 = vld [vmem:[#allocation2 + $0x58] sm:$0xf]  ;;  %v3858_v6 = vor.u32 %v4692_v22, %v3857_v20  ;;  %v5333_v20 = vld [vmem:[%s5802_s2] ss:$0 sm:$0xff] }
  0x52   : > { %375 = vst [vmem:[#allocation2 + $0xdc] sm:$0xf] %v630_v57  ;;  %2997 = vmatpush.bf16.msra.mxu1 %v4868_v8  ;;  %3264 = vmatpush.bf16.msra.mxu0 %v4892_v9  ;;  %v4693_v27 = vld [vmem:[#allocation2 + $0x78] sm:$0xf0]  ;;  %v444_v57 = vpack.c.bf16 %v412_v54, %v412_v54  ;;  %v4715_v23 = vld [vmem:[#allocation2 + $0x12c] sm:$0xf] }
  0x53   : > { %376 = vst [vmem:[#allocation2 + $0x100] sm:$0xf] %v631_v58  ;;  %v3866_v30 = vor.u32 %v4693_v27, %v3865_v25  ;;  %v4696_v37 = vld [vmem:[#allocation2 + $0x94] sm:$0xf]  ;;  %v3967_v25 = vld [vmem:[#allocation2 + $0x14c] sm:$0xf0] }
  0x54   : > { %471 = vst [vmem:[#allocation2 + $0xe0] sm:$0xf] %v439_v12  ;;  %v3887_v38 = vld [vmem:[#allocation2 + $0xb4] sm:$0xf0]  ;;  %3087 = vmatpush.bf16.msra.mxu2 %v4875_v51  ;;  %v445_v12 = vpack.c.bf16 %v413_v10, %v413_v10  ;;  %v3970_v31 = vor.u32 %v4715_v23, %v3967_v25  ;;  %v3665_v53 = vld [vmem:[%s5079_s26 + $0xc1] sm:$0xff]  ;;  %v3666_v54 = vld [vmem:[%s5079_s26 + $0xc9] sm:$0xff] }
  0x55   : > { %472 = vst [vmem:[#allocation2 + $0x104] sm:$0xf] %v440_v13  ;;  %v3893_v40 = vld [vmem:[#allocation2 + $0x98] sm:$0xf]  ;;  %3176 = vmatpush.bf16.msra.mxu3 %v4883_v52  ;;  %v446_v13 = vpack.c.bf16 %v414_v11, %v414_v11  ;;  %v3636_v23 = vld [vmem:[%s5079_s26 + $0xe0] sm:$0xff] }
  0x56   : > { %664 = vst [vmem:[#allocation2 + $0xe8] sm:$0xf] %v632_v18  ;;  %v4701_v44 = vld [vmem:[#allocation2 + $0xb8] sm:$0xf0]  ;;  %v3661_v58 = vld [vmem:[%s5079_s26 + $0x91] sm:$0xff]  ;;  %2998 = vmatpush.bf16.msra.mxu1 %v4867_v55  ;;  %3265 = vmatpush.bf16.msra.mxu0 %v4891_v26 }
  0x57   : > { %665 = vst [vmem:[#allocation2 + $0x10c] sm:$0xf] %v633_v19  ;;  %v3901_v45 = vld [vmem:[#allocation2 + $0xa0] sm:$0xf]  ;;  %v636_v62 = vpack.c.bf16 %v3661_v58, %v3661_v58  ;;  %v640_v58 = vpack.c.bf16 %v3665_v53, %v3665_v53  ;;  %v4724_v26 = vld [vmem:[#allocation2 + $0x174] sm:$0xf] }
  0x58   : > { %377 = vst [vmem:[#allocation2 + $0x124] sm:$0xf] %v632_v18  ;;  %v4702_v46 = vld [vmem:[#allocation2 + $0xc0] sm:$0xf0]  ;;  %v638_v18 = vpack.c.bf16 %v3663_v14, %v3663_v14  ;;  %3088 = vmatpush.bf16.msra.mxu2 %v4874_v35 }
  0x59   : > { %378 = vst [vmem:[#allocation2 + $0x148] sm:$0xf] %v633_v19  ;;  %v4705_v60 = vld [vmem:[#allocation2 + $0xdc] sm:$0xf]  ;;  %v639_v19 = vpack.c.bf16 %v3664_v15, %v3664_v15  ;;  %3177 = vmatpush.bf16.msra.mxu3 %v4882_v36  ;;  %v417_v15 = vld [vmem:[%s5079_s26 + $0xc2] sm:$0xff] }
  0x5a   : > { %473 = vst [vmem:[#allocation2 + $0x128] sm:$0xf] %v441_v33  ;;  %v3923_v61 = vld [vmem:[#allocation2 + $0xfc] sm:$0xf0] }
  0x5b   : > { %2594 = vmatmul.bf16.gmra.mxu1 %v4066_v47  ;;  %2614 = vmatmul.bf16.gmra.mxu2 %v4210_v48  ;;  %474 = vst [vmem:[#allocation2 + $0x14c] sm:$0xf] %v442_v34  ;;  %v3890_v47 = vor.u32 %v4696_v37, %v3887_v38  ;;  %v3894_v48 = vor.u32 %v4701_v44, %v3893_v40  ;;  %v3929_v41 = vld [vmem:[#allocation2 + $0xe0] sm:$0xf]  ;;  %v416_v40 = vld [vmem:[%s5079_s26 + $0xb2] sm:$0xff] }
  0x5c   : > { %2634 = vmatmul.bf16.gmra.mxu3 %v4354_v49  ;;  %666 = vst [vmem:[#allocation2 + $0x130] sm:$0xf] %v634_v7  ;;  %v3898_v49 = vor.u32 %v4697_v43, %v3895_v24  ;;  %v3926_v4 = vor.u32 %v4705_v60, %v3923_v61  ;;  %v3633_v43 = vld [vmem:[%s5079_s26 + $0xc0] sm:$0xff]  ;;  %v641_v61 = vpack.c.bf16 %v3666_v54, %v3666_v54 }
  0x5d   : > { %2574 = vmatmul.bf16.gmra.mxu0 %v3922_v50  ;;  %667 = vst [vmem:[#allocation2 + $0x154] sm:$0xf] %v635_v39  ;;  %v3902_v50 = vor.u32 %v4702_v46, %v3901_v45  ;;  %v4866_v45 = vld [vmem:[%s5801_s1 + $0x160] sm:$0xff] }
  0x5e   : > { %379 = vst [vmem:[#allocation2 + $0x16c] sm:$0xf] %v634_v7  ;;  %2999 = vmatpush.bf16.msra.mxu1 %v4866_v45 }
  0x5f   : > { %380 = vst [vmem:[#allocation2 + $0x190] sm:$0xf] %v635_v39  ;;  %v4714_v16 = vld [vmem:[#allocation2 + $0x124] sm:$0xf]  ;;  %v415_v39 = vld [vmem:[%s5079_s26 + $0xaa] sm:$0xff] }
  0x60   : > { %475 = vst [vmem:[#allocation2 + $0x170] sm:$0xf] %v443_v56  ;;  %v3959_v17 = vld [vmem:[#allocation2 + $0x144] sm:$0xf0]  ;;  %v447_v46 = vpack.c.bf16 %v415_v39, %v415_v39  ;;  %v4733_v39 = vld [vmem:[#allocation2 + $0x1bc] sm:$0xf] }
  0x61   : > { %476 = vst [vmem:[#allocation2 + $0x194] sm:$0xf] %v444_v57  ;;  %v3965_v21 = vld [vmem:[#allocation2 + $0x128] sm:$0xf]  ;;  %v4890_v57 = vld [vmem:[%s5801_s1 + $0x220] sm:$0xff] }
  0x62   : > { %668 = vst [vmem:[#allocation2 + $0x178] sm:$0xf] %v636_v62  ;;  %v4719_v22 = vld [vmem:[#allocation2 + $0x148] sm:$0xf0]  ;;  %3266 = vmatpush.bf16.msra.mxu0 %v4890_v57 }
  0x63   : > { %669 = vst [vmem:[#allocation2 + $0x19c] sm:$0xf] %v637_v63  ;;  %v3973_v27 = vld [vmem:[#allocation2 + $0x130] sm:$0xf] }
  0x64   : > { %381 = vst [vmem:[#allocation2 + $0x1b4] sm:$0xf] %v636_v62  ;;  %v4003_v62 = vld [vmem:[#allocation2 + $0x194] sm:$0xf0] }
  0x65   : > { %382 = vst [vmem:[#allocation2 + $0x1d8] sm:$0xf] %v637_v63  ;;  %v4723_v55 = vld [vmem:[#allocation2 + $0x16c] sm:$0xf] }
  0x66   : > { %477 = vst [vmem:[#allocation2 + $0x1b8] sm:$0xf] %v445_v12  ;;  %v3995_v56 = vld [vmem:[#allocation2 + $0x18c] sm:$0xf0] }
  0x67   : > { %478 = vst [vmem:[#allocation2 + $0x1dc] sm:$0xf] %v446_v13  ;;  %v4001_v59 = vld [vmem:[#allocation2 + $0x170] sm:$0xf] }
  0x68   : > { %670 = vst [vmem:[#allocation2 + $0x1c0] sm:$0xf] %v638_v18  ;;  %v4728_v60 = vld [vmem:[#allocation2 + $0x190] sm:$0xf0] }
  0x69   : > { %671 = vst [vmem:[#allocation2 + $0x1e4] sm:$0xf] %v639_v19  ;;  %v4009_v63 = vld [vmem:[#allocation2 + $0x178] sm:$0xf] }
  0x6a   : > { %383 = vst [vmem:[#allocation2 + $0x1fc] sm:$0xf] %v638_v18 }
  0x6b   : > { %2648 = vmatmul.bf16.vlgmr.msrb.gmra.mxu1 %v3818_v0  ;;  %2737 = vmatmul.bf16.vlgmr.msrb.gmra.mxu2 %v3822_v1  ;;  %v4710_v0 = vld [vmem:[#allocation2 + $0x100] sm:$0xf0]  ;;  %v3931_v1 = vld [vmem:[#allocation2 + $0x104] sm:$0xf0]  ;;  %384 = vst [vmem:[#allocation2 + $0x220] sm:$0xf] %v639_v19 }
  0x6c   : > { %2826 = vmatmul.bf16.vlgmr.msrb.gmra.mxu3 %v3826_v2  ;;  %v3937_v2 = vld [vmem:[#allocation2 + $0xe8] sm:$0xf]  ;;  %v3930_v5 = vor.u32 %v4710_v0, %v3929_v41  ;;  %v3934_v8 = vor.u32 %v4706_v42, %v3931_v1  ;;  %479 = vst [vmem:[#allocation2 + $0x200] sm:$0xf] %v447_v46  ;;  %v4729_v41 = vld [vmem:[#allocation2 + $0x198] sm:$0xf0] }
  0x6d   : > { %2915 = vmatmul.bf16.vlgmr.msrb.gmra.mxu0 %v3830_v3  ;;  %v4711_v3 = vld [vmem:[#allocation2 + $0x108] sm:$0xf0]  ;;  %672 = vst [vmem:[#allocation2 + $0x208] sm:$0xf] %v640_v58  ;;  %v4037_v36 = vld [vmem:[#allocation2 + $0x1b8] sm:$0xf] }
  0x6e   : > { %v3938_v9 = vor.u32 %v4711_v3, %v3937_v2  ;;  %v3998_v2 = vor.u32 %v4723_v55, %v3995_v56  ;;  %v4002_v3 = vor.u32 %v4728_v60, %v4001_v59  ;;  %673 = vst [vmem:[#allocation2 + $0x22c] sm:$0xf] %v641_v61  ;;  %v4881_v59 = vld [vmem:[%s5801_s1 + $0x1d8] sm:$0xff] }
  0x6f   : > { %385 = vst [vmem:[#allocation2 + $0x244] sm:$0xf] %v640_v58  ;;  %v4873_v58 = vld [vmem:[%s5801_s1 + $0x198] sm:$0xff]  ;;  %3178 = vmatpush.bf16.msra.mxu3 %v4881_v59 }
  0x70   : > { %386 = vst [vmem:[#allocation2 + $0x268] sm:$0xf] %v641_v61  ;;  %3089 = vmatpush.bf16.msra.mxu2 %v4873_v58  ;;  %v421_v58 = vld [vmem:[%s5079_s26 + $0xf2] sm:$0xff]  ;;  %v422_v59 = vld [vmem:[%s5079_s26 + $0xfa] sm:$0xff] }
  0x7b   : > { %2653 = vmatmul.bf16.gmra.mxu1 %v3854_v28  ;;  %2742 = vmatmul.bf16.gmra.mxu2 %v3858_v6  ;;  %v4720_v28 = vld [vmem:[#allocation2 + $0x150] sm:$0xf0]  ;;  %v3962_v6 = vor.u32 %v4714_v16, %v3959_v17  ;;  %v418_v16 = vld [vmem:[%s5079_s26 + $0xca] sm:$0xff]  ;;  %v3635_v17 = vld [vmem:[%s5079_s26 + $0xd8] sm:$0xff] }
  0x7c   : > { %2831 = vmatmul.bf16.gmra.mxu3 %v3862_v29  ;;  %v3966_v29 = vor.u32 %v4719_v22, %v3965_v21  ;;  %v3974_v32 = vor.u32 %v4720_v28, %v3973_v27  ;;  %v449_v21 = vpack.c.bf16 %v417_v15, %v417_v15  ;;  %v450_v22 = vpack.c.bf16 %v418_v16, %v418_v16  ;;  %v4889_v15 = vld [vmem:[%s5801_s1 + $0x218] sm:$0xff] }
  0x7d   : > { %2920 = vmatmul.bf16.gmra.mxu0 %v3866_v30  ;;  %v546_v25 = vpack.c.bf16 %v3635_v17, %v3635_v17  ;;  %v3669_v17 = vld [vmem:[%s5079_s26 + $0xf1] sm:$0xff] }
  0x7e   : > { %481 = vst [vmem:[#allocation2 + $0x248] sm:$0xf] %v449_v21  ;;  %v4067_v21 = vld [vmem:[#allocation2 + $0x21c] sm:$0xf0]  ;;  %3267 = vmatpush.bf16.msra.mxu0 %v4889_v15  ;;  %v3672_v15 = vld [vmem:[%s5079_s26 + $0x111] sm:$0xff] }
  0x7f   : > { %482 = vst [vmem:[#allocation2 + $0x26c] sm:$0xf] %v450_v22  ;;  %v3670_v22 = vld [vmem:[%s5079_s26 + $0xf9] sm:$0xff] }
  0x80   : > { %578 = vst [vmem:[#allocation2 + $0x24c] sm:$0xf] %v546_v25  ;;  %v4073_v25 = vld [vmem:[#allocation2 + $0x200] sm:$0xf] }
  0x8b   : > { %2658 = vmatmul.bf16.gmra.mxu1 %v3890_v47  ;;  %2747 = vmatmul.bf16.gmra.mxu2 %v3894_v48  ;;  %v448_v47 = vpack.c.bf16 %v416_v40, %v416_v40  ;;  %v3634_v48 = vld [vmem:[%s5079_s26 + $0xc8] sm:$0xff]  ;;  %v4039_v40 = vld [vmem:[#allocation2 + $0x1dc] sm:$0xf0] }
  0x8c   : > { %2836 = vmatmul.bf16.gmra.mxu3 %v3898_v49  ;;  %v544_v49 = vpack.c.bf16 %v3633_v43, %v3633_v43  ;;  %v545_v52 = vpack.c.bf16 %v3634_v48, %v3634_v48  ;;  %v4045_v43 = vld [vmem:[#allocation2 + $0x1c0] sm:$0xf]  ;;  %v4042_v54 = vor.u32 %v4733_v39, %v4039_v40 }
  0x8d   : > { %2925 = vmatmul.bf16.gmra.mxu0 %v3902_v50  ;;  %480 = vst [vmem:[#allocation2 + $0x224] sm:$0xf] %v448_v47 }
  0x8e   : > { %576 = vst [vmem:[#allocation2 + $0x204] sm:$0xf] %v544_v49 }
  0x8f   : > { %577 = vst [vmem:[#allocation2 + $0x228] sm:$0xf] %v545_v52 }
  0x9b   : > { %2663 = vmatmul.bf16.gmra.mxu1 %v3926_v4  ;;  %2752 = vmatmul.bf16.gmra.mxu2 %v3930_v5 }
  0x9c   : > { %2841 = vmatmul.bf16.gmra.mxu3 %v3934_v8  ;;  %v4006_v8 = vor.u32 %v4724_v26, %v4003_v62  ;;  %v419_v62 = vld [vmem:[%s5079_s26 + $0xda] sm:$0xff] }
  0x9d   : > { %2930 = vmatmul.bf16.gmra.mxu0 %v3938_v9  ;;  %v4010_v9 = vor.u32 %v4729_v41, %v4009_v63  ;;  %v420_v63 = vld [vmem:[%s5079_s26 + $0xe2] sm:$0xff]  ;;  %v3637_v41 = vld [vmem:[%s5079_s26 + $0xf0] sm:$0xff] }
  0xa8   : > { %v2580_v30 = vpop.f32.mrf.mxu1 }
  0xa9   : > { %v5336_v33 = vadd.f32 %v5333_v20, %v2580_v30  ;;  %v3668_v30 = vld [vmem:[%s5079_s26 + $0xe1] sm:$0xff] }
  0xaa   : > { %v5338_v34 = vpop.f32.mrf.mxu0 }
  0xab   : > { %2668 = vmatmul.bf16.gmra.mxu1 %v3962_v6  ;;  %2757 = vmatmul.bf16.gmra.mxu2 %v3966_v29  ;;  %v547_v6 = vpack.c.bf16 %v3636_v23, %v3636_v23  ;;  %v3667_v29 = vld [vmem:[%s5079_s26 + $0xd9] sm:$0xff]  ;;  %v644_v23 = vpack.c.bf16 %v3669_v17, %v3669_v17  ;;  %v4103_v17 = vld [vmem:[#allocation2 + $0x264] sm:$0xf0] }
  0xac   : > { %2846 = vmatmul.bf16.gmra.mxu3 %v3970_v31  ;;  %v4732_v31 = vld [vmem:[#allocation2 + $0x1b4] sm:$0xf]  ;;  %v642_v35 = vpack.c.bf16 %v3667_v29, %v3667_v29  ;;  %v645_v29 = vpack.c.bf16 %v3670_v22, %v3670_v22  ;;  %v4755_v22 = vld [vmem:[#allocation2 + $0x268] sm:$0xf0] }
  0xad   : > { %2935 = vmatmul.bf16.gmra.mxu0 %v3974_v32  ;;  %v4031_v32 = vld [vmem:[#allocation2 + $0x1d4] sm:$0xf0]  ;;  %579 = vst [vmem:[#allocation2 + $0x270] sm:$0xf] %v547_v6  ;;  %v4746_v6 = vld [vmem:[#allocation2 + $0x220] sm:$0xf0] }
  0xae   : > { %v2600_v37 = vpop.f32.mrf.mxu2  ;;  %674 = vst [vmem:[#allocation2 + $0x250] sm:$0xf] %v642_v35  ;;  %v4034_v48 = vor.u32 %v4732_v31, %v4031_v32  ;;  %v4075_v31 = vld [vmem:[#allocation2 + $0x224] sm:$0xf0]  ;;  %v4074_v40 = vor.u32 %v4746_v6, %v4073_v25  ;;  %v4751_v25 = vld [vmem:[#allocation2 + $0x24c] sm:$0xf] }
  0xaf   : > { %v5347_v38 = vadd.f32 %v5333_v20, %v2600_v37  ;;  %v2620_v7 = vpop.f32.mrf.mxu3  ;;  %v4737_v37 = vld [vmem:[#allocation2 + $0x1d8] sm:$0xf0]  ;;  %387 = vst [vmem:[#allocation2 + $0x28c] sm:$0xf] %v642_v35  ;;  %v4081_v32 = vld [vmem:[#allocation2 + $0x208] sm:$0xf] }
  0xb0   : > { %v5353_v44 = vadd.f32 %v5333_v20, %v2620_v7  ;;  %v2582_v24 = vpop.f32.mrf.mxu1  ;;  %v643_v7 = vpack.c.bf16 %v3668_v30, %v3668_v30  ;;  %v4038_v49 = vor.u32 %v4737_v37, %v4037_v36  ;;  %v4742_v30 = vld [vmem:[#allocation2 + $0x204] sm:$0xf]  ;;  %v4747_v35 = vld [vmem:[#allocation2 + $0x228] sm:$0xf0]  ;;  %676 = vst [vmem:[#allocation2 + $0x298] sm:$0xf] %v644_v23 }
  0xb1   : > { %v5360_v50 = vadd.f32 %v5333_v20, %v2582_v24  ;;  %v4738_v24 = vld [vmem:[#allocation2 + $0x1e0] sm:$0xf0]  ;;  %677 = vst [vmem:[#allocation2 + $0x2bc] sm:$0xf] %v645_v29 }
  0xb2   : > { %v5362_v51 = vpop.f32.mrf.mxu0  ;;  %675 = vst [vmem:[#allocation2 + $0x274] sm:$0xf] %v643_v7  ;;  %v4046_v55 = vor.u32 %v4738_v24, %v4045_v43 }
  0xb3   : > { %388 = vst [vmem:[#allocation2 + $0x2b0] sm:$0xf] %v643_v7 }
  0xb4   : > { %389 = vst [vmem:[#allocation2 + $0x2d4] sm:$0xf] %v644_v23  ;;  %v647_v23 = vpack.c.bf16 %v3672_v15, %v3672_v15  ;;  %v4111_v6 = vld [vmem:[#allocation2 + $0x26c] sm:$0xf0] }
  0xb5   : > { %390 = vst [vmem:[#allocation2 + $0x2f8] sm:$0xf] %v645_v29  ;;  %v4117_v29 = vld [vmem:[#allocation2 + $0x250] sm:$0xf] }
  0xb6   : > { %v2602_v42 = vpop.f32.mrf.mxu2  ;;  %679 = vst [vmem:[#allocation2 + $0x304] sm:$0xf] %v647_v23 }
  0xb7   : > { %v5370_v0 = vadd.f32 %v5333_v20, %v2602_v42  ;;  %v2622_v1 = vpop.f32.mrf.mxu3  ;;  %392 = vst [vmem:[#allocation2 + $0x340] sm:$0xf] %v647_v23  ;;  %v4864_v23 = vld [vmem:[%s5801_s1 + $0x150] sm:$0xff] }
  0xb8   : > { %v5373_v4 = vadd.f32 %v5333_v20, %v2622_v1  ;;  %v2585_v5 = vpop.f32.mrf.mxu1 }
  0xb9   : > { %v5376_v10 = vadd.f32 %v5333_v20, %v2585_v5  ;;  %v3638_v5 = vld [vmem:[%s5079_s26 + $0xf8] sm:$0xff] }
  0xba   : > { %v5378_v11 = vpop.f32.mrf.mxu0  ;;  %v549_v16 = vpack.c.bf16 %v3638_v5, %v3638_v5 }
  0xbb   : > { %2673 = vmatmul.bf16.gmra.mxu1 %v3998_v2  ;;  %2762 = vmatmul.bf16.gmra.mxu2 %v4002_v3  ;;  %v451_v2 = vpack.c.bf16 %v419_v62, %v419_v62  ;;  %v452_v3 = vpack.c.bf16 %v420_v63, %v420_v63  ;;  %v453_v63 = vpack.c.bf16 %v421_v58, %v421_v58  ;;  %v4880_v58 = vld [vmem:[%s5801_s1 + $0x1d0] sm:$0xff] }
  0xbc   : > { %2851 = vmatmul.bf16.gmra.mxu3 %v4006_v8  ;;  %v548_v8 = vpack.c.bf16 %v3637_v41, %v3637_v41  ;;  %581 = vst [vmem:[#allocation2 + $0x2b8] sm:$0xf] %v549_v16  ;;  %v454_v41 = vpack.c.bf16 %v422_v59, %v422_v59  ;;  %v4750_v16 = vld [vmem:[#allocation2 + $0x244] sm:$0xf] }
  0xbd   : > { %2940 = vmatmul.bf16.gmra.mxu0 %v4010_v9  ;;  %483 = vst [vmem:[#allocation2 + $0x290] sm:$0xf] %v451_v2  ;;  %3179 = vmatpush.bf16.msra.mxu3 %v4880_v58 }
  0xbe   : > { %v2605_v12 = vpop.f32.mrf.mxu2  ;;  %484 = vst [vmem:[#allocation2 + $0x2b4] sm:$0xf] %v452_v3 }
  0xbf   : > { %v5381_v13 = vadd.f32 %v5333_v20, %v2605_v12  ;;  %v2625_v14 = vpop.f32.mrf.mxu3  ;;  %580 = vst [vmem:[#allocation2 + $0x294] sm:$0xf] %v548_v8 }
  0xc0   : > { %v5387_v18 = vadd.f32 %v5333_v20, %v2625_v14  ;;  %v2587_v19 = vpop.f32.mrf.mxu1  ;;  %v4865_v14 = vld [vmem:[%s5801_s1 + $0x158] sm:$0xff]  ;;  %485 = vst [vmem:[#allocation2 + $0x2d8] sm:$0xf] %v453_v63 }
  0xc1   : > { %v5391_v27 = vadd.f32 %v5333_v20, %v2587_v19  ;;  %v4741_v19 = vld [vmem:[#allocation2 + $0x1fc] sm:$0xf]  ;;  %3000 = vmatpush.bf16.msra.mxu1 %v4865_v14  ;;  %v3671_v14 = vld [vmem:[%s5079_s26 + $0x109] sm:$0xff]  ;;  %486 = vst [vmem:[#allocation2 + $0x2fc] sm:$0xf] %v454_v41 }
  0xc2   : > { %v5393_v28 = vpop.f32.mrf.mxu0  ;;  %v4070_v39 = vor.u32 %v4741_v19, %v4067_v21  ;;  %v646_v19 = vpack.c.bf16 %v3671_v14, %v3671_v14  ;;  %v4109_v21 = vld [vmem:[#allocation2 + $0x248] sm:$0xf] }
  0xc3   : > { %v423_v41 = vld [vmem:[%s5079_s26 + $0x10a] sm:$0xff] }
  0xc4   : > { %678 = vst [vmem:[#allocation2 + $0x2e0] sm:$0xf] %v646_v19  ;;  %v455_v14 = vpack.c.bf16 %v423_v41, %v423_v41 }
  0xc5   : > { %391 = vst [vmem:[#allocation2 + $0x31c] sm:$0xf] %v646_v19  ;;  %3001 = vmatpush.bf16.msra.mxu1 %v4864_v23  ;;  %v425_v23 = vld [vmem:[%s5079_s26 + $0x122] sm:$0xff] }
  0xc6   : > { %v2607_v45 = vpop.f32.mrf.mxu2  ;;  %487 = vst [vmem:[#allocation2 + $0x320] sm:$0xf] %v455_v14 }
  0xc7   : > { %v5398_v46 = vadd.f32 %v5333_v20, %v2607_v45  ;;  %v2627_v47 = vpop.f32.mrf.mxu3  ;;  %v4078_v45 = vor.u32 %v4742_v30, %v4075_v31  ;;  %v4756_v30 = vld [vmem:[#allocation2 + $0x270] sm:$0xf0] }
  0xc8   : > { %v5401_v52 = vadd.f32 %v5333_v20, %v2627_v47  ;;  %v2590_v53 = vpop.f32.mrf.mxu1  ;;  %v4082_v47 = vor.u32 %v4747_v35, %v4081_v32  ;;  %v2561_v32 = vadd.f32 %v5333_v20, %v5338_v34  ;;  %v4872_v34 = vld [vmem:[%s5801_s1 + $0x190] sm:$0xff] }
  0xc9   : > { %v5404_v56 = vadd.f32 %v5333_v20, %v2590_v53  ;;  %3090 = vmatpush.bf16.msra.mxu2 %v4872_v34  ;;  %v4765_v34 = vld [vmem:[#allocation2 + $0x2b8] sm:$0xf0] }
  0xca   : > { %v5406_v57 = vpop.f32.mrf.mxu0 }
  0xcb   : > { %2678 = vmatmul.bf16.gmra.mxu1 %v4034_v48  ;;  %2767 = vmatmul.bf16.gmra.mxu2 %v4038_v49 }
  0xcc   : > { %2856 = vmatmul.bf16.gmra.mxu3 %v4042_v54 }
  0xcd   : > { %2945 = vmatmul.bf16.gmra.mxu0 %v4046_v55 }
  0xce   : > { %v2610_v60 = vpop.f32.mrf.mxu2 }
  0xcf   : > { %v5415_v61 = vadd.f32 %v5333_v20, %v2610_v60  ;;  %v2630_v26 = vpop.f32.mrf.mxu3  ;;  %v3639_v60 = vld [vmem:[%s5079_s26 + $0x108] sm:$0xff] }
  0xd0   : > { %v5421_v42 = vadd.f32 %v5333_v20, %v2630_v26  ;;  %v2592_v1 = vpop.f32.mrf.mxu1  ;;  %v550_v2 = vpack.c.bf16 %v3639_v60, %v3639_v60  ;;  %v2563_v60 = vadd.f32 %v5333_v20, %v5362_v51  ;;  %v4888_v51 = vld [vmem:[%s5801_s1 + $0x210] sm:$0xff] }
  0xd1   : > { %v5425_v9 = vadd.f32 %v5333_v20, %v2592_v1  ;;  %v3640_v1 = vld [vmem:[%s5079_s26 + $0x110] sm:$0xff]  ;;  %3268 = vmatpush.bf16.msra.mxu0 %v4888_v51 }
  0xd2   : > { %v5427_v12 = vpop.f32.mrf.mxu0  ;;  %v551_v8 = vpack.c.bf16 %v3640_v1, %v3640_v1  ;;  %582 = vst [vmem:[#allocation2 + $0x2dc] sm:$0xf] %v550_v2  ;;  %v424_v1 = vld [vmem:[%s5079_s26 + $0x112] sm:$0xff]  ;;  %v3641_v2 = vld [vmem:[%s5079_s26 + $0x120] sm:$0xff]  ;;  %v426_v51 = vld [vmem:[%s5079_s26 + $0x12a] sm:$0xff] }
  0xd3   : > { %v456_v15 = vpack.c.bf16 %v424_v1, %v424_v1 }
  0xd4   : > { %583 = vst [vmem:[#allocation2 + $0x300] sm:$0xf] %v551_v8 }
  0xd5   : > { %488 = vst [vmem:[#allocation2 + $0x344] sm:$0xf] %v456_v15 }
  0xd6   : > { %v2612_v36 = vpop.f32.mrf.mxu2 }
  0xd7   : > { %v5438_v37 = vadd.f32 %v5333_v20, %v2612_v36  ;;  %v2632_v7 = vpop.f32.mrf.mxu3 }
  0xd8   : > { %v5441_v43 = vadd.f32 %v5333_v20, %v2632_v7  ;;  %v2595_v24 = vpop.f32.mrf.mxu1  ;;  %v4106_v7 = vor.u32 %v4750_v16, %v4103_v17  ;;  %v3642_v16 = vld [vmem:[%s5079_s26 + $0x128] sm:$0xff]  ;;  %v552_v17 = vpack.c.bf16 %v3641_v2, %v3641_v2 }
  0xd9   : > { %v5444_v48 = vadd.f32 %v5333_v20, %v2595_v24 }
  0xda   : > { %v5446_v49 = vpop.f32.mrf.mxu0  ;;  %584 = vst [vmem:[#allocation2 + $0x324] sm:$0xf] %v552_v17  ;;  %v2568_v17 = vadd.f32 %v5333_v20, %v5393_v28 }
  0xdb   : > { %2683 = vmatmul.bf16.gmra.mxu1 %v4070_v39  ;;  %2772 = vmatmul.bf16.gmra.mxu2 %v4074_v40  ;;  %v4110_v39 = vor.u32 %v4755_v22, %v4109_v21 }
  0xdc   : > { %2861 = vmatmul.bf16.gmra.mxu3 %v4078_v45  ;;  %v4114_v45 = vor.u32 %v4751_v25, %v4111_v6  ;;  %v553_v25 = vpack.c.bf16 %v3642_v16, %v3642_v16  ;;  %v3673_v6 = vld [vmem:[%s5079_s26 + $0x121] sm:$0xff] }
  0xdd   : > { %2950 = vmatmul.bf16.gmra.mxu0 %v4082_v47  ;;  %v4118_v47 = vor.u32 %v4756_v30, %v4117_v29  ;;  %v4759_v29 = vld [vmem:[#allocation2 + $0x28c] sm:$0xf]  ;;  %v4139_v30 = vld [vmem:[#allocation2 + $0x2ac] sm:$0xf0] }
  0xde   : > { %v2615_v53 = vpop.f32.mrf.mxu2  ;;  %585 = vst [vmem:[#allocation2 + $0x348] sm:$0xf] %v553_v25  ;;  %v3643_v25 = vld [vmem:[%s5079_s26 + $0x138] sm:$0xff] }
  0xdf   : > { %v5449_v54 = vadd.f32 %v5333_v20, %v2615_v53  ;;  %v2635_v55 = vpop.f32.mrf.mxu3 }
  0xe0   : > { %v5455_v26 = vadd.f32 %v5333_v20, %v2635_v55  ;;  %v2597_v62 = vpop.f32.mrf.mxu1 }
  0xe1   : > { %v5459_v3 = vadd.f32 %v5333_v20, %v2597_v62 }
  0xe2   : > { %v5461_v5 = vpop.f32.mrf.mxu0 }
  0xe6   : > { %v2617_v31 = vpop.f32.mrf.mxu2 }
  0xe7   : > { %v5468_v35 = vadd.f32 %v5333_v20, %v2617_v31  ;;  %v2637_v36 = vpop.f32.mrf.mxu3  ;;  %v3674_v31 = vld [vmem:[%s5079_s26 + $0x129] sm:$0xff] }
  0xe8   : > { %v5471_v40 = vadd.f32 %v5333_v20, %v2637_v36  ;;  %v2649_v24 = vpop.f32.mrf.mxu1  ;;  %v4145_v36 = vld [vmem:[#allocation2 + $0x290] sm:$0xf] }
  0xe9   : > { %v2650_v53 = vadd.f32 %v2649_v24, %v2561_v32  ;;  %v648_v32 = vpack.c.bf16 %v3673_v6, %v3673_v6 }
  0xea   : > { %v2916_v55 = vpop.f32.mrf.mxu0 }
  0xeb   : > { %2688 = vmatmul.bf16.gmra.mxu1 %v4106_v7  ;;  %2777 = vmatmul.bf16.gmra.mxu2 %v4110_v39  ;;  %v4764_v7 = vld [vmem:[#allocation2 + $0x2b0] sm:$0xf0]  ;;  %v649_v39 = vpack.c.bf16 %v3674_v31, %v3674_v31  ;;  %680 = vst [vmem:[#allocation2 + $0x328] sm:$0xf] %v648_v32  ;;  %v3644_v31 = vld [vmem:[%s5079_s26 + $0x140] sm:$0xff] }
  0xec   : > { %2866 = vmatmul.bf16.gmra.mxu3 %v4114_v45  ;;  %v4760_v45 = vld [vmem:[#allocation2 + $0x294] sm:$0xf]  ;;  %v4146_v41 = vor.u32 %v4764_v7, %v4145_v36  ;;  %393 = vst [vmem:[#allocation2 + $0x364] sm:$0xf] %v648_v32  ;;  %v554_v32 = vpack.c.bf16 %v3643_v25, %v3643_v25 }
  0xed   : > { %2955 = vmatmul.bf16.gmra.mxu0 %v4118_v47  ;;  %v4147_v47 = vld [vmem:[#allocation2 + $0x2b4] sm:$0xf0]  ;;  %681 = vst [vmem:[#allocation2 + $0x34c] sm:$0xf] %v649_v39 }
  0xee   : > { %v2738_v59 = vpop.f32.mrf.mxu2  ;;  %v4150_v2 = vor.u32 %v4760_v45, %v4147_v47  ;;  %394 = vst [vmem:[#allocation2 + $0x388] sm:$0xf] %v649_v39  ;;  %v555_v39 = vpack.c.bf16 %v3644_v31, %v3644_v31  ;;  %v3675_v45 = vld [vmem:[%s5079_s26 + $0x139] sm:$0xff]  ;;  %v3676_v47 = vld [vmem:[%s5079_s26 + $0x141] sm:$0xff] }
  0xef   : > { %v2739_v62 = vadd.f32 %v2738_v59, %v2650_v53  ;;  %v2827_v63 = vpop.f32.mrf.mxu3  ;;  %v4153_v53 = vld [vmem:[#allocation2 + $0x298] sm:$0xf]  ;;  %v2566_v59 = vadd.f32 %v5333_v20, %v5378_v11  ;;  %v650_v28 = vpack.c.bf16 %v3675_v45, %v3675_v45  ;;  %586 = vst [vmem:[#allocation2 + $0x36c] sm:$0xf] %v554_v32  ;;  %v2573_v32 = vadd.f32 %v5333_v20, %v5427_v12  ;;  %v3645_v45 = vld [vmem:[%s5079_s26 + $0x150] sm:$0xff]  ;;  %v4887_v12 = vld [vmem:[%s5801_s1 + $0x208] sm:$0xff] }
  0xf0   : > { %v2651_v8 = vpop.f32.mrf.mxu1  ;;  %587 = vst [vmem:[#allocation2 + $0x390] sm:$0xf] %v555_v39  ;;  %v428_v39 = vld [vmem:[%s5079_s26 + $0x142] sm:$0xff]  ;;  %3269 = vmatpush.bf16.msra.mxu0 %v4887_v12  ;;  %v430_v12 = vld [vmem:[%s5079_s26 + $0x15a] sm:$0xff] }
  0xf1   : > { %v2828_v19 = vadd.f32 %v2827_v63, %v2739_v62  ;;  %v2652_v21 = vadd.f32 %v2651_v8, %v2563_v60  ;;  %v4142_v63 = vor.u32 %v4759_v29, %v4139_v30  ;;  %v457_v29 = vpack.c.bf16 %v425_v23, %v425_v23  ;;  %682 = vst [vmem:[#allocation2 + $0x370] sm:$0xf] %v650_v28 }
  0xf2   : > { %v2918_v22 = vpop.f32.mrf.mxu0  ;;  %v458_v30 = vpack.c.bf16 %v426_v51, %v426_v51  ;;  %395 = vst [vmem:[#allocation2 + $0x3ac] sm:$0xf] %v650_v28  ;;  %v3646_v28 = vld [vmem:[%s5079_s26 + $0x158] sm:$0xff] }
  0xf3   : > { %v5493_v24 = vadd.f32 %v2916_v55, %v2828_v19  ;;  %v4154_v55 = vor.u32 %v4765_v34, %v4153_v53  ;;  %v4768_v53 = vld [vmem:[#allocation2 + $0x2d4] sm:$0xf]  ;;  %v4175_v34 = vld [vmem:[#allocation2 + $0x2f4] sm:$0xf0]  ;;  %489 = vst [vmem:[#allocation2 + $0x368] sm:$0xf] %v457_v29 }
  0xf4   : > { %490 = vst [vmem:[#allocation2 + $0x38c] sm:$0xf] %v458_v30  ;;  %v4879_v30 = vld [vmem:[%s5801_s1 + $0x1c8] sm:$0xff] }
  0xf5   : > { %3180 = vmatpush.bf16.msra.mxu3 %v4879_v30 }
  0xf6   : > { %v2740_v58 = vpop.f32.mrf.mxu2 }
  0xf7   : > { %v2741_v60 = vadd.f32 %v2740_v58, %v2652_v21  ;;  %v2829_v62 = vpop.f32.mrf.mxu3  ;;  %v4181_v58 = vld [vmem:[#allocation2 + $0x2d8] sm:$0xf] }
  0xf8   : > { %v2654_v1 = vpop.f32.mrf.mxu1 }
  0xf9   : > { %v2830_v8 = vadd.f32 %v2829_v62, %v2741_v60  ;;  %v2655_v14 = vadd.f32 %v2654_v1, %v2566_v59  ;;  %v4773_v59 = vld [vmem:[#allocation2 + $0x2f8] sm:$0xf0]  ;;  %v651_v60 = vpack.c.bf16 %v3676_v47, %v3676_v47  ;;  %v4189_v1 = vld [vmem:[#allocation2 + $0x2e0] sm:$0xf] }
  0xfa   : > { %v2921_v15 = vpop.f32.mrf.mxu0 }
  0xfb   : > { %2693 = vmatmul.bf16.gmra.mxu1 %v4142_v63  ;;  %2782 = vmatmul.bf16.gmra.mxu2 %v4146_v41  ;;  %v5497_v11 = vadd.f32 %v2918_v22, %v2830_v8  ;;  %v4769_v63 = vld [vmem:[#allocation2 + $0x2dc] sm:$0xf]  ;;  %v4183_v41 = vld [vmem:[#allocation2 + $0x2fc] sm:$0xf0]  ;;  %v2571_v8 = vadd.f32 %v5333_v20, %v5406_v57  ;;  %683 = vst [vmem:[#allocation2 + $0x394] sm:$0xf] %v651_v60 }
  0xfc   : > { %2871 = vmatmul.bf16.gmra.mxu3 %v4150_v2  ;;  %v4774_v2 = vld [vmem:[#allocation2 + $0x300] sm:$0xf0]  ;;  %v4186_v23 = vor.u32 %v4769_v63, %v4183_v41  ;;  %396 = vst [vmem:[#allocation2 + $0x3d0] sm:$0xf] %v651_v60  ;;  %v4871_v57 = vld [vmem:[%s5801_s1 + $0x188] sm:$0xff] }
  0xfd   : > { %2960 = vmatmul.bf16.gmra.mxu0 %v4154_v55  ;;  %3091 = vmatpush.bf16.msra.mxu2 %v4871_v57  ;;  %v4863_v41 = vld [vmem:[%s5801_s1 + $0x148] sm:$0xff] }
  0xfe   : > { %v2743_v16 = vpop.f32.mrf.mxu2  ;;  %3002 = vmatpush.bf16.msra.mxu1 %v4863_v41  ;;  %v4783_v57 = vld [vmem:[#allocation2 + $0x348] sm:$0xf0]  ;;  %v429_v41 = vld [vmem:[%s5079_s26 + $0x152] sm:$0xff] }
  0xff   : > { %v2744_v19 = vadd.f32 %v2743_v16, %v2655_v14  ;;  %v2832_v21 = vpop.f32.mrf.mxu3 }
 0x100   : > { %v2656_v6 = vpop.f32.mrf.mxu1 }
 0x101   : > { %v2833_v22 = vadd.f32 %v2832_v21, %v2744_v19  ;;  %v2657_v36 = vadd.f32 %v2656_v6, %v2568_v17  ;;  %v4178_v17 = vor.u32 %v4768_v53, %v4175_v34  ;;  %v4182_v19 = vor.u32 %v4773_v59, %v4181_v58 }
 0x102   : > { %v2923_v7 = vpop.f32.mrf.mxu0  ;;  %v460_v34 = vpack.c.bf16 %v428_v39, %v428_v39  ;;  %v556_v58 = vpack.c.bf16 %v3645_v45, %v3645_v45 }
 0x103   : > { %v5507_v62 = vadd.f32 %v2921_v15, %v2833_v22  ;;  %v4190_v15 = vor.u32 %v4774_v2, %v4189_v1  ;;  %v557_v1 = vpack.c.bf16 %v3646_v28, %v3646_v28  ;;  %v3677_v2 = vld [vmem:[%s5079_s26 + $0x151] sm:$0xff] }
 0x104   : > { %492 = vst [vmem:[#allocation2 + $0x3d4] sm:$0xf] %v460_v34 }
 0x105   : > { %588 = vst [vmem:[#allocation2 + $0x3b4] sm:$0xf] %v556_v58  ;;  %v2578_v58 = vadd.f32 %v5333_v20, %v5461_v5  ;;  %v4253_v5 = vld [vmem:[#allocation2 + $0x368] sm:$0xf] }
 0x106   : > { %v2745_v55 = vpop.f32.mrf.mxu2  ;;  %589 = vst [vmem:[#allocation2 + $0x3d8] sm:$0xf] %v557_v1  ;;  %v3647_v1 = vld [vmem:[%s5079_s26 + $0x168] sm:$0xff] }
 0x107   : > { %v2746_v14 = vadd.f32 %v2745_v55, %v2657_v36  ;;  %v2834_v16 = vpop.f32.mrf.mxu3  ;;  %v4777_v55 = vld [vmem:[#allocation2 + $0x31c] sm:$0xf] }
 0x108   : > { %v2659_v21 = vpop.f32.mrf.mxu1 }
 0x109   : > { %v2835_v51 = vadd.f32 %v2834_v16, %v2746_v14  ;;  %v2660_v25 = vadd.f32 %v2659_v21, %v2571_v8  ;;  %v4211_v8 = vld [vmem:[#allocation2 + $0x33c] sm:$0xf0]  ;;  %v652_v16 = vpack.c.bf16 %v3677_v2, %v3677_v2 }
 0x10a   : > { %v2926_v6 = vpop.f32.mrf.mxu0  ;;  %v3678_v14 = vld [vmem:[%s5079_s26 + $0x159] sm:$0xff] }
 0x10b   : > { %2698 = vmatmul.bf16.gmra.mxu1 %v4178_v17  ;;  %2787 = vmatmul.bf16.gmra.mxu2 %v4182_v19  ;;  %v5511_v29 = vadd.f32 %v2923_v7, %v2835_v51  ;;  %v427_v7 = vld [vmem:[%s5079_s26 + $0x13a] sm:$0xff]  ;;  %v4782_v19 = vld [vmem:[#allocation2 + $0x340] sm:$0xf0]  ;;  %v653_v21 = vpack.c.bf16 %v3678_v14, %v3678_v14  ;;  %v4219_v51 = vld [vmem:[#allocation2 + $0x344] sm:$0xf0] }
 0x10c   : > { %2876 = vmatmul.bf16.gmra.mxu3 %v4186_v23  ;;  %v459_v53 = vpack.c.bf16 %v427_v7, %v427_v7  ;;  %v4217_v17 = vld [vmem:[#allocation2 + $0x320] sm:$0xf]  ;;  %684 = vst [vmem:[#allocation2 + $0x3b8] sm:$0xf] %v652_v16  ;;  %v3648_v14 = vld [vmem:[%s5079_s26 + $0x170] sm:$0xff] }
 0x10d   : > { %2965 = vmatmul.bf16.gmra.mxu0 %v4190_v15  ;;  %v4778_v15 = vld [vmem:[#allocation2 + $0x324] sm:$0xf]  ;;  %v4218_v7 = vor.u32 %v4782_v19, %v4217_v17  ;;  %685 = vst [vmem:[#allocation2 + $0x3dc] sm:$0xf] %v653_v21 }
 0x10e   : > { %v2748_v31 = vpop.f32.mrf.mxu2  ;;  %491 = vst [vmem:[#allocation2 + $0x3b0] sm:$0xf] %v459_v53  ;;  %v4222_v45 = vor.u32 %v4778_v15, %v4219_v51  ;;  %v3679_v15 = vld [vmem:[%s5079_s26 + $0x169] sm:$0xff]  ;;  %v3680_v51 = vld [vmem:[%s5079_s26 + $0x171] sm:$0xff] }
 0x10f   : > { %v2749_v22 = vadd.f32 %v2748_v31, %v2660_v25  ;;  %v2837_v36 = vpop.f32.mrf.mxu3  ;;  %v4225_v25 = vld [vmem:[#allocation2 + $0x328] sm:$0xf]  ;;  %v2576_v31 = vadd.f32 %v5333_v20, %v5446_v49  ;;  %397 = vst [vmem:[#allocation2 + $0x3f4] sm:$0xf] %v652_v16  ;;  %v558_v16 = vpack.c.bf16 %v3647_v1, %v3647_v1  ;;  %v654_v20 = vpack.c.bf16 %v3679_v15, %v3679_v15 }
 0x110   : > { %v2661_v47 = vpop.f32.mrf.mxu1  ;;  %398 = vst [vmem:[#allocation2 + $0x418] sm:$0xf] %v653_v21  ;;  %v559_v21 = vpack.c.bf16 %v3648_v14, %v3648_v14 }
 0x111   : > { %v2838_v59 = vadd.f32 %v2837_v36, %v2749_v22  ;;  %v2662_v60 = vadd.f32 %v2661_v47, %v2573_v32  ;;  %v4214_v36 = vor.u32 %v4777_v55, %v4211_v8  ;;  %v461_v55 = vpack.c.bf16 %v429_v41, %v429_v41  ;;  %590 = vst [vmem:[#allocation2 + $0x3fc] sm:$0xf] %v558_v16  ;;  %v431_v16 = vld [vmem:[%s5079_s26 + $0x16a] sm:$0xff] }
 0x112   : > { %v2928_v63 = vpop.f32.mrf.mxu0  ;;  %v462_v8 = vpack.c.bf16 %v430_v12, %v430_v12  ;;  %591 = vst [vmem:[#allocation2 + $0x420] sm:$0xf] %v559_v21  ;;  %v463_v21 = vpack.c.bf16 %v431_v16, %v431_v16 }
 0x113   : > { %v5533_v23 = vadd.f32 %v2926_v6, %v2838_v59  ;;  %v4226_v6 = vor.u32 %v4783_v57, %v4225_v25  ;;  %v4786_v25 = vld [vmem:[#allocation2 + $0x364] sm:$0xf]  ;;  %v4247_v57 = vld [vmem:[#allocation2 + $0x384] sm:$0xf0]  ;;  %493 = vst [vmem:[#allocation2 + $0x3f8] sm:$0xf] %v461_v55 }
 0x114   : > { %494 = vst [vmem:[#allocation2 + $0x41c] sm:$0xf] %v462_v8  ;;  %v4878_v55 = vld [vmem:[%s5801_s1 + $0x1c0] sm:$0xff] }
 0x115   : > { %686 = vst [vmem:[#allocation2 + $0x400] sm:$0xf] %v654_v20  ;;  %3181 = vmatpush.bf16.msra.mxu3 %v4878_v55 }
 0x116   : > { %v2750_v30 = vpop.f32.mrf.mxu2  ;;  %399 = vst [vmem:[#allocation2 + $0x43c] sm:$0xf] %v654_v20 }
 0x117   : > { %v2751_v32 = vadd.f32 %v2750_v30, %v2662_v60  ;;  %v2839_v22 = vpop.f32.mrf.mxu3  ;;  %v4791_v30 = vld [vmem:[#allocation2 + $0x388] sm:$0xf0]  ;;  %495 = vst [vmem:[#allocation2 + $0x440] sm:$0xf] %v463_v21 }
 0x118   : > { %v2664_v39 = vpop.f32.mrf.mxu1 }
 0x119   : > { %v2840_v47 = vadd.f32 %v2839_v22, %v2751_v32  ;;  %v2665_v53 = vadd.f32 %v2664_v39, %v2576_v31  ;;  %v655_v31 = vpack.c.bf16 %v3680_v51, %v3680_v51  ;;  %v4787_v22 = vld [vmem:[#allocation2 + $0x36c] sm:$0xf]  ;;  %v4792_v39 = vld [vmem:[#allocation2 + $0x390] sm:$0xf0] }
 0x11a   : > { %v2931_v34 = vpop.f32.mrf.mxu0  ;;  %v3650_v51 = vld [vmem:[%s5079_s26 + $0x188] sm:$0xff] }
 0x11b   : > { %2703 = vmatmul.bf16.gmra.mxu1 %v4214_v36  ;;  %2792 = vmatmul.bf16.gmra.mxu2 %v4218_v7  ;;  %v5537_v49 = vadd.f32 %v2928_v63, %v2840_v47  ;;  %v4255_v36 = vld [vmem:[#allocation2 + $0x38c] sm:$0xf0]  ;;  %687 = vst [vmem:[#allocation2 + $0x424] sm:$0xf] %v655_v31 }
 0x11c   : > { %2881 = vmatmul.bf16.gmra.mxu3 %v4222_v45  ;;  %v4261_v7 = vld [vmem:[#allocation2 + $0x370] sm:$0xf]  ;;  %400 = vst [vmem:[#allocation2 + $0x460] sm:$0xf] %v655_v31  ;;  %v4886_v31 = vld [vmem:[%s5801_s1 + $0x200] sm:$0xff] }
 0x11d   : > { %2970 = vmatmul.bf16.gmra.mxu0 %v4226_v6 }
 0x11e   : > { %v2753_v28 = vpop.f32.mrf.mxu2  ;;  %3270 = vmatpush.bf16.msra.mxu0 %v4886_v31 }
 0x11f   : > { %v2754_v59 = vadd.f32 %v2753_v28, %v2665_v53  ;;  %v2842_v60 = vpop.f32.mrf.mxu3  ;;  %v4250_v53 = vor.u32 %v4786_v25, %v4247_v57  ;;  %v4254_v28 = vor.u32 %v4791_v30, %v4253_v5  ;;  %v4862_v30 = vld [vmem:[%s5801_s1 + $0x140] sm:$0xff] }
 0x120   : > { %v2666_v2 = vpop.f32.mrf.mxu1  ;;  %3003 = vmatpush.bf16.msra.mxu1 %v4862_v30  ;;  %v3715_v30 = vld [vmem:[%s5079_s26 + $0x30] sm:$0xff] }
 0x121   : > { %v2843_v63 = vadd.f32 %v2842_v60, %v2754_v59  ;;  %v2667_v17 = vadd.f32 %v2666_v2, %v2578_v58  ;;  %v4258_v59 = vor.u32 %v4787_v22, %v4255_v36  ;;  %v4262_v60 = vor.u32 %v4792_v39, %v4261_v7  ;;  %v4870_v2 = vld [vmem:[%s5801_s1 + $0x180] sm:$0xff]  ;;  %v4795_v7 = vld [vmem:[#allocation2 + $0x3ac] sm:$0xf]  ;;  %v4283_v39 = vld [vmem:[#allocation2 + $0x3cc] sm:$0xf0] }
 0x122   : > { %v2933_v19 = vpop.f32.mrf.mxu0  ;;  %3092 = vmatpush.bf16.msra.mxu2 %v4870_v2  ;;  %v561_v22 = vpack.c.bf16 %v3650_v51, %v3650_v51  ;;  %v3681_v36 = vld [vmem:[%s5079_s26 + $0x181] sm:$0xff] }
 0x123   : > { %v5547_v32 = vadd.f32 %v2931_v34, %v2843_v63  ;;  %v432_v63 = vld [vmem:[%s5079_s26 + $0x172] sm:$0xff] }
 0x124   : > { %v464_v15 = vpack.c.bf16 %v432_v63, %v432_v63  ;;  %593 = vst [vmem:[#allocation2 + $0x468] sm:$0xf] %v561_v22 }
 0x126   : > { %v2755_v45 = vpop.f32.mrf.mxu2  ;;  %496 = vst [vmem:[#allocation2 + $0x464] sm:$0xf] %v464_v15 }
 0x127   : > { %v2756_v6 = vadd.f32 %v2755_v45, %v2667_v17  ;;  %v2844_v47 = vpop.f32.mrf.mxu3  ;;  %v3649_v17 = vld [vmem:[%s5079_s26 + $0x180] sm:$0xff]  ;;  %v3682_v45 = vld [vmem:[%s5079_s26 + $0x189] sm:$0xff] }
 0x128   : > { %v2669_v58 = vpop.f32.mrf.mxu1  ;;  %v560_v25 = vpack.c.bf16 %v3649_v17, %v3649_v17 }
 0x129   : > { %v2845_v41 = vadd.f32 %v2844_v47, %v2756_v6  ;;  %v2670_v34 = vadd.f32 %v2669_v58, %v5336_v33  ;;  %v656_v6 = vpack.c.bf16 %v3681_v36, %v3681_v36  ;;  %v4289_v47 = vld [vmem:[#allocation2 + $0x3b0] sm:$0xf]  ;;  %v4796_v58 = vld [vmem:[#allocation2 + $0x3b4] sm:$0xf]  ;;  %v3716_v36 = vld [vmem:[%s5079_s26 + $0x38] sm:$0xff] }
 0x12a   : > { %v2936_v12 = vpop.f32.mrf.mxu0  ;;  %592 = vst [vmem:[#allocation2 + $0x444] sm:$0xf] %v560_v25 }
 0x12b   : > { %2708 = vmatmul.bf16.gmra.mxu1 %v4250_v53  ;;  %2797 = vmatmul.bf16.gmra.mxu2 %v4254_v28  ;;  %v5550_v1 = vadd.f32 %v2933_v19, %v2845_v41  ;;  %v4800_v53 = vld [vmem:[#allocation2 + $0x3d0] sm:$0xf0]  ;;  %v4801_v41 = vld [vmem:[#allocation2 + $0x3d8] sm:$0xf0]  ;;  %688 = vst [vmem:[#allocation2 + $0x448] sm:$0xf] %v656_v6 }
 0x12c   : > { %2886 = vmatmul.bf16.gmra.mxu3 %v4258_v59  ;;  %v4291_v59 = vld [vmem:[#allocation2 + $0x3d4] sm:$0xf0] }
 0x12d   : > { %2975 = vmatmul.bf16.gmra.mxu0 %v4262_v60  ;;  %v4297_v60 = vld [vmem:[#allocation2 + $0x3b8] sm:$0xf]  ;;  %v4294_v16 = vor.u32 %v4796_v58, %v4291_v59  ;;  %v4804_v58 = vld [vmem:[#allocation2 + $0x3f4] sm:$0xf] }
 0x12e   : > { %v2758_v33 = vpop.f32.mrf.mxu2  ;;  %v4319_v59 = vld [vmem:[#allocation2 + $0x414] sm:$0xf0] }
 0x12f   : > { %v2759_v8 = vadd.f32 %v2758_v33, %v2670_v34  ;;  %v2847_v14 = vpop.f32.mrf.mxu3  ;;  %v4286_v33 = vor.u32 %v4795_v7, %v4283_v39  ;;  %v819_v7 = vpack.c.bf16 %v3715_v30, %v3715_v30  ;;  %v3747_v39 = vld [vmem:[%s5079_s26 + $0x31] sm:$0xff] }
 0x130   : > { %v2671_v19 = vpop.f32.mrf.mxu1 }
 0x131   : > { %v2848_v57 = vadd.f32 %v2847_v14, %v2759_v8  ;;  %v2672_v20 = vadd.f32 %v2671_v19, %v5360_v50  ;;  %v657_v50 = vpack.c.bf16 %v3682_v45, %v3682_v45  ;;  %v4290_v8 = vor.u32 %v4800_v53, %v4289_v47  ;;  %v3748_v45 = vld [vmem:[%s5079_s26 + $0x39] sm:$0xff]  ;;  %851 = vst [vmem:[#allocation2 + $0x18] sm:$0xf] %v819_v7 }
 0x132   : > { %v2938_v5 = vpop.f32.mrf.mxu0  ;;  %v820_v53 = vpack.c.bf16 %v3716_v36, %v3716_v36 }
 0x133   : > { %v5571_v28 = vadd.f32 %v2936_v12, %v2848_v57  ;;  %689 = vst [vmem:[#allocation2 + $0x46c] sm:$0xf] %v657_v50  ;;  %v4298_v12 = vor.u32 %v4801_v41, %v4297_v60  ;;  %v3683_v57 = vld [vmem:[%s5079_s26 + $0x1a] sm:$0xff]  ;;  %v3779_v50 = vld [vmem:[%s5079_s26 + $0x32] sm:$0xff]  ;;  %v915_v60 = vpack.c.bf16 %v3747_v39, %v3747_v39 }
 0x134   : > { %v3780_v41 = vld [vmem:[%s5079_s26 + $0x3a] sm:$0xff]  ;;  %852 = vst [vmem:[#allocation2 + $0x3c] sm:$0xf] %v820_v53 }
 0x135   : > { %947 = vst [vmem:[#allocation2 + $0x1c] sm:$0xf] %v915_v60 }
 0x136   : > { %v2760_v34 = vpop.f32.mrf.mxu2 }
 0x137   : > { %v2761_v2 = vadd.f32 %v2760_v34, %v2672_v20  ;;  %v2849_v55 = vpop.f32.mrf.mxu3  ;;  %v3684_v20 = vld [vmem:[%s5079_s26 + $0x22] sm:$0xff]  ;;  %v4325_v34 = vld [vmem:[#allocation2 + $0x3f8] sm:$0xf] }
 0x138   : > { %v2674_v14 = vpop.f32.mrf.mxu1  ;;  %v723_v22 = vpack.c.bf16 %v3684_v20, %v3684_v20 }
 0x139   : > { %v2850_v63 = vadd.f32 %v2849_v55, %v2761_v2  ;;  %v2675_v17 = vadd.f32 %v2674_v14, %v5376_v10  ;;  %v722_v10 = vpack.c.bf16 %v3683_v57, %v3683_v57  ;;  %v4809_v2 = vld [vmem:[#allocation2 + $0x418] sm:$0xf0]  ;;  %v916_v55 = vpack.c.bf16 %v3748_v45, %v3748_v45  ;;  %v4327_v14 = vld [vmem:[#allocation2 + $0x41c] sm:$0xf0] }
 0x13a   : > { %v2941_v19 = vpop.f32.mrf.mxu0  ;;  %755 = vst [vmem:[#allocation2 + $0x38] sm:$0xf] %v723_v22  ;;  %v4326_v57 = vor.u32 %v4809_v2, %v4325_v34  ;;  %v3781_v2 = vld [vmem:[%s5079_s26 + $0x4a] sm:$0xff] }
 0x13b   : > { %2713 = vmatmul.bf16.gmra.mxu1 %v4286_v33  ;;  %2802 = vmatmul.bf16.gmra.mxu2 %v4290_v8  ;;  %v5574_v21 = vadd.f32 %v2938_v5, %v2850_v63  ;;  %754 = vst [vmem:[#allocation2 + $0x14] sm:$0xf] %v722_v10  ;;  %v4805_v8 = vld [vmem:[#allocation2 + $0x3fc] sm:$0xf]  ;;  %v1012_v63 = vpack.c.bf16 %v3780_v41, %v3780_v41 }
 0x13c   : > { %2891 = vmatmul.bf16.gmra.mxu3 %v4294_v16  ;;  %v1011_v16 = vpack.c.bf16 %v3779_v50, %v3779_v50  ;;  %948 = vst [vmem:[#allocation2 + $0x40] sm:$0xf] %v916_v55  ;;  %v4330_v30 = vor.u32 %v4805_v8, %v4327_v14  ;;  %v3782_v55 = vld [vmem:[%s5079_s26 + $0x52] sm:$0xff]  ;;  %v4813_v8 = vld [vmem:[#allocation2 + $0x43c] sm:$0xf] }
 0x13d   : > { %2980 = vmatmul.bf16.gmra.mxu0 %v4298_v12  ;;  %v4333_v12 = vld [vmem:[#allocation2 + $0x400] sm:$0xf]  ;;  %1044 = vst [vmem:[#allocation2 + $0x44] sm:$0xf] %v1012_v63 }
 0x13e   : > { %v2763_v15 = vpop.f32.mrf.mxu2  ;;  %1043 = vst [vmem:[#allocation2 + $0x20] sm:$0xf] %v1011_v16  ;;  %v4355_v14 = vld [vmem:[#allocation2 + $0x45c] sm:$0xf0] }
 0x13f   : > { %v2764_v51 = vadd.f32 %v2763_v15, %v2675_v17  ;;  %v2852_v25 = vpop.f32.mrf.mxu3  ;;  %756 = vst [vmem:[#allocation2 + $0x5c] sm:$0xf] %v1011_v16 }
 0x140   : > { %v2676_v31 = vpop.f32.mrf.mxu1  ;;  %757 = vst [vmem:[#allocation2 + $0x80] sm:$0xf] %v1012_v63  ;;  %v4818_v63 = vld [vmem:[#allocation2 + $0x460] sm:$0xf0] }
 0x141   : > { %v2853_v6 = vadd.f32 %v2852_v25, %v2764_v51  ;;  %v2677_v5 = vadd.f32 %v2676_v31, %v5391_v27  ;;  %v4810_v27 = vld [vmem:[#allocation2 + $0x420] sm:$0xf0]  ;;  %v4322_v25 = vor.u32 %v4804_v58, %v4319_v59  ;;  %v3749_v58 = vld [vmem:[%s5079_s26 + $0x49] sm:$0xff]  ;;  %v3750_v59 = vld [vmem:[%s5079_s26 + $0x51] sm:$0xff] }
 0x142   : > { %v2943_v47 = vpop.f32.mrf.mxu0  ;;  %v4334_v31 = vor.u32 %v4810_v27, %v4333_v12  ;;  %v918_v16 = vpack.c.bf16 %v3750_v59, %v3750_v59  ;;  %v1013_v12 = vpack.c.bf16 %v3781_v2, %v3781_v2  ;;  %v4361_v27 = vld [vmem:[#allocation2 + $0x440] sm:$0xf] }
 0x143   : > { %v5585_v33 = vadd.f32 %v2941_v19, %v2853_v6  ;;  %v3717_v6 = vld [vmem:[%s5079_s26 + $0x48] sm:$0xff]  ;;  %v3719_v59 = vld [vmem:[%s5079_s26 + $0x60] sm:$0xff] }
 0x144   : > { %v821_v53 = vpack.c.bf16 %v3717_v6, %v3717_v6  ;;  %950 = vst [vmem:[#allocation2 + $0x88] sm:$0xf] %v918_v16  ;;  %v823_v2 = vpack.c.bf16 %v3719_v59, %v3719_v59 }
 0x145   : > { %1045 = vst [vmem:[#allocation2 + $0x68] sm:$0xf] %v1013_v12 }
 0x146   : > { %v2765_v17 = vpop.f32.mrf.mxu2  ;;  %853 = vst [vmem:[#allocation2 + $0x60] sm:$0xf] %v821_v53 }
 0x147   : > { %v2766_v15 = vadd.f32 %v2765_v17, %v2677_v5  ;;  %v2854_v51 = vpop.f32.mrf.mxu3  ;;  %v3718_v5 = vld [vmem:[%s5079_s26 + $0x50] sm:$0xff]  ;;  %v1014_v17 = vpack.c.bf16 %v3782_v55, %v3782_v55  ;;  %758 = vst [vmem:[#allocation2 + $0xa4] sm:$0xf] %v1013_v12 }
 0x148   : > { %v2679_v20 = vpop.f32.mrf.mxu1  ;;  %v822_v50 = vpack.c.bf16 %v3718_v5, %v3718_v5  ;;  %v3752_v55 = vld [vmem:[%s5079_s26 + $0x69] sm:$0xff]  ;;  %855 = vst [vmem:[#allocation2 + $0xa8] sm:$0xf] %v823_v2 }
 0x149   : > { %v2855_v19 = vadd.f32 %v2854_v51, %v2766_v15  ;;  %v2680_v10 = vadd.f32 %v2679_v20, %v5404_v56  ;;  %v4814_v51 = vld [vmem:[#allocation2 + $0x444] sm:$0xf]  ;;  %1046 = vst [vmem:[#allocation2 + $0x8c] sm:$0xf] %v1014_v17  ;;  %v920_v12 = vpack.c.bf16 %v3752_v55, %v3752_v55  ;;  %v3721_v55 = vld [vmem:[%s5079_s26 + $0x78] sm:$0xff] }
 0x14a   : > { %v2946_v22 = vpop.f32.mrf.mxu0  ;;  %854 = vst [vmem:[#allocation2 + $0x84] sm:$0xf] %v822_v50 }
 0x14b   : > { %2718 = vmatmul.bf16.gmra.mxu1 %v4322_v25  ;;  %2807 = vmatmul.bf16.gmra.mxu2 %v4326_v57  ;;  %v5588_v36 = vadd.f32 %v2943_v47, %v2855_v19  ;;  %v917_v47 = vpack.c.bf16 %v3749_v58, %v3749_v58  ;;  %v4363_v25 = vld [vmem:[#allocation2 + $0x464] sm:$0xf0]  ;;  %v4358_v19 = vor.u32 %v4813_v8, %v4355_v14 }
 0x14c   : > { %2896 = vmatmul.bf16.gmra.mxu3 %v4330_v30  ;;  %v4369_v57 = vld [vmem:[#allocation2 + $0x448] sm:$0xf]  ;;  %759 = vst [vmem:[#allocation2 + $0xc8] sm:$0xf] %v1014_v17  ;;  %v4680_v17 = vld [vmem:[#allocation2 + $0x14] sm:$0xf] }
 0x14d   : > { %2985 = vmatmul.bf16.gmra.mxu0 %v4334_v31  ;;  %949 = vst [vmem:[#allocation2 + $0x64] sm:$0xf] %v917_v47 }
 0x14e   : > { %v2768_v7 = vpop.f32.mrf.mxu2  ;;  %952 = vst [vmem:[#allocation2 + $0xd0] sm:$0xf] %v920_v12  ;;  %v825_v12 = vpack.c.bf16 %v3721_v55, %v3721_v55 }
 0x14f   : > { %v2769_v39 = vadd.f32 %v2768_v7, %v2680_v10  ;;  %v2857_v45 = vpop.f32.mrf.mxu3  ;;  %v4362_v10 = vor.u32 %v4818_v63, %v4361_v27  ;;  %v3783_v27 = vld [vmem:[%s5079_s26 + $0x62] sm:$0xff]  ;;  %v3784_v63 = vld [vmem:[%s5079_s26 + $0x6a] sm:$0xff] }
 0x150   : > { %v2681_v56 = vpop.f32.mrf.mxu1  ;;  %857 = vst [vmem:[#allocation2 + $0xf0] sm:$0xf] %v825_v12 }
 0x151   : > { %v2858_v60 = vadd.f32 %v2857_v45, %v2769_v39  ;;  %v2682_v41 = vadd.f32 %v2681_v56, %v5425_v9  ;;  %v4819_v9 = vld [vmem:[#allocation2 + $0x468] sm:$0xf0]  ;;  %v4366_v39 = vor.u32 %v4814_v51, %v4363_v25  ;;  %v3831_v51 = vld [vmem:[#allocation2 + $0x34] sm:$0xf0]  ;;  %v1015_v25 = vpack.c.bf16 %v3783_v27, %v3783_v27  ;;  %v3754_v27 = vld [vmem:[%s5079_s26 + $0x81] sm:$0xff] }
 0x152   : > { %v2948_v34 = vpop.f32.mrf.mxu0  ;;  %v4370_v45 = vor.u32 %v4819_v9, %v4369_v57  ;;  %v3837_v57 = vld [vmem:[#allocation2 + $0x18] sm:$0xf]  ;;  %v4685_v9 = vld [vmem:[#allocation2 + $0x38] sm:$0xf0] }
 0x153   : > { %v5597_v15 = vadd.f32 %v2946_v22, %v2858_v60  ;;  %v3720_v60 = vld [vmem:[%s5079_s26 + $0x68] sm:$0xff]  ;;  %1047 = vst [vmem:[#allocation2 + $0xb0] sm:$0xf] %v1015_v25 }
 0x154   : > { %760 = vst [vmem:[#allocation2 + $0xec] sm:$0xf] %v1015_v25  ;;  %v922_v25 = vpack.c.bf16 %v3754_v27, %v3754_v27  ;;  %v3723_v27 = vld [vmem:[%s5079_s26 + $0x90] sm:$0xff] }
 0x156   : > { %v2770_v20 = vpop.f32.mrf.mxu2  ;;  %954 = vst [vmem:[#allocation2 + $0x118] sm:$0xf] %v922_v25  ;;  %v827_v25 = vpack.c.bf16 %v3723_v27, %v3723_v27 }
 0x157   : > { %v2771_v30 = vadd.f32 %v2770_v20, %v2682_v41  ;;  %v2859_v31 = vpop.f32.mrf.mxu3  ;;  %v3751_v41 = vld [vmem:[%s5079_s26 + $0x61] sm:$0xff]  ;;  %v1016_v20 = vpack.c.bf16 %v3784_v63, %v3784_v63 }
 0x158   : > { %v2684_v7 = vpop.f32.mrf.mxu1  ;;  %v919_v8 = vpack.c.bf16 %v3751_v41, %v3751_v41  ;;  %859 = vst [vmem:[#allocation2 + $0x138] sm:$0xf] %v827_v25 }
 0x159   : > { %v2860_v22 = vadd.f32 %v2859_v31, %v2771_v30  ;;  %v2685_v6 = vadd.f32 %v2684_v7, %v5444_v48  ;;  %v824_v48 = vpack.c.bf16 %v3720_v60, %v3720_v60  ;;  %v4681_v31 = vld [vmem:[#allocation2 + $0x1c] sm:$0xf]  ;;  %v4686_v7 = vld [vmem:[#allocation2 + $0x40] sm:$0xf0]  ;;  %1048 = vst [vmem:[#allocation2 + $0xd4] sm:$0xf] %v1016_v20 }
 0x15a   : > { %v2951_v5 = vpop.f32.mrf.mxu0  ;;  %951 = vst [vmem:[#allocation2 + $0xac] sm:$0xf] %v919_v8  ;;  %v3722_v8 = vld [vmem:[%s5079_s26 + $0x80] sm:$0xff] }
 0x15b   : > { %2723 = vmatmul.bf16.gmra.mxu1 %v4358_v19  ;;  %2812 = vmatmul.bf16.gmra.mxu2 %v4362_v10  ;;  %v5600_v56 = vadd.f32 %v2948_v34, %v2860_v22  ;;  %856 = vst [vmem:[#allocation2 + $0xcc] sm:$0xf] %v824_v48  ;;  %v3839_v19 = vld [vmem:[#allocation2 + $0x3c] sm:$0xf0]  ;;  %v3834_v22 = vor.u32 %v4680_v17, %v3831_v51 }
 0x15c   : > { %2901 = vmatmul.bf16.gmra.mxu3 %v4366_v39  ;;  %v3845_v10 = vld [vmem:[#allocation2 + $0x20] sm:$0xf]  ;;  %761 = vst [vmem:[#allocation2 + $0x110] sm:$0xf] %v1016_v20  ;;  %v4689_v20 = vld [vmem:[#allocation2 + $0x5c] sm:$0xf] }
 0x15d   : > { %2990 = vmatmul.bf16.gmra.mxu0 %v4370_v45 }
 0x15e   : > { %v2773_v53 = vpop.f32.mrf.mxu2 }
 0x15f   : > { %v2774_v50 = vadd.f32 %v2773_v53, %v2685_v6  ;;  %v2862_v58 = vpop.f32.mrf.mxu3  ;;  %v3838_v6 = vor.u32 %v4685_v9, %v3837_v57  ;;  %v3785_v57 = vld [vmem:[%s5079_s26 + $0x7a] sm:$0xff]  ;;  %v3786_v9 = vld [vmem:[%s5079_s26 + $0x82] sm:$0xff] }
 0x160   : > { %v2686_v47 = vpop.f32.mrf.mxu1 }
 0x161   : > { %v2863_v14 = vadd.f32 %v2862_v58, %v2774_v50  ;;  %v2687_v16 = vadd.f32 %v2686_v47, %v5459_v3  ;;  %v3842_v50 = vor.u32 %v4681_v31, %v3839_v19  ;;  %v3846_v58 = vor.u32 %v4686_v7, %v3845_v10  ;;  %v3867_v31 = vld [vmem:[#allocation2 + $0x7c] sm:$0xf0]  ;;  %v4694_v7 = vld [vmem:[#allocation2 + $0x80] sm:$0xf0] }
 0x162   : > { %v2953_v34 = vpop.f32.mrf.mxu0  ;;  %v1017_v19 = vpack.c.bf16 %v3785_v57, %v3785_v57  ;;  %v3873_v10 = vld [vmem:[#allocation2 + $0x60] sm:$0xf] }
 0x163   : > { %v5609_v30 = vadd.f32 %v2951_v5, %v2863_v14  ;;  %v3753_v14 = vld [vmem:[%s5079_s26 + $0x79] sm:$0xff] }
 0x164   : > { %v921_v63 = vpack.c.bf16 %v3753_v14, %v3753_v14  ;;  %1049 = vst [vmem:[#allocation2 + $0xf8] sm:$0xf] %v1017_v19  ;;  %v3756_v57 = vld [vmem:[%s5079_s26 + $0x99] sm:$0xff] }
 0x165   : > { %762 = vst [vmem:[#allocation2 + $0x134] sm:$0xf] %v1017_v19  ;;  %v924_v19 = vpack.c.bf16 %v3756_v57, %v3756_v57  ;;  %v3725_v57 = vld [vmem:[%s5079_s26 + $0xa8] sm:$0xff] }
 0x166   : > { %v2775_v3 = vpop.f32.mrf.mxu2  ;;  %953 = vst [vmem:[#allocation2 + $0xf4] sm:$0xf] %v921_v63  ;;  %v3724_v63 = vld [vmem:[%s5079_s26 + $0x98] sm:$0xff] }
 0x167   : > { %v2776_v39 = vadd.f32 %v2775_v3, %v2687_v16  ;;  %v2864_v45 = vpop.f32.mrf.mxu3  ;;  %v1018_v3 = vpack.c.bf16 %v3786_v9, %v3786_v9  ;;  %956 = vst [vmem:[#allocation2 + $0x160] sm:$0xf] %v924_v19  ;;  %v829_v19 = vpack.c.bf16 %v3725_v57, %v3725_v57 }
 0x168   : > { %v2689_v53 = vpop.f32.mrf.mxu1 }
 0x169   : > { %v2865_v5 = vadd.f32 %v2864_v45, %v2776_v39  ;;  %v2690_v59 = vadd.f32 %v2689_v53, %v5347_v38  ;;  %v826_v38 = vpack.c.bf16 %v3722_v8, %v3722_v8  ;;  %v4690_v45 = vld [vmem:[#allocation2 + $0x64] sm:$0xf]  ;;  %v4695_v53 = vld [vmem:[#allocation2 + $0x88] sm:$0xf0]  ;;  %1050 = vst [vmem:[#allocation2 + $0x11c] sm:$0xf] %v1018_v3 }
 0x16a   : > { %v2956_v60 = vpop.f32.mrf.mxu0  ;;  %763 = vst [vmem:[#allocation2 + $0x158] sm:$0xf] %v1018_v3  ;;  %v4698_v3 = vld [vmem:[#allocation2 + $0xa4] sm:$0xf] }
 0x16b   : > { %3004 = vmatmul.bf16.vlgmr.msra.gmra.mxu1 %v3834_v22  ;;  %3093 = vmatmul.bf16.vlgmr.msra.gmra.mxu2 %v3838_v6  ;;  %v5612_v41 = vadd.f32 %v2953_v34, %v2865_v5  ;;  %858 = vst [vmem:[#allocation2 + $0x114] sm:$0xf] %v826_v38  ;;  %v3875_v22 = vld [vmem:[#allocation2 + $0x84] sm:$0xf0]  ;;  %v3870_v5 = vor.u32 %v4689_v20, %v3867_v31 }
 0x16c   : > { %3182 = vmatmul.bf16.vlgmr.msra.gmra.mxu3 %v3842_v50  ;;  %v3881_v6 = vld [vmem:[#allocation2 + $0x68] sm:$0xf]  ;;  %861 = vst [vmem:[#allocation2 + $0x180] sm:$0xf] %v829_v19 }
 0x16d   : > { %3271 = vmatmul.bf16.vlgmr.msra.gmra.mxu0 %v3846_v58 }
 0x16e   : > { %v2778_v47 = vpop.f32.mrf.mxu2 }
 0x16f   : > { %v2779_v2 = vadd.f32 %v2778_v47, %v2690_v59  ;;  %v2867_v48 = vpop.f32.mrf.mxu3  ;;  %v3874_v59 = vor.u32 %v4694_v7, %v3873_v10  ;;  %v3787_v10 = vld [vmem:[%s5079_s26 + $0x92] sm:$0xff]  ;;  %v3788_v7 = vld [vmem:[%s5079_s26 + $0x9a] sm:$0xff] }
 0x170   : > { %v2691_v16 = vpop.f32.mrf.mxu1 }
 0x171   : > { %v2868_v17 = vadd.f32 %v2867_v48, %v2779_v2  ;;  %v2692_v51 = vadd.f32 %v2691_v16, %v5370_v0  ;;  %v3878_v2 = vor.u32 %v4690_v45, %v3875_v22  ;;  %v3882_v48 = vor.u32 %v4695_v53, %v3881_v6  ;;  %v3903_v45 = vld [vmem:[#allocation2 + $0xc4] sm:$0xf0]  ;;  %v4703_v53 = vld [vmem:[#allocation2 + $0xc8] sm:$0xf0] }
 0x172   : > { %v2958_v34 = vpop.f32.mrf.mxu0  ;;  %v1019_v22 = vpack.c.bf16 %v3787_v10, %v3787_v10  ;;  %v3909_v6 = vld [vmem:[#allocation2 + $0xa8] sm:$0xf]  ;;  %v3758_v10 = vld [vmem:[%s5079_s26 + $0xb1] sm:$0xff] }
 0x173   : > { %v5621_v39 = vadd.f32 %v2956_v60, %v2868_v17  ;;  %v3755_v17 = vld [vmem:[%s5079_s26 + $0x91] sm:$0xff] }
 0x174   : > { %v923_v9 = vpack.c.bf16 %v3755_v17, %v3755_v17  ;;  %1051 = vst [vmem:[#allocation2 + $0x140] sm:$0xf] %v1019_v22 }
 0x175   : > { %764 = vst [vmem:[#allocation2 + $0x17c] sm:$0xf] %v1019_v22  ;;  %v926_v22 = vpack.c.bf16 %v3758_v10, %v3758_v10  ;;  %v3727_v10 = vld [vmem:[%s5079_s26 + $0xc0] sm:$0xff] }
 0x176   : > { %v2780_v0 = vpop.f32.mrf.mxu2  ;;  %955 = vst [vmem:[#allocation2 + $0x13c] sm:$0xf] %v923_v9  ;;  %v3726_v9 = vld [vmem:[%s5079_s26 + $0xb0] sm:$0xff] }
 0x177   : > { %v2781_v50 = vadd.f32 %v2780_v0, %v2692_v51  ;;  %v2869_v58 = vpop.f32.mrf.mxu3  ;;  %v1020_v0 = vpack.c.bf16 %v3788_v7, %v3788_v7  ;;  %958 = vst [vmem:[#allocation2 + $0x1a8] sm:$0xf] %v926_v22  ;;  %v831_v22 = vpack.c.bf16 %v3727_v10, %v3727_v10 }
 0x178   : > { %v2694_v47 = vpop.f32.mrf.mxu1 }
 0x179   : > { %v2870_v60 = vadd.f32 %v2869_v58, %v2781_v50  ;;  %v2695_v55 = vadd.f32 %v2694_v47, %v5381_v13  ;;  %v828_v13 = vpack.c.bf16 %v3724_v63, %v3724_v63  ;;  %v4699_v58 = vld [vmem:[#allocation2 + $0xac] sm:$0xf]  ;;  %v4704_v47 = vld [vmem:[#allocation2 + $0xd0] sm:$0xf0]  ;;  %1052 = vst [vmem:[#allocation2 + $0x164] sm:$0xf] %v1020_v0 }
 0x17a   : > { %v2961_v8 = vpop.f32.mrf.mxu0  ;;  %765 = vst [vmem:[#allocation2 + $0x1a0] sm:$0xf] %v1020_v0  ;;  %v4707_v0 = vld [vmem:[#allocation2 + $0xec] sm:$0xf] }
 0x17b   : > { %3009 = vmatmul.bf16.gmra.mxu1 %v3870_v5  ;;  %3098 = vmatmul.bf16.gmra.mxu2 %v3874_v59  ;;  %v5624_v14 = vadd.f32 %v2958_v34, %v2870_v60  ;;  %860 = vst [vmem:[#allocation2 + $0x15c] sm:$0xf] %v828_v13  ;;  %v3911_v5 = vld [vmem:[#allocation2 + $0xcc] sm:$0xf0]  ;;  %v3906_v60 = vor.u32 %v4698_v3, %v3903_v45 }
 0x17c   : > { %3187 = vmatmul.bf16.gmra.mxu3 %v3878_v2  ;;  %v3917_v59 = vld [vmem:[#allocation2 + $0xb0] sm:$0xf]  ;;  %863 = vst [vmem:[#allocation2 + $0x1c8] sm:$0xf] %v831_v22 }
 0x17d   : > { %3276 = vmatmul.bf16.gmra.mxu0 %v3882_v48 }
 0x17e   : > { %v2783_v16 = vpop.f32.mrf.mxu2 }
 0x17f   : > { %v2784_v12 = vadd.f32 %v2783_v16, %v2695_v55  ;;  %v2872_v38 = vpop.f32.mrf.mxu3  ;;  %v3910_v55 = vor.u32 %v4703_v53, %v3909_v6  ;;  %v3789_v6 = vld [vmem:[%s5079_s26 + $0xaa] sm:$0xff]  ;;  %v3790_v53 = vld [vmem:[%s5079_s26 + $0xb2] sm:$0xff] }
 0x180   : > { %v2696_v51 = vpop.f32.mrf.mxu1 }
 0x181   : > { %v2873_v20 = vadd.f32 %v2872_v38, %v2784_v12  ;;  %v2697_v31 = vadd.f32 %v2696_v51, %v5398_v46  ;;  %v3914_v12 = vor.u32 %v4699_v58, %v3911_v5  ;;  %v3918_v38 = vor.u32 %v4704_v47, %v3917_v59  ;;  %v3939_v58 = vld [vmem:[#allocation2 + $0x10c] sm:$0xf0]  ;;  %v4712_v47 = vld [vmem:[#allocation2 + $0x110] sm:$0xf0] }
 0x182   : > { %v2963_v34 = vpop.f32.mrf.mxu0  ;;  %v1021_v5 = vpack.c.bf16 %v3789_v6, %v3789_v6  ;;  %v3945_v59 = vld [vmem:[#allocation2 + $0xf0] sm:$0xf] }
 0x183   : > { %v5633_v50 = vadd.f32 %v2961_v8, %v2873_v20  ;;  %v3757_v20 = vld [vmem:[%s5079_s26 + $0xa9] sm:$0xff] }
 0x184   : > { %v925_v7 = vpack.c.bf16 %v3757_v20, %v3757_v20  ;;  %1053 = vst [vmem:[#allocation2 + $0x188] sm:$0xf] %v1021_v5  ;;  %v3760_v6 = vld [vmem:[%s5079_s26 + $0xc9] sm:$0xff] }
 0x185   : > { %766 = vst [vmem:[#allocation2 + $0x1c4] sm:$0xf] %v1021_v5  ;;  %v928_v5 = vpack.c.bf16 %v3760_v6, %v3760_v6  ;;  %v3729_v6 = vld [vmem:[%s5079_s26 + $0xd8] sm:$0xff] }
 0x186   : > { %v2785_v46 = vpop.f32.mrf.mxu2  ;;  %957 = vst [vmem:[#allocation2 + $0x184] sm:$0xf] %v925_v7  ;;  %v3728_v7 = vld [vmem:[%s5079_s26 + $0xc8] sm:$0xff] }
 0x187   : > { %v2786_v2 = vadd.f32 %v2785_v46, %v2697_v31  ;;  %v2874_v48 = vpop.f32.mrf.mxu3  ;;  %v1022_v46 = vpack.c.bf16 %v3790_v53, %v3790_v53  ;;  %960 = vst [vmem:[#allocation2 + $0x1f0] sm:$0xf] %v928_v5  ;;  %v833_v5 = vpack.c.bf16 %v3729_v6, %v3729_v6 }
 0x188   : > { %v2699_v16 = vpop.f32.mrf.mxu1 }
 0x189   : > { %v2875_v8 = vadd.f32 %v2874_v48, %v2786_v2  ;;  %v2700_v27 = vadd.f32 %v2699_v16, %v5415_v61  ;;  %v830_v61 = vpack.c.bf16 %v3726_v9, %v3726_v9  ;;  %v4708_v48 = vld [vmem:[#allocation2 + $0xf4] sm:$0xf]  ;;  %v4713_v16 = vld [vmem:[#allocation2 + $0x118] sm:$0xf0]  ;;  %1054 = vst [vmem:[#allocation2 + $0x1ac] sm:$0xf] %v1022_v46 }
 0x18a   : > { %v2966_v63 = vpop.f32.mrf.mxu0  ;;  %767 = vst [vmem:[#allocation2 + $0x1e8] sm:$0xf] %v1022_v46  ;;  %v4716_v46 = vld [vmem:[#allocation2 + $0x134] sm:$0xf] }
 0x18b   : > { %3014 = vmatmul.bf16.gmra.mxu1 %v3906_v60  ;;  %3103 = vmatmul.bf16.gmra.mxu2 %v3910_v55  ;;  %v5636_v17 = vadd.f32 %v2963_v34, %v2875_v8  ;;  %862 = vst [vmem:[#allocation2 + $0x1a4] sm:$0xf] %v830_v61  ;;  %v3947_v60 = vld [vmem:[#allocation2 + $0x114] sm:$0xf0]  ;;  %v3942_v8 = vor.u32 %v4707_v0, %v3939_v58 }
 0x18c   : > { %3192 = vmatmul.bf16.gmra.mxu3 %v3914_v12  ;;  %v3953_v55 = vld [vmem:[#allocation2 + $0xf8] sm:$0xf]  ;;  %865 = vst [vmem:[#allocation2 + $0x210] sm:$0xf] %v833_v5 }
 0x18d   : > { %3281 = vmatmul.bf16.gmra.mxu0 %v3918_v38 }
 0x18e   : > { %v2788_v51 = vpop.f32.mrf.mxu2 }
 0x18f   : > { %v2789_v25 = vadd.f32 %v2788_v51, %v2700_v27  ;;  %v2877_v13 = vpop.f32.mrf.mxu3  ;;  %v3946_v27 = vor.u32 %v4712_v47, %v3945_v59  ;;  %v3791_v59 = vld [vmem:[%s5079_s26 + $0xc2] sm:$0xff]  ;;  %v3792_v47 = vld [vmem:[%s5079_s26 + $0xca] sm:$0xff] }
 0x190   : > { %v2701_v31 = vpop.f32.mrf.mxu1 }
 0x191   : > { %v2878_v3 = vadd.f32 %v2877_v13, %v2789_v25  ;;  %v2702_v45 = vadd.f32 %v2701_v31, %v5438_v37  ;;  %v3950_v25 = vor.u32 %v4708_v48, %v3947_v60  ;;  %v3954_v13 = vor.u32 %v4713_v16, %v3953_v55  ;;  %v3975_v48 = vld [vmem:[#allocation2 + $0x154] sm:$0xf0]  ;;  %v4721_v16 = vld [vmem:[#allocation2 + $0x158] sm:$0xf0] }
 0x192   : > { %v2968_v34 = vpop.f32.mrf.mxu0  ;;  %v1023_v60 = vpack.c.bf16 %v3791_v59, %v3791_v59  ;;  %v3981_v55 = vld [vmem:[#allocation2 + $0x138] sm:$0xf]  ;;  %v3762_v59 = vld [vmem:[%s5079_s26 + $0xe1] sm:$0xff] }
 0x193   : > { %v5645_v2 = vadd.f32 %v2966_v63, %v2878_v3  ;;  %v3759_v3 = vld [vmem:[%s5079_s26 + $0xc1] sm:$0xff] }
 0x194   : > { %v927_v53 = vpack.c.bf16 %v3759_v3, %v3759_v3  ;;  %1055 = vst [vmem:[#allocation2 + $0x1d0] sm:$0xf] %v1023_v60 }
 0x195   : > { %768 = vst [vmem:[#allocation2 + $0x20c] sm:$0xf] %v1023_v60  ;;  %v930_v60 = vpack.c.bf16 %v3762_v59, %v3762_v59  ;;  %v3731_v59 = vld [vmem:[%s5079_s26 + $0xf0] sm:$0xff] }
 0x196   : > { %v2790_v37 = vpop.f32.mrf.mxu2  ;;  %959 = vst [vmem:[#allocation2 + $0x1cc] sm:$0xf] %v927_v53  ;;  %v3730_v53 = vld [vmem:[%s5079_s26 + $0xe0] sm:$0xff] }
 0x197   : > { %v2791_v12 = vadd.f32 %v2790_v37, %v2702_v45  ;;  %v2879_v38 = vpop.f32.mrf.mxu3  ;;  %v1024_v37 = vpack.c.bf16 %v3792_v47, %v3792_v47  ;;  %962 = vst [vmem:[#allocation2 + $0x238] sm:$0xf] %v930_v60  ;;  %v835_v60 = vpack.c.bf16 %v3731_v59, %v3731_v59 }
 0x198   : > { %v2704_v51 = vpop.f32.mrf.mxu1 }
 0x199   : > { %v2880_v63 = vadd.f32 %v2879_v38, %v2791_v12  ;;  %v2705_v57 = vadd.f32 %v2704_v51, %v5449_v54  ;;  %v832_v54 = vpack.c.bf16 %v3728_v7, %v3728_v7  ;;  %v4717_v38 = vld [vmem:[#allocation2 + $0x13c] sm:$0xf]  ;;  %v4722_v51 = vld [vmem:[#allocation2 + $0x160] sm:$0xf0]  ;;  %1056 = vst [vmem:[#allocation2 + $0x1f4] sm:$0xf] %v1024_v37 }
 0x19a   : > { %v2971_v9 = vpop.f32.mrf.mxu0  ;;  %769 = vst [vmem:[#allocation2 + $0x230] sm:$0xf] %v1024_v37  ;;  %v4725_v37 = vld [vmem:[#allocation2 + $0x17c] sm:$0xf] }
 0x19b   : > { %3019 = vmatmul.bf16.gmra.mxu1 %v3942_v8  ;;  %3108 = vmatmul.bf16.gmra.mxu2 %v3946_v27  ;;  %v5648_v20 = vadd.f32 %v2968_v34, %v2880_v63  ;;  %864 = vst [vmem:[#allocation2 + $0x1ec] sm:$0xf] %v832_v54  ;;  %v3983_v8 = vld [vmem:[#allocation2 + $0x15c] sm:$0xf0]  ;;  %v3978_v63 = vor.u32 %v4716_v46, %v3975_v48 }
 0x19c   : > { %3197 = vmatmul.bf16.gmra.mxu3 %v3950_v25  ;;  %v3989_v27 = vld [vmem:[#allocation2 + $0x140] sm:$0xf]  ;;  %867 = vst [vmem:[#allocation2 + $0x258] sm:$0xf] %v835_v60 }
 0x19d   : > { %3286 = vmatmul.bf16.gmra.mxu0 %v3954_v13 }
 0x19e   : > { %v2793_v31 = vpop.f32.mrf.mxu2 }
 0x19f   : > { %v2794_v19 = vadd.f32 %v2793_v31, %v2705_v57  ;;  %v2882_v61 = vpop.f32.mrf.mxu3  ;;  %v3982_v57 = vor.u32 %v4721_v16, %v3981_v55  ;;  %v3793_v55 = vld [vmem:[%s5079_s26 + $0xda] sm:$0xff]  ;;  %v3794_v16 = vld [vmem:[%s5079_s26 + $0xe2] sm:$0xff] }
 0x1a0   : > { %v2706_v45 = vpop.f32.mrf.mxu1 }
 0x1a1   : > { %v2883_v0 = vadd.f32 %v2882_v61, %v2794_v19  ;;  %v2707_v58 = vadd.f32 %v2706_v45, %v5468_v35  ;;  %v3986_v19 = vor.u32 %v4717_v38, %v3983_v8  ;;  %v3990_v61 = vor.u32 %v4722_v51, %v3989_v27  ;;  %v4011_v38 = vld [vmem:[#allocation2 + $0x19c] sm:$0xf0]  ;;  %v4730_v51 = vld [vmem:[#allocation2 + $0x1a0] sm:$0xf0] }
 0x1a2   : > { %v2973_v34 = vpop.f32.mrf.mxu0  ;;  %v1025_v8 = vpack.c.bf16 %v3793_v55, %v3793_v55  ;;  %v4017_v27 = vld [vmem:[#allocation2 + $0x180] sm:$0xf] }
 0x1a3   : > { %v5657_v12 = vadd.f32 %v2971_v9, %v2883_v0  ;;  %v3761_v0 = vld [vmem:[%s5079_s26 + $0xd9] sm:$0xff] }
 0x1a4   : > { %v929_v47 = vpack.c.bf16 %v3761_v0, %v3761_v0  ;;  %1057 = vst [vmem:[#allocation2 + $0x218] sm:$0xf] %v1025_v8  ;;  %v3764_v55 = vld [vmem:[%s5079_s26 + $0xf9] sm:$0xff] }
 0x1a5   : > { %770 = vst [vmem:[#allocation2 + $0x254] sm:$0xf] %v1025_v8  ;;  %v932_v8 = vpack.c.bf16 %v3764_v55, %v3764_v55  ;;  %v3733_v55 = vld [vmem:[%s5079_s26 + $0x108] sm:$0xff] }
 0x1a6   : > { %v2795_v35 = vpop.f32.mrf.mxu2  ;;  %961 = vst [vmem:[#allocation2 + $0x214] sm:$0xf] %v929_v47  ;;  %v3732_v47 = vld [vmem:[%s5079_s26 + $0xf8] sm:$0xff] }
 0x1a7   : > { %v2796_v25 = vadd.f32 %v2795_v35, %v2707_v58  ;;  %v2884_v13 = vpop.f32.mrf.mxu3  ;;  %v1026_v35 = vpack.c.bf16 %v3794_v16, %v3794_v16  ;;  %964 = vst [vmem:[#allocation2 + $0x280] sm:$0xf] %v932_v8  ;;  %v837_v8 = vpack.c.bf16 %v3733_v55, %v3733_v55 }
 0x1a8   : > { %v2709_v31 = vpop.f32.mrf.mxu1 }
 0x1a9   : > { %v2885_v9 = vadd.f32 %v2884_v13, %v2796_v25  ;;  %v2710_v10 = vadd.f32 %v2709_v31, %v5353_v44  ;;  %v834_v44 = vpack.c.bf16 %v3730_v53, %v3730_v53  ;;  %v4726_v13 = vld [vmem:[#allocation2 + $0x184] sm:$0xf]  ;;  %v4731_v31 = vld [vmem:[#allocation2 + $0x1a8] sm:$0xf0]  ;;  %1058 = vst [vmem:[#allocation2 + $0x23c] sm:$0xf] %v1026_v35 }
 0x1aa   : > { %v2976_v7 = vpop.f32.mrf.mxu0  ;;  %771 = vst [vmem:[#allocation2 + $0x278] sm:$0xf] %v1026_v35  ;;  %v4734_v35 = vld [vmem:[#allocation2 + $0x1c4] sm:$0xf] }
 0x1ab   : > { %3024 = vmatmul.bf16.gmra.mxu1 %v3978_v63  ;;  %3113 = vmatmul.bf16.gmra.mxu2 %v3982_v57  ;;  %v5660_v3 = vadd.f32 %v2973_v34, %v2885_v9  ;;  %866 = vst [vmem:[#allocation2 + $0x234] sm:$0xf] %v834_v44  ;;  %v4019_v63 = vld [vmem:[#allocation2 + $0x1a4] sm:$0xf0]  ;;  %v4014_v9 = vor.u32 %v4725_v37, %v4011_v38 }
 0x1ac   : > { %3202 = vmatmul.bf16.gmra.mxu3 %v3986_v19  ;;  %v4025_v57 = vld [vmem:[#allocation2 + $0x188] sm:$0xf]  ;;  %869 = vst [vmem:[#allocation2 + $0x2a0] sm:$0xf] %v837_v8 }
 0x1ad   : > { %3291 = vmatmul.bf16.gmra.mxu0 %v3990_v61 }
 0x1ae   : > { %v2798_v45 = vpop.f32.mrf.mxu2 }
 0x1af   : > { %v2799_v22 = vadd.f32 %v2798_v45, %v2710_v10  ;;  %v2887_v54 = vpop.f32.mrf.mxu3  ;;  %v4018_v10 = vor.u32 %v4730_v51, %v4017_v27  ;;  %v3795_v27 = vld [vmem:[%s5079_s26 + $0xf2] sm:$0xff]  ;;  %v3796_v51 = vld [vmem:[%s5079_s26 + $0xfa] sm:$0xff] }
 0x1b0   : > { %v2711_v58 = vpop.f32.mrf.mxu1 }
 0x1b1   : > { %v2888_v46 = vadd.f32 %v2887_v54, %v2799_v22  ;;  %v2712_v48 = vadd.f32 %v2711_v58, %v5373_v4  ;;  %v4022_v22 = vor.u32 %v4726_v13, %v4019_v63  ;;  %v4026_v54 = vor.u32 %v4731_v31, %v4025_v57  ;;  %v4047_v13 = vld [vmem:[#allocation2 + $0x1e4] sm:$0xf0]  ;;  %v4739_v31 = vld [vmem:[#allocation2 + $0x1e8] sm:$0xf0] }
 0x1b2   : > { %v2978_v34 = vpop.f32.mrf.mxu0  ;;  %v1027_v63 = vpack.c.bf16 %v3795_v27, %v3795_v27  ;;  %v4053_v57 = vld [vmem:[#allocation2 + $0x1c8] sm:$0xf]  ;;  %v3766_v27 = vld [vmem:[%s5079_s26 + $0x111] sm:$0xff] }
 0x1b3   : > { %v5669_v25 = vadd.f32 %v2976_v7, %v2888_v46  ;;  %v3763_v46 = vld [vmem:[%s5079_s26 + $0xf1] sm:$0xff] }
 0x1b4   : > { %v931_v16 = vpack.c.bf16 %v3763_v46, %v3763_v46  ;;  %1059 = vst [vmem:[#allocation2 + $0x260] sm:$0xf] %v1027_v63 }
 0x1b5   : > { %772 = vst [vmem:[#allocation2 + $0x29c] sm:$0xf] %v1027_v63  ;;  %v934_v63 = vpack.c.bf16 %v3766_v27, %v3766_v27  ;;  %v3735_v27 = vld [vmem:[%s5079_s26 + $0x120] sm:$0xff] }
 0x1b6   : > { %v2800_v4 = vpop.f32.mrf.mxu2  ;;  %963 = vst [vmem:[#allocation2 + $0x25c] sm:$0xf] %v931_v16  ;;  %v3734_v16 = vld [vmem:[%s5079_s26 + $0x110] sm:$0xff] }
 0x1b7   : > { %v2801_v19 = vadd.f32 %v2800_v4, %v2712_v48  ;;  %v2889_v61 = vpop.f32.mrf.mxu3  ;;  %v1028_v4 = vpack.c.bf16 %v3796_v51, %v3796_v51  ;;  %966 = vst [vmem:[#allocation2 + $0x2c8] sm:$0xf] %v934_v63  ;;  %v839_v63 = vpack.c.bf16 %v3735_v27, %v3735_v27 }
 0x1b8   : > { %v2714_v45 = vpop.f32.mrf.mxu1 }
 0x1b9   : > { %v2890_v7 = vadd.f32 %v2889_v61, %v2801_v19  ;;  %v2715_v6 = vadd.f32 %v2714_v45, %v5387_v18  ;;  %v836_v18 = vpack.c.bf16 %v3732_v47, %v3732_v47  ;;  %v4735_v61 = vld [vmem:[#allocation2 + $0x1cc] sm:$0xf]  ;;  %v4740_v45 = vld [vmem:[#allocation2 + $0x1f0] sm:$0xf0]  ;;  %1060 = vst [vmem:[#allocation2 + $0x284] sm:$0xf] %v1028_v4 }
 0x1ba   : > { %v2981_v53 = vpop.f32.mrf.mxu0  ;;  %773 = vst [vmem:[#allocation2 + $0x2c0] sm:$0xf] %v1028_v4  ;;  %v4743_v4 = vld [vmem:[#allocation2 + $0x20c] sm:$0xf] }
 0x1bb   : > { %3029 = vmatmul.bf16.gmra.mxu1 %v4014_v9  ;;  %3118 = vmatmul.bf16.gmra.mxu2 %v4018_v10  ;;  %v5672_v0 = vadd.f32 %v2978_v34, %v2890_v7  ;;  %868 = vst [vmem:[#allocation2 + $0x27c] sm:$0xf] %v836_v18  ;;  %v4055_v9 = vld [vmem:[#allocation2 + $0x1ec] sm:$0xf0]  ;;  %v4050_v7 = vor.u32 %v4734_v35, %v4047_v13 }
 0x1bc   : > { %3207 = vmatmul.bf16.gmra.mxu3 %v4022_v22  ;;  %v4061_v10 = vld [vmem:[#allocation2 + $0x1d0] sm:$0xf]  ;;  %871 = vst [vmem:[#allocation2 + $0x2e8] sm:$0xf] %v839_v63 }
 0x1bd   : > { %3296 = vmatmul.bf16.gmra.mxu0 %v4026_v54 }
 0x1be   : > { %v2803_v58 = vpop.f32.mrf.mxu2 }
 0x1bf   : > { %v2804_v5 = vadd.f32 %v2803_v58, %v2715_v6  ;;  %v2892_v44 = vpop.f32.mrf.mxu3  ;;  %v4054_v6 = vor.u32 %v4739_v31, %v4053_v57  ;;  %v3797_v57 = vld [vmem:[%s5079_s26 + $0x10a] sm:$0xff]  ;;  %v3798_v31 = vld [vmem:[%s5079_s26 + $0x112] sm:$0xff] }
 0x1c0   : > { %v2716_v48 = vpop.f32.mrf.mxu1 }
 0x1c1   : > { %v2893_v37 = vadd.f32 %v2892_v44, %v2804_v5  ;;  %v2717_v38 = vadd.f32 %v2716_v48, %v5401_v52  ;;  %v4058_v5 = vor.u32 %v4735_v61, %v4055_v9  ;;  %v4062_v44 = vor.u32 %v4740_v45, %v4061_v10  ;;  %v4083_v61 = vld [vmem:[#allocation2 + $0x22c] sm:$0xf0]  ;;  %v4748_v45 = vld [vmem:[#allocation2 + $0x230] sm:$0xf0] }
 0x1c2   : > { %v2983_v34 = vpop.f32.mrf.mxu0  ;;  %v1029_v9 = vpack.c.bf16 %v3797_v57, %v3797_v57  ;;  %v4089_v10 = vld [vmem:[#allocation2 + $0x210] sm:$0xf] }
 0x1c3   : > { %v5681_v19 = vadd.f32 %v2981_v53, %v2893_v37  ;;  %v3765_v37 = vld [vmem:[%s5079_s26 + $0x109] sm:$0xff] }
 0x1c4   : > { %v933_v51 = vpack.c.bf16 %v3765_v37, %v3765_v37  ;;  %1061 = vst [vmem:[#allocation2 + $0x2a8] sm:$0xf] %v1029_v9  ;;  %v3768_v57 = vld [vmem:[%s5079_s26 + $0x129] sm:$0xff] }
 0x1c5   : > { %774 = vst [vmem:[#allocation2 + $0x2e4] sm:$0xf] %v1029_v9  ;;  %v936_v9 = vpack.c.bf16 %v3768_v57, %v3768_v57  ;;  %v3738_v57 = vld [vmem:[%s5079_s26 + $0x140] sm:$0xff] }
 0x1c6   : > { %v2805_v52 = vpop.f32.mrf.mxu2  ;;  %965 = vst [vmem:[#allocation2 + $0x2a4] sm:$0xf] %v933_v51  ;;  %v3736_v51 = vld [vmem:[%s5079_s26 + $0x128] sm:$0xff] }
 0x1c7   : > { %v2806_v22 = vadd.f32 %v2805_v52, %v2717_v38  ;;  %v2894_v54 = vpop.f32.mrf.mxu3  ;;  %v1030_v52 = vpack.c.bf16 %v3798_v31, %v3798_v31  ;;  %968 = vst [vmem:[#allocation2 + $0x310] sm:$0xf] %v936_v9 }
 0x1c8   : > { %v2719_v58 = vpop.f32.mrf.mxu1 }
 0x1c9   : > { %v2895_v53 = vadd.f32 %v2894_v54, %v2806_v22  ;;  %v2720_v59 = vadd.f32 %v2719_v58, %v5421_v42  ;;  %v838_v42 = vpack.c.bf16 %v3734_v16, %v3734_v16  ;;  %v4744_v54 = vld [vmem:[#allocation2 + $0x214] sm:$0xf]  ;;  %v4749_v58 = vld [vmem:[#allocation2 + $0x238] sm:$0xf0]  ;;  %1062 = vst [vmem:[#allocation2 + $0x2cc] sm:$0xf] %v1030_v52 }
 0x1ca   : > { %v2986_v47 = vpop.f32.mrf.mxu0  ;;  %775 = vst [vmem:[#allocation2 + $0x308] sm:$0xf] %v1030_v52  ;;  %v4752_v52 = vld [vmem:[#allocation2 + $0x254] sm:$0xf] }
 0x1cb   : > { %3034 = vmatmul.bf16.gmra.mxu1 %v4050_v7  ;;  %3123 = vmatmul.bf16.gmra.mxu2 %v4054_v6  ;;  %v5684_v46 = vadd.f32 %v2983_v34, %v2895_v53  ;;  %870 = vst [vmem:[#allocation2 + $0x2c4] sm:$0xf] %v838_v42  ;;  %v4091_v7 = vld [vmem:[#allocation2 + $0x234] sm:$0xf0]  ;;  %v4086_v53 = vor.u32 %v4743_v4, %v4083_v61 }
 0x1cc   : > { %3212 = vmatmul.bf16.gmra.mxu3 %v4058_v5  ;;  %v4097_v6 = vld [vmem:[#allocation2 + $0x218] sm:$0xf] }
 0x1cd   : > { %3301 = vmatmul.bf16.gmra.mxu0 %v4062_v44 }
 0x1ce   : > { %v2808_v48 = vpop.f32.mrf.mxu2 }
 0x1cf   : > { %v2809_v60 = vadd.f32 %v2808_v48, %v2720_v59  ;;  %v2897_v18 = vpop.f32.mrf.mxu3  ;;  %v4090_v59 = vor.u32 %v4748_v45, %v4089_v10  ;;  %v3799_v10 = vld [vmem:[%s5079_s26 + $0x122] sm:$0xff]  ;;  %v3800_v45 = vld [vmem:[%s5079_s26 + $0x12a] sm:$0xff] }
 0x1d0   : > { %v2721_v38 = vpop.f32.mrf.mxu1 }
 0x1d1   : > { %v2898_v35 = vadd.f32 %v2897_v18, %v2809_v60  ;;  %v2722_v13 = vadd.f32 %v2721_v38, %v5441_v43  ;;  %v4094_v60 = vor.u32 %v4744_v54, %v4091_v7  ;;  %v4098_v18 = vor.u32 %v4749_v58, %v4097_v6  ;;  %v4119_v54 = vld [vmem:[#allocation2 + $0x274] sm:$0xf0]  ;;  %v4757_v58 = vld [vmem:[#allocation2 + $0x278] sm:$0xf0] }
 0x1d2   : > { %v2988_v34 = vpop.f32.mrf.mxu0  ;;  %v1031_v7 = vpack.c.bf16 %v3799_v10, %v3799_v10  ;;  %v4125_v6 = vld [vmem:[#allocation2 + $0x258] sm:$0xf]  ;;  %v842_v10 = vpack.c.bf16 %v3738_v57, %v3738_v57 }
 0x1d3   : > { %v5693_v22 = vadd.f32 %v2986_v47, %v2898_v35  ;;  %v3767_v35 = vld [vmem:[%s5079_s26 + $0x121] sm:$0xff] }
 0x1d4   : > { %v935_v31 = vpack.c.bf16 %v3767_v35, %v3767_v35  ;;  %1063 = vst [vmem:[#allocation2 + $0x2f0] sm:$0xf] %v1031_v7 }
 0x1d5   : > { %776 = vst [vmem:[#allocation2 + $0x32c] sm:$0xf] %v1031_v7  ;;  %v3801_v7 = vld [vmem:[%s5079_s26 + $0x13a] sm:$0xff] }
 0x1d6   : > { %v2810_v43 = vpop.f32.mrf.mxu2  ;;  %967 = vst [vmem:[#allocation2 + $0x2ec] sm:$0xf] %v935_v31  ;;  %v3769_v31 = vld [vmem:[%s5079_s26 + $0x139] sm:$0xff] }
 0x1d7   : > { %v2811_v5 = vadd.f32 %v2810_v43, %v2722_v13  ;;  %v2899_v44 = vpop.f32.mrf.mxu3  ;;  %v1032_v43 = vpack.c.bf16 %v3800_v45, %v3800_v45  ;;  %v3770_v45 = vld [vmem:[%s5079_s26 + $0x141] sm:$0xff]  ;;  %874 = vst [vmem:[#allocation2 + $0x354] sm:$0xf] %v842_v10 }
 0x1d8   : > { %v2724_v48 = vpop.f32.mrf.mxu1 }
 0x1d9   : > { %v2900_v47 = vadd.f32 %v2899_v44, %v2811_v5  ;;  %v2725_v55 = vadd.f32 %v2724_v48, %v5455_v26  ;;  %v840_v26 = vpack.c.bf16 %v3736_v51, %v3736_v51  ;;  %v4753_v44 = vld [vmem:[#allocation2 + $0x25c] sm:$0xf]  ;;  %v4758_v48 = vld [vmem:[#allocation2 + $0x280] sm:$0xf0]  ;;  %1064 = vst [vmem:[#allocation2 + $0x314] sm:$0xf] %v1032_v43 }
 0x1da   : > { %v2991_v16 = vpop.f32.mrf.mxu0  ;;  %777 = vst [vmem:[#allocation2 + $0x350] sm:$0xf] %v1032_v43  ;;  %v4155_v43 = vld [vmem:[#allocation2 + $0x2bc] sm:$0xf0] }
 0x1db   : > { %3039 = vmatmul.bf16.gmra.mxu1 %v4086_v53  ;;  %3128 = vmatmul.bf16.gmra.mxu2 %v4090_v59  ;;  %v5696_v37 = vadd.f32 %v2988_v34, %v2900_v47  ;;  %872 = vst [vmem:[#allocation2 + $0x30c] sm:$0xf] %v840_v26  ;;  %v4127_v53 = vld [vmem:[#allocation2 + $0x27c] sm:$0xf0]  ;;  %v4122_v47 = vor.u32 %v4752_v52, %v4119_v54  ;;  %v3737_v26 = vld [vmem:[%s5079_s26 + $0x138] sm:$0xff] }
 0x1dc   : > { %3217 = vmatmul.bf16.gmra.mxu3 %v4094_v60  ;;  %v4133_v59 = vld [vmem:[#allocation2 + $0x260] sm:$0xf]  ;;  %v841_v9 = vpack.c.bf16 %v3737_v26, %v3737_v26  ;;  %v937_v52 = vpack.c.bf16 %v3769_v31, %v3769_v31 }
 0x1dd   : > { %3306 = vmatmul.bf16.gmra.mxu0 %v4098_v18 }
 0x1de   : > { %v2813_v38 = vpop.f32.mrf.mxu2  ;;  %873 = vst [vmem:[#allocation2 + $0x330] sm:$0xf] %v841_v9 }
 0x1df   : > { %v2814_v8 = vadd.f32 %v2813_v38, %v2725_v55  ;;  %v2902_v42 = vpop.f32.mrf.mxu3  ;;  %v4126_v55 = vor.u32 %v4757_v58, %v4125_v6  ;;  %v3802_v6 = vld [vmem:[%s5079_s26 + $0x142] sm:$0xff]  ;;  %v4761_v58 = vld [vmem:[#allocation2 + $0x29c] sm:$0xf]  ;;  %969 = vst [vmem:[#allocation2 + $0x334] sm:$0xf] %v937_v52 }
 0x1e0   : > { %v2726_v13 = vpop.f32.mrf.mxu1 }
 0x1e1   : > { %v2903_v4 = vadd.f32 %v2902_v42, %v2814_v8  ;;  %v2727_v61 = vadd.f32 %v2726_v13, %v5471_v40  ;;  %v4130_v8 = vor.u32 %v4753_v44, %v4127_v53  ;;  %v1033_v44 = vpack.c.bf16 %v3801_v7, %v3801_v7  ;;  %v4766_v53 = vld [vmem:[#allocation2 + $0x2c0] sm:$0xf0] }
 0x1e2   : > { %v2993_v34 = vpop.f32.mrf.mxu0 }
 0x1e3   : > { %v5705_v5 = vadd.f32 %v2991_v16, %v2903_v4  ;;  %v4134_v16 = vor.u32 %v4758_v48, %v4133_v59  ;;  %v1034_v59 = vpack.c.bf16 %v3802_v6, %v3802_v6  ;;  %1065 = vst [vmem:[#allocation2 + $0x338] sm:$0xf] %v1033_v44  ;;  %v3739_v6 = vld [vmem:[%s5079_s26 + $0x150] sm:$0xff] }
 0x1e4   : > { %778 = vst [vmem:[#allocation2 + $0x374] sm:$0xf] %v1033_v44 }
 0x1e5   : > { %1066 = vst [vmem:[#allocation2 + $0x35c] sm:$0xf] %v1034_v59 }
 0x1e6   : > { %v2815_v40 = vpop.f32.mrf.mxu2  ;;  %779 = vst [vmem:[#allocation2 + $0x398] sm:$0xf] %v1034_v59  ;;  %v3772_v59 = vld [vmem:[%s5079_s26 + $0x159] sm:$0xff] }
 0x1e7   : > { %v2816_v60 = vadd.f32 %v2815_v40, %v2727_v61  ;;  %v2904_v18 = vpop.f32.mrf.mxu3  ;;  %v4762_v40 = vld [vmem:[#allocation2 + $0x2a4] sm:$0xf] }
 0x1e8   : > { %v3005_v38 = vpop.f32.mrf.mxu1 }
 0x1e9   : > { %v2905_v42 = vadd.f32 %v2904_v18, %v2816_v60  ;;  %v3006_v35 = vadd.f32 %v3005_v38, %v5493_v24  ;;  %v4161_v24 = vld [vmem:[#allocation2 + $0x2a0] sm:$0xf]  ;;  %v4163_v60 = vld [vmem:[#allocation2 + $0x2c4] sm:$0xf0] }
 0x1ea   : > { %v3272_v27 = vpop.f32.mrf.mxu0  ;;  %v4166_v57 = vor.u32 %v4762_v40, %v4163_v60 }
 0x1eb   : > { %3044 = vmatmul.bf16.gmra.mxu1 %v4122_v47  ;;  %3133 = vmatmul.bf16.gmra.mxu2 %v4126_v55  ;;  %v5707_v51 = vadd.f32 %v2993_v34, %v2905_v42  ;;  %v938_v34 = vpack.c.bf16 %v3770_v45, %v3770_v45  ;;  %v4169_v47 = vld [vmem:[#allocation2 + $0x2a8] sm:$0xf]  ;;  %v4767_v55 = vld [vmem:[#allocation2 + $0x2c8] sm:$0xf0]  ;;  %v4158_v42 = vor.u32 %v4761_v58, %v4155_v43  ;;  %v3740_v58 = vld [vmem:[%s5079_s26 + $0x158] sm:$0xff] }
 0x1ec   : > { %3222 = vmatmul.bf16.gmra.mxu3 %v4130_v8  ;;  %v3771_v43 = vld [vmem:[%s5079_s26 + $0x151] sm:$0xff] }
 0x1ed   : > { %3311 = vmatmul.bf16.gmra.mxu0 %v4134_v16  ;;  %970 = vst [vmem:[#allocation2 + $0x358] sm:$0xf] %v938_v34 }
 0x1ee   : > { %v3094_v13 = vpop.f32.mrf.mxu2 }
 0x1ef   : > { %v3183_v63 = vpop.f32.mrf.mxu3  ;;  %v3095_v4 = vadd.f32 %v3094_v13, %v3006_v35  ;;  %v4162_v35 = vor.u32 %v4766_v53, %v4161_v24  ;;  %v843_v24 = vpack.c.bf16 %v3739_v6, %v3739_v6  ;;  %v844_v53 = vpack.c.bf16 %v3740_v58, %v3740_v58 }
 0x1f0   : > { %v3007_v61 = vpop.f32.mrf.mxu1 }
 0x1f1   : > { %v3184_v48 = vadd.f32 %v3183_v63, %v3095_v4  ;;  %v3008_v18 = vadd.f32 %v3007_v61, %v5497_v11  ;;  %v4170_v63 = vor.u32 %v4767_v55, %v4169_v47  ;;  %v3803_v47 = vld [vmem:[%s5079_s26 + $0x152] sm:$0xff]  ;;  %v4770_v55 = vld [vmem:[#allocation2 + $0x2e4] sm:$0xf]  ;;  %875 = vst [vmem:[#allocation2 + $0x378] sm:$0xf] %v843_v24 }
 0x1f2   : > { %v3274_v54 = vpop.f32.mrf.mxu0  ;;  %876 = vst [vmem:[#allocation2 + $0x39c] sm:$0xf] %v844_v53 }
 0x1f3   : > { %v3273_v13 = vadd.f32 %v3272_v27, %v3184_v48  ;;  %v939_v48 = vpack.c.bf16 %v3771_v43, %v3771_v43 }
 0x1f5   : > { %v3454_v61 = vmul.f32 %v3273_v13, %v3273_v13  ;;  %971 = vst [vmem:[#allocation2 + $0x37c] sm:$0xf] %v939_v48 }
 0x1f6   : > { %v3096_v38 = vpop.f32.mrf.mxu2 }
 0x1f7   : > { %v3097_v8 = vadd.f32 %v3096_v38, %v3008_v18  ;;  %v3185_v16 = vpop.f32.mrf.mxu3  ;;  %v940_v18 = vpack.c.bf16 %v3772_v59, %v3772_v59  ;;  %v4191_v38 = vld [vmem:[#allocation2 + $0x304] sm:$0xf0] }
 0x1f8   : > { %v3010_v26 = vpop.f32.mrf.mxu1 }
 0x1f9   : > { %v3186_v31 = vadd.f32 %v3185_v16, %v3097_v8  ;;  %v3011_v45 = vadd.f32 %v3010_v26, %v5507_v62  ;;  %v3804_v62 = vld [vmem:[%s5079_s26 + $0x15a] sm:$0xff]  ;;  %v1035_v8 = vpack.c.bf16 %v3803_v47, %v3803_v47  ;;  %v4771_v26 = vld [vmem:[#allocation2 + $0x2ec] sm:$0xf]  ;;  %972 = vst [vmem:[#allocation2 + $0x3a0] sm:$0xf] %v940_v18 }
 0x1fa   : > { %v3277_v4 = vpop.f32.mrf.mxu0 }
 0x1fb   : > { %v3275_v11 = vadd.f32 %v3274_v54, %v3186_v31  ;;  %3049 = vmatmul.bf16.gmra.mxu1 %v4158_v42  ;;  %3138 = vmatmul.bf16.gmra.mxu2 %v4162_v35  ;;  %v4197_v42 = vld [vmem:[#allocation2 + $0x2e8] sm:$0xf]  ;;  %v4775_v35 = vld [vmem:[#allocation2 + $0x308] sm:$0xf0]  ;;  %1067 = vst [vmem:[#allocation2 + $0x380] sm:$0xf] %v1035_v8 }
 0x1fc   : > { %3227 = vmatmul.bf16.gmra.mxu3 %v4166_v57  ;;  %v4199_v57 = vld [vmem:[#allocation2 + $0x30c] sm:$0xf0]  ;;  %780 = vst [vmem:[#allocation2 + $0x3bc] sm:$0xf] %v1035_v8 }
 0x1fd   : > { %3316 = vmatmul.bf16.gmra.mxu0 %v4170_v63  ;;  %v4897_v27 = vpack.c.bf16 %v3275_v11, %v3273_v13  ;;  %v3416_v9 = vadd.f32 %v3275_v11, %v3273_v13  ;;  %v3455_v10 = vmul.f32 %v3275_v11, %v3275_v11  ;;  %v1036_v13 = vpack.c.bf16 %v3804_v62, %v3804_v62  ;;  %v3741_v62 = vld [vmem:[%s5079_s26 + $0x168] sm:$0xff] }
 0x1fe   : > { %v3099_v52 = vpop.f32.mrf.mxu2  ;;  %v4202_v58 = vor.u32 %v4771_v26, %v4199_v57  ;;  %v845_v8 = vpack.c.bf16 %v3741_v62, %v3741_v62 }
 0x1ff   : > { %4898 = vst [vmem:[%s5721_s6] sm:$0xff] %v4897_v27   ;;  %v3486_v54 = vadd.f32 %v3455_v10, %v3454_v61  ;;  %v3100_v34 = vadd.f32 %v3099_v52, %v3011_v45  ;;  %v3188_v7 = vpop.f32.mrf.mxu3  ;;  %v4205_v61 = vld [vmem:[#allocation2 + $0x2f0] sm:$0xf]  ;;  %v4776_v27 = vld [vmem:[#allocation2 + $0x310] sm:$0xf0] }
 0x200   : > { %v3012_v44 = vpop.f32.mrf.mxu1  ;;  %1068 = vst [vmem:[#allocation2 + $0x3a4] sm:$0xf] %v1036_v13  ;;  %v4206_v43 = vor.u32 %v4776_v27, %v4205_v61 }
 0x201   : > { %v3189_v40 = vadd.f32 %v3188_v7, %v3100_v34  ;;  %v3013_v11 = vadd.f32 %v3012_v44, %v5511_v29  ;;  %v4198_v7 = vor.u32 %v4775_v35, %v4197_v42  ;;  %781 = vst [vmem:[#allocation2 + $0x3e0] sm:$0xf] %v1036_v13  ;;  %v3774_v35 = vld [vmem:[%s5079_s26 + $0x171] sm:$0xff] }
 0x202   : > { %v3279_v60 = vpop.f32.mrf.mxu0  ;;  %v942_v57 = vpack.c.bf16 %v3774_v35, %v3774_v35  ;;  %877 = vst [vmem:[#allocation2 + $0x3c0] sm:$0xf] %v845_v8 }
 0x203   : > { %v3278_v16 = vadd.f32 %v3277_v4, %v3189_v40  ;;  %v4194_v4 = vor.u32 %v4770_v55, %v4191_v38  ;;  %v3773_v55 = vld [vmem:[%s5079_s26 + $0x169] sm:$0xff] }
 0x204   : > { %v941_v13 = vpack.c.bf16 %v3773_v55, %v3773_v55  ;;  %974 = vst [vmem:[#allocation2 + $0x3e8] sm:$0xf] %v942_v57  ;;  %v3743_v57 = vld [vmem:[%s5079_s26 + $0x180] sm:$0xff] }
 0x205   : > { %v3417_v63 = vadd.f32 %v3416_v9, %v3278_v16  ;;  %v3456_v31 = vmul.f32 %v3278_v16, %v3278_v16 }
 0x206   : > { %v3101_v10 = vpop.f32.mrf.mxu2  ;;  %973 = vst [vmem:[#allocation2 + $0x3c4] sm:$0xf] %v941_v13 }
 0x207   : > { %v3487_v45 = vadd.f32 %v3486_v54, %v3456_v31  ;;  %v3102_v52 = vadd.f32 %v3101_v10, %v3013_v11  ;;  %v3190_v34 = vpop.f32.mrf.mxu3  ;;  %v4779_v31 = vld [vmem:[#allocation2 + $0x32c] sm:$0xf]  ;;  %v4227_v11 = vld [vmem:[#allocation2 + $0x34c] sm:$0xf0] }
 0x208   : > { %v3015_v6 = vpop.f32.mrf.mxu1  ;;  %v4233_v10 = vld [vmem:[#allocation2 + $0x330] sm:$0xf] }
 0x209   : > { %v3191_v9 = vadd.f32 %v3190_v34, %v3102_v52  ;;  %v3016_v59 = vadd.f32 %v3015_v6, %v5533_v23  ;;  %v3806_v23 = vld [vmem:[%s5079_s26 + $0x172] sm:$0xff] }
 0x20a   : > { %v3282_v24 = vpop.f32.mrf.mxu0  ;;  %v1038_v52 = vpack.c.bf16 %v3806_v23, %v3806_v23  ;;  %v4780_v34 = vld [vmem:[#allocation2 + $0x334] sm:$0xf] }
 0x20b   : > { %v3280_v29 = vadd.f32 %v3279_v60, %v3191_v9  ;;  %3054 = vmatmul.bf16.gmra.mxu1 %v4194_v4  ;;  %3143 = vmatmul.bf16.gmra.mxu2 %v4198_v7  ;;  %v3742_v60 = vld [vmem:[%s5079_s26 + $0x170] sm:$0xff]  ;;  %v4235_v4 = vld [vmem:[#allocation2 + $0x354] sm:$0xf0]  ;;  %v4785_v9 = vld [vmem:[#allocation2 + $0x358] sm:$0xf0] }
 0x20c   : > { %3232 = vmatmul.bf16.gmra.mxu3 %v4202_v58  ;;  %v846_v42 = vpack.c.bf16 %v3742_v60, %v3742_v60  ;;  %1070 = vst [vmem:[#allocation2 + $0x3ec] sm:$0xf] %v1038_v52 }
 0x20d   : > { %3321 = vmatmul.bf16.gmra.mxu0 %v4206_v43  ;;  %v4902_v54 = vpack.c.bf16 %v3280_v29, %v3278_v16  ;;  %v3418_v44 = vadd.f32 %v3417_v63, %v3280_v29  ;;  %v3457_v53 = vmul.f32 %v3280_v29, %v3280_v29  ;;  %v3805_v63 = vld [vmem:[%s5079_s26 + $0x16a] sm:$0xff]  ;;  %v4241_v43 = vld [vmem:[#allocation2 + $0x338] sm:$0xf]  ;;  %783 = vst [vmem:[#allocation2 + $0x428] sm:$0xf] %v1038_v52 }
 0x20e   : > { %v3104_v48 = vpop.f32.mrf.mxu2  ;;  %v1037_v61 = vpack.c.bf16 %v3805_v63, %v3805_v63  ;;  %878 = vst [vmem:[#allocation2 + $0x3e4] sm:$0xf] %v846_v42  ;;  %v4242_v62 = vor.u32 %v4785_v9, %v4241_v43  ;;  %v3775_v63 = vld [vmem:[%s5079_s26 + $0x181] sm:$0xff]  ;;  %v4269_v43 = vld [vmem:[#allocation2 + $0x378] sm:$0xf] }
 0x20f   : > { %4974 = vst [vmem:[%s5721_s6 + $0x8] sm:$0xff] %v4902_v54   ;;  %v3488_v40 = vadd.f32 %v3487_v45, %v3457_v53  ;;  %v3105_v18 = vadd.f32 %v3104_v48, %v3016_v59  ;;  %v3193_v47 = vpop.f32.mrf.mxu3  ;;  %v4784_v45 = vld [vmem:[#allocation2 + $0x350] sm:$0xf0]  ;;  %v4793_v9 = vld [vmem:[#allocation2 + $0x398] sm:$0xf0] }
 0x210   : > { %v3017_v38 = vpop.f32.mrf.mxu1  ;;  %1069 = vst [vmem:[#allocation2 + $0x3c8] sm:$0xf] %v1037_v61  ;;  %v4234_v48 = vor.u32 %v4784_v45, %v4233_v10  ;;  %v943_v10 = vpack.c.bf16 %v3775_v63, %v3775_v63 }
 0x211   : > { %v3194_v16 = vadd.f32 %v3193_v47, %v3105_v18  ;;  %v3018_v58 = vadd.f32 %v3017_v38, %v5537_v49  ;;  %v4238_v47 = vor.u32 %v4780_v34, %v4235_v4  ;;  %782 = vst [vmem:[#allocation2 + $0x404] sm:$0xf] %v1037_v61  ;;  %v3776_v61 = vld [vmem:[%s5079_s26 + $0x189] sm:$0xff]  ;;  %v4788_v4 = vld [vmem:[#allocation2 + $0x374] sm:$0xf] }
 0x212   : > { %v3284_v26 = vpop.f32.mrf.mxu0  ;;  %v944_v52 = vpack.c.bf16 %v3776_v61, %v3776_v61  ;;  %v3807_v34 = vld [vmem:[%s5079_s26 + $0x182] sm:$0xff]  ;;  %975 = vst [vmem:[#allocation2 + $0x40c] sm:$0xf] %v943_v10  ;;  %v3745_v10 = vld [vmem:[%s5079_s26 + $0x198] sm:$0xff] }
 0x213   : > { %v3283_v27 = vadd.f32 %v3282_v24, %v3194_v16  ;;  %v4230_v24 = vor.u32 %v4779_v31, %v4227_v11  ;;  %v847_v31 = vpack.c.bf16 %v3743_v57, %v3743_v57 }
 0x214   : > { %976 = vst [vmem:[#allocation2 + $0x430] sm:$0xf] %v944_v52 }
 0x215   : > { %v3419_v7 = vadd.f32 %v3418_v44, %v3283_v27  ;;  %v3458_v6 = vmul.f32 %v3283_v27, %v3283_v27  ;;  %879 = vst [vmem:[#allocation2 + $0x408] sm:$0xf] %v847_v31 }
 0x216   : > { %v3106_v29 = vpop.f32.mrf.mxu2 }
 0x217   : > { %v3489_v54 = vadd.f32 %v3488_v40, %v3458_v6  ;;  %v3107_v53 = vadd.f32 %v3106_v29, %v3018_v58  ;;  %v3195_v59 = vpop.f32.mrf.mxu3  ;;  %v1039_v6 = vpack.c.bf16 %v3807_v34, %v3807_v34  ;;  %v849_v34 = vpack.c.bf16 %v3745_v10, %v3745_v10 }
 0x218   : > { %v3020_v18 = vpop.f32.mrf.mxu1 }
 0x219   : > { %v3196_v44 = vadd.f32 %v3195_v59, %v3107_v53  ;;  %v3021_v8 = vadd.f32 %v3020_v18, %v5547_v32  ;;  %v3808_v32 = vld [vmem:[%s5079_s26 + $0x18a] sm:$0xff]  ;;  %v4271_v53 = vld [vmem:[#allocation2 + $0x39c] sm:$0xf0]  ;;  %1071 = vst [vmem:[#allocation2 + $0x410] sm:$0xf] %v1039_v6 }
 0x21a   : > { %v3287_v60 = vpop.f32.mrf.mxu0  ;;  %v1040_v29 = vpack.c.bf16 %v3808_v32, %v3808_v32  ;;  %v4277_v18 = vld [vmem:[#allocation2 + $0x380] sm:$0xf]  ;;  %784 = vst [vmem:[#allocation2 + $0x44c] sm:$0xf] %v1039_v6 }
 0x21b   : > { %v3285_v49 = vadd.f32 %v3284_v26, %v3196_v44  ;;  %3059 = vmatmul.bf16.gmra.mxu1 %v4230_v24  ;;  %3148 = vmatmul.bf16.gmra.mxu2 %v4234_v48  ;;  %v3744_v26 = vld [vmem:[%s5079_s26 + $0x188] sm:$0xff]  ;;  %881 = vst [vmem:[#allocation2 + $0x450] sm:$0xf] %v849_v34 }
 0x21c   : > { %3237 = vmatmul.bf16.gmra.mxu3 %v4238_v47  ;;  %v848_v11 = vpack.c.bf16 %v3744_v26, %v3744_v26  ;;  %v4794_v47 = vld [vmem:[#allocation2 + $0x3a0] sm:$0xf0]  ;;  %1072 = vst [vmem:[#allocation2 + $0x434] sm:$0xf] %v1040_v29 }
 0x21d   : > { %3326 = vmatmul.bf16.gmra.mxu0 %v4242_v62  ;;  %v4907_v40 = vpack.c.bf16 %v3285_v49, %v3283_v27  ;;  %v3420_v55 = vadd.f32 %v3419_v7, %v3285_v49  ;;  %v3459_v38 = vmul.f32 %v3285_v49, %v3285_v49  ;;  %v4263_v7 = vld [vmem:[#allocation2 + $0x394] sm:$0xf0]  ;;  %785 = vst [vmem:[#allocation2 + $0x470] sm:$0xf] %v1040_v29  ;;  %v4797_v29 = vld [vmem:[#allocation2 + $0x3bc] sm:$0xf] }
 0x21e   : > { %v3109_v42 = vpop.f32.mrf.mxu2  ;;  %880 = vst [vmem:[#allocation2 + $0x42c] sm:$0xf] %v848_v11 }
 0x21f   : > { %4975 = vst [vmem:[%s5721_s6 + $0x10] sm:$0xff] %v4907_v40   ;;  %v3490_v35 = vadd.f32 %v3489_v54, %v3459_v38  ;;  %v3110_v13 = vadd.f32 %v3109_v42, %v3021_v8  ;;  %v3198_v16 = vpop.f32.mrf.mxu3  ;;  %v4789_v54 = vld [vmem:[#allocation2 + $0x37c] sm:$0xf]  ;;  %v4270_v38 = vor.u32 %v4793_v9, %v4269_v43 }
 0x220   : > { %v3022_v23 = vpop.f32.mrf.mxu1  ;;  %v4274_v42 = vor.u32 %v4789_v54, %v4271_v53  ;;  %v3809_v9 = vld [vmem:[%s5079_s26 + $0x19a] sm:$0xff] }
 0x221   : > { %v3199_v27 = vadd.f32 %v3198_v16, %v3110_v13  ;;  %v3023_v48 = vadd.f32 %v3022_v23, %v5550_v1  ;;  %v4278_v13 = vor.u32 %v4794_v47, %v4277_v18  ;;  %v4299_v54 = vld [vmem:[#allocation2 + $0x3dc] sm:$0xf0]  ;;  %v1041_v53 = vpack.c.bf16 %v3809_v9, %v3809_v9  ;;  %v4798_v47 = vld [vmem:[#allocation2 + $0x3c4] sm:$0xf]  ;;  %v4341_v9 = vld [vmem:[#allocation2 + $0x408] sm:$0xf] }
 0x222   : > { %v3289_v45 = vpop.f32.mrf.mxu0 }
 0x223   : > { %v3288_v58 = vadd.f32 %v3287_v60, %v3199_v27  ;;  %v4266_v60 = vor.u32 %v4788_v4, %v4263_v7  ;;  %v3746_v27 = vld [vmem:[%s5079_s26 + $0x1a0] sm:$0xff]  ;;  %1073 = vst [vmem:[#allocation2 + $0x458] sm:$0xf] %v1041_v53 }
 0x224   : > { %v850_v32 = vpack.c.bf16 %v3746_v27, %v3746_v27  ;;  %v3778_v4 = vld [vmem:[%s5079_s26 + $0x1a1] sm:$0xff] }
 0x225   : > { %v3421_v59 = vadd.f32 %v3420_v55, %v3288_v58  ;;  %v3460_v24 = vmul.f32 %v3288_v58, %v3288_v58  ;;  %v946_v43 = vpack.c.bf16 %v3778_v4, %v3778_v4 }
 0x226   : > { %v3111_v62 = vpop.f32.mrf.mxu2  ;;  %882 = vst [vmem:[#allocation2 + $0x474] sm:$0xf] %v850_v32 }
 0x227   : > { %v3491_v44 = vadd.f32 %v3490_v35, %v3460_v24  ;;  %v3112_v49 = vadd.f32 %v3111_v62, %v3023_v48  ;;  %v3200_v40 = vpop.f32.mrf.mxu3  ;;  %v4305_v24 = vld [vmem:[#allocation2 + $0x3c0] sm:$0xf]  ;;  %v4802_v48 = vld [vmem:[#allocation2 + $0x3e0] sm:$0xf0]  ;;  %v4307_v62 = vld [vmem:[#allocation2 + $0x3e4] sm:$0xf0] }
 0x228   : > { %v3025_v8 = vpop.f32.mrf.mxu1  ;;  %978 = vst [vmem:[#allocation2 + $0x478] sm:$0xf] %v946_v43  ;;  %v4806_v43 = vld [vmem:[#allocation2 + $0x404] sm:$0xf] }
 0x229   : > { %v3201_v55 = vadd.f32 %v3200_v40, %v3112_v49  ;;  %v3026_v63 = vadd.f32 %v3025_v8, %v5571_v28  ;;  %v3810_v28 = vld [vmem:[%s5079_s26 + $0x1a2] sm:$0xff] }
 0x22a   : > { %v3292_v16 = vpop.f32.mrf.mxu0  ;;  %v1042_v18 = vpack.c.bf16 %v3810_v28, %v3810_v28  ;;  %v4811_v28 = vld [vmem:[#allocation2 + $0x428] sm:$0xf0] }
 0x22b   : > { %v3290_v1 = vadd.f32 %v3289_v45, %v3201_v55  ;;  %3064 = vmatmul.bf16.gmra.mxu1 %v4266_v60  ;;  %3153 = vmatmul.bf16.gmra.mxu2 %v4270_v38  ;;  %v3777_v45 = vld [vmem:[%s5079_s26 + $0x199] sm:$0xff]  ;;  %v4313_v60 = vld [vmem:[#allocation2 + $0x3c8] sm:$0xf]  ;;  %v4803_v38 = vld [vmem:[#allocation2 + $0x3e8] sm:$0xf0]  ;;  %s3618_s26 = sshll.u32 %s5806_s16, 1 }
 0x22c   : > { %3242 = vmatmul.bf16.gmra.mxu3 %v4274_v42  ;;  %v945_v7 = vpack.c.bf16 %v3777_v45, %v3777_v45  ;;  %1074 = vst [vmem:[#allocation2 + $0x47c] sm:$0xf] %v1042_v18  ;;  %s208_s9 = scalar_lea.vmem %s5804_s4, %s3618_s26 }
 0x22d   : > { %3331 = vmatmul.bf16.gmra.mxu0 %v4278_v13  ;;  %v4912_v35 = vpack.c.bf16 %v3290_v1, %v3288_v58  ;;  %v3422_v57 = vadd.f32 %v3421_v59, %v3290_v1  ;;  %v3461_v26 = vmul.f32 %v3290_v1, %v3290_v1  ;;  %v4306_v1 = vor.u32 %v4802_v48, %v4305_v24  ;;  %v4343_v24 = vld [vmem:[#allocation2 + $0x42c] sm:$0xf0]  ;;  %v4812_v48 = vld [vmem:[#allocation2 + $0x430] sm:$0xf0] }
 0x22e   : > { %v3114_v23 = vpop.f32.mrf.mxu2  ;;  %977 = vst [vmem:[#allocation2 + $0x454] sm:$0xf] %v945_v7 }
 0x22f   : > { %4976 = vst [vmem:[%s5721_s6 + $0x18] sm:$0xff] %v4912_v35   ;;  %v3492_v31 = vadd.f32 %v3491_v44, %v3461_v26  ;;  %v3115_v11 = vadd.f32 %v3114_v23, %v3026_v63  ;;  %v3203_v61 = vpop.f32.mrf.mxu3  ;;  %v4310_v26 = vor.u32 %v4798_v47, %v4307_v62  ;;  %v4314_v63 = vor.u32 %v4803_v38, %v4313_v60 }
 0x230   : > { %v3027_v52 = vpop.f32.mrf.mxu1 }
 0x231   : > { %v3204_v6 = vadd.f32 %v3203_v61, %v3115_v11  ;;  %v3028_v40 = vadd.f32 %v3027_v52, %v5574_v21 }
 0x232   : > { %v3294_v58 = vpop.f32.mrf.mxu0 }
 0x233   : > { %v3293_v59 = vadd.f32 %v3292_v16, %v3204_v6  ;;  %v4302_v16 = vor.u32 %v4797_v29, %v4299_v54  ;;  %v4807_v29 = vld [vmem:[#allocation2 + $0x40c] sm:$0xf] }
 0x234   : > { %v4346_v38 = vor.u32 %v4807_v29, %v4343_v24 }
 0x235   : > { %v3423_v44 = vadd.f32 %v3422_v57, %v3293_v59  ;;  %v3462_v49 = vmul.f32 %v3293_v59, %v3293_v59 }
 0x236   : > { %v3116_v8 = vpop.f32.mrf.mxu2 }
 0x237   : > { %v3493_v42 = vadd.f32 %v3492_v31, %v3462_v49  ;;  %v3117_v13 = vadd.f32 %v3116_v8, %v3028_v40  ;;  %v3205_v55 = vpop.f32.mrf.mxu3  ;;  %v4342_v40 = vor.u32 %v4811_v28, %v4341_v9 }
 0x238   : > { %v3030_v35 = vpop.f32.mrf.mxu1 }
 0x239   : > { %v3206_v23 = vadd.f32 %v3205_v55, %v3117_v13  ;;  %v3031_v31 = vadd.f32 %v3030_v35, %v5585_v33  ;;  %v4349_v33 = vld [vmem:[#allocation2 + $0x410] sm:$0xf] }
 0x23a   : > { %v3297_v57 = vpop.f32.mrf.mxu0  ;;  %v4350_v8 = vor.u32 %v4812_v48, %v4349_v33 }
 0x23b   : > { %v3295_v11 = vadd.f32 %v3294_v58, %v3206_v23  ;;  %3069 = vmatmul.bf16.gmra.mxu1 %v4302_v16  ;;  %3158 = vmatmul.bf16.gmra.mxu2 %v4306_v1  ;;  %v4335_v58 = vld [vmem:[#allocation2 + $0x424] sm:$0xf0] }
 0x23c   : > { %3247 = vmatmul.bf16.gmra.mxu3 %v4310_v26  ;;  %v4338_v49 = vor.u32 %v4806_v43, %v4335_v58  ;;  %v4821_v43 = vld [vmem:[#allocation2 + $0x478] sm:$0xf0] }
 0x23d   : > { %3336 = vmatmul.bf16.gmra.mxu0 %v4314_v63  ;;  %v4917_v21 = vpack.c.bf16 %v3295_v11, %v3293_v59  ;;  %v3424_v61 = vadd.f32 %v3423_v44, %v3295_v11  ;;  %v3463_v10 = vmul.f32 %v3295_v11, %v3295_v11 }
 0x23e   : > { %v3119_v27 = vpop.f32.mrf.mxu2 }
 0x23f   : > { %4977 = vst [vmem:[%s5721_s6 + $0x20] sm:$0xff] %v4917_v21   ;;  %v3494_v45 = vadd.f32 %v3493_v42, %v3463_v10  ;;  %v3120_v52 = vadd.f32 %v3119_v27, %v3031_v31  ;;  %v3208_v34 = vpop.f32.mrf.mxu3  ;;  %v4815_v31 = vld [vmem:[#allocation2 + $0x44c] sm:$0xf]  ;;  %v4371_v27 = vld [vmem:[#allocation2 + $0x46c] sm:$0xf0] }
 0x240   : > { %v3032_v32 = vpop.f32.mrf.mxu1 }
 0x241   : > { %v3209_v4 = vadd.f32 %v3208_v34, %v3120_v52  ;;  %v3033_v59 = vadd.f32 %v3032_v32, %v5588_v36  ;;  %v4820_v52 = vld [vmem:[#allocation2 + $0x470] sm:$0xf0] }
 0x242   : > { %v3299_v7 = vpop.f32.mrf.mxu0  ;;  %v4816_v34 = vld [vmem:[#allocation2 + $0x454] sm:$0xf] }
 0x243   : > { %v3298_v6 = vadd.f32 %v3297_v57, %v3209_v4 }
 0x245   : > { %v3425_v54 = vadd.f32 %v3424_v61, %v3298_v6  ;;  %v3464_v53 = vmul.f32 %v3298_v6, %v3298_v6 }
 0x246   : > { %v3121_v18 = vpop.f32.mrf.mxu2 }
 0x247   : > { %v3495_v47 = vadd.f32 %v3494_v45, %v3464_v53  ;;  %v3122_v62 = vadd.f32 %v3121_v18, %v3033_v59  ;;  %v3210_v44 = vpop.f32.mrf.mxu3  ;;  %v4377_v45 = vld [vmem:[#allocation2 + $0x450] sm:$0xf] }
 0x248   : > { %v3035_v60 = vpop.f32.mrf.mxu1  ;;  %v4378_v53 = vor.u32 %v4820_v52, %v4377_v45 }
 0x249   : > { %v3211_v42 = vadd.f32 %v3210_v44, %v3122_v62  ;;  %v3036_v35 = vadd.f32 %v3035_v60, %v5597_v15  ;;  %v4385_v15 = vld [vmem:[#allocation2 + $0x458] sm:$0xf] }
 0x24a   : > { %v3302_v13 = vpop.f32.mrf.mxu0  ;;  %v4386_v33 = vor.u32 %v4821_v43, %v4385_v15 }
 0x24b   : > { %v3300_v55 = vadd.f32 %v3299_v7, %v3211_v42  ;;  %3074 = vmatmul.bf16.gmra.mxu1 %v4338_v49  ;;  %3163 = vmatmul.bf16.gmra.mxu2 %v4342_v40 }
 0x24c   : > { %3252 = vmatmul.bf16.gmra.mxu3 %v4346_v38 }
 0x24d   : > { %3341 = vmatmul.bf16.gmra.mxu0 %v4350_v8  ;;  %v4922_v36 = vpack.c.bf16 %v3300_v55, %v3298_v6  ;;  %v3426_v16 = vadd.f32 %v3425_v54, %v3300_v55  ;;  %v3465_v1 = vmul.f32 %v3300_v55, %v3300_v55  ;;  %v4379_v6 = vld [vmem:[#allocation2 + $0x474] sm:$0xf0]  ;;  %v4374_v54 = vor.u32 %v4815_v31, %v4371_v27 }
 0x24e   : > { %v3124_v26 = vpop.f32.mrf.mxu2  ;;  %v4382_v24 = vor.u32 %v4816_v34, %v4379_v6 }
 0x24f   : > { %4978 = vst [vmem:[%s5721_s6 + $0x28] sm:$0xff] %v4922_v36   ;;  %v3496_v63 = vadd.f32 %v3495_v47, %v3465_v1  ;;  %v3125_v23 = vadd.f32 %v3124_v26, %v3036_v35  ;;  %v3213_v57 = vpop.f32.mrf.mxu3 }
 0x250   : > { %v3037_v11 = vpop.f32.mrf.mxu1 }
 0x251   : > { %v3214_v21 = vadd.f32 %v3213_v57, %v3125_v23  ;;  %v3038_v7 = vadd.f32 %v3037_v11, %v5600_v56 }
 0x252   : > { %v3304_v61 = vpop.f32.mrf.mxu0 }
 0x253   : > { %v3303_v10 = vadd.f32 %v3302_v13, %v3214_v21 }
 0x255   : > { %v3427_v32 = vadd.f32 %v3426_v16, %v3303_v10  ;;  %v3466_v4 = vmul.f32 %v3303_v10, %v3303_v10 }
 0x256   : > { %v3126_v58 = vpop.f32.mrf.mxu2 }
 0x257   : > { %v3497_v9 = vadd.f32 %v3496_v63, %v3466_v4  ;;  %v3127_v28 = vadd.f32 %v3126_v58, %v3038_v7  ;;  %v3215_v29 = vpop.f32.mrf.mxu3 }
 0x258   : > { %v3040_v59 = vpop.f32.mrf.mxu1 }
 0x259   : > { %v3216_v48 = vadd.f32 %v3215_v29, %v3127_v28  ;;  %v3041_v49 = vadd.f32 %v3040_v59, %v5609_v30 }
 0x25a   : > { %v3307_v18 = vpop.f32.mrf.mxu0 }
 0x25b   : > { %v3305_v47 = vadd.f32 %v3304_v61, %v3216_v48  ;;  %3079 = vmatmul.bf16.gmra.mxu1 %v4374_v54  ;;  %3168 = vmatmul.bf16.gmra.mxu2 %v4378_v53 }
 0x25c   : > { %3257 = vmatmul.bf16.gmra.mxu3 %v4382_v24 }
 0x25d   : > { %3346 = vmatmul.bf16.gmra.mxu0 %v4386_v33  ;;  %v4927_v56 = vpack.c.bf16 %v3305_v47, %v3303_v10  ;;  %v3428_v62 = vadd.f32 %v3427_v32, %v3305_v47  ;;  %v3467_v44 = vmul.f32 %v3305_v47, %v3305_v47 }
 0x25e   : > { %v3129_v40 = vpop.f32.mrf.mxu2 }
 0x25f   : > { %4979 = vst [vmem:[%s5721_s6 + $0x30] sm:$0xff] %v4927_v56   ;;  %v3498_v60 = vadd.f32 %v3497_v9, %v3467_v44  ;;  %v3130_v38 = vadd.f32 %v3129_v40, %v3041_v49  ;;  %v3218_v8 = vpop.f32.mrf.mxu3 }
 0x260   : > { %v3042_v42 = vpop.f32.mrf.mxu1 }
 0x261   : > { %v3219_v13 = vadd.f32 %v3218_v8, %v3130_v38  ;;  %v3043_v35 = vadd.f32 %v3042_v42, %v5612_v41 }
 0x262   : > { %v3309_v55 = vpop.f32.mrf.mxu0 }
 0x263   : > { %v3308_v36 = vadd.f32 %v3307_v18, %v3219_v13 }
 0x265   : > { %v3429_v16 = vadd.f32 %v3428_v62, %v3308_v36  ;;  %v3468_v1 = vmul.f32 %v3308_v36, %v3308_v36 }
 0x266   : > { %v3131_v26 = vpop.f32.mrf.mxu2 }
 0x267   : > { %v3499_v63 = vadd.f32 %v3498_v60, %v3468_v1  ;;  %v3132_v23 = vadd.f32 %v3131_v26, %v3043_v35  ;;  %v3220_v57 = vpop.f32.mrf.mxu3 }
 0x268   : > { %v3045_v11 = vpop.f32.mrf.mxu1 }
 0x269   : > { %v3221_v30 = vadd.f32 %v3220_v57, %v3132_v23  ;;  %v3046_v45 = vadd.f32 %v3045_v11, %v5621_v39 }
 0x26a   : > { %v3312_v21 = vpop.f32.mrf.mxu0 }
 0x26b   : > { %v3310_v61 = vadd.f32 %v3309_v55, %v3221_v30 }
 0x26d   : > { %v4932_v10 = vpack.c.bf16 %v3310_v61, %v3308_v36  ;;  %v3430_v31 = vadd.f32 %v3429_v16, %v3310_v61  ;;  %v3469_v27 = vmul.f32 %v3310_v61, %v3310_v61 }
 0x26e   : > { %v3134_v52 = vpop.f32.mrf.mxu2 }
 0x26f   : > { %4980 = vst [vmem:[%s5721_s6 + $0x38] sm:$0xff] %v4932_v10   ;;  %v3500_v34 = vadd.f32 %v3499_v63, %v3469_v27  ;;  %v3135_v32 = vadd.f32 %v3134_v52, %v3046_v45  ;;  %v3223_v4 = vpop.f32.mrf.mxu3 }
 0x270   : > { %v3047_v7 = vpop.f32.mrf.mxu1 }
 0x271   : > { %v3224_v41 = vadd.f32 %v3223_v4, %v3135_v32  ;;  %v3048_v9 = vadd.f32 %v3047_v7, %v5624_v14 }
 0x272   : > { %v3314_v6 = vpop.f32.mrf.mxu0 }
 0x273   : > { %v3313_v15 = vadd.f32 %v3312_v21, %v3224_v41 }
 0x275   : > { %v3431_v43 = vadd.f32 %v3430_v31, %v3313_v15  ;;  %v3470_v58 = vmul.f32 %v3313_v15, %v3313_v15 }
 0x276   : > { %v3136_v28 = vpop.f32.mrf.mxu2 }
 0x277   : > { %v3501_v29 = vadd.f32 %v3500_v34, %v3470_v58  ;;  %v3137_v54 = vadd.f32 %v3136_v28, %v3048_v9  ;;  %v3225_v53 = vpop.f32.mrf.mxu3 }
 0x278   : > { %v3050_v59 = vpop.f32.mrf.mxu1 }
 0x279   : > { %v3226_v39 = vadd.f32 %v3225_v53, %v3137_v54  ;;  %v3051_v56 = vadd.f32 %v3050_v59, %v5633_v50 }
 0x27a   : > { %v3317_v24 = vpop.f32.mrf.mxu0 }
 0x27b   : > { %v3315_v33 = vadd.f32 %v3314_v6, %v3226_v39 }
 0x27d   : > { %v4937_v48 = vpack.c.bf16 %v3315_v33, %v3313_v15  ;;  %v3432_v18 = vadd.f32 %v3431_v43, %v3315_v33  ;;  %v3471_v47 = vmul.f32 %v3315_v33, %v3315_v33 }
 0x27e   : > { %v3139_v62 = vpop.f32.mrf.mxu2 }
 0x27f   : > { %4981 = vst [vmem:[%s5721_s6 + $0x40] sm:$0xff] %v4937_v48   ;;  %v3502_v44 = vadd.f32 %v3501_v29, %v3471_v47  ;;  %v3140_v49 = vadd.f32 %v3139_v62, %v3051_v56  ;;  %v3228_v40 = vpop.f32.mrf.mxu3 }
 0x280   : > { %v3052_v60 = vpop.f32.mrf.mxu1 }
 0x281   : > { %v3229_v14 = vadd.f32 %v3228_v40, %v3140_v49  ;;  %v3053_v55 = vadd.f32 %v3052_v60, %v5636_v17 }
 0x282   : > { %v3319_v38 = vpop.f32.mrf.mxu0 }
 0x283   : > { %v3318_v8 = vadd.f32 %v3317_v24, %v3229_v14 }
 0x285   : > { %v3433_v42 = vadd.f32 %v3432_v18, %v3318_v8  ;;  %v3472_v13 = vmul.f32 %v3318_v8, %v3318_v8 }
 0x286   : > { %v3141_v36 = vpop.f32.mrf.mxu2 }
 0x287   : > { %v3503_v16 = vadd.f32 %v3502_v44, %v3472_v13  ;;  %v3142_v1 = vadd.f32 %v3141_v36, %v3053_v55  ;;  %v3230_v35 = vpop.f32.mrf.mxu3 }
 0x288   : > { %v3055_v26 = vpop.f32.mrf.mxu1 }
 0x289   : > { %v3231_v50 = vadd.f32 %v3230_v35, %v3142_v1  ;;  %v3056_v21 = vadd.f32 %v3055_v26, %v5645_v2 }
 0x28a   : > { %v3322_v63 = vpop.f32.mrf.mxu0 }
 0x28b   : > { %v3320_v23 = vadd.f32 %v3319_v38, %v3231_v50 }
 0x28d   : > { %v4942_v57 = vpack.c.bf16 %v3320_v23, %v3318_v8  ;;  %v3434_v11 = vadd.f32 %v3433_v42, %v3320_v23  ;;  %v3473_v30 = vmul.f32 %v3320_v23, %v3320_v23 }
 0x28e   : > { %v3144_v61 = vpop.f32.mrf.mxu2 }
 0x28f   : > { %4982 = vst [vmem:[%s5721_s6 + $0x48] sm:$0xff] %v4942_v57   ;;  %v3504_v10 = vadd.f32 %v3503_v16, %v3473_v30  ;;  %v3145_v31 = vadd.f32 %v3144_v61, %v3056_v21  ;;  %v3233_v27 = vpop.f32.mrf.mxu3 }
 0x290   : > { %v3057_v45 = vpop.f32.mrf.mxu1 }
 0x291   : > { %v3234_v17 = vadd.f32 %v3233_v27, %v3145_v31  ;;  %v3058_v7 = vadd.f32 %v3057_v45, %v5648_v20 }
 0x292   : > { %v3324_v52 = vpop.f32.mrf.mxu0 }
 0x293   : > { %v3323_v34 = vadd.f32 %v3322_v63, %v3234_v17 }
 0x295   : > { %v3435_v32 = vadd.f32 %v3434_v11, %v3323_v34  ;;  %v3474_v4 = vmul.f32 %v3323_v34, %v3323_v34 }
 0x296   : > { %v3146_v41 = vpop.f32.mrf.mxu2 }
 0x297   : > { %v3505_v6 = vadd.f32 %v3504_v10, %v3474_v4  ;;  %v3147_v15 = vadd.f32 %v3146_v41, %v3058_v7  ;;  %v3235_v43 = vpop.f32.mrf.mxu3 }
 0x298   : > { %v3060_v58 = vpop.f32.mrf.mxu1 }
 0x299   : > { %v3236_v2 = vadd.f32 %v3235_v43, %v3147_v15  ;;  %v3061_v59 = vadd.f32 %v3060_v58, %v5657_v12 }
 0x29a   : > { %v3327_v9 = vpop.f32.mrf.mxu0 }
 0x29b   : > { %v3325_v28 = vadd.f32 %v3324_v52, %v3236_v2 }
 0x29d   : > { %v4947_v29 = vpack.c.bf16 %v3325_v28, %v3323_v34  ;;  %v3436_v54 = vadd.f32 %v3435_v32, %v3325_v28  ;;  %v3475_v53 = vmul.f32 %v3325_v28, %v3325_v28 }
 0x29e   : > { %v3149_v39 = vpop.f32.mrf.mxu2 }
 0x29f   : > { %4983 = vst [vmem:[%s5721_s6 + $0x50] sm:$0xff] %v4947_v29   ;;  %v3506_v24 = vadd.f32 %v3505_v6, %v3475_v53  ;;  %v3150_v33 = vadd.f32 %v3149_v39, %v3061_v59  ;;  %v3238_v48 = vpop.f32.mrf.mxu3 }
 0x2a0   : > { %v3062_v18 = vpop.f32.mrf.mxu1 }
 0x2a1   : > { %v3239_v20 = vadd.f32 %v3238_v48, %v3150_v33  ;;  %v3063_v49 = vadd.f32 %v3062_v18, %v5660_v3 }
 0x2a2   : > { %v3329_v47 = vpop.f32.mrf.mxu0 }
 0x2a3   : > { %v3328_v56 = vadd.f32 %v3327_v9, %v3239_v20 }
 0x2a5   : > { %v3437_v62 = vadd.f32 %v3436_v54, %v3328_v56  ;;  %v3476_v44 = vmul.f32 %v3328_v56, %v3328_v56 }
 0x2a6   : > { %v3151_v40 = vpop.f32.mrf.mxu2 }
 0x2a7   : > { %v3507_v60 = vadd.f32 %v3506_v24, %v3476_v44  ;;  %v3152_v14 = vadd.f32 %v3151_v40, %v3063_v49  ;;  %v3240_v38 = vpop.f32.mrf.mxu3 }
 0x2a8   : > { %v3065_v8 = vpop.f32.mrf.mxu1 }
 0x2a9   : > { %v3241_v12 = vadd.f32 %v3240_v38, %v3152_v14  ;;  %v3066_v1 = vadd.f32 %v3065_v8, %v5669_v25 }
 0x2aa   : > { %v3332_v42 = vpop.f32.mrf.mxu0 }
 0x2ab   : > { %v3330_v13 = vadd.f32 %v3329_v47, %v3241_v12 }
 0x2ad   : > { %v4952_v55 = vpack.c.bf16 %v3330_v13, %v3328_v56  ;;  %v3438_v36 = vadd.f32 %v3437_v62, %v3330_v13  ;;  %v3477_v16 = vmul.f32 %v3330_v13, %v3330_v13 }
 0x2ae   : > { %v3154_v35 = vpop.f32.mrf.mxu2 }
 0x2af   : > { %4984 = vst [vmem:[%s5721_s6 + $0x58] sm:$0xff] %v4952_v55   ;;  %v3508_v26 = vadd.f32 %v3507_v60, %v3477_v16  ;;  %v3155_v50 = vadd.f32 %v3154_v35, %v3066_v1  ;;  %v3243_v63 = vpop.f32.mrf.mxu3 }
 0x2b0   : > { %v3067_v23 = vpop.f32.mrf.mxu1 }
 0x2b1   : > { %v3244_v3 = vadd.f32 %v3243_v63, %v3155_v50  ;;  %v3068_v61 = vadd.f32 %v3067_v23, %v5672_v0 }
 0x2b2   : > { %v3334_v57 = vpop.f32.mrf.mxu0 }
 0x2b3   : > { %v3333_v11 = vadd.f32 %v3332_v42, %v3244_v3 }
 0x2b5   : > { %v3439_v30 = vadd.f32 %v3438_v36, %v3333_v11  ;;  %v3478_v21 = vmul.f32 %v3333_v11, %v3333_v11 }
 0x2b6   : > { %v3156_v10 = vpop.f32.mrf.mxu2 }
 0x2b7   : > { %v3509_v31 = vadd.f32 %v3508_v26, %v3478_v21  ;;  %v3157_v27 = vadd.f32 %v3156_v10, %v3068_v61  ;;  %v3245_v45 = vpop.f32.mrf.mxu3 }
 0x2b8   : > { %v3070_v17 = vpop.f32.mrf.mxu1 }
 0x2b9   : > { %v3246_v25 = vadd.f32 %v3245_v45, %v3157_v27  ;;  %v3071_v41 = vadd.f32 %v3070_v17, %v5681_v19 }
 0x2ba   : > { %v3337_v52 = vpop.f32.mrf.mxu0 }
 0x2bb   : > { %v3335_v34 = vadd.f32 %v3334_v57, %v3246_v25 }
 0x2bd   : > { %v4957_v32 = vpack.c.bf16 %v3335_v34, %v3333_v11  ;;  %v3440_v4 = vadd.f32 %v3439_v30, %v3335_v34  ;;  %v3479_v7 = vmul.f32 %v3335_v34, %v3335_v34 }
 0x2be   : > { %v3159_v6 = vpop.f32.mrf.mxu2 }
 0x2bf   : > { %4985 = vst [vmem:[%s5721_s6 + $0x60] sm:$0xff] %v4957_v32   ;;  %v3510_v15 = vadd.f32 %v3509_v31, %v3479_v7  ;;  %v3160_v43 = vadd.f32 %v3159_v6, %v3071_v41  ;;  %v3248_v58 = vpop.f32.mrf.mxu3 }
 0x2c0   : > { %v3072_v2 = vpop.f32.mrf.mxu1 }
 0x2c1   : > { %v3249_v0 = vadd.f32 %v3248_v58, %v3160_v43  ;;  %v3073_v53 = vadd.f32 %v3072_v2, %v5684_v46 }
 0x2c2   : > { %v3339_v9 = vpop.f32.mrf.mxu0 }
 0x2c3   : > { %v3338_v28 = vadd.f32 %v3337_v52, %v3249_v0 }
 0x2c5   : > { %v3441_v29 = vadd.f32 %v3440_v4, %v3338_v28  ;;  %v3480_v54 = vmul.f32 %v3338_v28, %v3338_v28 }
 0x2c6   : > { %v3161_v59 = vpop.f32.mrf.mxu2 }
 0x2c7   : > { %v3511_v39 = vadd.f32 %v3510_v15, %v3480_v54  ;;  %v3162_v24 = vadd.f32 %v3161_v59, %v3073_v53  ;;  %v3250_v33 = vpop.f32.mrf.mxu3 }
 0x2c8   : > { %v3075_v48 = vpop.f32.mrf.mxu1 }
 0x2c9   : > { %v3251_v19 = vadd.f32 %v3250_v33, %v3162_v24  ;;  %v3076_v44 = vadd.f32 %v3075_v48, %v5693_v22 }
 0x2ca   : > { %v3342_v20 = vpop.f32.mrf.mxu0 }
 0x2cb   : > { %v3340_v18 = vadd.f32 %v3339_v9, %v3251_v19 }
 0x2cd   : > { %v4962_v47 = vpack.c.bf16 %v3340_v18, %v3338_v28  ;;  %v3442_v56 = vadd.f32 %v3441_v29, %v3340_v18  ;;  %v3481_v62 = vmul.f32 %v3340_v18, %v3340_v18 }
 0x2ce   : > { %v3164_v49 = vpop.f32.mrf.mxu2 }
 0x2cf   : > { %4986 = vst [vmem:[%s5721_s6 + $0x68] sm:$0xff] %v4962_v47   ;;  %v3512_v40 = vadd.f32 %v3511_v39, %v3481_v62  ;;  %v3165_v60 = vadd.f32 %v3164_v49, %v3076_v44  ;;  %v3253_v14 = vpop.f32.mrf.mxu3 }
 0x2d0   : > { %v3077_v38 = vpop.f32.mrf.mxu1 }
 0x2d1   : > { %v3254_v46 = vadd.f32 %v3253_v14, %v3165_v60  ;;  %v3078_v13 = vadd.f32 %v3077_v38, %v5696_v37 }
 0x2d2   : > { %v3344_v55 = vpop.f32.mrf.mxu0 }
 0x2d3   : > { %v3343_v8 = vadd.f32 %v3342_v20, %v3254_v46 }
 0x2d5   : > { %v3443_v12 = vadd.f32 %v3442_v56, %v3343_v8  ;;  %v3482_v42 = vmul.f32 %v3343_v8, %v3343_v8 }
 0x2d6   : > { %v3166_v36 = vpop.f32.mrf.mxu2 }
 0x2d7   : > { %v3513_v16 = vadd.f32 %v3512_v40, %v3482_v42  ;;  %v3167_v1 = vadd.f32 %v3166_v36, %v3078_v13  ;;  %v3255_v35 = vpop.f32.mrf.mxu3 }
 0x2d8   : > { %v3080_v26 = vpop.f32.mrf.mxu1 }
 0x2d9   : > { %v3256_v22 = vadd.f32 %v3255_v35, %v3167_v1  ;;  %v3081_v57 = vadd.f32 %v3080_v26, %v5705_v5 }
 0x2da   : > { %v3347_v10 = vpop.f32.mrf.mxu0 }
 0x2db   : > { %v3345_v50 = vadd.f32 %v3344_v55, %v3256_v22 }
 0x2dd   : > { %v4967_v63 = vpack.c.bf16 %v3345_v50, %v3343_v8  ;;  %v3444_v23 = vadd.f32 %v3443_v12, %v3345_v50  ;;  %v3483_v3 = vmul.f32 %v3345_v50, %v3345_v50 }
 0x2de   : > { %v3169_v11 = vpop.f32.mrf.mxu2 }
 0x2df   : > { %4987 = vst [vmem:[%s5721_s6 + $0x70] sm:$0xff] %v4967_v63   ;;  %v3514_v30 = vadd.f32 %v3513_v16, %v3483_v3  ;;  %v3170_v21 = vadd.f32 %v3169_v11, %v3081_v57  ;;  %v3258_v61 = vpop.f32.mrf.mxu3 }
 0x2e0   : > { %v3082_v31 = vpop.f32.mrf.mxu1 }
 0x2e1   : > { %v3259_v37 = vadd.f32 %v3258_v61, %v3170_v21  ;;  %v3083_v25 = vadd.f32 %v3082_v31, %v5707_v51 }
 0x2e2   : > { %v3349_v7 = vpop.f32.mrf.mxu0 }
 0x2e3   : > { %v3348_v27 = vadd.f32 %v3347_v10, %v3259_v37 }
 0x2e5   : > { %v3445_v45 = vadd.f32 %v3444_v23, %v3348_v27  ;;  %v3484_v17 = vmul.f32 %v3348_v27, %v3348_v27 }
 0x2e6   : > { %v3171_v52 = vpop.f32.mrf.mxu2 }
 0x2e7   : > { %v3515_v34 = vadd.f32 %v3514_v30, %v3484_v17  ;;  %v3172_v32 = vadd.f32 %v3171_v52, %v3083_v25  ;;  %v3260_v4 = vpop.f32.mrf.mxu3 }
 0x2e9   : > { %v3261_v5 = vadd.f32 %v3260_v4, %v3172_v32 }
 0x2eb   : > { %v3350_v41 = vadd.f32 %v3349_v7, %v3261_v5 }
 0x2ed   : > { %v4972_v6 = vpack.c.bf16 %v3350_v41, %v3348_v27  ;;  %v3446_v15 = vadd.f32 %v3445_v45, %v3350_v41  ;;  %v3485_v43 = vmul.f32 %v3350_v41, %v3350_v41 }
 0x2ef   : > { %4988 = vst [vmem:[%s5721_s6 + $0x78] sm:$0xff] %v4972_v6   ;;  %v3447_v58 = vrot.slane %v3446_v15, 4  ;;  %v3516_v2 = vadd.f32 %v3515_v34, %v3485_v43 }
 0x2f1   : > { %v3448_v0 = vadd.f32 %v3447_v58, %v3446_v15  ;;  %v3517_v9 = vrot.slane %v3516_v2, 4 }
 0x2f3   : > { %v3449_v28 = vrot.slane %v3448_v0, 2  ;;  %v3518_v29 = vadd.f32 %v3517_v9, %v3516_v2 }
 0x2f5   : > { %v3450_v51 = vadd.f32 %v3449_v28, %v3448_v0  ;;  %v3519_v54 = vrot.slane %v3518_v29, 2 }
 0x2f7   : > { %v3451_v53 = vrot.slane %v3450_v51, 1  ;;  %v3520_v59 = vadd.f32 %v3519_v54, %v3518_v29 }
 0x2f9   : > { %v3452_v39 = vadd.f32 %v3451_v53, %v3450_v51  ;;  %v3521_v24 = vrot.slane %v3520_v59, 1 }
 0x2fb   : > { %3453 = vst [vmem:[%s208_s9] sm:$0x1] %v3452_v39  ;;  %v3522_v33 = vadd.f32 %v3521_v24, %v3520_v59 }
 0x2fd   : > { %3523 = vst [vmem:[%s208_s9 + $0x1] sm:$0x1] %v3522_v33 }
 0x2fe PF: > { %s15_s15 = sadd.s32 1, %s5029_s15  }
 0x2ff   : > { %p12_p4 = scmp.ge.s32.totalorder %s15_s15, 4  }
 0x301   :  { %14 = sbr.rel (!%p12_p4) target bundleno = 1 (0x1), region = 76 }

// kernel: respath_forward.4
= control target key start
LH: loop header
LB: loop body
LE: loop exit
PB: predicated region body
PF: predicated region fallthrough
CT: control target
= control target key end

     0   :  { %s5756_s27 = smov 0   ;;  %s6878_s0 = inlined_call_operand.vmem [shape: f32[2,18,18,128], index: 0, kind: input, shape index: {}, may-alias: {0,6}]   ;;  %s6879_s1 = inlined_call_operand.vmem [shape: bf16[2,16,16,128], index: 1, kind: input, shape index: {}]   ;;  %s6880_s2 = inlined_call_operand.vmem [shape: f32[1,128], index: 2, kind: input, shape index: {}]   ;;  %s6881_s3 = inlined_call_operand.vmem [shape: f32[1,128], index: 3, kind: input, shape index: {}]   ;;  %s6882_s4 = inlined_call_operand.vmem [shape: bf16[1152,128], index: 4, kind: input, shape index: {}]   ;;  %s6883_s5 = inlined_call_operand.vmem [shape: f32[1,128], index: 5, kind: input, shape index: {}]   ;;  %s6884_s6 = inlined_call_operand.vmem [shape: f32[2,18,18,128], index: 6, kind: output, shape index: {0}, may-alias: {0,6}]   ;;  %s6885_s7 = inlined_call_operand.vmem [shape: bf16[2,16,16,128], index: 7, kind: output, shape index: {1}]   ;;  %s6886_s8 = inlined_call_operand.vmem [shape: f32[2,2,128], index: 8, kind: output, shape index: {2}]  }
   0x1 LB: > { %s4099_s28 = sadd.s32 4294967295, %s5707_s27   ;;  %p4103_p0 = scmp.ge.s32.totalorder %s5707_s27, 1  ;;  %s5707_s27 = sphi %s5756_s27, %s19_s27  }
   0x2   : > { %p277_p1 = scmp.lt.s32.totalorder %s5707_s27, 3 }
   0x4   : > { %p278_p2 = pnand %p4103_p0, %p277_p1 }
   0x5   : > { %p325_p3 = scmp.lt.s32.totalorder (!%p278_p2), %s4099_s28, 1 }
   0x6   : > { %281 = sbr.rel (%p278_p2) target bundleno = 813 (0x32d), region = 44 }
   0xb   : > { %v5421_v0 = vld [vmem:[%s6882_s4 + $0x38] sm:$0xff]  ;;  %v5420_v1 = vld [vmem:[%s6882_s4 + $0x30] sm:$0xff]  ;;  %s6888_s28 = smov (!%p325_p3, %s4099_s28), 1  ;;  %v5784_v2 = vld [vmem:[%s6880_s2] ss:$0 sm:$0xff]  ;;  %v5709_v51 = vmov 0.0  }
   0xc   : > { %5660 = vmatpush.bf16.msra.mxu1 %v5421_v0  ;;  %5661 = vmatpush.bf16.msra.mxu2 %v5421_v0  ;;  %s5268_s11 = sshll.u32 %s6888_s28, 7  ;;  %s5684_s12 = smul.u32 432, %s6888_s28  ;;  %v5419_v3 = vld [vmem:[%s6882_s4 + $0x28] sm:$0xff]  ;;  %v5793_v7 = vld [vmem:[%s6881_s3] ss:$0 sm:$0xff]  ;;  %v5417_v13 = vld [vmem:[%s6882_s4 + $0x18] sm:$0xff] }
   0xd   : > { %5662 = vmatpush.bf16.msra.mxu3 %v5421_v0  ;;  %2995 = vmatpush.bf16.msra.mxu0 %v5421_v0  ;;  %s5779_s15 = scalar_lea.vmem %s6879_s1, %s5268_s11  ;;  %v5418_v10 = vld [vmem:[%s6882_s4 + $0x20] sm:$0xff]  ;;  %v5416_v50 = vld [vmem:[%s6882_s4 + $0x10] sm:$0xff]  ;;  %v5415_v52 = vld [vmem:[%s6882_s4 + $0x8] sm:$0xff]  ;;  %s6800_s21 = scalar_lea.vmem %s6885_s7, %s5268_s11 }
   0xe   : > { %v5632_v4 = vld [vmem:[%s5779_s15 + $0x18] sm:$0xff]   ;;  %s5800_s24 = scalar_lea.vmem %s6878_s0, %s5684_s12  ;;  %s5873_s13 = scalar_lea.vmem %s6884_s6, %s5684_s12  ;;  %v5414_v53 = vld [vmem:[%s6882_s4] sm:$0xff] }
   0xf   : > { %v5500_v5 = vunpack.c.l.bf16 %v5632_v4  ;;  %v5501_v6 = vunpack.c.h.bf16 %v5632_v4  ;;  %v4117_v14 = vld [vmem:[%s5800_s24 + $0x61] sm:$0xff]  ;;  %v4118_v15 = vld [vmem:[%s5800_s24 + $0x69] sm:$0xff]  ;;  %v5815_v18 = vld [vmem:[%s5800_s24 + $0x19] sm:$0xff]  ;;  %s4110_s11 = sshll.u32 %s6888_s28, 1 }
  0x10   : > { %5663 = vmatpush.bf16.msra.mxu1 %v5420_v1  ;;  %5664 = vmatpush.bf16.msra.mxu2 %v5420_v1  ;;  %v5818_v19 = vld [vmem:[%s5800_s24 + $0x21] sm:$0xff]  ;;  %v5821_v20 = vld [vmem:[%s5800_s24 + $0x31] sm:$0xff]  ;;  %v5824_v21 = vld [vmem:[%s5800_s24 + $0x39] sm:$0xff] }
  0x11   : > { %5665 = vmatpush.bf16.msra.mxu3 %v5420_v1  ;;  %2996 = vmatpush.bf16.msra.mxu0 %v5420_v1  ;;  %v423_v8 = vmul.f32 %v5784_v2, %v5500_v5  ;;  %v424_v9 = vmul.f32 %v5784_v2, %v5501_v6  ;;  %v5827_v22 = vld [vmem:[%s5800_s24 + $0x49] sm:$0xff]  ;;  %v5830_v23 = vld [vmem:[%s5800_s24 + $0x51] sm:$0xff]  ;;  %v5833_v24 = vld [vmem:[%s5800_s24 + $0x79] sm:$0xff] }
  0x12   : > { %v5836_v25 = vld [vmem:[%s5800_s24 + $0x81] sm:$0xff]  ;;  %v5839_v26 = vld [vmem:[%s5800_s24 + $0x91] sm:$0xff]  ;;  %v5842_v27 = vld [vmem:[%s5800_s24 + $0x99] sm:$0xff] }
  0x13   : > { %v459_v11 = vadd.f32 %v5793_v7, %v423_v8  ;;  %v460_v12 = vadd.f32 %v5793_v7, %v424_v9  ;;  %v5845_v28 = vld [vmem:[%s5800_s24 + $0xa9] sm:$0xff]  ;;  %v5848_v29 = vld [vmem:[%s5800_s24 + $0xb1] sm:$0xff]  ;;  %v5851_v30 = vld [vmem:[%s5800_s24 + $0xd9] sm:$0xff] }
  0x14   : > { %5666 = vmatpush.bf16.msra.mxu1 %v5419_v3  ;;  %5667 = vmatpush.bf16.msra.mxu2 %v5419_v3  ;;  %v5854_v31 = vld [vmem:[%s5800_s24 + $0xe1] sm:$0xff]  ;;  %v5857_v32 = vld [vmem:[%s5800_s24 + $0xf1] sm:$0xff]  ;;  %v5860_v33 = vld [vmem:[%s5800_s24 + $0xf9] sm:$0xff] }
  0x15   : > { %5668 = vmatpush.bf16.msra.mxu3 %v5419_v3  ;;  %2997 = vmatpush.bf16.msra.mxu0 %v5419_v3  ;;  %v491_v16 = vmax.f32 %v459_v11, 0.0  ;;  %v492_v17 = vmax.f32 %v460_v12, 0.0  ;;  %v5863_v34 = vld [vmem:[%s5800_s24 + $0x109] sm:$0xff]  ;;  %v5866_v35 = vld [vmem:[%s5800_s24 + $0x111] sm:$0xff]  ;;  %v5876_v36 = vld [vmem:[%s5800_s24 + $0xc1] sm:$0xff] }
  0x16   : > { %v5879_v37 = vld [vmem:[%s5800_s24 + $0xc9] sm:$0xff]  ;;  %v5882_v38 = vld [vmem:[%s5800_s24 + $0x121] sm:$0xff]  ;;  %v5885_v39 = vld [vmem:[%s5800_s24 + $0x139] sm:$0xff] }
  0x17   : > { %v5888_v40 = vld [vmem:[%s5800_s24 + $0x141] sm:$0xff]  ;;  %v5891_v41 = vld [vmem:[%s5800_s24 + $0x151] sm:$0xff]  ;;  %v556_v42 = vadd.f32 %v4117_v14, %v491_v16  ;;  %v557_v43 = vadd.f32 %v4118_v15, %v492_v17  ;;  %v5894_v44 = vld [vmem:[%s5800_s24 + $0x159] sm:$0xff] }
  0x18   : > { %5669 = vmatpush.bf16.msra.mxu1 %v5418_v10  ;;  %5670 = vmatpush.bf16.msra.mxu2 %v5418_v10  ;;  %v5897_v45 = vld [vmem:[%s5800_s24 + $0x169] sm:$0xff]  ;;  %v5900_v46 = vld [vmem:[%s5800_s24 + $0x171] sm:$0xff]  ;;  %v5906_v48 = vld [vmem:[%s5800_s24 + $0x181] sm:$0xff] }
  0x19   : > { %5671 = vmatpush.bf16.msra.mxu3 %v5418_v10  ;;  %2998 = vmatpush.bf16.msra.mxu0 %v5418_v10  ;;  %v5903_v47 = vld [vmem:[%s5800_s24 + $0x129] sm:$0xff]  ;;  %v5636_v60 = vld [vmem:[%s5779_s15 + $0x38] sm:$0xff]   ;;  %v5633_v4 = vld [vmem:[%s5779_s15 + $0x20] sm:$0xff]  }
  0x1a   : > { %v5909_v49 = vld [vmem:[%s5800_s24 + $0x189] sm:$0xff]  ;;  %v5640_v62 = vld [vmem:[%s5779_s15 + $0x58] sm:$0xff]   ;;  %v5516_v63 = vunpack.c.l.bf16 %v5636_v60  ;;  %v5517_v0 = vunpack.c.h.bf16 %v5636_v60  ;;  %v5637_v8 = vld [vmem:[%s5779_s15 + $0x40] sm:$0xff]   ;;  %v5504_v10 = vunpack.c.l.bf16 %v5633_v4  ;;  %v5505_v12 = vunpack.c.h.bf16 %v5633_v4 }
  0x1b   : > { %4149 = vst [vmem:[%s5873_s13 + $0x61] sm:$0xff] %v556_v42  ;;  %v5532_v1 = vunpack.c.l.bf16 %v5640_v62  ;;  %v5533_v3 = vunpack.c.h.bf16 %v5640_v62  ;;  %v5520_v15 = vunpack.c.l.bf16 %v5637_v8  ;;  %v5521_v16 = vunpack.c.h.bf16 %v5637_v8  ;;  %v5436_v60 = vld [vmem:[%s6882_s4 + $0xb0] sm:$0xff]  ;;  %v5487_v8 = vld [vmem:[%s5779_s15] sm:$0xff]  }
  0x1c   : > { %5672 = vmatpush.bf16.msra.mxu1 %v5417_v13  ;;  %5673 = vmatpush.bf16.msra.mxu2 %v5417_v13  ;;  %4150 = vst [vmem:[%s5873_s13 + $0x69] sm:$0xff] %v557_v43  ;;  %v431_v5 = vmul.f32 %v5784_v2, %v5516_v63  ;;  %v432_v6 = vmul.f32 %v5784_v2, %v5517_v0  ;;  %v5641_v43 = vld [vmem:[%s5779_s15 + $0x60] sm:$0xff]  }
  0x1d   : > { %5674 = vmatpush.bf16.msra.mxu3 %v5417_v13  ;;  %2999 = vmatpush.bf16.msra.mxu0 %v5417_v13  ;;  %4181 = vst [vmem:[%s5873_s13 + $0x60] sm:$0x1] %v5709_v51  ;;  %v439_v9 = vmul.f32 %v5784_v2, %v5532_v1  ;;  %v440_v11 = vmul.f32 %v5784_v2, %v5533_v3  ;;  %v5536_v63 = vunpack.c.l.bf16 %v5641_v43  ;;  %v5537_v0 = vunpack.c.h.bf16 %v5641_v43  ;;  %v5428_v3 = vld [vmem:[%s6882_s4 + $0x70] sm:$0xff] }
  0x1e   : > { %615 = vst [vmem:[%s5873_s13] sm:$0xff] %v5709_v51  ;;  %v467_v13 = vadd.f32 %v5793_v7, %v431_v5  ;;  %v468_v14 = vadd.f32 %v5793_v7, %v432_v6  ;;  %v425_v42 = vmul.f32 %v5784_v2, %v5504_v10  ;;  %v434_v62 = vmul.f32 %v5784_v2, %v5521_v16 }
  0x1f   : > { %616 = vst [vmem:[%s5873_s13 + $0x8] sm:$0xff] %v5709_v51  ;;  %v475_v17 = vadd.f32 %v5793_v7, %v439_v9 }
  0x20   : > { %5675 = vmatpush.bf16.msra.mxu1 %v5416_v50  ;;  %5676 = vmatpush.bf16.msra.mxu2 %v5416_v50  ;;  %617 = vst [vmem:[%s5873_s13 + $0x10] sm:$0x3] %v5709_v51  ;;  %v461_v4 = vadd.f32 %v5793_v7, %v425_v42  ;;  %v5634_v42 = vld [vmem:[%s5779_s15 + $0x28] sm:$0xff]  }
  0x21   : > { %5677 = vmatpush.bf16.msra.mxu3 %v5416_v50  ;;  %3000 = vmatpush.bf16.msra.mxu0 %v5416_v50  ;;  %4175 = vst [vmem:[%s5873_s13 + $0x198] sm:$0xff] %v5709_v51  ;;  %v476_v50 = vadd.f32 %v5793_v7, %v440_v11  ;;  %v507_v1 = vmax.f32 %v475_v17, 0.0 }
  0x22   : > { %4176 = vst [vmem:[%s5873_s13 + $0x1a0] sm:$0xff] %v5709_v51 }
  0x23   : > { %v663_v54 = vld [vmem:[%s5873_s13 + $0x68] sm:$0xff]  ;;  %4177 = vst [vmem:[%s5873_s13 + $0x1a8] sm:$0x3] %v5709_v51  ;;  %v508_v5 = vmax.f32 %v476_v50, 0.0  ;;  %v5489_v50 = vunpack.c.h.bf16 %v5487_v8 }
  0x24   : > { %5678 = vmatpush.bf16.msra.mxu1 %v5415_v52  ;;  %5679 = vmatpush.bf16.msra.mxu2 %v5415_v52  ;;  %v662_v55 = vld [vmem:[%s5873_s13 + $0x60] sm:$0xff]  ;;  %v695_v56 = vpack.c.bf16 %v663_v54, %v663_v54  ;;  %4178 = vst [vmem:[%s5873_s13 + $0x18] sm:$0x1] %v5709_v51  ;;  %v5429_v54 = vld [vmem:[%s6882_s4 + $0x78] sm:$0xff] }
  0x25   : > { %5680 = vmatpush.bf16.msra.mxu3 %v5415_v52  ;;  %3001 = vmatpush.bf16.msra.mxu0 %v5415_v52  ;;  %v694_v57 = vpack.c.bf16 %v662_v55, %v662_v55  ;;  %4179 = vst [vmem:[%s5873_s13 + $0x30] sm:$0x1] %v5709_v51  ;;  %v5437_v52 = vld [vmem:[%s6882_s4 + $0xb8] sm:$0xff]  ;;  %v426_v55 = vmul.f32 %v5784_v2, %v5505_v12 }
  0x26   : > { %727 = vst [vmem:[#allocation2 + $0x144] sm:$0xf] %v695_v56  ;;  %v499_v56 = vmax.f32 %v467_v13, 0.0  ;;  %v470_v12 = vadd.f32 %v5793_v7, %v434_v62  ;;  %v441_v13 = vmul.f32 %v5784_v2, %v5536_v63  ;;  %v573_v16 = vadd.f32 %v5903_v47, %v508_v5  ;;  %v5642_v63 = vld [vmem:[%s5779_s15 + $0x68] sm:$0xff]  }
  0x27   : > { %726 = vst [vmem:[#allocation2 + $0x120] sm:$0xf] %v694_v57  ;;  %v500_v57 = vmax.f32 %v468_v14, 0.0  ;;  %v462_v6 = vadd.f32 %v5793_v7, %v426_v55  ;;  %v442_v14 = vmul.f32 %v5784_v2, %v5537_v0  ;;  %v5508_v47 = vunpack.c.l.bf16 %v5634_v42 }
  0x28   : > { %5681 = vmatpush.bf16.msra.mxu1 %v5414_v53  ;;  %5682 = vmatpush.bf16.msra.mxu2 %v5414_v53  ;;  %4180 = vst [vmem:[%s5873_s13 + $0x48] sm:$0x1] %v5709_v51  ;;  %v564_v9 = vadd.f32 %v5876_v36, %v499_v56  ;;  %v572_v36 = vadd.f32 %v5882_v38, %v507_v1  ;;  %v5509_v56 = vunpack.c.h.bf16 %v5634_v42 }
  0x29   : > { %5683 = vmatpush.bf16.msra.mxu3 %v5414_v53  ;;  %3002 = vmatpush.bf16.msra.mxu0 %v5414_v53  ;;  %4182 = vst [vmem:[%s5873_s13 + $0x78] sm:$0x1] %v5709_v51  ;;  %v5445_v53 = vld [vmem:[%s6882_s4 + $0xf8] sm:$0xff]  ;;  %v565_v10 = vadd.f32 %v5879_v37, %v500_v57  ;;  %v493_v37 = vmax.f32 %v461_v4, 0.0  ;;  %v494_v17 = vmax.f32 %v462_v6, 0.0  ;;  %v478_v38 = vadd.f32 %v5793_v7, %v442_v14  ;;  %v5638_v57 = vld [vmem:[%s5779_s15 + $0x48] sm:$0xff]  }
  0x2a   : > { %4183 = vst [vmem:[%s5873_s13 + $0x90] sm:$0x1] %v5709_v51  ;;  %v427_v0 = vmul.f32 %v5784_v2, %v5508_v47  ;;  %v5525_v4 = vunpack.c.h.bf16 %v5638_v57 }
  0x2b   : > { %4184 = vst [vmem:[%s5873_s13 + $0xa8] sm:$0x1] %v5709_v51  ;;  %v559_v55 = vadd.f32 %v5836_v25, %v494_v17  ;;  %v510_v62 = vmax.f32 %v478_v38, 0.0  ;;  %v5442_v38 = vld [vmem:[%s6882_s4 + $0xe0] sm:$0xff] }
  0x2c   : > { %4185 = vst [vmem:[%s5873_s13 + $0xc0] sm:$0x1] %v5709_v51  ;;  %3173 = vmatpush.bf16.msrb.mxu2 %v5437_v52  ;;  %3084 = vmatpush.bf16.msrb.mxu1 %v5429_v54  ;;  %v502_v52 = vmax.f32 %v470_v12, 0.0  ;;  %v558_v54 = vadd.f32 %v5833_v24, %v493_v37  ;;  %v5452_v37 = vld [vmem:[%s6882_s4 + $0x130] sm:$0xff] }
  0x2d   : > { %v5310_v58 = vld [vmem:[#allocation2 + $0x140] sm:$0xf0]  ;;  %4186 = vst [vmem:[%s5873_s13 + $0xd8] sm:$0x1] %v5709_v51  ;;  %3262 = vmatpush.bf16.msrb.mxu3 %v5445_v53  ;;  %v477_v53 = vadd.f32 %v5793_v7, %v441_v13  ;;  %v575_v14 = vadd.f32 %v5888_v40, %v510_v62 }
  0x2e   : > { %v4548_v59 = vld [vmem:[#allocation2 + $0x120] sm:$0xf]  ;;  %4187 = vst [vmem:[%s5873_s13 + $0xf0] sm:$0x1] %v5709_v51  ;;  %v567_v24 = vadd.f32 %v5854_v31, %v502_v52  ;;  %v428_v31 = vmul.f32 %v5784_v2, %v5509_v56 }
  0x2f   : > { %v4549_v61 = vor.u32 %v5310_v58, %v4548_v59  ;;  %4188 = vst [vmem:[%s5873_s13 + $0x108] sm:$0x1] %v5709_v51  ;;  %v5453_v58 = vld [vmem:[%s6882_s4 + $0x138] sm:$0xff]  ;;  %v433_v59 = vmul.f32 %v5784_v2, %v5520_v15  ;;  %v5488_v15 = vunpack.c.l.bf16 %v5487_v8  ;;  %v5434_v40 = vld [vmem:[%s6882_s4 + $0xa0] sm:$0xff] }
  0x30   : > { %4189 = vst [vmem:[%s5873_s13 + $0x120] sm:$0x1] %v5709_v51  ;;  %3351 = vmatpush.bf16.msrb.mxu0 %v5453_v58  ;;  %3174 = vmatpush.bf16.msrb.mxu2 %v5436_v60  ;;  %v5710_v58 = vmov 0.0|0.0   ;;  %v418_v60 = vmul.f32 %v5784_v2, %v5489_v50  ;;  %v5426_v56 = vld [vmem:[%s6882_s4 + $0x60] sm:$0xff] }
  0x31   : > { %3023 = vmatmul.bf16.vlgmr.msra.gmra.mxu1 %v4549_v61  ;;  %4190 = vst [vmem:[%s5873_s13 + $0x138] sm:$0x1] %v5709_v51  ;;  %v5444_v61 = vld [vmem:[%s6882_s4 + $0xf0] sm:$0xff]  ;;  %v469_v11 = vadd.f32 %v5793_v7, %v433_v59 }
  0x32   : > { %4191 = vst [vmem:[%s5873_s13 + $0x150] sm:$0x1] %v5709_v51  ;;  %3263 = vmatpush.bf16.msrb.mxu3 %v5444_v61  ;;  %3085 = vmatpush.bf16.msrb.mxu1 %v5428_v3  ;;  %v509_v61 = vmax.f32 %v477_v53, 0.0  ;;  %v5435_v3 = vld [vmem:[%s6882_s4 + $0xa8] sm:$0xff]  ;;  %v6078_v8 = vadd.f32 %v5793_v7, %v418_v60 }
  0x33   : > { %4192 = vst [vmem:[%s5873_s13 + $0x168] sm:$0x1] %v5709_v51  ;;  %v501_v43 = vmax.f32 %v469_v11, 0.0 }
  0x34   : > { %4193 = vst [vmem:[%s5873_s13 + $0x180] sm:$0x1] %v5709_v51  ;;  %v574_v13 = vadd.f32 %v5885_v39, %v509_v61  ;;  %3175 = vmatpush.bf16.msrb.mxu2 %v5435_v3  ;;  %v5427_v39 = vld [vmem:[%s6882_s4 + $0x68] sm:$0xff]  ;;  %3352 = vmatpush.bf16.msrb.mxu0 %v5452_v37  ;;  %v486_v60 = vmax.f32 %v6078_v8, 0.0 }
  0x35   : > { %4194 = vst [vmem:[%s5873_s13 + $0x29] sm:$0x1] %v5709_v51  ;;  %v566_v59 = vadd.f32 %v5851_v30, %v501_v43  ;;  %v5524_v30 = vunpack.c.l.bf16 %v5638_v57  ;;  %v463_v43 = vadd.f32 %v5793_v7, %v427_v0 }
  0x36   : > { %4195 = vst [vmem:[%s5873_s13 + $0x41] sm:$0x1] %v5709_v51  ;;  %3086 = vmatpush.bf16.msrb.mxu1 %v5427_v39 }
  0x37   : > { %4196 = vst [vmem:[%s5873_s13 + $0x59] sm:$0x1] %v5709_v51  ;;  %v435_v50 = vmul.f32 %v5784_v2, %v5524_v30 }
  0x38   : > { %4197 = vst [vmem:[%s5873_s13 + $0x71] sm:$0x1] %v5709_v51  ;;  %3176 = vmatpush.bf16.msrb.mxu2 %v5434_v40 }
  0x39   : > { %4198 = vst [vmem:[%s5873_s13 + $0x89] sm:$0x1] %v5709_v51  ;;  %v471_v0 = vadd.f32 %v5793_v7, %v435_v50 }
  0x3a   : > { %4199 = vst [vmem:[%s5873_s13 + $0xa1] sm:$0x1] %v5709_v51  ;;  %3087 = vmatpush.bf16.msrb.mxu1 %v5426_v56 }
  0x3b   : > { %4200 = vst [vmem:[%s5873_s13 + $0xb9] sm:$0x1] %v5709_v51 }
  0x3c   : > { %4201 = vst [vmem:[%s5873_s13 + $0xd1] sm:$0x1] %v5709_v51 }
  0x3d   : > { %4202 = vst [vmem:[%s5873_s13 + $0xe9] sm:$0x1] %v5709_v51 }
  0x3e   : > { %4203 = vst [vmem:[%s5873_s13 + $0x101] sm:$0x1] %v5709_v51 }
  0x3f   : > { %4204 = vst [vmem:[%s5873_s13 + $0x119] sm:$0x1] %v5709_v51 }
  0x40   : > { %4205 = vst [vmem:[%s5873_s13 + $0x131] sm:$0x1] %v5709_v51 }
  0x41   : > { %4206 = vst [vmem:[%s5873_s13 + $0x149] sm:$0x1] %v5709_v51 }
  0x42   : > { %4207 = vst [vmem:[%s5873_s13 + $0x161] sm:$0x1] %v5709_v51 }
  0x43   : > { %4208 = vst [vmem:[%s5873_s13 + $0x179] sm:$0x1] %v5709_v51 }
  0x44   : > { %4209 = vst [vmem:[%s5873_s13 + $0x191] sm:$0x1] %v5709_v51  ;;  %v417_v51 = vmul.f32 %v5784_v2, %v5488_v15  ;;  %v5541_v15 = vunpack.c.h.bf16 %v5642_v63 }
  0x45   : > { %4157 = vst [vmem:[%s5873_s13 + $0xc1] sm:$0xff] %v564_v9  ;;  %v5540_v9 = vunpack.c.l.bf16 %v5642_v63 }
  0x46   : > { %4158 = vst [vmem:[%s5873_s13 + $0xc9] sm:$0xff] %v565_v10  ;;  %v6066_v25 = vadd.f32 %v5793_v7, %v417_v51  ;;  %v6081_v10 = vld [vmem:[%s5779_s15 + $0x8] sm:$0xff]   ;;  %v436_v51 = vmul.f32 %v5784_v2, %v5525_v4 }
  0x47   : > { %4165 = vst [vmem:[%s5873_s13 + $0x121] sm:$0xff] %v572_v36  ;;  %v5443_v36 = vld [vmem:[%s6882_s4 + $0xe8] sm:$0xff]  ;;  %v443_v57 = vmul.f32 %v5784_v2, %v5540_v9  ;;  %v5492_v61 = vunpack.c.l.bf16 %v6081_v10  ;;  %v5493_v30 = vunpack.c.h.bf16 %v6081_v10 }
  0x48   : > { %4166 = vst [vmem:[%s5873_s13 + $0x129] sm:$0xff] %v573_v16  ;;  %v485_v42 = vmax.f32 %v6066_v25, 0.0  ;;  %3264 = vmatpush.bf16.msrb.mxu3 %v5443_v36  ;;  %v495_v25 = vmax.f32 %v463_v43, 0.0  ;;  %v472_v4 = vadd.f32 %v5793_v7, %v436_v51  ;;  %v5639_v43 = vld [vmem:[%s5779_s15 + $0x50] sm:$0xff]  }
  0x49   : > { %718 = vst [vmem:[#allocation2] sm:$0xf] %v5710_v58  ;;  %v479_v9 = vadd.f32 %v5793_v7, %v443_v57  ;;  %v419_v36 = vmul.f32 %v5784_v2, %v5492_v61  ;;  %v5528_v57 = vunpack.c.l.bf16 %v5639_v43 }
  0x4a   : > { %719 = vst [vmem:[#allocation2 + $0x24] sm:$0xf] %v5710_v58  ;;  %v6128_v8 = vadd.f32 %v5815_v18, %v485_v42  ;;  %v560_v18 = vadd.f32 %v5839_v26, %v495_v25  ;;  %v504_v39 = vmax.f32 %v472_v4, 0.0 }
  0x4b   : > { %4151 = vst [vmem:[%s5873_s13 + $0x79] sm:$0xff] %v558_v54  ;;  %v464_v54 = vadd.f32 %v5793_v7, %v428_v31 }
  0x4c   : > { %v670_v1 = vld [vmem:[%s5873_s13 + $0xc0] sm:$0xff]  ;;  %4152 = vst [vmem:[%s5873_s13 + $0x81] sm:$0xff] %v559_v55  ;;  %v5451_v55 = vld [vmem:[%s6882_s4 + $0x128] sm:$0xff]  ;;  %3265 = vmatpush.bf16.msrb.mxu3 %v5442_v38 }
  0x4d   : > { %v671_v5 = vld [vmem:[%s5873_s13 + $0xc8] sm:$0xff]  ;;  %v702_v6 = vpack.c.bf16 %v670_v1, %v670_v1  ;;  %4159 = vst [vmem:[%s5873_s13 + $0xd9] sm:$0xff] %v566_v59  ;;  %v496_v31 = vmax.f32 %v464_v54, 0.0  ;;  %3353 = vmatpush.bf16.msrb.mxu0 %v5451_v55  ;;  %v455_v54 = vadd.f32 %v5793_v7, %v419_v36 }
  0x4e   : > { %v703_v11 = vpack.c.bf16 %v671_v5, %v671_v5  ;;  %v678_v12 = vld [vmem:[%s5873_s13 + $0x120] sm:$0xff]  ;;  %4160 = vst [vmem:[%s5873_s13 + $0xe1] sm:$0xff] %v567_v24  ;;  %v444_v24 = vmul.f32 %v5784_v2, %v5541_v15  ;;  %v503_v15 = vmax.f32 %v471_v0, 0.0 }
  0x4f   : > { %734 = vst [vmem:[#allocation2 + $0x240] sm:$0xf] %v702_v6  ;;  %v679_v16 = vld [vmem:[%s5873_s13 + $0x128] sm:$0xff]  ;;  %v710_v17 = vpack.c.bf16 %v678_v12, %v678_v12 }
  0x50   : > { %735 = vst [vmem:[#allocation2 + $0x264] sm:$0xf] %v703_v11  ;;  %v711_v52 = vpack.c.bf16 %v679_v16, %v679_v16  ;;  %v4404_v53 = vld [vmem:[#allocation2] sm:$0xf]  ;;  %v5635_v11 = vld [vmem:[%s5779_s15 + $0x30] sm:$0xff]   ;;  %v420_v16 = vmul.f32 %v5784_v2, %v5493_v30  ;;  %v568_v55 = vadd.f32 %v5857_v32, %v503_v15  ;;  %v487_v30 = vmax.f32 %v455_v54, 0.0 }
  0x51   : > { %742 = vst [vmem:[#allocation2 + $0x360] sm:$0xf] %v710_v17  ;;  %v5274_v47 = vld [vmem:[#allocation2 + $0x20] sm:$0xf0]  ;;  %v5512_v40 = vunpack.c.l.bf16 %v5635_v11  ;;  %v5513_v51 = vunpack.c.h.bf16 %v5635_v11  ;;  %v5449_v15 = vld [vmem:[%s6882_s4 + $0x118] sm:$0xff] }
  0x52   : > { %743 = vst [vmem:[#allocation2 + $0x384] sm:$0xf] %v711_v52  ;;  %v4405_v58 = vor.u32 %v5274_v47, %v4404_v53  ;;  %v664_v59 = vld [vmem:[%s5873_s13 + $0x78] sm:$0xff]  ;;  %v511_v52 = vmax.f32 %v479_v9, 0.0  ;;  %v456_v56 = vadd.f32 %v5793_v7, %v420_v16  ;;  %v5424_v16 = vld [vmem:[%s6882_s4 + $0x50] sm:$0xff] }
  0x53   : > { %v665_v62 = vld [vmem:[%s5873_s13 + $0x80] sm:$0xff]  ;;  %v696_v63 = vpack.c.bf16 %v664_v59, %v664_v59  ;;  %4167 = vst [vmem:[%s5873_s13 + $0x139] sm:$0xff] %v574_v13  ;;  %v6133_v13 = vadd.f32 %v5818_v19, %v486_v60  ;;  %v561_v19 = vadd.f32 %v5842_v27, %v496_v31  ;;  %v569_v60 = vadd.f32 %v5860_v33, %v504_v39 }
  0x54   : > { %3003 = vmatmul.bf16.vlgmr.msra.gmra.mxu0 %v4405_v58  ;;  %v697_v1 = vpack.c.bf16 %v665_v62, %v665_v62  ;;  %v672_v3 = vld [vmem:[%s5873_s13 + $0xd8] sm:$0xff]  ;;  %4168 = vst [vmem:[%s5873_s13 + $0x141] sm:$0xff] %v575_v14  ;;  %v480_v14 = vadd.f32 %v5793_v7, %v444_v24  ;;  %v429_v61 = vmul.f32 %v5784_v2, %v5512_v40  ;;  %v5529_v62 = vunpack.c.h.bf16 %v5639_v43 }
  0x55   : > { %728 = vst [vmem:[#allocation2 + $0x168] sm:$0xf] %v696_v63  ;;  %v673_v5 = vld [vmem:[%s5873_s13 + $0xe0] sm:$0xff]  ;;  %v704_v6 = vpack.c.bf16 %v672_v3, %v672_v3  ;;  %v5433_v24 = vld [vmem:[%s6882_s4 + $0x98] sm:$0xff]  ;;  %v5643_v63 = vld [vmem:[%s5779_s15 + $0x70] sm:$0xff]   ;;  %v576_v25 = vadd.f32 %v5891_v41, %v511_v52  ;;  %v430_v31 = vmul.f32 %v5784_v2, %v5513_v51  ;;  %v488_v4 = vmax.f32 %v456_v56, 0.0 }
  0x56   : > { %v4692_v10 = vld [vmem:[#allocation2 + $0x240] sm:$0xf]  ;;  %729 = vst [vmem:[#allocation2 + $0x18c] sm:$0xf] %v697_v1  ;;  %v705_v12 = vpack.c.bf16 %v673_v5, %v673_v5  ;;  %v512_v38 = vmax.f32 %v480_v14, 0.0  ;;  %3177 = vmatpush.bf16.msrb.mxu2 %v5433_v24  ;;  %v5441_v1 = vld [vmem:[%s6882_s4 + $0xd8] sm:$0xff]  ;;  %v5544_v9 = vunpack.c.l.bf16 %v5643_v63  ;;  %v438_v14 = vmul.f32 %v5784_v2, %v5529_v62 }
  0x57   : > { %v5346_v37 = vld [vmem:[#allocation2 + $0x260] sm:$0xf0]  ;;  %736 = vst [vmem:[#allocation2 + $0x288] sm:$0xf] %v704_v6  ;;  %v5631_v41 = vld [vmem:[%s5779_s15 + $0x10] sm:$0xff]   ;;  %v437_v6 = vmul.f32 %v5784_v2, %v5528_v57  ;;  %3266 = vmatpush.bf16.msrb.mxu3 %v5441_v1  ;;  %v5545_v36 = vunpack.c.h.bf16 %v5643_v63  ;;  %v6198_v40 = vadd.f32 %v5821_v20, %v487_v30  ;;  %v466_v43 = vadd.f32 %v5793_v7, %v430_v31 }
  0x58   : > { %v4693_v17 = vor.u32 %v5346_v37, %v4692_v10  ;;  %v4836_v42 = vld [vmem:[#allocation2 + $0x360] sm:$0xf]  ;;  %737 = vst [vmem:[#allocation2 + $0x2ac] sm:$0xf] %v705_v12  ;;  %v577_v33 = vadd.f32 %v5894_v44, %v512_v38  ;;  %v5425_v44 = vld [vmem:[%s6882_s4 + $0x58] sm:$0xff]  ;;  %v5432_v5 = vld [vmem:[%s6882_s4 + $0x90] sm:$0xff]  ;;  %v465_v12 = vadd.f32 %v5793_v7, %v429_v61  ;;  %v6204_v38 = vadd.f32 %v5824_v21, %v488_v4 }
  0x59   : > { %v5382_v50 = vld [vmem:[#allocation2 + $0x380] sm:$0xf0]  ;;  %4143 = vst [vmem:[%s5873_s13 + $0x19] sm:$0xff] %v6128_v8  ;;  %v5440_v10 = vld [vmem:[%s6882_s4 + $0xd0] sm:$0xff]  ;;  %3088 = vmatpush.bf16.msrb.mxu1 %v5425_v44  ;;  %v473_v54 = vadd.f32 %v5793_v7, %v437_v6  ;;  %v445_v51 = vmul.f32 %v5784_v2, %v5544_v9 }
  0x5a   : > { %3043 = vmatmul.bf16.vlgmr.msra.gmra.mxu2 %v4693_v17  ;;  %v4837_v26 = vor.u32 %v5382_v50, %v4836_v42  ;;  %v680_v53 = vld [vmem:[%s5873_s13 + $0x138] sm:$0xff]  ;;  %4144 = vst [vmem:[%s5873_s13 + $0x21] sm:$0xff] %v6133_v13  ;;  %v5450_v3 = vld [vmem:[%s6882_s4 + $0x120] sm:$0xff]  ;;  %v5496_v17 = vunpack.c.l.bf16 %v5631_v41  ;;  %v5497_v50 = vunpack.c.h.bf16 %v5631_v41 }
  0x5b   : > { %v681_v27 = vld [vmem:[%s5873_s13 + $0x140] sm:$0xff]  ;;  %v712_v47 = vpack.c.bf16 %v680_v53, %v680_v53  ;;  %4153 = vst [vmem:[%s5873_s13 + $0x91] sm:$0xff] %v560_v18  ;;  %3354 = vmatpush.bf16.msrb.mxu0 %v5450_v3  ;;  %3178 = vmatpush.bf16.msrb.mxu2 %v5432_v5  ;;  %v505_v63 = vmax.f32 %v473_v54, 0.0 }
  0x5c   : > { %3063 = vmatmul.bf16.vlgmr.msra.gmra.mxu3 %v4837_v26  ;;  %v4584_v58 = vld [vmem:[#allocation2 + $0x168] sm:$0xf]  ;;  %v713_v59 = vpack.c.bf16 %v681_v27, %v681_v27  ;;  %4154 = vst [vmem:[%s5873_s13 + $0x99] sm:$0xff] %v561_v19  ;;  %v497_v27 = vmax.f32 %v465_v12, 0.0  ;;  %v421_v21 = vmul.f32 %v5784_v2, %v5496_v17  ;;  %v422_v24 = vmul.f32 %v5784_v2, %v5497_v50  ;;  %v5448_v17 = vld [vmem:[%s6882_s4 + $0x110] sm:$0xff] }
  0x5d   : > { %v5319_v32 = vld [vmem:[#allocation2 + $0x188] sm:$0xf0]  ;;  %744 = vst [vmem:[#allocation2 + $0x3a8] sm:$0xf] %v712_v47  ;;  %3267 = vmatpush.bf16.msrb.mxu3 %v5440_v10  ;;  %v474_v47 = vadd.f32 %v5793_v7, %v438_v14  ;;  %3089 = vmatpush.bf16.msrb.mxu1 %v5424_v16 }
  0x5e   : > { %v4585_v0 = vor.u32 %v5319_v32, %v4584_v58  ;;  %745 = vst [vmem:[#allocation2 + $0x3cc] sm:$0xf] %v713_v59  ;;  %v4728_v42 = vld [vmem:[#allocation2 + $0x288] sm:$0xf]  ;;  %v481_v32 = vadd.f32 %v5793_v7, %v445_v51  ;;  %v457_v41 = vadd.f32 %v5793_v7, %v421_v21  ;;  %v458_v6 = vadd.f32 %v5793_v7, %v422_v24  ;;  %v5422_v51 = vld [vmem:[%s6882_s4 + $0x40] sm:$0xff] }
  0x5f   : > { %4161 = vst [vmem:[%s5873_s13 + $0xf1] sm:$0xff] %v568_v55  ;;  %v5355_v52 = vld [vmem:[#allocation2 + $0x2a8] sm:$0xf0]  ;;  %v446_v55 = vmul.f32 %v5784_v2, %v5545_v36  ;;  %3355 = vmatpush.bf16.msrb.mxu0 %v5449_v15  ;;  %v506_v30 = vmax.f32 %v474_v47, 0.0  ;;  %v6224_v2 = vadd.f32 %v5845_v28, %v497_v27  ;;  %v5446_v47 = vld [vmem:[%s6882_s4 + $0x100] sm:$0xff] }
  0x60   : > { %3028 = vmatmul.bf16.gmra.mxu1 %v4585_v0  ;;  %v656_v11 = vld [vmem:[%s5873_s13 + $0x18] sm:$0xff]  ;;  %4162 = vst [vmem:[%s5873_s13 + $0xf9] sm:$0xff] %v569_v60  ;;  %v4729_v58 = vor.u32 %v5355_v52, %v4728_v42  ;;  %v498_v60 = vmax.f32 %v466_v43, 0.0  ;;  %v513_v28 = vmax.f32 %v481_v32, 0.0  ;;  %v490_v16 = vmax.f32 %v458_v6, 0.0  ;;  %v5423_v50 = vld [vmem:[%s6882_s4 + $0x48] sm:$0xff] }
  0x61   : > { %v657_v37 = vld [vmem:[%s5873_s13 + $0x20] sm:$0xff]  ;;  %v6184_v18 = vpack.c.bf16 %v656_v11, %v656_v11  ;;  %4169 = vst [vmem:[%s5873_s13 + $0x151] sm:$0xff] %v576_v25  ;;  %v482_v1 = vadd.f32 %v5793_v7, %v446_v55  ;;  %v570_v11 = vadd.f32 %v5863_v34, %v505_v63  ;;  %v571_v14 = vadd.f32 %v5866_v35, %v506_v30  ;;  %v5431_v7 = vld [vmem:[%s6882_s4 + $0x88] sm:$0xff] }
  0x62   : > { %v6193_v19 = vpack.c.bf16 %v657_v37, %v657_v37  ;;  %v666_v39 = vld [vmem:[%s5873_s13 + $0x90] sm:$0xff]  ;;  %4170 = vst [vmem:[%s5873_s13 + $0x159] sm:$0xff] %v577_v33  ;;  %v6228_v5 = vadd.f32 %v5848_v29, %v498_v60  ;;  %v489_v37 = vmax.f32 %v457_v41, 0.0  ;;  %3179 = vmatpush.bf16.msrb.mxu2 %v5431_v7  ;;  %v5439_v35 = vld [vmem:[%s6882_s4 + $0xc8] sm:$0xff]  ;;  %v578_v43 = vadd.f32 %v5897_v45, %v513_v28  ;;  %v5430_v52 = vld [vmem:[%s6882_s4 + $0x80] sm:$0xff] }
  0x63   : > { %720 = vst [vmem:[#allocation2 + $0x48] sm:$0xf] %v6184_v18  ;;  %v667_v26 = vld [vmem:[%s5873_s13 + $0x98] sm:$0xff]  ;;  %v698_v53 = vpack.c.bf16 %v666_v39, %v666_v39  ;;  %v514_v36 = vmax.f32 %v482_v1, 0.0  ;;  %3268 = vmatpush.bf16.msrb.mxu3 %v5439_v35  ;;  %v5438_v45 = vld [vmem:[%s6882_s4 + $0xc0] sm:$0xff]  ;;  %3356 = vmatpush.bf16.msrb.mxu0 %v5448_v17  ;;  %v847_v6 = vld [vmem:[%s5873_s13 + $0xa] sm:$0xff]  ;;  %v1070_v17 = vpack.c.bf16 %v6128_v8, %v6128_v8 }
  0x64   : > { %721 = vst [vmem:[#allocation2 + $0x6c] sm:$0xf] %v6193_v19  ;;  %v699_v20 = vpack.c.bf16 %v667_v26, %v667_v26  ;;  %v4872_v56 = vld [vmem:[#allocation2 + $0x3a8] sm:$0xf]  ;;  %v6267_v54 = vadd.f32 %v5827_v22, %v489_v37  ;;  %3090 = vmatpush.bf16.msrb.mxu1 %v5423_v50  ;;  %v5469_v28 = vld [vmem:[%s6882_s4 + $0x1b8] sm:$0xff] }
  0x65   : > { %v5391_v57 = vld [vmem:[#allocation2 + $0x3c8] sm:$0xf0]  ;;  %730 = vst [vmem:[#allocation2 + $0x1b0] sm:$0xf] %v698_v53  ;;  %v579_v53 = vadd.f32 %v5900_v46, %v514_v36  ;;  %v846_v41 = vld [vmem:[%s5873_s13 + $0x2] sm:$0xff]  ;;  %v5477_v37 = vld [vmem:[%s6882_s4 + $0x1f8] sm:$0xff] }
  0x66   : > { %731 = vst [vmem:[#allocation2 + $0x1d4] sm:$0xf] %v699_v20  ;;  %v674_v59 = vld [vmem:[%s5873_s13 + $0xf0] sm:$0xff]  ;;  %v4873_v25 = vor.u32 %v5391_v57, %v4872_v56  ;;  %v5447_v46 = vld [vmem:[%s6882_s4 + $0x108] sm:$0xff]  ;;  %v6277_v20 = vadd.f32 %v5830_v23, %v490_v16  ;;  %3180 = vmatpush.bf16.msrb.mxu2 %v5430_v52  ;;  %v5485_v16 = vld [vmem:[%s6882_s4 + $0x238] sm:$0xff] }
  0x67   : > { %v675_v61 = vld [vmem:[%s5873_s13 + $0xf8] sm:$0xff]  ;;  %v706_v62 = vpack.c.bf16 %v674_v59, %v674_v59  ;;  %4145 = vst [vmem:[%s5873_s13 + $0x31] sm:$0xff] %v6198_v40  ;;  %3269 = vmatpush.bf16.msrb.mxu3 %v5438_v45  ;;  %v750_v57 = vld [vmem:[%s5873_s13 + $0x1] sm:$0xff]  ;;  %3357 = vmatpush.bf16.msrb.mxu0 %v5447_v46  ;;  %v751_v59 = vld [vmem:[%s5873_s13 + $0x9] sm:$0xff] }
  0x68   : > { %v707_v0 = vpack.c.bf16 %v675_v61, %v675_v61  ;;  %v682_v33 = vld [vmem:[%s5873_s13 + $0x150] sm:$0xff]  ;;  %4146 = vst [vmem:[%s5873_s13 + $0x39] sm:$0xff] %v6204_v38  ;;  %3091 = vmatpush.bf16.msrb.mxu1 %v5422_v51  ;;  %v782_v32 = vpack.c.bf16 %v750_v57, %v750_v57  ;;  %v783_v30 = vpack.c.bf16 %v751_v59, %v751_v59  ;;  %v848_v50 = vld [vmem:[%s5873_s13 + $0x1a] sm:$0xff] }
  0x69   : > { %738 = vst [vmem:[#allocation2 + $0x2d0] sm:$0xf] %v706_v62  ;;  %v683_v3 = vld [vmem:[%s5873_s13 + $0x158] sm:$0xff]  ;;  %v714_v31 = vpack.c.bf16 %v682_v33, %v682_v33  ;;  %v880_v51 = vpack.c.bf16 %v848_v50, %v848_v50 }
  0x6a   : > { %3048 = vmatmul.bf16.gmra.mxu2 %v4729_v58  ;;  %v4440_v4 = vld [vmem:[#allocation2 + $0x48] sm:$0xf]  ;;  %739 = vst [vmem:[#allocation2 + $0x2f4] sm:$0xf] %v707_v0  ;;  %v715_v44 = vpack.c.bf16 %v683_v3, %v683_v3 }
  0x6b   : > { %v5283_v9 = vld [vmem:[#allocation2 + $0x68] sm:$0xf0]  ;;  %746 = vst [vmem:[#allocation2 + $0x3f0] sm:$0xf] %v714_v31  ;;  %3358 = vmatpush.bf16.msrb.mxu0 %v5446_v47  ;;  %3529 = vmatpush.bf16.msra.mxu2 %v5469_v28 }
  0x6c   : > { %3068 = vmatmul.bf16.gmra.mxu3 %v4873_v25  ;;  %v4441_v10 = vor.u32 %v5283_v9, %v4440_v4  ;;  %v4620_v12 = vld [vmem:[#allocation2 + $0x1b0] sm:$0xf]  ;;  %747 = vst [vmem:[#allocation2 + $0x414] sm:$0xf] %v715_v44 }
  0x6d   : > { %v5328_v29 = vld [vmem:[#allocation2 + $0x1d0] sm:$0xf0]  ;;  %4155 = vst [vmem:[%s5873_s13 + $0xa9] sm:$0xff] %v6224_v2  ;;  %3618 = vmatpush.bf16.msra.mxu3 %v5477_v37 }
  0x6e   : > { %3008 = vmatmul.bf16.gmra.mxu0 %v4441_v10  ;;  %v4621_v34 = vor.u32 %v5328_v29, %v4620_v12  ;;  %v658_v15 = vld [vmem:[%s5873_s13 + $0x30] sm:$0xff]  ;;  %4156 = vst [vmem:[%s5873_s13 + $0xb1] sm:$0xff] %v6228_v5  ;;  %v879_v29 = vpack.c.bf16 %v847_v6, %v847_v6  ;;  %v4216_v6 = vld [vmem:[%s5873_s13 + $0x60] sm:$0xff] }
  0x6f   : > { %v659_v42 = vld [vmem:[%s5873_s13 + $0x38] sm:$0xff]  ;;  %v6248_v39 = vpack.c.bf16 %v658_v15, %v658_v15  ;;  %4163 = vst [vmem:[%s5873_s13 + $0x109] sm:$0xff] %v570_v11  ;;  %3707 = vmatpush.bf16.msra.mxu0 %v5485_v16  ;;  %v980_v28 = vpack.c.bf16 %v4216_v6, %v4216_v6 }
  0x70   : > { %3033 = vmatmul.bf16.gmra.mxu1 %v4621_v34  ;;  %v6258_v26 = vpack.c.bf16 %v659_v42, %v659_v42  ;;  %4164 = vst [vmem:[%s5873_s13 + $0x111] sm:$0xff] %v571_v14  ;;  %v4764_v22 = vld [vmem:[#allocation2 + $0x2d0] sm:$0xf]  ;;  %v878_v14 = vpack.c.bf16 %v846_v41, %v846_v41  ;;  %v5461_v34 = vld [vmem:[%s6882_s4 + $0x178] sm:$0xff] }
  0x71   : > { %722 = vst [vmem:[#allocation2 + $0x90] sm:$0xf] %v6248_v39  ;;  %v5364_v27 = vld [vmem:[#allocation2 + $0x2f0] sm:$0xf0]  ;;  %3440 = vmatpush.bf16.msra.mxu1 %v5461_v34 }
  0x72   : > { %723 = vst [vmem:[#allocation2 + $0xb4] sm:$0xf] %v6258_v26  ;;  %v4908_v55 = vld [vmem:[#allocation2 + $0x3f0] sm:$0xf]  ;;  %v4765_v60 = vor.u32 %v5364_v27, %v4764_v22 }
  0x73   : > { %4171 = vst [vmem:[%s5873_s13 + $0x169] sm:$0xff] %v578_v43  ;;  %v5400_v21 = vld [vmem:[#allocation2 + $0x410] sm:$0xf0]  ;;  %v1071_v43 = vpack.c.bf16 %v6133_v13, %v6133_v13  ;;  %v1072_v13 = vpack.c.bf16 %v6198_v40, %v6198_v40 }
  0x74   : > { %v668_v56 = vld [vmem:[%s5873_s13 + $0xa8] sm:$0xff]  ;;  %4172 = vst [vmem:[%s5873_s13 + $0x171] sm:$0xff] %v579_v53  ;;  %v4909_v25 = vor.u32 %v5400_v21, %v4908_v55  ;;  %v850_v40 = vld [vmem:[%s5873_s13 + $0x32] sm:$0xff] }
  0x75   : > { %v669_v23 = vld [vmem:[%s5873_s13 + $0xb0] sm:$0xff]  ;;  %v6287_v58 = vpack.c.bf16 %v668_v56, %v668_v56  ;;  %4147 = vst [vmem:[%s5873_s13 + $0x49] sm:$0xff] %v6267_v54  ;;  %v849_v53 = vld [vmem:[%s5873_s13 + $0x22] sm:$0xff]  ;;  %v882_v59 = vpack.c.bf16 %v850_v40, %v850_v40 }
  0x76   : > { %v6292_v24 = vpack.c.bf16 %v669_v23, %v669_v23  ;;  %v676_v61 = vld [vmem:[%s5873_s13 + $0x108] sm:$0xff]  ;;  %4148 = vst [vmem:[%s5873_s13 + $0x51] sm:$0xff] %v6277_v20  ;;  %v881_v8 = vpack.c.bf16 %v849_v53, %v849_v53  ;;  %v851_v23 = vld [vmem:[%s5873_s13 + $0x3a] sm:$0xff] }
  0x77   : > { %732 = vst [vmem:[#allocation2 + $0x1f8] sm:$0xf] %v6287_v58  ;;  %v677_v62 = vld [vmem:[%s5873_s13 + $0x110] sm:$0xff]  ;;  %v708_v63 = vpack.c.bf16 %v676_v61, %v676_v61 }
  0x78   : > { %v4476_v0 = vld [vmem:[#allocation2 + $0x90] sm:$0xf]  ;;  %733 = vst [vmem:[#allocation2 + $0x21c] sm:$0xf] %v6292_v24  ;;  %v709_v33 = vpack.c.bf16 %v677_v62, %v677_v62 }
  0x79   : > { %v5292_v1 = vld [vmem:[#allocation2 + $0xb0] sm:$0xf0]  ;;  %740 = vst [vmem:[#allocation2 + $0x318] sm:$0xf] %v708_v63 }
  0x7a   : > { %3053 = vmatmul.bf16.gmra.mxu2 %v4765_v60  ;;  %v4477_v3 = vor.u32 %v5292_v1, %v4476_v0  ;;  %741 = vst [vmem:[#allocation2 + $0x33c] sm:$0xf] %v709_v33  ;;  %v684_v31 = vld [vmem:[%s5873_s13 + $0x168] sm:$0xff]  ;;  %v883_v60 = vpack.c.bf16 %v851_v23, %v851_v23  ;;  %v5468_v1 = vld [vmem:[%s6882_s4 + $0x1b0] sm:$0xff] }
  0x7b   : > { %v685_v4 = vld [vmem:[%s5873_s13 + $0x170] sm:$0xff]  ;;  %v716_v44 = vpack.c.bf16 %v684_v31, %v684_v31  ;;  %814 = vst [vmem:[#allocation2 + $0x4] sm:$0xf] %v782_v32  ;;  %3530 = vmatpush.bf16.msra.mxu2 %v5468_v1 }
  0x7c   : > { %3073 = vmatmul.bf16.gmra.mxu3 %v4909_v25  ;;  %v717_v9 = vpack.c.bf16 %v685_v4, %v685_v4  ;;  %v660_v11 = vld [vmem:[%s5873_s13 + $0x48] sm:$0xff]  ;;  %815 = vst [vmem:[#allocation2 + $0x28] sm:$0xf] %v783_v30  ;;  %v5484_v31 = vld [vmem:[%s6882_s4 + $0x230] sm:$0xff] }
  0x7d   : > { %748 = vst [vmem:[#allocation2 + $0x438] sm:$0xf] %v716_v44  ;;  %v661_v10 = vld [vmem:[%s5873_s13 + $0x50] sm:$0xff]  ;;  %v692_v12 = vpack.c.bf16 %v660_v11, %v660_v11  ;;  %3708 = vmatpush.bf16.msra.mxu0 %v5484_v31 }
  0x7e   : > { %3013 = vmatmul.bf16.gmra.mxu0 %v4477_v3  ;;  %v4656_v36 = vld [vmem:[#allocation2 + $0x1f8] sm:$0xf]  ;;  %749 = vst [vmem:[#allocation2 + $0x45c] sm:$0xf] %v717_v9  ;;  %v6309_v7 = vpack.c.bf16 %v661_v10, %v661_v10  ;;  %v852_v41 = vld [vmem:[%s5873_s13 + $0x4a] sm:$0xff] }
  0x7f   : > { %v5337_v15 = vld [vmem:[#allocation2 + $0x218] sm:$0xf0]  ;;  %724 = vst [vmem:[#allocation2 + $0xd8] sm:$0xf] %v692_v12  ;;  %v853_v4 = vld [vmem:[%s5873_s13 + $0x52] sm:$0xff]  ;;  %v884_v44 = vpack.c.bf16 %v852_v41, %v852_v41  ;;  %v4217_v9 = vld [vmem:[%s5873_s13 + $0x68] sm:$0xff] }
  0x80   : > { %v4657_v35 = vor.u32 %v5337_v15, %v4656_v36  ;;  %725 = vst [vmem:[#allocation2 + $0xfc] sm:$0xf] %v6309_v7  ;;  %v4800_v42 = vld [vmem:[#allocation2 + $0x318] sm:$0xf]  ;;  %v885_v11 = vpack.c.bf16 %v853_v4, %v853_v4  ;;  %v981_v10 = vpack.c.bf16 %v4217_v9, %v4217_v9 }
  0x81   : > { %910 = vst [vmem:[#allocation2 + $0x8] sm:$0xf] %v878_v14  ;;  %v5373_v52 = vld [vmem:[#allocation2 + $0x338] sm:$0xf0]  ;;  %v4249_v14 = vld [vmem:[%s5873_s13 + $0x69] sm:$0xff]  ;;  %v4252_v41 = vld [vmem:[%s5873_s13 + $0x91] sm:$0xff] }
  0x82   : > { %3038 = vmatmul.bf16.gmra.mxu1 %v4657_v35  ;;  %911 = vst [vmem:[#allocation2 + $0x2c] sm:$0xf] %v879_v29  ;;  %v4801_v22 = vor.u32 %v5373_v52, %v4800_v42  ;;  %v5270_v56 = vld [vmem:[#allocation2 + $0x4] sm:$0xf]  ;;  %v1077_v37 = vpack.c.bf16 %v4249_v14, %v4249_v14  ;;  %v4253_v4 = vld [vmem:[%s5873_s13 + $0x99] sm:$0xff] }
  0x83   : > { %1006 = vst [vmem:[#allocation2 + $0xc] sm:$0xf] %v6184_v18  ;;  %v4406_v57 = vld [vmem:[#allocation2 + $0x24] sm:$0xf0] }
  0x84   : > { %1007 = vst [vmem:[#allocation2 + $0x30] sm:$0xf] %v6193_v19  ;;  %v4944_v45 = vld [vmem:[#allocation2 + $0x438] sm:$0xf]  ;;  %v1073_v19 = vpack.c.bf16 %v6204_v38, %v6204_v38  ;;  %v4409_v21 = vor.u32 %v5270_v56, %v4406_v57  ;;  %v1074_v38 = vpack.c.bf16 %v6267_v54, %v6267_v54 }
  0x85   : > { %v5409_v46 = vld [vmem:[#allocation2 + $0x458] sm:$0xf0]  ;;  %1102 = vst [vmem:[#allocation2 + $0x10] sm:$0xf] %v1070_v17 }
  0x86   : > { %1103 = vst [vmem:[#allocation2 + $0x34] sm:$0xf] %v1071_v43  ;;  %v4512_v27 = vld [vmem:[#allocation2 + $0xd8] sm:$0xf]  ;;  %v4945_v55 = vor.u32 %v5409_v46, %v4944_v45  ;;  %v854_v45 = vld [vmem:[%s5873_s13 + $0x62] sm:$0xff]  ;;  %v855_v46 = vld [vmem:[%s5873_s13 + $0x6a] sm:$0xff] }
  0x87   : > { %v5301_v47 = vld [vmem:[#allocation2 + $0xf8] sm:$0xf0]  ;;  %816 = vst [vmem:[#allocation2 + $0x4c] sm:$0xf] %v1070_v17 }
  0x88   : > { %817 = vst [vmem:[#allocation2 + $0x70] sm:$0xf] %v1071_v43  ;;  %v4513_v18 = vor.u32 %v5301_v47, %v4512_v27  ;;  %v4219_v27 = vld [vmem:[%s5873_s13 + $0x80] sm:$0xff] }
  0x89   : > { %912 = vst [vmem:[#allocation2 + $0x50] sm:$0xf] %v880_v51  ;;  %v5275_v61 = vld [vmem:[#allocation2 + $0x28] sm:$0xf0]  ;;  %v4218_v51 = vld [vmem:[%s5873_s13 + $0x78] sm:$0xff] }
  0x8a   : > { %3058 = vmatmul.bf16.gmra.mxu2 %v4801_v22  ;;  %913 = vst [vmem:[#allocation2 + $0x74] sm:$0xf] %v881_v8  ;;  %v5271_v62 = vld [vmem:[#allocation2 + $0xc] sm:$0xf]  ;;  %v886_v22 = vpack.c.bf16 %v854_v45, %v854_v45  ;;  %v887_v8 = vpack.c.bf16 %v855_v46, %v855_v46  ;;  %v982_v47 = vpack.c.bf16 %v4218_v51, %v4218_v51 }
  0x8b   : > { %1008 = vst [vmem:[#allocation2 + $0x54] sm:$0xf] %v6248_v39  ;;  %v1075_v39 = vpack.c.bf16 %v6277_v20, %v6277_v20  ;;  %v4414_v63 = vld [vmem:[#allocation2 + $0x2c] sm:$0xf0] }
  0x8c   : > { %3078 = vmatmul.bf16.gmra.mxu3 %v4945_v55  ;;  %1009 = vst [vmem:[#allocation2 + $0x78] sm:$0xf] %v6258_v26  ;;  %v4412_v26 = vld [vmem:[#allocation2 + $0x8] sm:$0xf]  ;;  %v4420_v25 = vld [vmem:[#allocation2 + $0x10] sm:$0xf]  ;;  %v4417_v33 = vor.u32 %v5271_v62, %v4414_v63  ;;  %v983_v55 = vpack.c.bf16 %v4219_v27, %v4219_v27 }
  0x8d   : > { %1104 = vst [vmem:[#allocation2 + $0x58] sm:$0xf] %v1072_v13  ;;  %v4413_v32 = vor.u32 %v5275_v61, %v4412_v26  ;;  %v5276_v0 = vld [vmem:[#allocation2 + $0x30] sm:$0xf0]  ;;  %v5467_v63 = vld [vmem:[%s6882_s4 + $0x1a8] sm:$0xff] }
  0x8e   : > { %3018 = vmatmul.bf16.gmra.mxu0 %v4513_v18  ;;  %1105 = vst [vmem:[#allocation2 + $0x7c] sm:$0xf] %v1073_v19  ;;  %v4421_v54 = vor.u32 %v5276_v0, %v4420_v25  ;;  %v5279_v20 = vld [vmem:[#allocation2 + $0x4c] sm:$0xf]  ;;  %v4251_v18 = vld [vmem:[%s5873_s13 + $0x81] sm:$0xff]  ;;  %3531 = vmatpush.bf16.msra.mxu2 %v5467_v63 }
  0x8f   : > { %818 = vst [vmem:[#allocation2 + $0x94] sm:$0xf] %v1072_v13  ;;  %v4442_v30 = vld [vmem:[#allocation2 + $0x6c] sm:$0xf0]  ;;  %v4250_v13 = vld [vmem:[%s5873_s13 + $0x79] sm:$0xff]  ;;  %v5475_v25 = vld [vmem:[%s6882_s4 + $0x1e8] sm:$0xff] }
  0x90   : > { %819 = vst [vmem:[#allocation2 + $0xb8] sm:$0xf] %v1073_v19  ;;  %v4445_v3 = vor.u32 %v5279_v20, %v4442_v30  ;;  %v1078_v19 = vpack.c.bf16 %v4250_v13, %v4250_v13  ;;  %v856_v0 = vld [vmem:[%s5873_s13 + $0x7a] sm:$0xff]  ;;  %v5459_v20 = vld [vmem:[%s6882_s4 + $0x168] sm:$0xff] }
  0x91   : > { %1010 = vst [vmem:[#allocation2 + $0x9c] sm:$0xf] %v692_v12  ;;  %v4248_v12 = vld [vmem:[%s5873_s13 + $0x61] sm:$0xff]  ;;  %v5284_v29 = vld [vmem:[#allocation2 + $0x70] sm:$0xf0]  ;;  %v888_v1 = vpack.c.bf16 %v856_v0, %v856_v0 }
  0x92   : > { %3092 = vmatmul.bf16.vlgmr.msrb.gmra.mxu1 %v4409_v21  ;;  %914 = vst [vmem:[#allocation2 + $0x98] sm:$0xf] %v882_v59  ;;  %v1076_v36 = vpack.c.bf16 %v4248_v12, %v4248_v12  ;;  %v5280_v34 = vld [vmem:[#allocation2 + $0x54] sm:$0xf]  ;;  %v1079_v21 = vpack.c.bf16 %v4251_v18, %v4251_v18  ;;  %v5483_v30 = vld [vmem:[%s6882_s4 + $0x228] sm:$0xff] }
  0x93   : > { %915 = vst [vmem:[#allocation2 + $0xbc] sm:$0xf] %v883_v60  ;;  %v4450_v15 = vld [vmem:[#allocation2 + $0x74] sm:$0xf0]  ;;  %3709 = vmatpush.bf16.msra.mxu0 %v5483_v30  ;;  %v4257_v30 = vld [vmem:[%s5873_s13 + $0xc9] sm:$0xff] }
  0x94   : > { %1011 = vst [vmem:[#allocation2 + $0xc0] sm:$0xf] %v6309_v7  ;;  %v4448_v7 = vld [vmem:[#allocation2 + $0x50] sm:$0xf]  ;;  %v4456_v35 = vld [vmem:[#allocation2 + $0x58] sm:$0xf]  ;;  %v4453_v42 = vor.u32 %v5280_v34, %v4450_v15 }
  0x95   : > { %1106 = vst [vmem:[#allocation2 + $0xa0] sm:$0xf] %v1074_v38  ;;  %v4449_v16 = vor.u32 %v5284_v29, %v4448_v7  ;;  %v5285_v17 = vld [vmem:[#allocation2 + $0x78] sm:$0xf0] }
  0x96   : > { %1107 = vst [vmem:[#allocation2 + $0xc4] sm:$0xf] %v1075_v39  ;;  %v4457_v43 = vor.u32 %v5285_v17, %v4456_v35  ;;  %v5288_v50 = vld [vmem:[#allocation2 + $0x94] sm:$0xf]  ;;  %v859_v17 = vld [vmem:[%s5873_s13 + $0x9a] sm:$0xff] }
  0x97   : > { %820 = vst [vmem:[#allocation2 + $0xdc] sm:$0xf] %v1074_v38  ;;  %v4478_v52 = vld [vmem:[#allocation2 + $0xb4] sm:$0xf0] }
  0x98   : > { %821 = vst [vmem:[#allocation2 + $0x100] sm:$0xf] %v1075_v39  ;;  %v4481_v53 = vor.u32 %v5288_v50, %v4478_v52  ;;  %v5289_v40 = vld [vmem:[#allocation2 + $0x9c] sm:$0xf]  ;;  %v858_v35 = vld [vmem:[%s5873_s13 + $0x92] sm:$0xff]  ;;  %v1082_v50 = vpack.c.bf16 %v6224_v2, %v6224_v2  ;;  %v1083_v52 = vpack.c.bf16 %v6228_v5, %v6228_v5 }
  0x99   : > { %1018 = vst [vmem:[#allocation2 + $0x1bc] sm:$0xf] %v6287_v58  ;;  %v5476_v58 = vld [vmem:[%s6882_s4 + $0x1f0] sm:$0xff]  ;;  %v4484_v56 = vld [vmem:[#allocation2 + $0x98] sm:$0xf] }
  0x9a   : > { %3181 = vmatmul.bf16.vlgmr.msrb.gmra.mxu2 %v4413_v32  ;;  %1019 = vst [vmem:[#allocation2 + $0x1e0] sm:$0xf] %v6292_v24  ;;  %v5460_v24 = vld [vmem:[%s6882_s4 + $0x170] sm:$0xff]  ;;  %3619 = vmatpush.bf16.msra.mxu3 %v5476_v58  ;;  %v5293_v57 = vld [vmem:[#allocation2 + $0xb8] sm:$0xf0] }
  0x9b   : > { %3441 = vmatpush.bf16.msra.mxu1 %v5460_v24  ;;  %916 = vst [vmem:[#allocation2 + $0xe0] sm:$0xf] %v884_v44  ;;  %v4486_v23 = vld [vmem:[#allocation2 + $0xbc] sm:$0xf0]  ;;  %v4485_v59 = vor.u32 %v5293_v57, %v4484_v56  ;;  %v4221_v58 = vld [vmem:[%s5873_s13 + $0x98] sm:$0xff]  ;;  %v1080_v44 = vpack.c.bf16 %v4252_v41, %v4252_v41 }
  0x9c   : > { %3270 = vmatmul.bf16.vlgmr.msrb.gmra.mxu3 %v4417_v33  ;;  %917 = vst [vmem:[#allocation2 + $0x104] sm:$0xf] %v885_v11  ;;  %v4492_v60 = vld [vmem:[#allocation2 + $0xa0] sm:$0xf]  ;;  %v4489_v39 = vor.u32 %v5289_v40, %v4486_v23  ;;  %v985_v31 = vpack.c.bf16 %v4221_v58, %v4221_v58  ;;  %v1081_v11 = vpack.c.bf16 %v4253_v4, %v4253_v4 }
  0x9d   : > { %1012 = vst [vmem:[#allocation2 + $0xe4] sm:$0xf] %v980_v28  ;;  %v5294_v38 = vld [vmem:[#allocation2 + $0xc0] sm:$0xf0] }
  0x9e   : > { %3359 = vmatmul.bf16.vlgmr.msrb.gmra.mxu0 %v4421_v54  ;;  %1013 = vst [vmem:[#allocation2 + $0x108] sm:$0xf] %v981_v10  ;;  %v4493_v26 = vor.u32 %v5294_v38, %v4492_v60  ;;  %v5297_v61 = vld [vmem:[#allocation2 + $0xdc] sm:$0xf]  ;;  %v857_v33 = vld [vmem:[%s5873_s13 + $0x82] sm:$0xff]  ;;  %v4220_v54 = vld [vmem:[%s5873_s13 + $0x90] sm:$0xff]  ;;  %3620 = vmatpush.bf16.msra.mxu3 %v5475_v25 }
  0x9f   : > { %1108 = vst [vmem:[#allocation2 + $0xe8] sm:$0xf] %v1076_v36  ;;  %v4514_v62 = vld [vmem:[#allocation2 + $0xfc] sm:$0xf0]  ;;  %v984_v24 = vpack.c.bf16 %v4220_v54, %v4220_v54  ;;  %3442 = vmatpush.bf16.msra.mxu1 %v5459_v20  ;;  %v765_v60 = vld [vmem:[%s5873_s13 + $0xb1] sm:$0xff] }
  0xa0   : > { %1109 = vst [vmem:[#allocation2 + $0x10c] sm:$0xf] %v1077_v37  ;;  %v4517_v32 = vor.u32 %v5297_v61, %v4514_v62  ;;  %v5474_v40 = vld [vmem:[%s6882_s4 + $0x1e0] sm:$0xff]  ;;  %v860_v38 = vld [vmem:[%s5873_s13 + $0xaa] sm:$0xff]  ;;  %v797_v61 = vpack.c.bf16 %v765_v60, %v765_v60  ;;  %v861_v62 = vld [vmem:[%s5873_s13 + $0xb2] sm:$0xff] }
  0xa1   : > { %822 = vst [vmem:[#allocation2 + $0x124] sm:$0xf] %v1076_v36  ;;  %v892_v63 = vpack.c.bf16 %v860_v38, %v860_v38  ;;  %v893_v0 = vpack.c.bf16 %v861_v62, %v861_v62  ;;  %v4256_v54 = vld [vmem:[%s5873_s13 + $0xc1] sm:$0xff] }
  0xa2   : > { %3097 = vmatmul.bf16.gmra.mxu1 %v4445_v3  ;;  %823 = vst [vmem:[#allocation2 + $0x148] sm:$0xf] %v1077_v37  ;;  %v889_v3 = vpack.c.bf16 %v857_v33, %v857_v33  ;;  %v4520_v6 = vld [vmem:[#allocation2 + $0xe0] sm:$0xf]  ;;  %3621 = vmatpush.bf16.msra.mxu3 %v5474_v40  ;;  %v4225_v33 = vld [vmem:[%s5873_s13 + $0xc8] sm:$0xff] }
  0xa3   : > { %918 = vst [vmem:[#allocation2 + $0x128] sm:$0xf] %v886_v22  ;;  %v5302_v9 = vld [vmem:[#allocation2 + $0x100] sm:$0xf0]  ;;  %v989_v58 = vpack.c.bf16 %v4225_v33, %v4225_v33  ;;  %v4630_v40 = vld [vmem:[#allocation2 + $0x1dc] sm:$0xf0] }
  0xa4   : > { %919 = vst [vmem:[#allocation2 + $0x14c] sm:$0xf] %v887_v8  ;;  %v5298_v28 = vld [vmem:[#allocation2 + $0xe4] sm:$0xf]  ;;  %v4521_v12 = vor.u32 %v5302_v9, %v4520_v6  ;;  %v1085_v9 = vpack.c.bf16 %v4257_v30, %v4257_v30  ;;  %v5465_v33 = vld [vmem:[%s6882_s4 + $0x198] sm:$0xff] }
  0xa5   : > { %1014 = vst [vmem:[#allocation2 + $0x12c] sm:$0xf] %v982_v47  ;;  %v4522_v10 = vld [vmem:[#allocation2 + $0x104] sm:$0xf0]  ;;  %v5473_v30 = vld [vmem:[%s6882_s4 + $0x1d8] sm:$0xff] }
  0xa6   : > { %1015 = vst [vmem:[#allocation2 + $0x150] sm:$0xf] %v983_v55  ;;  %v4528_v14 = vld [vmem:[#allocation2 + $0xe8] sm:$0xf]  ;;  %v4525_v7 = vor.u32 %v5298_v28, %v4522_v10  ;;  %3622 = vmatpush.bf16.msra.mxu3 %v5473_v30 }
  0xa7   : > { %1110 = vst [vmem:[#allocation2 + $0x130] sm:$0xf] %v1078_v19  ;;  %v5303_v36 = vld [vmem:[#allocation2 + $0x108] sm:$0xf0] }
  0xa8   : > { %1111 = vst [vmem:[#allocation2 + $0x154] sm:$0xf] %v1079_v21  ;;  %v4529_v37 = vor.u32 %v5303_v36, %v4528_v14  ;;  %v5306_v34 = vld [vmem:[#allocation2 + $0x124] sm:$0xf] }
  0xa9   : > { %824 = vst [vmem:[#allocation2 + $0x16c] sm:$0xf] %v1078_v19  ;;  %v4550_v15 = vld [vmem:[#allocation2 + $0x144] sm:$0xf0]  ;;  %v5466_v19 = vld [vmem:[%s6882_s4 + $0x1a0] sm:$0xff] }
  0xaa   : > { %3186 = vmatmul.bf16.gmra.mxu2 %v4449_v16  ;;  %825 = vst [vmem:[#allocation2 + $0x190] sm:$0xf] %v1079_v21  ;;  %v4553_v16 = vor.u32 %v5306_v34, %v4550_v15 }
  0xab   : > { %920 = vst [vmem:[#allocation2 + $0x170] sm:$0xf] %v888_v1  ;;  %v5311_v45 = vld [vmem:[#allocation2 + $0x148] sm:$0xf0]  ;;  %3532 = vmatpush.bf16.msra.mxu2 %v5466_v19 }
  0xac   : > { %3275 = vmatmul.bf16.gmra.mxu3 %v4453_v42  ;;  %921 = vst [vmem:[#allocation2 + $0x194] sm:$0xf] %v889_v3  ;;  %v890_v42 = vpack.c.bf16 %v858_v35, %v858_v35  ;;  %v5307_v51 = vld [vmem:[#allocation2 + $0x12c] sm:$0xf] }
  0xad   : > { %1016 = vst [vmem:[#allocation2 + $0x174] sm:$0xf] %v984_v24  ;;  %v4558_v22 = vld [vmem:[#allocation2 + $0x14c] sm:$0xf0]  ;;  %v5482_v24 = vld [vmem:[%s6882_s4 + $0x220] sm:$0xff] }
  0xae   : > { %3364 = vmatmul.bf16.gmra.mxu0 %v4457_v43  ;;  %1017 = vst [vmem:[#allocation2 + $0x198] sm:$0xf] %v985_v31  ;;  %v6386_v29 = vpop.f32.mrf.mxu1  ;;  %v891_v43 = vpack.c.bf16 %v859_v17, %v859_v17  ;;  %v4564_v47 = vld [vmem:[#allocation2 + $0x130] sm:$0xf]  ;;  %v4561_v2 = vor.u32 %v5307_v51, %v4558_v22  ;;  %v1084_v31 = vpack.c.bf16 %v4256_v54, %v4256_v54 }
  0xaf   : > { %1112 = vst [vmem:[#allocation2 + $0x178] sm:$0xf] %v1080_v44  ;;  %v5312_v55 = vld [vmem:[#allocation2 + $0x150] sm:$0xf0]  ;;  %3710 = vmatpush.bf16.msra.mxu0 %v5482_v24  ;;  %3533 = vmatpush.bf16.msra.mxu2 %v5465_v33  ;;  %v865_v24 = vld [vmem:[%s5873_s13 + $0xe2] sm:$0xff]  ;;  %v867_v33 = vld [vmem:[%s5873_s13 + $0xfa] sm:$0xff] }
  0xb0   : > { %1113 = vst [vmem:[#allocation2 + $0x19c] sm:$0xf] %v1081_v11  ;;  %v4565_v5 = vor.u32 %v5312_v55, %v4564_v47  ;;  %v5315_v13 = vld [vmem:[#allocation2 + $0x16c] sm:$0xf]  ;;  %v4259_v47 = vld [vmem:[%s5873_s13 + $0xe1] sm:$0xff] }
  0xb1   : > { %826 = vst [vmem:[#allocation2 + $0x1b4] sm:$0xf] %v1080_v44  ;;  %v4586_v18 = vld [vmem:[#allocation2 + $0x18c] sm:$0xf0] }
  0xb2   : > { %3102 = vmatmul.bf16.gmra.mxu1 %v4481_v53  ;;  %827 = vst [vmem:[#allocation2 + $0x1d8] sm:$0xf] %v1081_v11  ;;  %v4556_v53 = vld [vmem:[#allocation2 + $0x128] sm:$0xf]  ;;  %v4589_v21 = vor.u32 %v5315_v13, %v4586_v18  ;;  %v4592_v1 = vld [vmem:[#allocation2 + $0x170] sm:$0xf]  ;;  %v1087_v18 = vpack.c.bf16 %v4259_v47, %v4259_v47 }
  0xb3   : > { %922 = vst [vmem:[#allocation2 + $0x1b8] sm:$0xf] %v890_v42  ;;  %v4557_v8 = vor.u32 %v5311_v45, %v4556_v53  ;;  %v5320_v3 = vld [vmem:[#allocation2 + $0x190] sm:$0xf0]  ;;  %v862_v42 = vld [vmem:[%s5873_s13 + $0xc2] sm:$0xff]  ;;  %v4226_v53 = vld [vmem:[%s5873_s13 + $0xd8] sm:$0xff] }
  0xb4   : > { %923 = vst [vmem:[#allocation2 + $0x1dc] sm:$0xf] %v891_v43  ;;  %v5316_v4 = vld [vmem:[#allocation2 + $0x174] sm:$0xf]  ;;  %v4593_v11 = vor.u32 %v5320_v3, %v4592_v1  ;;  %v863_v43 = vld [vmem:[%s5873_s13 + $0xca] sm:$0xff]  ;;  %v4227_v45 = vld [vmem:[%s5873_s13 + $0xe0] sm:$0xff]  ;;  %v990_v51 = vpack.c.bf16 %v4226_v53, %v4226_v53 }
  0xb5   : > { %1114 = vst [vmem:[#allocation2 + $0x1c0] sm:$0xf] %v1082_v50  ;;  %v4594_v44 = vld [vmem:[#allocation2 + $0x194] sm:$0xf0]  ;;  %v894_v50 = vpack.c.bf16 %v862_v42, %v862_v42  ;;  %v991_v22 = vpack.c.bf16 %v4227_v45, %v4227_v45 }
  0xb6   : > { %v6394_v46 = vpop.f32.mrf.mxu1  ;;  %1115 = vst [vmem:[#allocation2 + $0x1e4] sm:$0xf] %v1083_v52  ;;  %v4600_v10 = vld [vmem:[#allocation2 + $0x178] sm:$0xf]  ;;  %v4597_v14 = vor.u32 %v5316_v4, %v4594_v44  ;;  %v895_v52 = vpack.c.bf16 %v863_v43, %v863_v43 }
  0xb7   : > { %829 = vst [vmem:[#allocation2 + $0x220] sm:$0xf] %v797_v61  ;;  %v5457_v4 = vld [vmem:[%s6882_s4 + $0x158] sm:$0xff] }
  0xb8   : > { %924 = vst [vmem:[#allocation2 + $0x200] sm:$0xf] %v892_v63  ;;  %v5481_v43 = vld [vmem:[%s6882_s4 + $0x218] sm:$0xff] }
  0xb9   : > { %925 = vst [vmem:[#allocation2 + $0x224] sm:$0xf] %v893_v0  ;;  %v4622_v34 = vld [vmem:[#allocation2 + $0x1d4] sm:$0xf0]  ;;  %3711 = vmatpush.bf16.msra.mxu0 %v5481_v43 }
  0xba   : > { %3191 = vmatmul.bf16.gmra.mxu2 %v4485_v59  ;;  %v764_v59 = vld [vmem:[%s5873_s13 + $0xa9] sm:$0xff]  ;;  %1021 = vst [vmem:[#allocation2 + $0x228] sm:$0xf] %v989_v58  ;;  %v864_v58 = vld [vmem:[%s5873_s13 + $0xda] sm:$0xff] }
  0xbb   : > { %1116 = vst [vmem:[#allocation2 + $0x208] sm:$0xf] %v1084_v31  ;;  %v5329_v13 = vld [vmem:[#allocation2 + $0x1d8] sm:$0xf0]  ;;  %v896_v44 = vpack.c.bf16 %v864_v58, %v864_v58 }
  0xbc   : > { %3280 = vmatmul.bf16.gmra.mxu3 %v4489_v39  ;;  %v5458_v39 = vld [vmem:[%s6882_s4 + $0x160] sm:$0xff]  ;;  %1117 = vst [vmem:[#allocation2 + $0x22c] sm:$0xf] %v1085_v9 }
  0xbd   : > { %3443 = vmatpush.bf16.msra.mxu1 %v5458_v39  ;;  %830 = vst [vmem:[#allocation2 + $0x244] sm:$0xf] %v1084_v31  ;;  %v4636_v39 = vld [vmem:[#allocation2 + $0x1c0] sm:$0xf]  ;;  %v4228_v31 = vld [vmem:[%s5873_s13 + $0xf0] sm:$0xff] }
  0xbe   : > { %3369 = vmatmul.bf16.gmra.mxu0 %v4493_v26  ;;  %v796_v26 = vpack.c.bf16 %v764_v59, %v764_v59  ;;  %831 = vst [vmem:[#allocation2 + $0x268] sm:$0xf] %v1085_v9  ;;  %v4658_v0 = vld [vmem:[#allocation2 + $0x21c] sm:$0xf0]  ;;  %v897_v9 = vpack.c.bf16 %v865_v24, %v865_v24  ;;  %v899_v24 = vpack.c.bf16 %v867_v33, %v867_v33  ;;  %v5472_v33 = vld [vmem:[%s6882_s4 + $0x1d0] sm:$0xff] }
  0xbf   : > { %926 = vst [vmem:[#allocation2 + $0x248] sm:$0xf] %v894_v50  ;;  %3623 = vmatpush.bf16.msra.mxu3 %v5472_v33 }
  0xc0   : > { %828 = vst [vmem:[#allocation2 + $0x1fc] sm:$0xf] %v796_v26  ;;  %v5330_v26 = vld [vmem:[#allocation2 + $0x1e0] sm:$0xf0] }
  0xc1   : > { %927 = vst [vmem:[#allocation2 + $0x26c] sm:$0xf] %v895_v52  ;;  %v4637_v62 = vor.u32 %v5330_v26, %v4636_v39  ;;  %v5338_v42 = vld [vmem:[#allocation2 + $0x220] sm:$0xf0]  ;;  %3444 = vmatpush.bf16.msra.mxu1 %v5457_v4  ;;  %v4666_v45 = vld [vmem:[#allocation2 + $0x224] sm:$0xf0] }
  0xc2   : > { %3107 = vmatmul.bf16.gmra.mxu1 %v4517_v32  ;;  %v4224_v32 = vld [vmem:[%s5873_s13 + $0xc0] sm:$0xff]  ;;  %1022 = vst [vmem:[#allocation2 + $0x24c] sm:$0xf] %v990_v51 }
  0xc3   : > { %v988_v20 = vpack.c.bf16 %v4224_v32, %v4224_v32  ;;  %1023 = vst [vmem:[#allocation2 + $0x270] sm:$0xf] %v991_v22  ;;  %v5339_v47 = vld [vmem:[#allocation2 + $0x228] sm:$0xf0] }
  0xc4   : > { %1119 = vst [vmem:[#allocation2 + $0x274] sm:$0xf] %v1087_v18 }
  0xc5   : > { %1020 = vst [vmem:[#allocation2 + $0x204] sm:$0xf] %v988_v20 }
  0xc6   : > { %833 = vst [vmem:[#allocation2 + $0x2b0] sm:$0xf] %v1087_v18 }
  0xc7   : > { %v5333_v32 = vld [vmem:[#allocation2 + $0x1fc] sm:$0xf]  ;;  %928 = vst [vmem:[#allocation2 + $0x290] sm:$0xf] %v896_v44 }
  0xc8   : > { %v4661_v20 = vor.u32 %v5333_v32, %v4658_v0  ;;  %929 = vst [vmem:[#allocation2 + $0x2b4] sm:$0xf] %v897_v9  ;;  %v866_v0 = vld [vmem:[%s5873_s13 + $0xf2] sm:$0xff]  ;;  %v4262_v9 = vld [vmem:[%s5873_s13 + $0x109] sm:$0xff] }
  0xc9   : > { %v898_v58 = vpack.c.bf16 %v866_v0, %v866_v0  ;;  %931 = vst [vmem:[#allocation2 + $0x2fc] sm:$0xf] %v899_v24  ;;  %v868_v24 = vld [vmem:[%s5873_s13 + $0x10a] sm:$0xff] }
  0xca   : > { %3196 = vmatmul.bf16.gmra.mxu2 %v4521_v12  ;;  %v5321_v12 = vld [vmem:[#allocation2 + $0x198] sm:$0xf0] }
  0xcb   : > { %v4601_v36 = vor.u32 %v5321_v12, %v4600_v10  ;;  %v992_v10 = vpack.c.bf16 %v4228_v31, %v4228_v31  ;;  %v4231_v31 = vld [vmem:[%s5873_s13 + $0x110] sm:$0xff]  ;;  %930 = vst [vmem:[#allocation2 + $0x2d8] sm:$0xf] %v898_v58 }
  0xcc   : > { %3285 = vmatmul.bf16.gmra.mxu3 %v4525_v7  ;;  %v5334_v53 = vld [vmem:[#allocation2 + $0x204] sm:$0xf]  ;;  %v995_v44 = vpack.c.bf16 %v4231_v31, %v4231_v31  ;;  %v869_v31 = vld [vmem:[%s5873_s13 + $0x112] sm:$0xff] }
  0xcd   : > { %1024 = vst [vmem:[#allocation2 + $0x294] sm:$0xf] %v992_v10  ;;  %v1090_v10 = vpack.c.bf16 %v4262_v9, %v4262_v9 }
  0xce   : > { %3374 = vmatmul.bf16.gmra.mxu0 %v4529_v37  ;;  %v5324_v37 = vld [vmem:[#allocation2 + $0x1b4] sm:$0xf]  ;;  %1027 = vst [vmem:[#allocation2 + $0x300] sm:$0xf] %v995_v44 }
  0xcf   : > { %v4625_v35 = vor.u32 %v5324_v37, %v4622_v34  ;;  %v4664_v37 = vld [vmem:[#allocation2 + $0x200] sm:$0xf]  ;;  %1122 = vst [vmem:[#allocation2 + $0x2e0] sm:$0xf] %v1090_v10 }
  0xd0   : > { %v4665_v51 = vor.u32 %v5338_v42, %v4664_v37  ;;  %v4702_v42 = vld [vmem:[#allocation2 + $0x26c] sm:$0xf0]  ;;  %836 = vst [vmem:[#allocation2 + $0x31c] sm:$0xf] %v1090_v10  ;;  %v4233_v10 = vld [vmem:[%s5873_s13 + $0x128] sm:$0xff] }
  0xd1   : > { %v6396_v27 = vpop.f32.mrf.mxu0 }
  0xd2   : > { %3112 = vmatmul.bf16.gmra.mxu1 %v4553_v16 }
  0xd9   : > { %v6418_v25 = vpop.f32.mrf.mxu0 }
  0xda   : > { %3201 = vmatmul.bf16.gmra.mxu2 %v4557_v8  ;;  %v4258_v8 = vld [vmem:[%s5873_s13 + $0xd9] sm:$0xff] }
  0xdb   : > { %v1086_v55 = vpack.c.bf16 %v4258_v8, %v4258_v8  ;;  %v4672_v8 = vld [vmem:[#allocation2 + $0x208] sm:$0xf] }
  0xdc   : > { %3290 = vmatmul.bf16.gmra.mxu3 %v4561_v2 }
  0xdd   : > { %v6401_v56 = vpop.f32.mrf.mxu2  ;;  %v6403_v57 = vpop.f32.mrf.mxu1  ;;  %1118 = vst [vmem:[#allocation2 + $0x250] sm:$0xf] %v1086_v55 }
  0xde   : > { %3379 = vmatmul.bf16.gmra.mxu0 %v4565_v5  ;;  %v4628_v5 = vld [vmem:[#allocation2 + $0x1b8] sm:$0xf]  ;;  %832 = vst [vmem:[#allocation2 + $0x28c] sm:$0xf] %v1086_v55 }
  0xdf   : > { %v6408_v23 = vpop.f32.mrf.mxu3  ;;  %v4629_v60 = vor.u32 %v5329_v13, %v4628_v5  ;;  %v4669_v5 = vor.u32 %v5334_v53, %v4666_v45  ;;  %v4673_v13 = vor.u32 %v5339_v47, %v4672_v8  ;;  %v5348_v45 = vld [vmem:[#allocation2 + $0x270] sm:$0xf0] }
  0xe2   : > { %3117 = vmatmul.bf16.gmra.mxu1 %v4589_v21  ;;  %v5325_v21 = vld [vmem:[#allocation2 + $0x1bc] sm:$0xf] }
  0xe3   : > { %v4633_v61 = vor.u32 %v5325_v21, %v4630_v40  ;;  %v5342_v21 = vld [vmem:[#allocation2 + $0x244] sm:$0xf]  ;;  %v4694_v40 = vld [vmem:[#allocation2 + $0x264] sm:$0xf0] }
  0xe4   : > { %v4708_v53 = vld [vmem:[#allocation2 + $0x250] sm:$0xf] }
  0xe5   : > { %v6426_v41 = vpop.f32.mrf.mxu2  ;;  %v6428_v6 = vpop.f32.mrf.mxu1  ;;  %v4709_v47 = vor.u32 %v5348_v45, %v4708_v53 }
  0xe7   : > { %v6430_v28 = vpop.f32.mrf.mxu3 }
  0xea   : > { %3206 = vmatmul.bf16.gmra.mxu2 %v4593_v11  ;;  %v4229_v11 = vld [vmem:[%s5873_s13 + $0xf8] sm:$0xff] }
  0xeb   : > { %v6432_v7 = vpop.f32.mrf.mxu0  ;;  %v993_v12 = vpack.c.bf16 %v4229_v11, %v4229_v11  ;;  %v4263_v11 = vld [vmem:[%s5873_s13 + $0x111] sm:$0xff] }
  0xec   : > { %3295 = vmatmul.bf16.gmra.mxu3 %v4597_v14  ;;  %v4260_v14 = vld [vmem:[%s5873_s13 + $0xf1] sm:$0xff] }
  0xed   : > { %v6434_v15 = vpop.f32.mrf.mxu2  ;;  %v6436_v16 = vpop.f32.mrf.mxu1  ;;  %v1088_v34 = vpack.c.bf16 %v4260_v14, %v4260_v14  ;;  %1025 = vst [vmem:[#allocation2 + $0x2b8] sm:$0xf] %v993_v12  ;;  %v4700_v12 = vld [vmem:[#allocation2 + $0x248] sm:$0xf]  ;;  %v5347_v14 = vld [vmem:[#allocation2 + $0x268] sm:$0xf0] }
  0xee   : > { %3384 = vmatmul.bf16.gmra.mxu0 %v4601_v36  ;;  %v4261_v36 = vld [vmem:[%s5873_s13 + $0xf9] sm:$0xff]  ;;  %v4701_v43 = vor.u32 %v5347_v14, %v4700_v12  ;;  %v997_v14 = vpack.c.bf16 %v4233_v10, %v4233_v10 }
  0xef   : > { %v6438_v17 = vpop.f32.mrf.mxu3  ;;  %v1089_v50 = vpack.c.bf16 %v4261_v36, %v4261_v36  ;;  %1120 = vst [vmem:[#allocation2 + $0x298] sm:$0xf] %v1088_v34  ;;  %v1091_v36 = vpack.c.bf16 %v4263_v11, %v4263_v11  ;;  %v901_v11 = vpack.c.bf16 %v869_v31, %v869_v31 }
  0xf0   : > { %834 = vst [vmem:[#allocation2 + $0x2d4] sm:$0xf] %v1088_v34  ;;  %v5343_v34 = vld [vmem:[#allocation2 + $0x24c] sm:$0xf] }
  0xf1   : > { %1121 = vst [vmem:[#allocation2 + $0x2bc] sm:$0xf] %v1089_v50  ;;  %v4705_v8 = vor.u32 %v5343_v34, %v4702_v42  ;;  %v4265_v34 = vld [vmem:[%s5873_s13 + $0x129] sm:$0xff] }
  0xf2   : > { %3122 = vmatmul.bf16.gmra.mxu1 %v4625_v35  ;;  %835 = vst [vmem:[#allocation2 + $0x2f8] sm:$0xf] %v1089_v50 }
  0xf3   : > { %v6446_v2 = vpop.f32.mrf.mxu0  ;;  %1123 = vst [vmem:[#allocation2 + $0x304] sm:$0xf] %v1091_v36 }
  0xf4   : > { %837 = vst [vmem:[#allocation2 + $0x340] sm:$0xf] %v1091_v36  ;;  %v4264_v36 = vld [vmem:[%s5873_s13 + $0x121] sm:$0xff] }
  0xf5   : > { %v6448_v19 = vpop.f32.mrf.mxu2  ;;  %v6450_v59 = vpop.f32.mrf.mxu1  ;;  %v1092_v53 = vpack.c.bf16 %v4264_v36, %v4264_v36  ;;  %933 = vst [vmem:[#allocation2 + $0x344] sm:$0xf] %v901_v11 }
  0xf6   : > { %1029 = vst [vmem:[#allocation2 + $0x348] sm:$0xf] %v997_v14 }
  0xf7   : > { %v6452_v38 = vpop.f32.mrf.mxu3  ;;  %1124 = vst [vmem:[#allocation2 + $0x328] sm:$0xf] %v1092_v53 }
  0xf8   : > { %838 = vst [vmem:[#allocation2 + $0x364] sm:$0xf] %v1092_v53  ;;  %v871_v53 = vld [vmem:[%s5873_s13 + $0x12a] sm:$0xff] }
  0xf9   : > { %v4766_v11 = vld [vmem:[#allocation2 + $0x2f4] sm:$0xf0] }
  0xfa   : > { %3211 = vmatmul.bf16.gmra.mxu2 %v4629_v60  ;;  %v6493_v60 = vld [vmem:[%s6883_s5] ss:$0 sm:$0xff] }
  0xfb   : > { %v6454_v63 = vpop.f32.mrf.mxu0  ;;  %v3005_v26 = vadd.f32 %v6493_v60, %v6396_v27  ;;  %v3007_v42 = vadd.f32 %v6493_v60, %v6418_v25  ;;  %v4738_v25 = vld [vmem:[#allocation2 + $0x2b4] sm:$0xf0] }
  0xfc   : > { %3300 = vmatmul.bf16.gmra.mxu3 %v4633_v61  ;;  %v4697_v61 = vor.u32 %v5342_v21, %v4694_v40  ;;  %v4730_v21 = vld [vmem:[#allocation2 + $0x2ac] sm:$0xf0] }
  0xfd   : > { %v6459_v54 = vpop.f32.mrf.mxu2  ;;  %v5464_v40 = vld [vmem:[%s6882_s4 + $0x190] sm:$0xff] }
  0xfe   : > { %3389 = vmatmul.bf16.gmra.mxu0 %v4637_v62  ;;  %3534 = vmatpush.bf16.msra.mxu2 %v5464_v40 }
  0xff   : > { %v6464_v1 = vpop.f32.mrf.mxu3  ;;  %v6466_v3 = vpop.f32.mrf.mxu1 }
 0x102   : > { %3127 = vmatmul.bf16.gmra.mxu1 %v4661_v20  ;;  %v4230_v20 = vld [vmem:[%s5873_s13 + $0x108] sm:$0xff] }
 0x103   : > { %v6477_v35 = vpop.f32.mrf.mxu0  ;;  %v994_v4 = vpack.c.bf16 %v4230_v20, %v4230_v20 }
 0x105   : > { %v6482_v52 = vpop.f32.mrf.mxu2  ;;  %1026 = vst [vmem:[#allocation2 + $0x2dc] sm:$0xf] %v994_v4  ;;  %v4232_v4 = vld [vmem:[%s5873_s13 + $0x120] sm:$0xff] }
 0x106   : > { %v996_v12 = vpack.c.bf16 %v4232_v4, %v4232_v4 }
 0x107   : > { %v6484_v22 = vpop.f32.mrf.mxu3  ;;  %v6486_v55 = vpop.f32.mrf.mxu1 }
 0x108   : > { %1028 = vst [vmem:[#allocation2 + $0x324] sm:$0xf] %v996_v12  ;;  %v3015_v12 = vadd.f32 %v6493_v60, %v6454_v63 }
 0x10a   : > { %3216 = vmatmul.bf16.gmra.mxu2 %v4665_v51 }
 0x10b   : > { %v6488_v18 = vpop.f32.mrf.mxu0 }
 0x10c   : > { %3305 = vmatmul.bf16.gmra.mxu3 %v4669_v5 }
 0x10d   : > { %v6495_v39 = vpop.f32.mrf.mxu2 }
 0x10e   : > { %3394 = vmatmul.bf16.gmra.mxu0 %v4673_v13  ;;  %v5351_v13 = vld [vmem:[#allocation2 + $0x28c] sm:$0xf] }
 0x10f   : > { %v6499_v62 = vpop.f32.mrf.mxu3  ;;  %v3093_v32 = vpop.f32.mrf.mxu1  ;;  %v4733_v0 = vor.u32 %v5351_v13, %v4730_v21  ;;  %v5480_v13 = vld [vmem:[%s6882_s4 + $0x210] sm:$0xff]  ;;  %v1093_v21 = vpack.c.bf16 %v4265_v34, %v4265_v34 }
 0x110   : > { %v3094_v30 = vadd.f32 %v3093_v32, %v3005_v26  ;;  %3712 = vmatpush.bf16.msra.mxu0 %v5480_v13 }
 0x111   : > { %1125 = vst [vmem:[#allocation2 + $0x34c] sm:$0xf] %v1093_v21 }
 0x112   : > { %3132 = vmatmul.bf16.gmra.mxu1 %v4697_v61  ;;  %v3010_v61 = vadd.f32 %v6493_v60, %v6432_v7  ;;  %v5456_v7 = vld [vmem:[%s6882_s4 + $0x150] sm:$0xff]  ;;  %839 = vst [vmem:[#allocation2 + $0x388] sm:$0xf] %v1093_v21 }
 0x113   : > { %v6507_v27 = vpop.f32.mrf.mxu0  ;;  %3445 = vmatpush.bf16.msra.mxu1 %v5456_v7 }
 0x115   : > { %v6509_v37 = vpop.f32.mrf.mxu2 }
 0x117   : > { %v6511_v50 = vpop.f32.mrf.mxu3  ;;  %v3095_v51 = vpop.f32.mrf.mxu1 }
 0x118   : > { %v3096_v40 = vadd.f32 %v3095_v51, %v3007_v42 }
 0x11a   : > { %3221 = vmatmul.bf16.gmra.mxu2 %v4701_v43  ;;  %v4736_v43 = vld [vmem:[#allocation2 + $0x290] sm:$0xf] }
 0x11b   : > { %v3360_v5 = vpop.f32.mrf.mxu0 }
 0x11c   : > { %3310 = vmatmul.bf16.gmra.mxu3 %v4705_v8 }
 0x11d   : > { %v3182_v26 = vpop.f32.mrf.mxu2 }
 0x11e   : > { %3399 = vmatmul.bf16.gmra.mxu0 %v4709_v47  ;;  %v3183_v32 = vadd.f32 %v3182_v26, %v3094_v30  ;;  %v900_v30 = vpack.c.bf16 %v868_v24, %v868_v24  ;;  %v5356_v47 = vld [vmem:[#allocation2 + $0x2b0] sm:$0xf0] }
 0x11f   : > { %v3271_v20 = vpop.f32.mrf.mxu3  ;;  %v3098_v58 = vpop.f32.mrf.mxu1 }
 0x120   : > { %v3272_v44 = vadd.f32 %v3271_v20, %v3183_v32  ;;  %v3099_v9 = vadd.f32 %v3098_v58, %v3010_v61  ;;  %932 = vst [vmem:[#allocation2 + $0x320] sm:$0xf] %v900_v30  ;;  %v5352_v61 = vld [vmem:[#allocation2 + $0x294] sm:$0xf]  ;;  %v4744_v20 = vld [vmem:[#allocation2 + $0x298] sm:$0xf] }
 0x121   : > { %v5357_v58 = vld [vmem:[#allocation2 + $0x2b8] sm:$0xf0]  ;;  %v4741_v4 = vor.u32 %v5352_v61, %v4738_v25  ;;  %v5360_v30 = vld [vmem:[#allocation2 + $0x2d4] sm:$0xf] }
 0x122   : > { %3137 = vmatmul.bf16.gmra.mxu1 %v4733_v0  ;;  %v6532_v45 = vadd.f32 %v3360_v5, %v3272_v44  ;;  %v3012_v5 = vadd.f32 %v6493_v60, %v6446_v2  ;;  %v4737_v0 = vor.u32 %v5356_v47, %v4736_v43  ;;  %v4745_v44 = vor.u32 %v5357_v58, %v4744_v20  ;;  %v870_v43 = vld [vmem:[%s5873_s13 + $0x122] sm:$0xff]  ;;  %v5365_v20 = vld [vmem:[#allocation2 + $0x2f8] sm:$0xf0] }
 0x123   : > { %v3362_v8 = vpop.f32.mrf.mxu0  ;;  %v4769_v36 = vor.u32 %v5360_v30, %v4766_v11  ;;  %v902_v21 = vpack.c.bf16 %v870_v43, %v870_v43 }
 0x125   : > { %v3184_v26 = vpop.f32.mrf.mxu2  ;;  %934 = vst [vmem:[#allocation2 + $0x368] sm:$0xf] %v902_v21 }
 0x126   : > { %v3185_v32 = vadd.f32 %v3184_v26, %v3096_v40  ;;  %v903_v40 = vpack.c.bf16 %v871_v53, %v871_v53  ;;  %v4235_v26 = vld [vmem:[%s5873_s13 + $0x140] sm:$0xff] }
 0x127   : > { %v3273_v33 = vpop.f32.mrf.mxu3  ;;  %v3100_v24 = vpop.f32.mrf.mxu1  ;;  %v999_v25 = vpack.c.bf16 %v4235_v26, %v4235_v26 }
 0x128   : > { %v3274_v31 = vadd.f32 %v3273_v33, %v3185_v32  ;;  %v3101_v51 = vadd.f32 %v3100_v24, %v3012_v5  ;;  %v4266_v5 = vld [vmem:[%s5873_s13 + $0x139] sm:$0xff]  ;;  %v4267_v32 = vld [vmem:[%s5873_s13 + $0x141] sm:$0xff]  ;;  %935 = vst [vmem:[#allocation2 + $0x38c] sm:$0xf] %v903_v40  ;;  %v3020_v40 = vadd.f32 %v6493_v60, %v6488_v18 }
 0x129   : > { %v1094_v63 = vpack.c.bf16 %v4266_v5, %v4266_v5  ;;  %v4772_v33 = vld [vmem:[#allocation2 + $0x2d8] sm:$0xf]  ;;  %v1095_v58 = vpack.c.bf16 %v4267_v32, %v4267_v32  ;;  %1031 = vst [vmem:[#allocation2 + $0x390] sm:$0xf] %v999_v25  ;;  %v5471_v25 = vld [vmem:[%s6882_s4 + $0x1c8] sm:$0xff] }
 0x12a   : > { %3226 = vmatmul.bf16.gmra.mxu2 %v4737_v0  ;;  %v6539_v7 = vadd.f32 %v3362_v8, %v3274_v31  ;;  %v4234_v8 = vld [vmem:[%s5873_s13 + $0x138] sm:$0xff]  ;;  %v4773_v11 = vor.u32 %v5365_v20, %v4772_v33  ;;  %v4236_v33 = vld [vmem:[%s5873_s13 + $0x150] sm:$0xff]  ;;  %3624 = vmatpush.bf16.msra.mxu3 %v5471_v25  ;;  %v5455_v18 = vld [vmem:[%s6882_s4 + $0x148] sm:$0xff] }
 0x12b   : > { %v3365_v2 = vpop.f32.mrf.mxu0  ;;  %v998_v61 = vpack.c.bf16 %v4234_v8, %v4234_v8  ;;  %v5361_v31 = vld [vmem:[#allocation2 + $0x2dc] sm:$0xf]  ;;  %1126 = vst [vmem:[#allocation2 + $0x370] sm:$0xf] %v1094_v63  ;;  %v4802_v8 = vld [vmem:[#allocation2 + $0x33c] sm:$0xf0]  ;;  %3446 = vmatpush.bf16.msra.mxu1 %v5455_v18 }
 0x12c   : > { %3315 = vmatmul.bf16.gmra.mxu3 %v4741_v4  ;;  %v4774_v4 = vld [vmem:[#allocation2 + $0x2fc] sm:$0xf0]  ;;  %1127 = vst [vmem:[#allocation2 + $0x394] sm:$0xf] %v1095_v58  ;;  %v5375_v25 = vld [vmem:[#allocation2 + $0x348] sm:$0xf0] }
 0x12d   : > { %v3187_v10 = vpop.f32.mrf.mxu2  ;;  %1030 = vst [vmem:[#allocation2 + $0x36c] sm:$0xf] %v998_v61  ;;  %v4838_v18 = vld [vmem:[#allocation2 + $0x384] sm:$0xf0] }
 0x12e   : > { %3404 = vmatmul.bf16.gmra.mxu0 %v4745_v44  ;;  %v3188_v14 = vadd.f32 %v3187_v10, %v3099_v9  ;;  %v3017_v44 = vadd.f32 %v6493_v60, %v6477_v35  ;;  %840 = vst [vmem:[#allocation2 + $0x3ac] sm:$0xf] %v1094_v63  ;;  %v872_v63 = vld [vmem:[%s5873_s13 + $0x13a] sm:$0xff] }
 0x12f   : > { %v3276_v34 = vpop.f32.mrf.mxu3  ;;  %v3103_v42 = vpop.f32.mrf.mxu1  ;;  %841 = vst [vmem:[#allocation2 + $0x3d0] sm:$0xf] %v1095_v58 }
 0x130   : > { %v3277_v47 = vadd.f32 %v3276_v34, %v3188_v14  ;;  %v3104_v13 = vadd.f32 %v3103_v42, %v3015_v12  ;;  %v4780_v12 = vld [vmem:[#allocation2 + $0x2e0] sm:$0xf]  ;;  %v4777_v34 = vor.u32 %v5361_v31, %v4774_v4  ;;  %v4237_v31 = vld [vmem:[%s5873_s13 + $0x158] sm:$0xff]  ;;  %v1000_v4 = vpack.c.bf16 %v4236_v33, %v4236_v33 }
 0x132   : > { %3142 = vmatmul.bf16.gmra.mxu1 %v4769_v36  ;;  %v6549_v0 = vadd.f32 %v3365_v2, %v3277_v47  ;;  %v5366_v2 = vld [vmem:[#allocation2 + $0x300] sm:$0xf0]  ;;  %v5463_v47 = vld [vmem:[%s6882_s4 + $0x188] sm:$0xff]  ;;  %1032 = vst [vmem:[#allocation2 + $0x3b4] sm:$0xf] %v1000_v4 }
 0x133   : > { %v3367_v9 = vpop.f32.mrf.mxu0  ;;  %v4781_v43 = vor.u32 %v5366_v2, %v4780_v12  ;;  %3535 = vmatpush.bf16.msra.mxu2 %v5463_v47  ;;  %v4810_v47 = vld [vmem:[#allocation2 + $0x344] sm:$0xf0] }
 0x135   : > { %v3189_v24 = vpop.f32.mrf.mxu2 }
 0x136   : > { %v3190_v30 = vadd.f32 %v3189_v24, %v3101_v51  ;;  %v5369_v51 = vld [vmem:[#allocation2 + $0x31c] sm:$0xf] }
 0x137   : > { %v3278_v10 = vpop.f32.mrf.mxu3  ;;  %v3105_v14 = vpop.f32.mrf.mxu1  ;;  %v4805_v61 = vor.u32 %v5369_v51, %v4802_v8  ;;  %v5370_v8 = vld [vmem:[#allocation2 + $0x324] sm:$0xf] }
 0x138   : > { %v3279_v36 = vadd.f32 %v3278_v10, %v3190_v30  ;;  %v3106_v42 = vadd.f32 %v3105_v14, %v3017_v44  ;;  %v1001_v44 = vpack.c.bf16 %v4237_v31, %v4237_v31  ;;  %v4268_v30 = vld [vmem:[%s5873_s13 + $0x151] sm:$0xff]  ;;  %v4808_v10 = vld [vmem:[#allocation2 + $0x320] sm:$0xf] }
 0x139   : > { %v1096_v12 = vpack.c.bf16 %v4268_v30, %v4268_v30  ;;  %v5644_v31 = vld [vmem:[%s5779_s15 + $0x78] sm:$0xff]   ;;  %s348_s15 = scalar_lea.vmem %s6886_s8, %s4110_s11 }
 0x13a   : > { %3231 = vmatmul.bf16.gmra.mxu2 %v4773_v11  ;;  %v6553_v53 = vadd.f32 %v3367_v9, %v3279_v36  ;;  %v873_v9 = vld [vmem:[%s5873_s13 + $0x142] sm:$0xff]  ;;  %v4269_v11 = vld [vmem:[%s5873_s13 + $0x159] sm:$0xff]  ;;  %1033 = vst [vmem:[#allocation2 + $0x3d8] sm:$0xf] %v1001_v44  ;;  %v5548_v30 = vunpack.c.l.bf16 %v5644_v31 }
 0x13b   : > { %v3370_v35 = vpop.f32.mrf.mxu0  ;;  %v905_v24 = vpack.c.bf16 %v873_v9, %v873_v9  ;;  %v5374_v36 = vld [vmem:[#allocation2 + $0x340] sm:$0xf0]  ;;  %1128 = vst [vmem:[#allocation2 + $0x3b8] sm:$0xf] %v1096_v12 }
 0x13c   : > { %3320 = vmatmul.bf16.gmra.mxu3 %v4777_v34  ;;  %v5479_v34 = vld [vmem:[%s6882_s4 + $0x208] sm:$0xff]  ;;  %842 = vst [vmem:[#allocation2 + $0x3f4] sm:$0xf] %v1096_v12 }
 0x13d   : > { %v3192_v21 = vpop.f32.mrf.mxu2  ;;  %937 = vst [vmem:[#allocation2 + $0x3d4] sm:$0xf] %v905_v24  ;;  %3713 = vmatpush.bf16.msra.mxu0 %v5479_v34  ;;  %v4238_v34 = vld [vmem:[%s5873_s13 + $0x168] sm:$0xff] }
 0x13e   : > { %3409 = vmatmul.bf16.gmra.mxu0 %v4781_v43  ;;  %v3193_v26 = vadd.f32 %v3192_v21, %v3104_v13  ;;  %v904_v13 = vpack.c.bf16 %v872_v63, %v872_v63  ;;  %v1097_v43 = vpack.c.bf16 %v4269_v11, %v4269_v11  ;;  %v3022_v21 = vadd.f32 %v6493_v60, %v6507_v27 }
 0x13f   : > { %v3281_v5 = vpop.f32.mrf.mxu3  ;;  %v3108_v32 = vpop.f32.mrf.mxu1  ;;  %v4813_v63 = vor.u32 %v5370_v8, %v4810_v47  ;;  %v5549_v11 = vunpack.c.h.bf16 %v5644_v31 }
 0x140   : > { %v3282_v20 = vadd.f32 %v3281_v5, %v3193_v26  ;;  %v3109_v58 = vadd.f32 %v3108_v32, %v3020_v40  ;;  %936 = vst [vmem:[#allocation2 + $0x3b0] sm:$0xf] %v904_v13  ;;  %v4809_v40 = vor.u32 %v5374_v36, %v4808_v10  ;;  %v3025_v13 = vadd.f32 %v6493_v60, %v6386_v29  ;;  %v875_v36 = vld [vmem:[%s5873_s13 + $0x15a] sm:$0xff]  ;;  %v4239_v29 = vld [vmem:[%s5873_s13 + $0x170] sm:$0xff] }
 0x141   : > { %1129 = vst [vmem:[#allocation2 + $0x3dc] sm:$0xf] %v1097_v43  ;;  %v907_v47 = vpack.c.bf16 %v875_v36, %v875_v36  ;;  %v4852_v36 = vld [vmem:[#allocation2 + $0x370] sm:$0xf] }
 0x142   : > { %3147 = vmatmul.bf16.gmra.mxu1 %v4805_v61  ;;  %v6572_v2 = vadd.f32 %v3370_v35, %v3282_v20  ;;  %v4816_v61 = vld [vmem:[#allocation2 + $0x328] sm:$0xf]  ;;  %843 = vst [vmem:[#allocation2 + $0x418] sm:$0xf] %v1097_v43 }
 0x143   : > { %v3372_v14 = vpop.f32.mrf.mxu0  ;;  %v4817_v33 = vor.u32 %v5375_v25, %v4816_v61  ;;  %939 = vst [vmem:[#allocation2 + $0x41c] sm:$0xf] %v907_v47 }
 0x145   : > { %v3194_v51 = vpop.f32.mrf.mxu2 }
 0x146   : > { %v3195_v35 = vadd.f32 %v3194_v51, %v3106_v42  ;;  %v5378_v42 = vld [vmem:[#allocation2 + $0x364] sm:$0xf] }
 0x147   : > { %v3283_v26 = vpop.f32.mrf.mxu3  ;;  %v3110_v5 = vpop.f32.mrf.mxu1  ;;  %v4841_v44 = vor.u32 %v5378_v42, %v4838_v18  ;;  %v5383_v42 = vld [vmem:[#allocation2 + $0x388] sm:$0xf0] }
 0x148   : > { %v3284_v32 = vadd.f32 %v3283_v26, %v3195_v35  ;;  %v3111_v9 = vadd.f32 %v3110_v5, %v3022_v21  ;;  %v1002_v21 = vpack.c.bf16 %v4238_v34, %v4238_v34  ;;  %v1003_v35 = vpack.c.bf16 %v4239_v29, %v4239_v29  ;;  %v4271_v26 = vld [vmem:[%s5873_s13 + $0x171] sm:$0xff] }
 0x149   : > { %v1099_v18 = vpack.c.bf16 %v4271_v26, %v4271_v26  ;;  %v5384_v34 = vld [vmem:[#allocation2 + $0x390] sm:$0xf0]  ;;  %v5387_v26 = vld [vmem:[#allocation2 + $0x3ac] sm:$0xf] }
 0x14a   : > { %3236 = vmatmul.bf16.gmra.mxu2 %v4809_v40  ;;  %v6579_v20 = vadd.f32 %v3372_v14, %v3284_v32  ;;  %v874_v14 = vld [vmem:[%s5873_s13 + $0x152] sm:$0xff]  ;;  %v4270_v40 = vld [vmem:[%s5873_s13 + $0x169] sm:$0xff]  ;;  %1034 = vst [vmem:[#allocation2 + $0x3fc] sm:$0xf] %v1002_v21 }
 0x14b   : > { %v3375_v27 = vpop.f32.mrf.mxu0  ;;  %v906_v8 = vpack.c.bf16 %v874_v14, %v874_v14  ;;  %v1098_v5 = vpack.c.bf16 %v4270_v40, %v4270_v40  ;;  %1035 = vst [vmem:[#allocation2 + $0x420] sm:$0xf] %v1003_v35  ;;  %v4853_v35 = vor.u32 %v5384_v34, %v4852_v36  ;;  %v5478_v36 = vld [vmem:[%s6882_s4 + $0x200] sm:$0xff] }
 0x14c   : > { %3325 = vmatmul.bf16.gmra.mxu3 %v4813_v63  ;;  %1131 = vst [vmem:[#allocation2 + $0x424] sm:$0xf] %v1099_v18  ;;  %3714 = vmatpush.bf16.msra.mxu0 %v5478_v36 }
 0x14d   : > { %v3197_v24 = vpop.f32.mrf.mxu2  ;;  %938 = vst [vmem:[#allocation2 + $0x3f8] sm:$0xf] %v906_v8 }
 0x14e   : > { %3414 = vmatmul.bf16.gmra.mxu0 %v4817_v33  ;;  %v3198_v4 = vadd.f32 %v3197_v24, %v3109_v58  ;;  %v5697_v58 = vld [vmem:[%s6880_s2] ss:$0 sm:$0xff]  ;;  %v4844_v33 = vld [vmem:[#allocation2 + $0x368] sm:$0xf]  ;;  %1130 = vst [vmem:[#allocation2 + $0x400] sm:$0xf] %v1098_v5 }
 0x14f   : > { %v3286_v10 = vpop.f32.mrf.mxu3  ;;  %v3113_v12 = vpop.f32.mrf.mxu1  ;;  %v447_v61 = vmul.f32 %v5697_v58, %v5548_v30  ;;  %v448_v25 = vmul.f32 %v5697_v58, %v5549_v11  ;;  %v4846_v11 = vld [vmem:[#allocation2 + $0x38c] sm:$0xf0]  ;;  %844 = vst [vmem:[#allocation2 + $0x43c] sm:$0xf] %v1098_v5 }
 0x150   : > { %v3287_v43 = vadd.f32 %v3286_v10, %v3198_v4  ;;  %v3114_v51 = vadd.f32 %v3113_v12, %v3025_v13  ;;  %v5698_v13 = vld [vmem:[%s6881_s3] ss:$0 sm:$0xff]  ;;  %v5379_v4 = vld [vmem:[#allocation2 + $0x36c] sm:$0xf]  ;;  %v4845_v12 = vor.u32 %v5383_v42, %v4844_v33  ;;  %845 = vst [vmem:[#allocation2 + $0x460] sm:$0xf] %v1099_v18 }
 0x151   : > { %v483_v24 = vadd.f32 %v5698_v13, %v447_v61  ;;  %v484_v31 = vadd.f32 %v5698_v13, %v448_v25  ;;  %v4849_v29 = vor.u32 %v5379_v4, %v4846_v11  ;;  %v4874_v58 = vld [vmem:[#allocation2 + $0x3cc] sm:$0xf0] }
 0x152   : > { %3152 = vmatmul.bf16.gmra.mxu1 %v4841_v44  ;;  %v6593_v32 = vadd.f32 %v3375_v27, %v3287_v43  ;;  %v4877_v5 = vor.u32 %v5387_v26, %v4874_v58  ;;  %v876_v18 = vld [vmem:[%s5873_s13 + $0x16a] sm:$0xff]  ;;  %v877_v13 = vld [vmem:[%s5873_s13 + $0x172] sm:$0xff] }
 0x153   : > { %v3377_v63 = vpop.f32.mrf.mxu0  ;;  %v515_v44 = vmax.f32 %v483_v24, 0.0  ;;  %v516_v10 = vmax.f32 %v484_v31, 0.0  ;;  %v909_v4 = vpack.c.bf16 %v877_v13, %v877_v13  ;;  %v4880_v11 = vld [vmem:[#allocation2 + $0x3b0] sm:$0xf]  ;;  %v5388_v58 = vld [vmem:[#allocation2 + $0x3b4] sm:$0xf] }
 0x155   : > { %v3199_v30 = vpop.f32.mrf.mxu2  ;;  %v580_v8 = vadd.f32 %v5906_v48, %v515_v44  ;;  %v581_v21 = vadd.f32 %v5909_v49, %v516_v10  ;;  %v5462_v48 = vld [vmem:[%s6882_s4 + $0x180] sm:$0xff]  ;;  %v3030_v49 = vadd.f32 %v6493_v60, %v6403_v57  ;;  %941 = vst [vmem:[#allocation2 + $0x464] sm:$0xf] %v909_v4 }
 0x156   : > { %v3200_v27 = vadd.f32 %v3199_v30, %v3111_v9  ;;  %3536 = vmatpush.bf16.msra.mxu2 %v5462_v48  ;;  %v5454_v57 = vld [vmem:[%s6882_s4 + $0x140] sm:$0xff]  ;;  %v3027_v30 = vadd.f32 %v6493_v60, %v6394_v46  ;;  %v4882_v48 = vld [vmem:[#allocation2 + $0x3d4] sm:$0xf0] }
 0x157   : > { %v3288_v14 = vpop.f32.mrf.mxu3  ;;  %v3115_v43 = vpop.f32.mrf.mxu1  ;;  %4173 = vst [vmem:[%s5873_s13 + $0x181] sm:$0xff] %v580_v8  ;;  %v1100_v10 = vpack.c.bf16 %v580_v8, %v580_v8  ;;  %3447 = vmatpush.bf16.msra.mxu1 %v5454_v57  ;;  %v3032_v8 = vadd.f32 %v6493_v60, %v6428_v6  ;;  %v5396_v6 = vld [vmem:[#allocation2 + $0x3f4] sm:$0xf] }
 0x158   : > { %v3289_v47 = vadd.f32 %v3288_v14, %v3200_v27  ;;  %4174 = vst [vmem:[%s5873_s13 + $0x189] sm:$0xff] %v581_v21  ;;  %v5392_v14 = vld [vmem:[#allocation2 + $0x3d0] sm:$0xf0] }
 0x159   : > { %1132 = vst [vmem:[#allocation2 + $0x448] sm:$0xf] %v1100_v10  ;;  %v4274_v10 = vld [vmem:[%s5873_s13 + $0x1a] sm:$0xff] }
 0x15a   : > { %3241 = vmatmul.bf16.gmra.mxu2 %v4845_v12  ;;  %v6600_v9 = vadd.f32 %v3377_v63, %v3289_v47  ;;  %v5470_v63 = vld [vmem:[%s6882_s4 + $0x1c0] sm:$0xff] }
 0x15b   : > { %v3380_v40 = vpop.f32.mrf.mxu0  ;;  %3625 = vmatpush.bf16.msra.mxu3 %v5470_v63 }
 0x15c   : > { %3330 = vmatmul.bf16.gmra.mxu3 %v4849_v29  ;;  %v1101_v29 = vpack.c.bf16 %v581_v21, %v581_v21 }
 0x15d   : > { %v3202_v61 = vpop.f32.mrf.mxu2 }
 0x15e   : > { %3419 = vmatmul.bf16.gmra.mxu0 %v4853_v35  ;;  %v3203_v25 = vadd.f32 %v3202_v61, %v3114_v51  ;;  %v908_v51 = vpack.c.bf16 %v876_v18, %v876_v18  ;;  %v4240_v44 = vld [vmem:[%s5873_s13 + $0x180] sm:$0xff]  ;;  %v3116_v35 = vadd.f32 %v3115_v43, %v3027_v30  ;;  %v4881_v61 = vor.u32 %v5392_v14, %v4880_v11  ;;  %v4306_v14 = vld [vmem:[%s5873_s13 + $0x30] sm:$0xff] }
 0x15f   : > { %v3291_v33 = vpop.f32.mrf.mxu3  ;;  %v3118_v42 = vpop.f32.mrf.mxu1  ;;  %v4241_v34 = vld [vmem:[%s5873_s13 + $0x188] sm:$0xff]  ;;  %v1004_v47 = vpack.c.bf16 %v4240_v44, %v4240_v44  ;;  %1133 = vst [vmem:[#allocation2 + $0x46c] sm:$0xf] %v1101_v29  ;;  %v4885_v43 = vor.u32 %v5388_v58, %v4882_v48  ;;  %v1263_v58 = vpack.c.bf16 %v4306_v14, %v4306_v14 }
 0x160   : > { %v3292_v24 = vadd.f32 %v3291_v33, %v3203_v25  ;;  %v3119_v31 = vadd.f32 %v3118_v42, %v3030_v49  ;;  %940 = vst [vmem:[#allocation2 + $0x440] sm:$0xf] %v908_v51  ;;  %v1005_v46 = vpack.c.bf16 %v4241_v34, %v4241_v34  ;;  %v4888_v25 = vld [vmem:[#allocation2 + $0x3b8] sm:$0xf]  ;;  %v3035_v51 = vadd.f32 %v6493_v60, %v6436_v16 }
 0x161   : > { %1036 = vst [vmem:[#allocation2 + $0x444] sm:$0xf] %v1004_v47  ;;  %v1166_v47 = vpack.c.bf16 %v4274_v10, %v4274_v10  ;;  %v4370_v16 = vld [vmem:[%s5873_s13 + $0x32] sm:$0xff] }
 0x162   : > { %3157 = vmatmul.bf16.gmra.mxu1 %v4877_v5  ;;  %v6620_v27 = vadd.f32 %v3380_v40, %v3292_v24  ;;  %1037 = vst [vmem:[#allocation2 + $0x468] sm:$0xf] %v1005_v46  ;;  %v5393_v5 = vld [vmem:[#allocation2 + $0x3d8] sm:$0xf0]  ;;  %v4910_v24 = vld [vmem:[#allocation2 + $0x414] sm:$0xf0] }
 0x163   : > { %v3382_v12 = vpop.f32.mrf.mxu0  ;;  %v4889_v42 = vor.u32 %v5393_v5, %v4888_v25  ;;  %v4913_v30 = vor.u32 %v5396_v6, %v4910_v24  ;;  %v4338_v46 = vld [vmem:[%s5873_s13 + $0x31] sm:$0xff]  ;;  %1198 = vst [vmem:[#allocation2 + $0x14] sm:$0xf] %v1166_v47  ;;  %v5401_v25 = vld [vmem:[#allocation2 + $0x418] sm:$0xf0]  ;;  %v3037_v24 = vadd.f32 %v6493_v60, %v6450_v59 }
 0x164   : > { %1295 = vst [vmem:[#allocation2 + $0x18] sm:$0xf] %v1263_v58  ;;  %v4946_v47 = vld [vmem:[#allocation2 + $0x45c] sm:$0xf0] }
 0x165   : > { %v3204_v26 = vpop.f32.mrf.mxu2 }
 0x166   : > { %v3205_v40 = vadd.f32 %v3204_v26, %v3116_v35  ;;  %v4307_v35 = vld [vmem:[%s5873_s13 + $0x38] sm:$0xff] }
 0x167   : > { %v3293_v49 = vpop.f32.mrf.mxu3  ;;  %v3120_v63 = vpop.f32.mrf.mxu1  ;;  %v4339_v26 = vld [vmem:[%s5873_s13 + $0x39] sm:$0xff]  ;;  %v1264_v48 = vpack.c.bf16 %v4307_v35, %v4307_v35  ;;  %v3040_v35 = vadd.f32 %v6493_v60, %v6466_v3 }
 0x168   : > { %v3294_v21 = vadd.f32 %v3293_v49, %v3205_v40  ;;  %v3121_v33 = vadd.f32 %v3120_v63, %v3032_v8  ;;  %v4371_v8 = vld [vmem:[%s5873_s13 + $0x3a] sm:$0xff]  ;;  %v1360_v5 = vpack.c.bf16 %v4339_v26, %v4339_v26  ;;  %v1455_v63 = vpack.c.bf16 %v4370_v16, %v4370_v16  ;;  %v4308_v16 = vld [vmem:[%s5873_s13 + $0x48] sm:$0xff] }
 0x169   : > { %v4916_v49 = vld [vmem:[#allocation2 + $0x3f8] sm:$0xf]  ;;  %1296 = vst [vmem:[#allocation2 + $0x3c] sm:$0xf] %v1264_v48  ;;  %v1456_v6 = vpack.c.bf16 %v4371_v8, %v4371_v8 }
 0x16a   : > { %3246 = vmatmul.bf16.gmra.mxu2 %v4881_v61  ;;  %v6628_v18 = vadd.f32 %v3382_v12, %v3294_v21  ;;  %v4275_v12 = vld [vmem:[%s5873_s13 + $0x22] sm:$0xff]  ;;  %1392 = vst [vmem:[#allocation2 + $0x40] sm:$0xf] %v1360_v5 }
 0x16b   : > { %v3385_v13 = vpop.f32.mrf.mxu0  ;;  %v1167_v29 = vpack.c.bf16 %v4275_v12, %v4275_v12  ;;  %1487 = vst [vmem:[#allocation2 + $0x20] sm:$0xf] %v1455_v63  ;;  %v4340_v5 = vld [vmem:[%s5873_s13 + $0x49] sm:$0xff] }
 0x16c   : > { %3335 = vmatmul.bf16.gmra.mxu3 %v4885_v43  ;;  %v5397_v43 = vld [vmem:[#allocation2 + $0x3fc] sm:$0xf]  ;;  %1488 = vst [vmem:[#allocation2 + $0x44] sm:$0xf] %v1456_v6 }
 0x16d   : > { %v3207_v57 = vpop.f32.mrf.mxu2  ;;  %1199 = vst [vmem:[#allocation2 + $0x38] sm:$0xf] %v1167_v29 }
 0x16e   : > { %3424 = vmatmul.bf16.gmra.mxu0 %v4889_v42  ;;  %v3208_v4 = vadd.f32 %v3207_v57, %v3119_v31  ;;  %v1359_v31 = vpack.c.bf16 %v4338_v46, %v4338_v46  ;;  %v4918_v42 = vld [vmem:[#allocation2 + $0x41c] sm:$0xf0]  ;;  %1200 = vst [vmem:[#allocation2 + $0x5c] sm:$0xf] %v1455_v63  ;;  %v4341_v63 = vld [vmem:[%s5873_s13 + $0x51] sm:$0xff] }
 0x16f   : > { %v3296_v11 = vpop.f32.mrf.mxu3  ;;  %v3123_v44 = vpop.f32.mrf.mxu1  ;;  %v4921_v10 = vor.u32 %v5397_v43, %v4918_v42  ;;  %1201 = vst [vmem:[#allocation2 + $0x80] sm:$0xf] %v1456_v6  ;;  %v1362_v43 = vpack.c.bf16 %v4341_v63, %v4341_v63  ;;  %v4372_v42 = vld [vmem:[%s5873_s13 + $0x4a] sm:$0xff]  ;;  %v4373_v6 = vld [vmem:[%s5873_s13 + $0x52] sm:$0xff] }
 0x170   : > { %v3297_v36 = vadd.f32 %v3296_v11, %v3208_v4  ;;  %v3124_v34 = vadd.f32 %v3123_v44, %v3035_v51  ;;  %v4917_v51 = vor.u32 %v5401_v25, %v4916_v49  ;;  %1391 = vst [vmem:[#allocation2 + $0x1c] sm:$0xf] %v1359_v31  ;;  %v4924_v4 = vld [vmem:[#allocation2 + $0x400] sm:$0xf]  ;;  %v4309_v31 = vld [vmem:[%s5873_s13 + $0x50] sm:$0xff]  ;;  %v1265_v49 = vpack.c.bf16 %v4308_v16, %v4308_v16 }
 0x171   : > { %v1266_v25 = vpack.c.bf16 %v4309_v31, %v4309_v31  ;;  %v1457_v3 = vpack.c.bf16 %v4372_v42, %v4372_v42  ;;  %1394 = vst [vmem:[#allocation2 + $0x88] sm:$0xf] %v1362_v43  ;;  %v4311_v43 = vld [vmem:[%s5873_s13 + $0x68] sm:$0xff] }
 0x172   : > { %3162 = vmatmul.bf16.gmra.mxu1 %v4913_v30  ;;  %v6640_v40 = vadd.f32 %v3385_v13, %v3297_v36  ;;  %v5402_v30 = vld [vmem:[#allocation2 + $0x420] sm:$0xf0]  ;;  %1297 = vst [vmem:[#allocation2 + $0x60] sm:$0xf] %v1265_v49 }
 0x173   : > { %v3387_v61 = vpop.f32.mrf.mxu0  ;;  %v4925_v14 = vor.u32 %v5402_v30, %v4924_v4  ;;  %1298 = vst [vmem:[#allocation2 + $0x84] sm:$0xf] %v1266_v25  ;;  %v5406_v30 = vld [vmem:[#allocation2 + $0x444] sm:$0xf] }
 0x174   : > { %1489 = vst [vmem:[#allocation2 + $0x68] sm:$0xf] %v1457_v3  ;;  %v4422_v16 = vld [vmem:[#allocation2 + $0x34] sm:$0xf0]  ;;  %v4342_v42 = vld [vmem:[%s5873_s13 + $0x61] sm:$0xff] }
 0x175   : > { %v3209_v21 = vpop.f32.mrf.mxu2  ;;  %1202 = vst [vmem:[#allocation2 + $0xa4] sm:$0xf] %v1457_v3 }
 0x176   : > { %v3210_v57 = vadd.f32 %v3209_v21, %v3121_v33  ;;  %v5405_v33 = vld [vmem:[#allocation2 + $0x43c] sm:$0xf]  ;;  %v1361_v21 = vpack.c.bf16 %v4340_v5, %v4340_v5 }
 0x177   : > { %v3298_v13 = vpop.f32.mrf.mxu3  ;;  %v3125_v11 = vpop.f32.mrf.mxu1  ;;  %v4949_v26 = vor.u32 %v5405_v33, %v4946_v47  ;;  %v4960_v47 = vld [vmem:[#allocation2 + $0x448] sm:$0xf] }
 0x178   : > { %v3299_v44 = vadd.f32 %v3298_v13, %v3210_v57  ;;  %v3126_v12 = vadd.f32 %v3125_v11, %v3037_v24  ;;  %v4952_v57 = vld [vmem:[#allocation2 + $0x440] sm:$0xf]  ;;  %v1458_v13 = vpack.c.bf16 %v4373_v6, %v4373_v6  ;;  %1393 = vst [vmem:[#allocation2 + $0x64] sm:$0xf] %v1361_v21  ;;  %v4954_v11 = vld [vmem:[#allocation2 + $0x464] sm:$0xf0] }
 0x179   : > { %v4310_v21 = vld [vmem:[%s5873_s13 + $0x60] sm:$0xff] }
 0x17a   : > { %3251 = vmatmul.bf16.gmra.mxu2 %v4917_v51  ;;  %v6644_v36 = vadd.f32 %v3387_v61, %v3299_v44  ;;  %v5410_v51 = vld [vmem:[#allocation2 + $0x460] sm:$0xf0]  ;;  %v3042_v44 = vadd.f32 %v6493_v60, %v6486_v55  ;;  %1490 = vst [vmem:[#allocation2 + $0x8c] sm:$0xf] %v1458_v13 }
 0x17b   : > { %v3390_v59 = vpop.f32.mrf.mxu0  ;;  %1203 = vst [vmem:[#allocation2 + $0xc8] sm:$0xf] %v1458_v13  ;;  %v1363_v13 = vpack.c.bf16 %v4342_v42, %v4342_v42 }
 0x17c   : > { %3340 = vmatmul.bf16.gmra.mxu3 %v4921_v10 }
 0x17d   : > { %v3212_v29 = vpop.f32.mrf.mxu2  ;;  %1395 = vst [vmem:[#allocation2 + $0xac] sm:$0xf] %v1363_v13  ;;  %v4312_v13 = vld [vmem:[%s5873_s13 + $0x78] sm:$0xff] }
 0x17e   : > { %3429 = vmatmul.bf16.gmra.mxu0 %v4925_v14  ;;  %v3213_v46 = vadd.f32 %v3212_v29, %v3124_v34  ;;  %v4953_v14 = vor.u32 %v5410_v51, %v4952_v57  ;;  %v1268_v57 = vpack.c.bf16 %v4311_v43, %v4311_v43  ;;  %v4343_v51 = vld [vmem:[%s5873_s13 + $0x69] sm:$0xff]  ;;  %v6677_v43 = vld [vmem:[%s6883_s5] ss:$0 sm:$0xff] }
 0x17f   : > { %v3301_v58 = vpop.f32.mrf.mxu3  ;;  %v3128_v48 = vpop.f32.mrf.mxu1  ;;  %v3050_v42 = vadd.f32 %v6677_v43, %v6434_v15 }
 0x180   : > { %v3302_v8 = vadd.f32 %v3301_v58, %v3213_v46  ;;  %v3129_v61 = vadd.f32 %v3128_v48, %v3040_v35  ;;  %v4957_v46 = vor.u32 %v5406_v30, %v4954_v11  ;;  %v4374_v30 = vld [vmem:[%s5873_s13 + $0x62] sm:$0xff]  ;;  %v4375_v11 = vld [vmem:[%s5873_s13 + $0x6a] sm:$0xff]  ;;  %1300 = vst [vmem:[#allocation2 + $0xcc] sm:$0xf] %v1268_v57 }
 0x182   : > { %3167 = vmatmul.bf16.gmra.mxu1 %v4949_v26  ;;  %v6654_v24 = vadd.f32 %v3390_v59, %v3302_v8  ;;  %v5411_v59 = vld [vmem:[#allocation2 + $0x468] sm:$0xf0]  ;;  %v3045_v8 = vadd.f32 %v6493_v60, %v6401_v56  ;;  %v1459_v56 = vpack.c.bf16 %v4374_v30, %v4374_v30  ;;  %v4344_v30 = vld [vmem:[%s5873_s13 + $0x79] sm:$0xff] }
 0x183   : > { %v3392_v34 = vpop.f32.mrf.mxu0  ;;  %v4961_v58 = vor.u32 %v5411_v59, %v4960_v47  ;;  %v5273_v59 = vld [vmem:[#allocation2 + $0x1c] sm:$0xf] }
 0x184   : > { %1491 = vst [vmem:[#allocation2 + $0xb0] sm:$0xf] %v1459_v56 }
 0x185   : > { %v3214_v4 = vpop.f32.mrf.mxu2  ;;  %1204 = vst [vmem:[#allocation2 + $0xec] sm:$0xf] %v1459_v56 }
 0x186   : > { %v3215_v10 = vadd.f32 %v3214_v4, %v3126_v12  ;;  %v5272_v12 = vld [vmem:[#allocation2 + $0x14] sm:$0xf]  ;;  %v1364_v4 = vpack.c.bf16 %v4343_v51, %v4343_v51 }
 0x187   : > { %v3303_v33 = vpop.f32.mrf.mxu3  ;;  %v3130_v29 = vpop.f32.mrf.mxu1  ;;  %v4425_v25 = vor.u32 %v5272_v12, %v4422_v16  ;;  %v4436_v16 = vld [vmem:[#allocation2 + $0x20] sm:$0xf] }
 0x188   : > { %v3304_v35 = vadd.f32 %v3303_v33, %v3215_v10  ;;  %v3131_v26 = vadd.f32 %v3130_v29, %v3042_v44  ;;  %v4428_v10 = vld [vmem:[#allocation2 + $0x18] sm:$0xf]  ;;  %v1460_v33 = vpack.c.bf16 %v4375_v11, %v4375_v11  ;;  %v4430_v29 = vld [vmem:[#allocation2 + $0x3c] sm:$0xf0]  ;;  %1396 = vst [vmem:[#allocation2 + $0xd0] sm:$0xf] %v1364_v4 }
 0x189   : > { %v4313_v4 = vld [vmem:[%s5873_s13 + $0x80] sm:$0xff] }
 0x18a   : > { %3256 = vmatmul.bf16.gmra.mxu2 %v4953_v14  ;;  %v6658_v48 = vadd.f32 %v3392_v34, %v3304_v35  ;;  %v1267_v34 = vpack.c.bf16 %v4310_v21, %v4310_v21  ;;  %v5277_v14 = vld [vmem:[#allocation2 + $0x38] sm:$0xf0]  ;;  %v3047_v35 = vadd.f32 %v6493_v60, %v6426_v41  ;;  %1492 = vst [vmem:[#allocation2 + $0xd4] sm:$0xf] %v1460_v33 }
 0x18b   : > { %v3395_v55 = vpop.f32.mrf.mxu0  ;;  %1205 = vst [vmem:[#allocation2 + $0x110] sm:$0xf] %v1460_v33  ;;  %v5281_v60 = vld [vmem:[#allocation2 + $0x5c] sm:$0xf]  ;;  %v1365_v33 = vpack.c.bf16 %v4344_v30, %v4344_v30  ;;  %v3055_v30 = vadd.f32 %v6677_v43, %v6459_v54 }
 0x18c   : > { %3345 = vmatmul.bf16.gmra.mxu3 %v4957_v46  ;;  %1299 = vst [vmem:[#allocation2 + $0xa8] sm:$0xf] %v1267_v34 }
 0x18d   : > { %v3217_v31 = vpop.f32.mrf.mxu2  ;;  %1397 = vst [vmem:[#allocation2 + $0xf4] sm:$0xf] %v1365_v33  ;;  %v4314_v33 = vld [vmem:[%s5873_s13 + $0x90] sm:$0xff] }
 0x18e   : > { %3434 = vmatmul.bf16.gmra.mxu0 %v4961_v58  ;;  %v3218_v49 = vadd.f32 %v3217_v31, %v3129_v61  ;;  %v4429_v58 = vor.u32 %v5277_v14, %v4428_v10  ;;  %v1270_v10 = vpack.c.bf16 %v4313_v4, %v4313_v4  ;;  %v4345_v14 = vld [vmem:[%s5873_s13 + $0x81] sm:$0xff] }
 0x18f   : > { %v3306_v5 = vpop.f32.mrf.mxu3  ;;  %v3133_v63 = vpop.f32.mrf.mxu1 }
 0x190   : > { %v3307_v6 = vadd.f32 %v3306_v5, %v3218_v49  ;;  %v3134_v3 = vadd.f32 %v3133_v63, %v3045_v8  ;;  %v4433_v49 = vor.u32 %v5273_v59, %v4430_v29  ;;  %v4376_v59 = vld [vmem:[%s5873_s13 + $0x7a] sm:$0xff]  ;;  %v4377_v29 = vld [vmem:[%s5873_s13 + $0x82] sm:$0xff]  ;;  %1302 = vst [vmem:[#allocation2 + $0x114] sm:$0xf] %v1270_v10 }
 0x191   : > { %v1461_v15 = vpack.c.bf16 %v4376_v59, %v4376_v59  ;;  %v4346_v59 = vld [vmem:[%s5873_s13 + $0x91] sm:$0xff] }
 0x192   : > { %3448 = vmatmul.bf16.vlgmr.msra.gmra.mxu1 %v4425_v25  ;;  %v6668_v44 = vadd.f32 %v3395_v55, %v3307_v6  ;;  %v5278_v55 = vld [vmem:[#allocation2 + $0x40] sm:$0xf0] }
 0x193   : > { %v3397_v61 = vpop.f32.mrf.mxu0  ;;  %v4437_v5 = vor.u32 %v5278_v55, %v4436_v16  ;;  %v5282_v55 = vld [vmem:[#allocation2 + $0x64] sm:$0xf]  ;;  %1493 = vst [vmem:[#allocation2 + $0xf8] sm:$0xf] %v1461_v15 }
 0x194   : > { %1206 = vst [vmem:[#allocation2 + $0x134] sm:$0xf] %v1461_v15 }
 0x195   : > { %v3219_v47 = vpop.f32.mrf.mxu2 }
 0x196   : > { %v3220_v46 = vadd.f32 %v3219_v47, %v3131_v26  ;;  %v4458_v26 = vld [vmem:[#allocation2 + $0x7c] sm:$0xf0]  ;;  %v1366_v47 = vpack.c.bf16 %v4345_v14, %v4345_v14 }
 0x197   : > { %v3308_v12 = vpop.f32.mrf.mxu3  ;;  %v3135_v31 = vpop.f32.mrf.mxu1  ;;  %v4461_v34 = vor.u32 %v5281_v60, %v4458_v26  ;;  %v4472_v26 = vld [vmem:[#allocation2 + $0x68] sm:$0xf] }
 0x198   : > { %v3309_v8 = vadd.f32 %v3308_v12, %v3220_v46  ;;  %v3136_v25 = vadd.f32 %v3135_v31, %v3047_v35  ;;  %v4464_v46 = vld [vmem:[#allocation2 + $0x60] sm:$0xf]  ;;  %v1462_v12 = vpack.c.bf16 %v4377_v29, %v4377_v29  ;;  %v4466_v31 = vld [vmem:[#allocation2 + $0x84] sm:$0xf0]  ;;  %1398 = vst [vmem:[#allocation2 + $0x118] sm:$0xf] %v1366_v47 }
 0x199   : > { %v4315_v47 = vld [vmem:[%s5873_s13 + $0x98] sm:$0xff] }
 0x19a   : > { %3537 = vmatmul.bf16.vlgmr.msra.gmra.mxu2 %v4429_v58  ;;  %v6672_v63 = vadd.f32 %v3397_v61, %v3309_v8  ;;  %v1269_v61 = vpack.c.bf16 %v4312_v13, %v4312_v13  ;;  %v5286_v58 = vld [vmem:[#allocation2 + $0x80] sm:$0xf0]  ;;  %v3052_v8 = vadd.f32 %v6677_v43, %v6448_v19  ;;  %1494 = vst [vmem:[#allocation2 + $0x11c] sm:$0xf] %v1462_v12  ;;  %v4494_v13 = vld [vmem:[#allocation2 + $0xc4] sm:$0xf0] }
 0x19b   : > { %v3400_v41 = vpop.f32.mrf.mxu0  ;;  %1207 = vst [vmem:[#allocation2 + $0x158] sm:$0xf] %v1462_v12  ;;  %v1367_v12 = vpack.c.bf16 %v4346_v59, %v4346_v59  ;;  %v3060_v59 = vadd.f32 %v6677_v43, %v6495_v39 }
 0x19c   : > { %3626 = vmatmul.bf16.vlgmr.msra.gmra.mxu3 %v4433_v49  ;;  %1301 = vst [vmem:[#allocation2 + $0xf0] sm:$0xf] %v1269_v61 }
 0x19d   : > { %v3222_v21 = vpop.f32.mrf.mxu2  ;;  %1399 = vst [vmem:[#allocation2 + $0x13c] sm:$0xf] %v1367_v12  ;;  %v4316_v12 = vld [vmem:[%s5873_s13 + $0xa8] sm:$0xff] }
 0x19e   : > { %3715 = vmatmul.bf16.vlgmr.msra.gmra.mxu0 %v4437_v5  ;;  %v3223_v6 = vadd.f32 %v3222_v21, %v3134_v3  ;;  %v4465_v5 = vor.u32 %v5286_v58, %v4464_v46  ;;  %v1272_v46 = vpack.c.bf16 %v4315_v47, %v4315_v47  ;;  %v4347_v58 = vld [vmem:[%s5873_s13 + $0x99] sm:$0xff] }
 0x19f   : > { %v3311_v57 = vpop.f32.mrf.mxu3  ;;  %v3138_v51 = vpop.f32.mrf.mxu1 }
 0x1a0   : > { %v3312_v11 = vadd.f32 %v3311_v57, %v3223_v6  ;;  %v3139_v56 = vadd.f32 %v3138_v51, %v3050_v42  ;;  %v4469_v6 = vor.u32 %v5282_v55, %v4466_v31  ;;  %v4378_v55 = vld [vmem:[%s5873_s13 + $0x92] sm:$0xff]  ;;  %v4379_v31 = vld [vmem:[%s5873_s13 + $0x9a] sm:$0xff]  ;;  %1304 = vst [vmem:[#allocation2 + $0x15c] sm:$0xf] %v1272_v46 }
 0x1a1   : > { %v1463_v54 = vpack.c.bf16 %v4378_v55, %v4378_v55  ;;  %v4348_v55 = vld [vmem:[%s5873_s13 + $0xa9] sm:$0xff] }
 0x1a2   : > { %3453 = vmatmul.bf16.gmra.mxu1 %v4461_v34  ;;  %v6687_v35 = vadd.f32 %v3400_v41, %v3312_v11  ;;  %v5287_v41 = vld [vmem:[#allocation2 + $0x88] sm:$0xf0] }
 0x1a3   : > { %v3402_v3 = vpop.f32.mrf.mxu0  ;;  %v4473_v57 = vor.u32 %v5287_v41, %v4472_v26  ;;  %v5291_v41 = vld [vmem:[#allocation2 + $0xac] sm:$0xf]  ;;  %1495 = vst [vmem:[#allocation2 + $0x140] sm:$0xf] %v1463_v54 }
 0x1a4   : > { %1208 = vst [vmem:[#allocation2 + $0x17c] sm:$0xf] %v1463_v54 }
 0x1a5   : > { %v3224_v16 = vpop.f32.mrf.mxu2 }
 0x1a6   : > { %v3225_v49 = vadd.f32 %v3224_v16, %v3136_v25  ;;  %v5290_v25 = vld [vmem:[#allocation2 + $0xa4] sm:$0xf]  ;;  %v1368_v16 = vpack.c.bf16 %v4347_v58, %v4347_v58 }
 0x1a7   : > { %v3313_v60 = vpop.f32.mrf.mxu3  ;;  %v3140_v21 = vpop.f32.mrf.mxu1  ;;  %v4497_v61 = vor.u32 %v5290_v25, %v4494_v13  ;;  %v4508_v13 = vld [vmem:[#allocation2 + $0xb0] sm:$0xf] }
 0x1a8   : > { %v3314_v42 = vadd.f32 %v3313_v60, %v3225_v49  ;;  %v3141_v34 = vadd.f32 %v3140_v21, %v3052_v8  ;;  %v4500_v49 = vld [vmem:[#allocation2 + $0xa8] sm:$0xf]  ;;  %v1464_v60 = vpack.c.bf16 %v4379_v31, %v4379_v31  ;;  %v4502_v21 = vld [vmem:[#allocation2 + $0xcc] sm:$0xf0]  ;;  %1400 = vst [vmem:[#allocation2 + $0x160] sm:$0xf] %v1368_v16 }
 0x1a9   : > { %v4317_v16 = vld [vmem:[%s5873_s13 + $0xb0] sm:$0xff] }
 0x1aa   : > { %3542 = vmatmul.bf16.gmra.mxu2 %v4465_v5  ;;  %v6691_v51 = vadd.f32 %v3402_v3, %v3314_v42  ;;  %v1271_v3 = vpack.c.bf16 %v4314_v33, %v4314_v33  ;;  %v5295_v5 = vld [vmem:[#allocation2 + $0xc8] sm:$0xf0]  ;;  %v3057_v42 = vadd.f32 %v6677_v43, %v6482_v52  ;;  %1496 = vst [vmem:[#allocation2 + $0x164] sm:$0xf] %v1464_v60  ;;  %v4530_v33 = vld [vmem:[#allocation2 + $0x10c] sm:$0xf0] }
 0x1ab   : > { %v3405_v19 = vpop.f32.mrf.mxu0  ;;  %1209 = vst [vmem:[#allocation2 + $0x1a0] sm:$0xf] %v1464_v60  ;;  %v1369_v60 = vpack.c.bf16 %v4348_v55, %v4348_v55  ;;  %v3065_v55 = vadd.f32 %v6677_v43, %v6408_v23 }
 0x1ac   : > { %3631 = vmatmul.bf16.gmra.mxu3 %v4469_v6  ;;  %1303 = vst [vmem:[#allocation2 + $0x138] sm:$0xf] %v1271_v3 }
 0x1ad   : > { %v3227_v4 = vpop.f32.mrf.mxu2  ;;  %1401 = vst [vmem:[#allocation2 + $0x184] sm:$0xf] %v1369_v60  ;;  %v4318_v60 = vld [vmem:[%s5873_s13 + $0xc0] sm:$0xff] }
 0x1ae   : > { %3720 = vmatmul.bf16.gmra.mxu0 %v4473_v57  ;;  %v3228_v11 = vadd.f32 %v3227_v4, %v3139_v56  ;;  %v4501_v57 = vor.u32 %v5295_v5, %v4500_v49  ;;  %v1274_v49 = vpack.c.bf16 %v4317_v16, %v4317_v16  ;;  %v4349_v5 = vld [vmem:[%s5873_s13 + $0xb1] sm:$0xff] }
 0x1af   : > { %v3316_v10 = vpop.f32.mrf.mxu3  ;;  %v3143_v14 = vpop.f32.mrf.mxu1 }
 0x1b0   : > { %v3317_v29 = vadd.f32 %v3316_v10, %v3228_v11  ;;  %v3144_v15 = vadd.f32 %v3143_v14, %v3055_v30  ;;  %v4505_v11 = vor.u32 %v5291_v41, %v4502_v21  ;;  %v4380_v41 = vld [vmem:[%s5873_s13 + $0xaa] sm:$0xff]  ;;  %v4381_v21 = vld [vmem:[%s5873_s13 + $0xb2] sm:$0xff]  ;;  %1306 = vst [vmem:[#allocation2 + $0x1a4] sm:$0xf] %v1274_v49 }
 0x1b1   : > { %v1465_v39 = vpack.c.bf16 %v4380_v41, %v4380_v41  ;;  %v4350_v41 = vld [vmem:[%s5873_s13 + $0xc1] sm:$0xff] }
 0x1b2   : > { %3458 = vmatmul.bf16.gmra.mxu1 %v4497_v61  ;;  %v6701_v8 = vadd.f32 %v3405_v19, %v3317_v29  ;;  %v5296_v19 = vld [vmem:[#allocation2 + $0xd0] sm:$0xf0] }
 0x1b3   : > { %v3407_v56 = vpop.f32.mrf.mxu0  ;;  %v4509_v10 = vor.u32 %v5296_v19, %v4508_v13  ;;  %v5300_v19 = vld [vmem:[#allocation2 + $0xf4] sm:$0xf]  ;;  %1497 = vst [vmem:[#allocation2 + $0x188] sm:$0xf] %v1465_v39 }
 0x1b4   : > { %1210 = vst [vmem:[#allocation2 + $0x1c4] sm:$0xf] %v1465_v39 }
 0x1b5   : > { %v3229_v26 = vpop.f32.mrf.mxu2 }
 0x1b6   : > { %v3230_v6 = vadd.f32 %v3229_v26, %v3141_v34  ;;  %v5299_v34 = vld [vmem:[#allocation2 + $0xec] sm:$0xf]  ;;  %v1370_v26 = vpack.c.bf16 %v4349_v5, %v4349_v5 }
 0x1b7   : > { %v3318_v25 = vpop.f32.mrf.mxu3  ;;  %v3145_v4 = vpop.f32.mrf.mxu1  ;;  %v4533_v3 = vor.u32 %v5299_v34, %v4530_v33  ;;  %v4544_v33 = vld [vmem:[#allocation2 + $0xf8] sm:$0xf] }
 0x1b8   : > { %v3319_v30 = vadd.f32 %v3318_v25, %v3230_v6  ;;  %v3146_v61 = vadd.f32 %v3145_v4, %v3057_v42  ;;  %v4536_v6 = vld [vmem:[#allocation2 + $0xf0] sm:$0xf]  ;;  %v1466_v25 = vpack.c.bf16 %v4381_v21, %v4381_v21  ;;  %v4538_v4 = vld [vmem:[#allocation2 + $0x114] sm:$0xf0]  ;;  %1402 = vst [vmem:[#allocation2 + $0x1a8] sm:$0xf] %v1370_v26 }
 0x1b9   : > { %v4319_v26 = vld [vmem:[%s5873_s13 + $0xc8] sm:$0xff] }
 0x1ba   : > { %3547 = vmatmul.bf16.gmra.mxu2 %v4501_v57  ;;  %v6705_v14 = vadd.f32 %v3407_v56, %v3319_v30  ;;  %v1273_v56 = vpack.c.bf16 %v4316_v12, %v4316_v12  ;;  %v5304_v57 = vld [vmem:[#allocation2 + $0x110] sm:$0xf0]  ;;  %v3062_v30 = vadd.f32 %v6677_v43, %v6509_v37  ;;  %1498 = vst [vmem:[#allocation2 + $0x1ac] sm:$0xf] %v1466_v25  ;;  %v4566_v12 = vld [vmem:[#allocation2 + $0x154] sm:$0xf0] }
 0x1bb   : > { %v3410_v52 = vpop.f32.mrf.mxu0  ;;  %1211 = vst [vmem:[#allocation2 + $0x1e8] sm:$0xf] %v1466_v25  ;;  %v1371_v25 = vpack.c.bf16 %v4350_v41, %v4350_v41  ;;  %v3070_v41 = vadd.f32 %v6677_v43, %v6438_v17 }
 0x1bc   : > { %3636 = vmatmul.bf16.gmra.mxu3 %v4505_v11  ;;  %1305 = vst [vmem:[#allocation2 + $0x180] sm:$0xf] %v1273_v56 }
 0x1bd   : > { %v3232_v47 = vpop.f32.mrf.mxu2  ;;  %1403 = vst [vmem:[#allocation2 + $0x1cc] sm:$0xf] %v1371_v25  ;;  %v4320_v25 = vld [vmem:[%s5873_s13 + $0xd8] sm:$0xff] }
 0x1be   : > { %3725 = vmatmul.bf16.gmra.mxu0 %v4509_v10  ;;  %v3233_v29 = vadd.f32 %v3232_v47, %v3144_v15  ;;  %v4537_v10 = vor.u32 %v5304_v57, %v4536_v6  ;;  %v1276_v6 = vpack.c.bf16 %v4319_v26, %v4319_v26  ;;  %v4351_v57 = vld [vmem:[%s5873_s13 + $0xc9] sm:$0xff] }
 0x1bf   : > { %v3321_v46 = vpop.f32.mrf.mxu3  ;;  %v3148_v58 = vpop.f32.mrf.mxu1 }
 0x1c0   : > { %v3322_v31 = vadd.f32 %v3321_v46, %v3233_v29  ;;  %v3149_v54 = vadd.f32 %v3148_v58, %v3060_v59  ;;  %v4541_v29 = vor.u32 %v5300_v19, %v4538_v4  ;;  %v4382_v19 = vld [vmem:[%s5873_s13 + $0xc2] sm:$0xff]  ;;  %v4383_v4 = vld [vmem:[%s5873_s13 + $0xca] sm:$0xff]  ;;  %1308 = vst [vmem:[#allocation2 + $0x1ec] sm:$0xf] %v1276_v6 }
 0x1c1   : > { %v1467_v23 = vpack.c.bf16 %v4382_v19, %v4382_v19  ;;  %v4352_v19 = vld [vmem:[%s5873_s13 + $0xd9] sm:$0xff] }
 0x1c2   : > { %3463 = vmatmul.bf16.gmra.mxu1 %v4533_v3  ;;  %v6715_v42 = vadd.f32 %v3410_v52, %v3322_v31  ;;  %v5305_v52 = vld [vmem:[#allocation2 + $0x118] sm:$0xf0] }
 0x1c3   : > { %v3412_v15 = vpop.f32.mrf.mxu0  ;;  %v4545_v46 = vor.u32 %v5305_v52, %v4544_v33  ;;  %v5309_v52 = vld [vmem:[#allocation2 + $0x13c] sm:$0xf]  ;;  %1499 = vst [vmem:[#allocation2 + $0x1d0] sm:$0xf] %v1467_v23 }
 0x1c4   : > { %1212 = vst [vmem:[#allocation2 + $0x20c] sm:$0xf] %v1467_v23 }
 0x1c5   : > { %v3234_v13 = vpop.f32.mrf.mxu2 }
 0x1c6   : > { %v3235_v11 = vadd.f32 %v3234_v13, %v3146_v61  ;;  %v5308_v61 = vld [vmem:[#allocation2 + $0x134] sm:$0xf]  ;;  %v1372_v13 = vpack.c.bf16 %v4351_v57, %v4351_v57 }
 0x1c7   : > { %v3323_v34 = vpop.f32.mrf.mxu3  ;;  %v3150_v47 = vpop.f32.mrf.mxu1  ;;  %v4569_v56 = vor.u32 %v5308_v61, %v4566_v12  ;;  %v4580_v12 = vld [vmem:[#allocation2 + $0x140] sm:$0xf] }
 0x1c8   : > { %v3324_v59 = vadd.f32 %v3323_v34, %v3235_v11  ;;  %v3151_v3 = vadd.f32 %v3150_v47, %v3062_v30  ;;  %v4572_v11 = vld [vmem:[#allocation2 + $0x138] sm:$0xf]  ;;  %v1468_v34 = vpack.c.bf16 %v4383_v4, %v4383_v4  ;;  %v4574_v47 = vld [vmem:[#allocation2 + $0x15c] sm:$0xf0]  ;;  %1404 = vst [vmem:[#allocation2 + $0x1f0] sm:$0xf] %v1372_v13 }
 0x1c9   : > { %v4321_v13 = vld [vmem:[%s5873_s13 + $0xe0] sm:$0xff] }
 0x1ca   : > { %3552 = vmatmul.bf16.gmra.mxu2 %v4537_v10  ;;  %v6719_v58 = vadd.f32 %v3412_v15, %v3324_v59  ;;  %v1275_v15 = vpack.c.bf16 %v4318_v60, %v4318_v60  ;;  %v5313_v10 = vld [vmem:[#allocation2 + $0x158] sm:$0xf0]  ;;  %v3067_v59 = vadd.f32 %v6677_v43, %v6430_v28  ;;  %1500 = vst [vmem:[#allocation2 + $0x1f4] sm:$0xf] %v1468_v34  ;;  %v4602_v60 = vld [vmem:[#allocation2 + $0x19c] sm:$0xf0] }
 0x1cb   : > { %v3415_v37 = vpop.f32.mrf.mxu0  ;;  %1213 = vst [vmem:[#allocation2 + $0x230] sm:$0xf] %v1468_v34  ;;  %v1373_v34 = vpack.c.bf16 %v4352_v19, %v4352_v19  ;;  %v3075_v19 = vadd.f32 %v6677_v43, %v6464_v1 }
 0x1cc   : > { %3641 = vmatmul.bf16.gmra.mxu3 %v4541_v29  ;;  %1307 = vst [vmem:[#allocation2 + $0x1c8] sm:$0xf] %v1275_v15 }
 0x1cd   : > { %v3237_v16 = vpop.f32.mrf.mxu2  ;;  %1405 = vst [vmem:[#allocation2 + $0x214] sm:$0xf] %v1373_v34  ;;  %v4322_v34 = vld [vmem:[%s5873_s13 + $0xf0] sm:$0xff] }
 0x1ce   : > { %3730 = vmatmul.bf16.gmra.mxu0 %v4545_v46  ;;  %v3238_v31 = vadd.f32 %v3237_v16, %v3149_v54  ;;  %v4573_v46 = vor.u32 %v5313_v10, %v4572_v11  ;;  %v1278_v11 = vpack.c.bf16 %v4321_v13, %v4321_v13  ;;  %v4353_v10 = vld [vmem:[%s5873_s13 + $0xe1] sm:$0xff] }
 0x1cf   : > { %v3326_v49 = vpop.f32.mrf.mxu3  ;;  %v3153_v5 = vpop.f32.mrf.mxu1 }
 0x1d0   : > { %v3327_v21 = vadd.f32 %v3326_v49, %v3238_v31  ;;  %v3154_v39 = vadd.f32 %v3153_v5, %v3065_v55  ;;  %v4577_v31 = vor.u32 %v5309_v52, %v4574_v47  ;;  %v4384_v52 = vld [vmem:[%s5873_s13 + $0xda] sm:$0xff]  ;;  %v4385_v47 = vld [vmem:[%s5873_s13 + $0xe2] sm:$0xff]  ;;  %1310 = vst [vmem:[#allocation2 + $0x234] sm:$0xf] %v1278_v11 }
 0x1d1   : > { %v1469_v17 = vpack.c.bf16 %v4384_v52, %v4384_v52  ;;  %v4354_v52 = vld [vmem:[%s5873_s13 + $0xf1] sm:$0xff] }
 0x1d2   : > { %3468 = vmatmul.bf16.gmra.mxu1 %v4569_v56  ;;  %v6729_v30 = vadd.f32 %v3415_v37, %v3327_v21  ;;  %v5314_v37 = vld [vmem:[#allocation2 + $0x160] sm:$0xf0] }
 0x1d3   : > { %v3417_v54 = vpop.f32.mrf.mxu0  ;;  %v4581_v49 = vor.u32 %v5314_v37, %v4580_v12  ;;  %v5318_v37 = vld [vmem:[#allocation2 + $0x184] sm:$0xf]  ;;  %1501 = vst [vmem:[#allocation2 + $0x218] sm:$0xf] %v1469_v17 }
 0x1d4   : > { %1214 = vst [vmem:[#allocation2 + $0x254] sm:$0xf] %v1469_v17 }
 0x1d5   : > { %v3239_v33 = vpop.f32.mrf.mxu2 }
 0x1d6   : > { %v3240_v29 = vadd.f32 %v3239_v33, %v3151_v3  ;;  %v5317_v3 = vld [vmem:[#allocation2 + $0x17c] sm:$0xf]  ;;  %v1374_v33 = vpack.c.bf16 %v4353_v10, %v4353_v10 }
 0x1d7   : > { %v3328_v61 = vpop.f32.mrf.mxu3  ;;  %v3155_v16 = vpop.f32.mrf.mxu1  ;;  %v4605_v15 = vor.u32 %v5317_v3, %v4602_v60  ;;  %v4616_v60 = vld [vmem:[#allocation2 + $0x188] sm:$0xf] }
 0x1d8   : > { %v3329_v55 = vadd.f32 %v3328_v61, %v3240_v29  ;;  %v3156_v56 = vadd.f32 %v3155_v16, %v3067_v59  ;;  %v4608_v29 = vld [vmem:[#allocation2 + $0x180] sm:$0xf]  ;;  %v1470_v61 = vpack.c.bf16 %v4385_v47, %v4385_v47  ;;  %v4610_v16 = vld [vmem:[#allocation2 + $0x1a4] sm:$0xf0]  ;;  %1406 = vst [vmem:[#allocation2 + $0x238] sm:$0xf] %v1374_v33 }
 0x1d9   : > { %v4323_v33 = vld [vmem:[%s5873_s13 + $0xf8] sm:$0xff] }
 0x1da   : > { %3557 = vmatmul.bf16.gmra.mxu2 %v4573_v46  ;;  %v6733_v5 = vadd.f32 %v3417_v54, %v3329_v55  ;;  %v1277_v54 = vpack.c.bf16 %v4320_v25, %v4320_v25  ;;  %v5322_v46 = vld [vmem:[#allocation2 + $0x1a0] sm:$0xf0]  ;;  %v3072_v55 = vadd.f32 %v6677_v43, %v6452_v38  ;;  %1502 = vst [vmem:[#allocation2 + $0x23c] sm:$0xf] %v1470_v61  ;;  %v4638_v25 = vld [vmem:[#allocation2 + $0x1e4] sm:$0xf0] }
 0x1db   : > { %v3420_v28 = vpop.f32.mrf.mxu0  ;;  %1215 = vst [vmem:[#allocation2 + $0x278] sm:$0xf] %v1470_v61  ;;  %v1375_v61 = vpack.c.bf16 %v4354_v52, %v4354_v52  ;;  %v3080_v52 = vadd.f32 %v6677_v43, %v6499_v62 }
 0x1dc   : > { %3646 = vmatmul.bf16.gmra.mxu3 %v4577_v31  ;;  %1309 = vst [vmem:[#allocation2 + $0x210] sm:$0xf] %v1277_v54 }
 0x1dd   : > { %v3242_v26 = vpop.f32.mrf.mxu2  ;;  %1407 = vst [vmem:[#allocation2 + $0x25c] sm:$0xf] %v1375_v61  ;;  %v4324_v61 = vld [vmem:[%s5873_s13 + $0x108] sm:$0xff] }
 0x1de   : > { %3735 = vmatmul.bf16.gmra.mxu0 %v4581_v49  ;;  %v3243_v21 = vadd.f32 %v3242_v26, %v3154_v39  ;;  %v4609_v49 = vor.u32 %v5322_v46, %v4608_v29  ;;  %v1280_v29 = vpack.c.bf16 %v4323_v33, %v4323_v33  ;;  %v4355_v46 = vld [vmem:[%s5873_s13 + $0xf9] sm:$0xff] }
 0x1df   : > { %v3331_v6 = vpop.f32.mrf.mxu3  ;;  %v3158_v57 = vpop.f32.mrf.mxu1 }
 0x1e0   : > { %v3332_v4 = vadd.f32 %v3331_v6, %v3243_v21  ;;  %v3159_v23 = vadd.f32 %v3158_v57, %v3070_v41  ;;  %v4613_v21 = vor.u32 %v5318_v37, %v4610_v16  ;;  %v4386_v37 = vld [vmem:[%s5873_s13 + $0xf2] sm:$0xff]  ;;  %v4387_v16 = vld [vmem:[%s5873_s13 + $0xfa] sm:$0xff]  ;;  %1312 = vst [vmem:[#allocation2 + $0x27c] sm:$0xf] %v1280_v29 }
 0x1e1   : > { %v1471_v1 = vpack.c.bf16 %v4386_v37, %v4386_v37  ;;  %v4356_v37 = vld [vmem:[%s5873_s13 + $0x109] sm:$0xff] }
 0x1e2   : > { %3473 = vmatmul.bf16.gmra.mxu1 %v4605_v15  ;;  %v6743_v59 = vadd.f32 %v3420_v28, %v3332_v4  ;;  %v5323_v28 = vld [vmem:[#allocation2 + $0x1a8] sm:$0xf0] }
 0x1e3   : > { %v3422_v39 = vpop.f32.mrf.mxu0  ;;  %v4617_v6 = vor.u32 %v5323_v28, %v4616_v60  ;;  %v5327_v28 = vld [vmem:[#allocation2 + $0x1cc] sm:$0xf]  ;;  %1503 = vst [vmem:[#allocation2 + $0x260] sm:$0xf] %v1471_v1 }
 0x1e4   : > { %1216 = vst [vmem:[#allocation2 + $0x29c] sm:$0xf] %v1471_v1 }
 0x1e5   : > { %v3244_v12 = vpop.f32.mrf.mxu2 }
 0x1e6   : > { %v3245_v31 = vadd.f32 %v3244_v12, %v3156_v56  ;;  %v5326_v56 = vld [vmem:[#allocation2 + $0x1c4] sm:$0xf]  ;;  %v1376_v12 = vpack.c.bf16 %v4355_v46, %v4355_v46 }
 0x1e7   : > { %v3333_v3 = vpop.f32.mrf.mxu3  ;;  %v3160_v26 = vpop.f32.mrf.mxu1  ;;  %v4641_v54 = vor.u32 %v5326_v56, %v4638_v25  ;;  %v4652_v25 = vld [vmem:[#allocation2 + $0x1d0] sm:$0xf] }
 0x1e8   : > { %v3334_v41 = vadd.f32 %v3333_v3, %v3245_v31  ;;  %v3161_v15 = vadd.f32 %v3160_v26, %v3072_v55  ;;  %v4644_v31 = vld [vmem:[#allocation2 + $0x1c8] sm:$0xf]  ;;  %v1472_v3 = vpack.c.bf16 %v4387_v16, %v4387_v16  ;;  %v4646_v26 = vld [vmem:[#allocation2 + $0x1ec] sm:$0xf0]  ;;  %1408 = vst [vmem:[#allocation2 + $0x280] sm:$0xf] %v1376_v12 }
 0x1e9   : > { %v4325_v12 = vld [vmem:[%s5873_s13 + $0x110] sm:$0xff] }
 0x1ea   : > { %3562 = vmatmul.bf16.gmra.mxu2 %v4609_v49  ;;  %v6747_v57 = vadd.f32 %v3422_v39, %v3334_v41  ;;  %v1279_v39 = vpack.c.bf16 %v4322_v34, %v4322_v34  ;;  %v5331_v49 = vld [vmem:[#allocation2 + $0x1e8] sm:$0xf0]  ;;  %v3077_v41 = vadd.f32 %v6677_v43, %v6484_v22  ;;  %1504 = vst [vmem:[#allocation2 + $0x284] sm:$0xf] %v1472_v3  ;;  %v4674_v34 = vld [vmem:[#allocation2 + $0x22c] sm:$0xf0] }
 0x1eb   : > { %v3425_v38 = vpop.f32.mrf.mxu0  ;;  %1217 = vst [vmem:[#allocation2 + $0x2c0] sm:$0xf] %v1472_v3  ;;  %v1377_v3 = vpack.c.bf16 %v4356_v37, %v4356_v37 }
 0x1ec   : > { %3651 = vmatmul.bf16.gmra.mxu3 %v4613_v21  ;;  %1311 = vst [vmem:[#allocation2 + $0x258] sm:$0xf] %v1279_v39 }
 0x1ed   : > { %v3247_v13 = vpop.f32.mrf.mxu2  ;;  %1409 = vst [vmem:[#allocation2 + $0x2a4] sm:$0xf] %v1377_v3  ;;  %v4358_v3 = vld [vmem:[%s5873_s13 + $0x121] sm:$0xff] }
 0x1ee   : > { %3740 = vmatmul.bf16.gmra.mxu0 %v4617_v6  ;;  %v3248_v4 = vadd.f32 %v3247_v13, %v3159_v23  ;;  %v4645_v6 = vor.u32 %v5331_v49, %v4644_v31  ;;  %v1282_v31 = vpack.c.bf16 %v4325_v12, %v4325_v12  ;;  %v4357_v49 = vld [vmem:[%s5873_s13 + $0x111] sm:$0xff] }
 0x1ef   : > { %v3336_v11 = vpop.f32.mrf.mxu3  ;;  %v3163_v10 = vpop.f32.mrf.mxu1 }
 0x1f0   : > { %v3337_v47 = vadd.f32 %v3336_v11, %v3248_v4  ;;  %v3164_v17 = vadd.f32 %v3163_v10, %v3075_v19  ;;  %v4649_v4 = vor.u32 %v5327_v28, %v4646_v26  ;;  %v4388_v28 = vld [vmem:[%s5873_s13 + $0x10a] sm:$0xff]  ;;  %v4389_v26 = vld [vmem:[%s5873_s13 + $0x112] sm:$0xff]  ;;  %1314 = vst [vmem:[#allocation2 + $0x2c4] sm:$0xf] %v1282_v31  ;;  %v4326_v31 = vld [vmem:[%s5873_s13 + $0x120] sm:$0xff] }
 0x1f1   : > { %v1473_v62 = vpack.c.bf16 %v4388_v28, %v4388_v28  ;;  %v1283_v28 = vpack.c.bf16 %v4326_v31, %v4326_v31 }
 0x1f2   : > { %3478 = vmatmul.bf16.gmra.mxu1 %v4641_v54  ;;  %v6757_v55 = vadd.f32 %v3425_v38, %v3337_v47  ;;  %v5332_v38 = vld [vmem:[#allocation2 + $0x1f0] sm:$0xf0] }
 0x1f3   : > { %v3427_v23 = vpop.f32.mrf.mxu0  ;;  %v4653_v11 = vor.u32 %v5332_v38, %v4652_v25  ;;  %v5336_v38 = vld [vmem:[#allocation2 + $0x214] sm:$0xf]  ;;  %1505 = vst [vmem:[#allocation2 + $0x2a8] sm:$0xf] %v1473_v62 }
 0x1f4   : > { %1218 = vst [vmem:[#allocation2 + $0x2e4] sm:$0xf] %v1473_v62  ;;  %v4359_v62 = vld [vmem:[%s5873_s13 + $0x129] sm:$0xff] }
 0x1f5   : > { %v3249_v60 = vpop.f32.mrf.mxu2  ;;  %1315 = vst [vmem:[#allocation2 + $0x2e8] sm:$0xf] %v1283_v28 }
 0x1f6   : > { %v3250_v21 = vadd.f32 %v3249_v60, %v3161_v15  ;;  %v5335_v15 = vld [vmem:[#allocation2 + $0x20c] sm:$0xf]  ;;  %v1378_v60 = vpack.c.bf16 %v4357_v49, %v4357_v49 }
 0x1f7   : > { %v3338_v56 = vpop.f32.mrf.mxu3  ;;  %v3165_v13 = vpop.f32.mrf.mxu1  ;;  %v4677_v39 = vor.u32 %v5335_v15, %v4674_v34  ;;  %v4688_v34 = vld [vmem:[#allocation2 + $0x218] sm:$0xf]  ;;  %v4327_v49 = vld [vmem:[%s5873_s13 + $0x128] sm:$0xff] }
 0x1f8   : > { %v3339_v19 = vadd.f32 %v3338_v56, %v3250_v21  ;;  %v3166_v54 = vadd.f32 %v3165_v13, %v3077_v41  ;;  %v4680_v21 = vld [vmem:[#allocation2 + $0x210] sm:$0xf]  ;;  %v1474_v56 = vpack.c.bf16 %v4389_v26, %v4389_v26  ;;  %v4682_v13 = vld [vmem:[#allocation2 + $0x234] sm:$0xf0]  ;;  %1410 = vst [vmem:[#allocation2 + $0x2c8] sm:$0xf] %v1378_v60  ;;  %v1284_v26 = vpack.c.bf16 %v4327_v49, %v4327_v49 }
 0x1fa   : > { %3567 = vmatmul.bf16.gmra.mxu2 %v4645_v6  ;;  %v6761_v10 = vadd.f32 %v3427_v23, %v3339_v19  ;;  %v1281_v23 = vpack.c.bf16 %v4324_v61, %v4324_v61  ;;  %v5340_v6 = vld [vmem:[#allocation2 + $0x230] sm:$0xf0]  ;;  %v3082_v19 = vadd.f32 %v6677_v43, %v6511_v50  ;;  %1506 = vst [vmem:[#allocation2 + $0x2cc] sm:$0xf] %v1474_v56 }
 0x1fb   : > { %v3430_v22 = vpop.f32.mrf.mxu0  ;;  %1219 = vst [vmem:[#allocation2 + $0x308] sm:$0xf] %v1474_v56  ;;  %v5344_v43 = vld [vmem:[#allocation2 + $0x254] sm:$0xf]  ;;  %v4391_v56 = vld [vmem:[%s5873_s13 + $0x12a] sm:$0xff] }
 0x1fc   : > { %3656 = vmatmul.bf16.gmra.mxu3 %v4649_v4  ;;  %1313 = vst [vmem:[#allocation2 + $0x2a0] sm:$0xf] %v1281_v23 }
 0x1fd   : > { %v3252_v33 = vpop.f32.mrf.mxu2  ;;  %1316 = vst [vmem:[#allocation2 + $0x30c] sm:$0xf] %v1284_v26  ;;  %v4328_v26 = vld [vmem:[%s5873_s13 + $0x138] sm:$0xff] }
 0x1fe   : > { %3745 = vmatmul.bf16.gmra.mxu0 %v4653_v11  ;;  %v3253_v47 = vadd.f32 %v3252_v33, %v3164_v17  ;;  %v4681_v11 = vor.u32 %v5340_v6, %v4680_v21  ;;  %v1380_v21 = vpack.c.bf16 %v4359_v62, %v4359_v62  ;;  %v4390_v6 = vld [vmem:[%s5873_s13 + $0x122] sm:$0xff] }
 0x1ff   : > { %v3341_v29 = vpop.f32.mrf.mxu3  ;;  %v3168_v46 = vpop.f32.mrf.mxu1  ;;  %v4329_v62 = vld [vmem:[%s5873_s13 + $0x140] sm:$0xff] }
 0x200   : > { %v3342_v16 = vadd.f32 %v3341_v29, %v3253_v47  ;;  %v3169_v1 = vadd.f32 %v3168_v46, %v3080_v52  ;;  %v4685_v47 = vor.u32 %v5336_v38, %v4682_v13  ;;  %v4716_v13 = vld [vmem:[#allocation2 + $0x258] sm:$0xf]  ;;  %1412 = vst [vmem:[#allocation2 + $0x310] sm:$0xf] %v1380_v21 }
 0x202   : > { %3483 = vmatmul.bf16.gmra.mxu1 %v4677_v39  ;;  %v6771_v41 = vadd.f32 %v3430_v22, %v3342_v16  ;;  %v5341_v22 = vld [vmem:[#allocation2 + $0x238] sm:$0xf0] }
 0x203   : > { %v3432_v17 = vpop.f32.mrf.mxu0  ;;  %v4689_v29 = vor.u32 %v5341_v22, %v4688_v34  ;;  %v4718_v34 = vld [vmem:[#allocation2 + $0x27c] sm:$0xf0] }
 0x205   : > { %v3254_v25 = vpop.f32.mrf.mxu2 }
 0x206   : > { %v3255_v4 = vadd.f32 %v3254_v25, %v3166_v54  ;;  %v4710_v54 = vld [vmem:[#allocation2 + $0x274] sm:$0xf0]  ;;  %v1475_v25 = vpack.c.bf16 %v4390_v6, %v4390_v6  ;;  %v1285_v6 = vpack.c.bf16 %v4328_v26, %v4328_v26 }
 0x207   : > { %v3343_v15 = vpop.f32.mrf.mxu3  ;;  %v3170_v33 = vpop.f32.mrf.mxu1  ;;  %v4713_v37 = vor.u32 %v5344_v43, %v4710_v54 }
 0x208   : > { %v3344_v52 = vadd.f32 %v3343_v15, %v3255_v4  ;;  %v3171_v39 = vadd.f32 %v3170_v33, %v3082_v19  ;;  %v5349_v19 = vld [vmem:[#allocation2 + $0x278] sm:$0xf0]  ;;  %v1476_v4 = vpack.c.bf16 %v4391_v56, %v4391_v56  ;;  %1507 = vst [vmem:[#allocation2 + $0x2f0] sm:$0xf] %v1475_v25  ;;  %v1286_v56 = vpack.c.bf16 %v4329_v62, %v4329_v62 }
 0x209   : > { %v5345_v15 = vld [vmem:[#allocation2 + $0x25c] sm:$0xf]  ;;  %v4717_v33 = vor.u32 %v5349_v19, %v4716_v13  ;;  %1220 = vst [vmem:[#allocation2 + $0x32c] sm:$0xf] %v1475_v25  ;;  %v4361_v25 = vld [vmem:[%s5873_s13 + $0x141] sm:$0xff] }
 0x20a   : > { %3572 = vmatmul.bf16.gmra.mxu2 %v4681_v11  ;;  %v6775_v46 = vadd.f32 %v3432_v17, %v3344_v52  ;;  %v1379_v17 = vpack.c.bf16 %v4358_v3, %v4358_v3  ;;  %1508 = vst [vmem:[#allocation2 + $0x314] sm:$0xf] %v1476_v4  ;;  %v4721_v54 = vor.u32 %v5345_v15, %v4718_v34  ;;  %v4392_v19 = vld [vmem:[%s5873_s13 + $0x13a] sm:$0xff] }
 0x20b   : > { %v3435_v50 = vpop.f32.mrf.mxu0  ;;  %1221 = vst [vmem:[#allocation2 + $0x350] sm:$0xf] %v1476_v4  ;;  %v1382_v13 = vpack.c.bf16 %v4361_v25, %v4361_v25  ;;  %v4393_v4 = vld [vmem:[%s5873_s13 + $0x142] sm:$0xff] }
 0x20c   : > { %3661 = vmatmul.bf16.gmra.mxu3 %v4685_v47  ;;  %1411 = vst [vmem:[#allocation2 + $0x2ec] sm:$0xf] %v1379_v17  ;;  %v4724_v47 = vld [vmem:[#allocation2 + $0x260] sm:$0xf]  ;;  %v1478_v34 = vpack.c.bf16 %v4393_v4, %v4393_v4 }
 0x20d   : > { %v3257_v61 = vpop.f32.mrf.mxu2  ;;  %v4360_v17 = vld [vmem:[%s5873_s13 + $0x139] sm:$0xff]  ;;  %1317 = vst [vmem:[#allocation2 + $0x330] sm:$0xf] %v1285_v6 }
 0x20e   : > { %3750 = vmatmul.bf16.gmra.mxu0 %v4689_v29  ;;  %v3258_v12 = vadd.f32 %v3257_v61, %v3169_v1  ;;  %v5350_v29 = vld [vmem:[#allocation2 + $0x280] sm:$0xf0]  ;;  %1318 = vst [vmem:[#allocation2 + $0x354] sm:$0xf] %v1286_v56 }
 0x20f   : > { %v3346_v16 = vpop.f32.mrf.mxu3  ;;  %v3449_v23 = vpop.f32.mrf.mxu1  ;;  %v4725_v61 = vor.u32 %v5350_v29, %v4724_v47  ;;  %v5354_v47 = vld [vmem:[#allocation2 + $0x2a4] sm:$0xf]  ;;  %v4754_v29 = vld [vmem:[#allocation2 + $0x2c4] sm:$0xf0]  ;;  %1414 = vst [vmem:[#allocation2 + $0x358] sm:$0xf] %v1382_v13 }
 0x210   : > { %v3347_v60 = vadd.f32 %v3346_v16, %v3258_v12  ;;  %v4746_v16 = vld [vmem:[#allocation2 + $0x2bc] sm:$0xf0]  ;;  %v3450_v49 = vadd.f32 %v3449_v23, %v6532_v45  ;;  %v5358_v23 = vld [vmem:[#allocation2 + $0x2c0] sm:$0xf0]  ;;  %1510 = vst [vmem:[#allocation2 + $0x35c] sm:$0xf] %v1478_v34  ;;  %v4757_v26 = vor.u32 %v5354_v47, %v4754_v29 }
 0x211   : > { %v4752_v45 = vld [vmem:[#allocation2 + $0x2a0] sm:$0xf]  ;;  %1223 = vst [vmem:[#allocation2 + $0x398] sm:$0xf] %v1478_v34  ;;  %v4394_v29 = vld [vmem:[%s5873_s13 + $0x152] sm:$0xff] }
 0x212   : > { %3488 = vmatmul.bf16.gmra.mxu1 %v4713_v37  ;;  %v6783_v38 = vadd.f32 %v3435_v50, %v3347_v60 }
 0x213   : > { %v3437_v1 = vpop.f32.mrf.mxu0 }
 0x215   : > { %v3259_v11 = vpop.f32.mrf.mxu2 }
 0x216   : > { %v3260_v22 = vadd.f32 %v3259_v11, %v3171_v39  ;;  %v5353_v39 = vld [vmem:[#allocation2 + $0x29c] sm:$0xf]  ;;  %v1477_v11 = vpack.c.bf16 %v4392_v19, %v4392_v19 }
 0x217   : > { %v3348_v52 = vpop.f32.mrf.mxu3  ;;  %v3451_v43 = vpop.f32.mrf.mxu1  ;;  %v4749_v3 = vor.u32 %v5353_v39, %v4746_v16  ;;  %v4760_v39 = vld [vmem:[#allocation2 + $0x2a8] sm:$0xf]  ;;  %v5359_v16 = vld [vmem:[#allocation2 + $0x2c8] sm:$0xf0] }
 0x218   : > { %v3349_v50 = vadd.f32 %v3348_v52, %v3260_v22  ;;  %1509 = vst [vmem:[#allocation2 + $0x338] sm:$0xf] %v1477_v11 }
 0x219   : > { %1222 = vst [vmem:[#allocation2 + $0x374] sm:$0xf] %v1477_v11  ;;  %v4330_v11 = vld [vmem:[%s5873_s13 + $0x150] sm:$0xff] }
 0x21a   : > { %3577 = vmatmul.bf16.gmra.mxu2 %v4717_v33  ;;  %v6785_v12 = vadd.f32 %v3437_v1, %v3349_v50  ;;  %v1381_v1 = vpack.c.bf16 %v4360_v17, %v4360_v17  ;;  %v3452_v33 = vadd.f32 %v3451_v43, %v6539_v7  ;;  %v4761_v7 = vor.u32 %v5359_v16, %v4760_v39  ;;  %v5362_v17 = vld [vmem:[#allocation2 + $0x2e4] sm:$0xf]  ;;  %v4788_v16 = vld [vmem:[#allocation2 + $0x2e8] sm:$0xf] }
 0x21b   : > { %v3716_v37 = vpop.f32.mrf.mxu0  ;;  %v1287_v34 = vpack.c.bf16 %v4330_v11, %v4330_v11 }
 0x21c   : > { %3666 = vmatmul.bf16.gmra.mxu3 %v4721_v54  ;;  %1413 = vst [vmem:[#allocation2 + $0x334] sm:$0xf] %v1381_v1  ;;  %v4753_v54 = vor.u32 %v5358_v23, %v4752_v45  ;;  %v4362_v45 = vld [vmem:[%s5873_s13 + $0x151] sm:$0xff] }
 0x21d   : > { %v3538_v31 = vpop.f32.mrf.mxu2  ;;  %1319 = vst [vmem:[#allocation2 + $0x378] sm:$0xf] %v1287_v34 }
 0x21e   : > { %3755 = vmatmul.bf16.gmra.mxu0 %v4725_v61  ;;  %v3539_v21 = vadd.f32 %v3538_v31, %v3450_v49 }
 0x21f   : > { %v3627_v60 = vpop.f32.mrf.mxu3  ;;  %v3454_v28 = vpop.f32.mrf.mxu1 }
 0x220   : > { %v3628_v22 = vadd.f32 %v3627_v60, %v3539_v21  ;;  %v3455_v43 = vadd.f32 %v3454_v28, %v6549_v0 }
 0x222   : > { %3493 = vmatmul.bf16.gmra.mxu1 %v4749_v3  ;;  %v3717_v49 = vadd.f32 %v3716_v37, %v3628_v22  ;;  %v4782_v37 = vld [vmem:[#allocation2 + $0x304] sm:$0xf0] }
 0x223   : > { %v3718_v15 = vpop.f32.mrf.mxu0  ;;  %v4785_v0 = vor.u32 %v5362_v17, %v4782_v37  ;;  %v5363_v17 = vld [vmem:[#allocation2 + $0x2ec] sm:$0xf]  ;;  %v4790_v37 = vld [vmem:[#allocation2 + $0x30c] sm:$0xf0] }
 0x224   : > { %v3898_v21 = vmul.f32 %v3717_v49, %v3717_v49 }
 0x225   : > { %v3540_v52 = vpop.f32.mrf.mxu2 }
 0x226   : > { %v3541_v50 = vadd.f32 %v3540_v52, %v3452_v33  ;;  %v4363_v33 = vld [vmem:[%s5873_s13 + $0x159] sm:$0xff]  ;;  %v1383_v52 = vpack.c.bf16 %v4362_v45, %v4362_v45 }
 0x227   : > { %v3629_v61 = vpop.f32.mrf.mxu3  ;;  %v3456_v31 = vpop.f32.mrf.mxu1  ;;  %v1384_v47 = vpack.c.bf16 %v4363_v33, %v4363_v33 }
 0x228   : > { %v3630_v3 = vadd.f32 %v3629_v61, %v3541_v50  ;;  %v4395_v50 = vld [vmem:[%s5873_s13 + $0x15a] sm:$0xff]  ;;  %v1479_v61 = vpack.c.bf16 %v4394_v29, %v4394_v29  ;;  %1415 = vst [vmem:[#allocation2 + $0x37c] sm:$0xf] %v1383_v52 }
 0x229   : > { %1416 = vst [vmem:[#allocation2 + $0x3a0] sm:$0xf] %v1384_v47 }
 0x22a   : > { %v3719_v60 = vadd.f32 %v3718_v15, %v3630_v3  ;;  %3582 = vmatmul.bf16.gmra.mxu2 %v4753_v54  ;;  %v4331_v15 = vld [vmem:[%s5873_s13 + $0x158] sm:$0xff]  ;;  %v1480_v3 = vpack.c.bf16 %v4395_v50, %v4395_v50  ;;  %1511 = vst [vmem:[#allocation2 + $0x380] sm:$0xf] %v1479_v61 }
 0x22b   : > { %v3721_v62 = vpop.f32.mrf.mxu0  ;;  %v1288_v22 = vpack.c.bf16 %v4331_v15, %v4331_v15  ;;  %1224 = vst [vmem:[#allocation2 + $0x3bc] sm:$0xf] %v1479_v61  ;;  %v5371_v15 = vld [vmem:[#allocation2 + $0x32c] sm:$0xf] }
 0x22c   : > { %v5553_v6 = vpack.c.bf16 %v3719_v60, %v3717_v49  ;;  %v3860_v56 = vadd.f32 %v3719_v60, %v3717_v49  ;;  %v3899_v25 = vmul.f32 %v3719_v60, %v3719_v60  ;;  %3671 = vmatmul.bf16.gmra.mxu3 %v4757_v26  ;;  %v5367_v49 = vld [vmem:[#allocation2 + $0x308] sm:$0xf0]  ;;  %1512 = vst [vmem:[#allocation2 + $0x3a4] sm:$0xf] %v1480_v3 }
 0x22d   : > { %v3543_v1 = vpop.f32.mrf.mxu2  ;;  %1320 = vst [vmem:[#allocation2 + $0x39c] sm:$0xf] %v1288_v22 }
 0x22e   : > { %5554 = vst [vmem:[%s6800_s21] sm:$0xff] %v5553_v6   ;;  %v3930_v13 = vadd.f32 %v3899_v25, %v3898_v21  ;;  %3760 = vmatmul.bf16.gmra.mxu0 %v4761_v7  ;;  %v3544_v19 = vadd.f32 %v3543_v1, %v3455_v43  ;;  %v3457_v7 = vadd.f32 %v3456_v31, %v6553_v53  ;;  %v4796_v1 = vld [vmem:[#allocation2 + $0x2f0] sm:$0xf] }
 0x22f   : > { %v3632_v28 = vpop.f32.mrf.mxu3  ;;  %v3459_v4 = vpop.f32.mrf.mxu1  ;;  %1225 = vst [vmem:[#allocation2 + $0x3e0] sm:$0xf] %v1480_v3 }
 0x230   : > { %v3633_v23 = vadd.f32 %v3632_v28, %v3544_v19  ;;  %v5368_v19 = vld [vmem:[#allocation2 + $0x310] sm:$0xf0]  ;;  %v3460_v22 = vadd.f32 %v3459_v4, %v6572_v2 }
 0x231   : > { %v4797_v53 = vor.u32 %v5368_v19, %v4796_v1 }
 0x232   : > { %v3722_v54 = vadd.f32 %v3721_v62, %v3633_v23  ;;  %3498 = vmatmul.bf16.gmra.mxu1 %v4785_v0  ;;  %v4789_v62 = vor.u32 %v5367_v49, %v4788_v16  ;;  %v4333_v16 = vld [vmem:[%s5873_s13 + $0x170] sm:$0xff] }
 0x233   : > { %v3723_v39 = vpop.f32.mrf.mxu0  ;;  %v4364_v49 = vld [vmem:[%s5873_s13 + $0x169] sm:$0xff] }
 0x234   : > { %v3861_v26 = vadd.f32 %v3860_v56, %v3722_v54  ;;  %v3900_v60 = vmul.f32 %v3722_v54, %v3722_v54  ;;  %v4793_v56 = vor.u32 %v5363_v17, %v4790_v37  ;;  %v1385_v2 = vpack.c.bf16 %v4364_v49, %v4364_v49 }
 0x235   : > { %v3545_v43 = vpop.f32.mrf.mxu2 }
 0x236   : > { %v3931_v21 = vadd.f32 %v3930_v13, %v3900_v60  ;;  %v3546_v6 = vadd.f32 %v3545_v43, %v3457_v7  ;;  %v4818_v13 = vld [vmem:[#allocation2 + $0x34c] sm:$0xf0]  ;;  %1417 = vst [vmem:[#allocation2 + $0x3c4] sm:$0xf] %v1385_v2 }
 0x237   : > { %v3634_v25 = vpop.f32.mrf.mxu3  ;;  %v3461_v0 = vpop.f32.mrf.mxu1  ;;  %v4821_v29 = vor.u32 %v5371_v15, %v4818_v13  ;;  %v4365_v60 = vld [vmem:[%s5873_s13 + $0x171] sm:$0xff] }
 0x238   : > { %v3635_v28 = vadd.f32 %v3634_v25, %v3546_v6  ;;  %v1386_v4 = vpack.c.bf16 %v4365_v60, %v4365_v60  ;;  %v4396_v7 = vld [vmem:[%s5873_s13 + $0x16a] sm:$0xff]  ;;  %v4397_v43 = vld [vmem:[%s5873_s13 + $0x172] sm:$0xff] }
 0x239   : > { %v1481_v37 = vpack.c.bf16 %v4396_v7, %v4396_v7  ;;  %v4824_v6 = vld [vmem:[#allocation2 + $0x330] sm:$0xf]  ;;  %v1482_v25 = vpack.c.bf16 %v4397_v43, %v4397_v43  ;;  %v4334_v43 = vld [vmem:[%s5873_s13 + $0x180] sm:$0xff] }
 0x23a   : > { %v3724_v11 = vadd.f32 %v3723_v39, %v3635_v28  ;;  %3587 = vmatmul.bf16.gmra.mxu2 %v4789_v62  ;;  %v4332_v39 = vld [vmem:[%s5873_s13 + $0x168] sm:$0xff]  ;;  %v5376_v62 = vld [vmem:[#allocation2 + $0x350] sm:$0xf0]  ;;  %v3462_v28 = vadd.f32 %v3461_v0, %v6579_v20  ;;  %1418 = vst [vmem:[#allocation2 + $0x3e8] sm:$0xf] %v1386_v4 }
 0x23b   : > { %v3726_v31 = vpop.f32.mrf.mxu0  ;;  %v1289_v3 = vpack.c.bf16 %v4332_v39, %v4332_v39  ;;  %1513 = vst [vmem:[#allocation2 + $0x3c8] sm:$0xf] %v1481_v37 }
 0x23c   : > { %v5558_v45 = vpack.c.bf16 %v3724_v11, %v3722_v54  ;;  %v3862_v23 = vadd.f32 %v3861_v26, %v3724_v11  ;;  %v3901_v34 = vmul.f32 %v3724_v11, %v3724_v11  ;;  %3676 = vmatmul.bf16.gmra.mxu3 %v4793_v56  ;;  %v1290_v26 = vpack.c.bf16 %v4333_v16, %v4333_v16  ;;  %v5372_v11 = vld [vmem:[#allocation2 + $0x334] sm:$0xf] }
 0x23d   : > { %v3548_v33 = vpop.f32.mrf.mxu2  ;;  %1321 = vst [vmem:[#allocation2 + $0x3c0] sm:$0xf] %v1289_v3 }
 0x23e   : > { %5645 = vst [vmem:[%s6800_s21 + $0x8] sm:$0xff] %v5558_v45   ;;  %v3932_v52 = vadd.f32 %v3931_v21, %v3901_v34  ;;  %3765 = vmatmul.bf16.gmra.mxu0 %v4797_v53  ;;  %v3549_v47 = vadd.f32 %v3548_v33, %v3460_v22  ;;  %v4826_v53 = vld [vmem:[#allocation2 + $0x354] sm:$0xf0]  ;;  %v5377_v22 = vld [vmem:[#allocation2 + $0x358] sm:$0xf0] }
 0x23f   : > { %v3637_v50 = vpop.f32.mrf.mxu3  ;;  %v3464_v61 = vpop.f32.mrf.mxu1  ;;  %1322 = vst [vmem:[#allocation2 + $0x3e4] sm:$0xf] %v1290_v26  ;;  %v4832_v34 = vld [vmem:[#allocation2 + $0x338] sm:$0xf] }
 0x240   : > { %v3638_v54 = vadd.f32 %v3637_v50, %v3549_v47  ;;  %1514 = vst [vmem:[#allocation2 + $0x3ec] sm:$0xf] %v1482_v25  ;;  %v4833_v20 = vor.u32 %v5377_v22, %v4832_v34  ;;  %v5380_v50 = vld [vmem:[#allocation2 + $0x374] sm:$0xf] }
 0x241   : > { %1226 = vst [vmem:[#allocation2 + $0x404] sm:$0xf] %v1481_v37  ;;  %v4335_v37 = vld [vmem:[%s5873_s13 + $0x188] sm:$0xff] }
 0x242   : > { %v3727_v17 = vadd.f32 %v3726_v31, %v3638_v54  ;;  %3503 = vmatmul.bf16.gmra.mxu1 %v4821_v29  ;;  %v4825_v31 = vor.u32 %v5376_v62, %v4824_v6  ;;  %1227 = vst [vmem:[#allocation2 + $0x428] sm:$0xf] %v1482_v25  ;;  %v3465_v54 = vadd.f32 %v3464_v61, %v6593_v32  ;;  %v4367_v25 = vld [vmem:[%s5873_s13 + $0x189] sm:$0xff] }
 0x243   : > { %v3728_v21 = vpop.f32.mrf.mxu0  ;;  %v1291_v6 = vpack.c.bf16 %v4334_v43, %v4334_v43  ;;  %v1292_v62 = vpack.c.bf16 %v4335_v37, %v4335_v37  ;;  %v1388_v61 = vpack.c.bf16 %v4367_v25, %v4367_v25 }
 0x244   : > { %v3863_v1 = vadd.f32 %v3862_v23, %v3727_v17  ;;  %v3902_v19 = vmul.f32 %v3727_v17, %v3727_v17  ;;  %v4829_v23 = vor.u32 %v5372_v11, %v4826_v53  ;;  %v4860_v53 = vld [vmem:[#allocation2 + $0x378] sm:$0xf] }
 0x245   : > { %v3550_v56 = vpop.f32.mrf.mxu2  ;;  %1323 = vst [vmem:[#allocation2 + $0x408] sm:$0xf] %v1291_v6 }
 0x246   : > { %v3933_v15 = vadd.f32 %v3932_v52, %v3902_v19  ;;  %v3551_v13 = vadd.f32 %v3550_v56, %v3462_v28  ;;  %v4854_v52 = vld [vmem:[#allocation2 + $0x394] sm:$0xf0]  ;;  %v4399_v19 = vld [vmem:[%s5873_s13 + $0x18a] sm:$0xff]  ;;  %1324 = vst [vmem:[#allocation2 + $0x42c] sm:$0xf] %v1292_v62 }
 0x247   : > { %v3639_v45 = vpop.f32.mrf.mxu3  ;;  %v3466_v33 = vpop.f32.mrf.mxu1  ;;  %v4857_v2 = vor.u32 %v5380_v50, %v4854_v52  ;;  %1420 = vst [vmem:[#allocation2 + $0x430] sm:$0xf] %v1388_v61  ;;  %v4868_v52 = vld [vmem:[#allocation2 + $0x380] sm:$0xf] }
 0x248   : > { %v3640_v47 = vadd.f32 %v3639_v45, %v3551_v13  ;;  %v1484_v13 = vpack.c.bf16 %v4399_v19, %v4399_v19  ;;  %v3467_v34 = vadd.f32 %v3466_v33, %v6600_v9  ;;  %v4368_v61 = vld [vmem:[%s5873_s13 + $0x199] sm:$0xff] }
 0x24a   : > { %v3729_v29 = vadd.f32 %v3728_v21, %v3640_v47  ;;  %3592 = vmatmul.bf16.gmra.mxu2 %v4825_v31  ;;  %v4366_v21 = vld [vmem:[%s5873_s13 + $0x181] sm:$0xff]  ;;  %v5381_v47 = vld [vmem:[#allocation2 + $0x37c] sm:$0xf]  ;;  %1516 = vst [vmem:[#allocation2 + $0x434] sm:$0xf] %v1484_v13 }
 0x24b   : > { %v3731_v0 = vpop.f32.mrf.mxu0  ;;  %v1387_v32 = vpack.c.bf16 %v4366_v21, %v4366_v21  ;;  %1229 = vst [vmem:[#allocation2 + $0x470] sm:$0xf] %v1484_v13 }
 0x24c   : > { %v5563_v39 = vpack.c.bf16 %v3729_v29, %v3727_v17  ;;  %v3864_v16 = vadd.f32 %v3863_v1, %v3729_v29  ;;  %v3903_v49 = vmul.f32 %v3729_v29, %v3729_v29  ;;  %3681 = vmatmul.bf16.gmra.mxu3 %v4829_v23  ;;  %v4398_v1 = vld [vmem:[%s5873_s13 + $0x182] sm:$0xff] }
 0x24d   : > { %v3553_v3 = vpop.f32.mrf.mxu2  ;;  %v1483_v56 = vpack.c.bf16 %v4398_v1, %v4398_v1  ;;  %1419 = vst [vmem:[#allocation2 + $0x40c] sm:$0xf] %v1387_v32  ;;  %v4862_v23 = vld [vmem:[#allocation2 + $0x39c] sm:$0xf0] }
 0x24e   : > { %5646 = vst [vmem:[%s6800_s21 + $0x10] sm:$0xff] %v5563_v39   ;;  %v3934_v26 = vadd.f32 %v3933_v15, %v3903_v49  ;;  %3770 = vmatmul.bf16.gmra.mxu0 %v4833_v20  ;;  %v3554_v60 = vadd.f32 %v3553_v3, %v3465_v54  ;;  %v5385_v15 = vld [vmem:[#allocation2 + $0x398] sm:$0xf0]  ;;  %v5386_v39 = vld [vmem:[#allocation2 + $0x3a0] sm:$0xf0] }
 0x24f   : > { %v3642_v4 = vpop.f32.mrf.mxu3  ;;  %v3469_v7 = vpop.f32.mrf.mxu1  ;;  %1515 = vst [vmem:[#allocation2 + $0x410] sm:$0xf] %v1483_v56  ;;  %v4869_v9 = vor.u32 %v5386_v39, %v4868_v52  ;;  %v4369_v1 = vld [vmem:[%s5873_s13 + $0x1a1] sm:$0xff] }
 0x250   : > { %v3643_v17 = vadd.f32 %v3642_v4, %v3554_v60  ;;  %1228 = vst [vmem:[#allocation2 + $0x44c] sm:$0xf] %v1483_v56  ;;  %v5389_v60 = vld [vmem:[#allocation2 + $0x3bc] sm:$0xf]  ;;  %v3470_v37 = vadd.f32 %v3469_v7, %v6620_v27  ;;  %v4401_v27 = vld [vmem:[%s5873_s13 + $0x1a2] sm:$0xff] }
 0x252   : > { %v3732_v28 = vadd.f32 %v3731_v0, %v3643_v17  ;;  %3508 = vmatmul.bf16.gmra.mxu1 %v4857_v2  ;;  %v4861_v0 = vor.u32 %v5385_v15, %v4860_v53  ;;  %v1390_v53 = vpack.c.bf16 %v4369_v1, %v4369_v1  ;;  %v4400_v15 = vld [vmem:[%s5873_s13 + $0x19a] sm:$0xff] }
 0x253   : > { %v3733_v11 = vpop.f32.mrf.mxu0  ;;  %v1485_v13 = vpack.c.bf16 %v4400_v15, %v4400_v15  ;;  %v4932_v15 = vld [vmem:[#allocation2 + $0x408] sm:$0xf] }
 0x254   : > { %v3865_v31 = vadd.f32 %v3864_v16, %v3732_v28  ;;  %v3904_v45 = vmul.f32 %v3732_v28, %v3732_v28  ;;  %v4865_v16 = vor.u32 %v5381_v47, %v4862_v23  ;;  %1422 = vst [vmem:[#allocation2 + $0x478] sm:$0xf] %v1390_v53 }
 0x255   : > { %v3555_v22 = vpop.f32.mrf.mxu2  ;;  %1517 = vst [vmem:[#allocation2 + $0x458] sm:$0xf] %v1485_v13 }
 0x256   : > { %v3935_v29 = vadd.f32 %v3934_v26, %v3904_v45  ;;  %v3556_v20 = vadd.f32 %v3555_v22, %v3467_v34  ;;  %v4890_v26 = vld [vmem:[#allocation2 + $0x3dc] sm:$0xf0]  ;;  %v5394_v34 = vld [vmem:[#allocation2 + $0x3e0] sm:$0xf0]  ;;  %v1486_v22 = vpack.c.bf16 %v4401_v27, %v4401_v27  ;;  %v5403_v27 = vld [vmem:[#allocation2 + $0x428] sm:$0xf0] }
 0x257   : > { %v3644_v50 = vpop.f32.mrf.mxu3  ;;  %v3471_v49 = vpop.f32.mrf.mxu1  ;;  %v4893_v62 = vor.u32 %v5389_v60, %v4890_v26  ;;  %v4896_v45 = vld [vmem:[#allocation2 + $0x3c0] sm:$0xf] }
 0x258   : > { %v3645_v54 = vadd.f32 %v3644_v50, %v3556_v20  ;;  %v4898_v50 = vld [vmem:[#allocation2 + $0x3e4] sm:$0xf0]  ;;  %1518 = vst [vmem:[#allocation2 + $0x47c] sm:$0xf] %v1486_v22 }
 0x25a   : > { %v3734_v3 = vadd.f32 %v3733_v11, %v3645_v54  ;;  %3597 = vmatmul.bf16.gmra.mxu2 %v4861_v0  ;;  %v1389_v11 = vpack.c.bf16 %v4368_v61, %v4368_v61  ;;  %v5390_v0 = vld [vmem:[#allocation2 + $0x3c4] sm:$0xf]  ;;  %v4897_v54 = vor.u32 %v5394_v34, %v4896_v45  ;;  %v4934_v45 = vld [vmem:[#allocation2 + $0x42c] sm:$0xf0] }
 0x25b   : > { %v3736_v33 = vpop.f32.mrf.mxu0  ;;  %v4901_v26 = vor.u32 %v5390_v0, %v4898_v50 }
 0x25c   : > { %v5568_v2 = vpack.c.bf16 %v3734_v3, %v3732_v28  ;;  %v3866_v4 = vadd.f32 %v3865_v31, %v3734_v3  ;;  %v3905_v43 = vmul.f32 %v3734_v3, %v3734_v3  ;;  %3686 = vmatmul.bf16.gmra.mxu3 %v4865_v16  ;;  %v5700_v28 = vld [vmem:[%s5873_s13] sm:$0xff]  ;;  %1421 = vst [vmem:[#allocation2 + $0x454] sm:$0xf] %v1389_v11  ;;  %v4904_v3 = vld [vmem:[#allocation2 + $0x3c8] sm:$0xf] }
 0x25d   : > { %v3558_v21 = vpop.f32.mrf.mxu2  ;;  %v1293_v56 = vpack.c.bf16 %v5700_v28, %v5700_v28 }
 0x25e   : > { %5647 = vst [vmem:[%s6800_s21 + $0x18] sm:$0xff] %v5568_v2   ;;  %v3936_v17 = vadd.f32 %v3935_v29, %v3905_v43  ;;  %3775 = vmatmul.bf16.gmra.mxu0 %v4869_v9  ;;  %v3559_v6 = vadd.f32 %v3558_v21, %v3470_v37  ;;  %v3472_v29 = vadd.f32 %v3471_v49, %v6628_v18  ;;  %v5395_v9 = vld [vmem:[#allocation2 + $0x3e8] sm:$0xf0]  ;;  %v4926_v43 = vld [vmem:[#allocation2 + $0x424] sm:$0xf0] }
 0x25f   : > { %v3647_v25 = vpop.f32.mrf.mxu3  ;;  %v3474_v32 = vpop.f32.mrf.mxu1  ;;  %1325 = vst [vmem:[#allocation2 + $0x450] sm:$0xf] %v1293_v56  ;;  %v4905_v18 = vor.u32 %v5395_v9, %v4904_v3  ;;  %v5407_v3 = vld [vmem:[#allocation2 + $0x44c] sm:$0xf]  ;;  %v4962_v9 = vld [vmem:[#allocation2 + $0x46c] sm:$0xf0] }
 0x260   : > { %v3648_v19 = vadd.f32 %v3647_v25, %v3559_v6  ;;  %1326 = vst [vmem:[#allocation2 + $0x474] sm:$0xf] %v1293_v56  ;;  %v3475_v6 = vadd.f32 %v3474_v32, %v6640_v40  ;;  %v5399_v32 = vld [vmem:[#allocation2 + $0x40c] sm:$0xf] }
 0x262   : > { %v3737_v7 = vadd.f32 %v3736_v33, %v3648_v19  ;;  %3513 = vmatmul.bf16.gmra.mxu1 %v4893_v62 }
 0x263   : > { %v3738_v31 = vpop.f32.mrf.mxu0 }
 0x264   : > { %v3867_v47 = vadd.f32 %v3866_v4, %v3737_v7  ;;  %v3906_v23 = vmul.f32 %v3737_v7, %v3737_v7  ;;  %v5398_v4 = vld [vmem:[#allocation2 + $0x404] sm:$0xf] }
 0x265   : > { %v3560_v20 = vpop.f32.mrf.mxu2  ;;  %v4929_v1 = vor.u32 %v5398_v4, %v4926_v43  ;;  %v4965_v4 = vor.u32 %v5407_v3, %v4962_v9 }
 0x266   : > { %v3937_v52 = vadd.f32 %v3936_v17, %v3906_v23  ;;  %v3561_v39 = vadd.f32 %v3560_v20, %v3472_v29  ;;  %v4940_v29 = vld [vmem:[#allocation2 + $0x410] sm:$0xf]  ;;  %v5404_v20 = vld [vmem:[#allocation2 + $0x430] sm:$0xf0] }
 0x267   : > { %v3649_v16 = vpop.f32.mrf.mxu3  ;;  %v3476_v33 = vpop.f32.mrf.mxu1 }
 0x268   : > { %v3650_v60 = vadd.f32 %v3649_v16, %v3561_v39 }
 0x26a   : > { %v3739_v2 = vadd.f32 %v3738_v31, %v3650_v60  ;;  %3602 = vmatmul.bf16.gmra.mxu2 %v4897_v54  ;;  %v3477_v31 = vadd.f32 %v3476_v33, %v6644_v36  ;;  %v4941_v54 = vor.u32 %v5404_v20, %v4940_v29 }
 0x26b   : > { %v3741_v49 = vpop.f32.mrf.mxu0 }
 0x26c   : > { %v5573_v37 = vpack.c.bf16 %v3739_v2, %v3737_v7  ;;  %v3868_v21 = vadd.f32 %v3867_v47, %v3739_v2  ;;  %v3907_v17 = vmul.f32 %v3739_v2, %v3739_v2  ;;  %3691 = vmatmul.bf16.gmra.mxu3 %v4901_v26  ;;  %v4933_v47 = vor.u32 %v5403_v27, %v4932_v15 }
 0x26d   : > { %v3563_v62 = vpop.f32.mrf.mxu2 }
 0x26e   : > { %5648 = vst [vmem:[%s6800_s21 + $0x20] sm:$0xff] %v5573_v37   ;;  %v3938_v25 = vadd.f32 %v3937_v52, %v3907_v17  ;;  %3780 = vmatmul.bf16.gmra.mxu0 %v4905_v18  ;;  %v3564_v61 = vadd.f32 %v3563_v62, %v3475_v6  ;;  %v4937_v52 = vor.u32 %v5399_v32, %v4934_v45  ;;  %v4968_v62 = vld [vmem:[#allocation2 + $0x450] sm:$0xf] }
 0x26f   : > { %v3652_v19 = vpop.f32.mrf.mxu3  ;;  %v3479_v28 = vpop.f32.mrf.mxu1 }
 0x270   : > { %v3653_v56 = vadd.f32 %v3652_v19, %v3564_v61  ;;  %v3480_v26 = vadd.f32 %v3479_v28, %v6654_v24  ;;  %v5408_v28 = vld [vmem:[#allocation2 + $0x454] sm:$0xf] }
 0x272   : > { %v3742_v11 = vadd.f32 %v3741_v49, %v3653_v56  ;;  %3518 = vmatmul.bf16.gmra.mxu1 %v4929_v1  ;;  %v4970_v56 = vld [vmem:[#allocation2 + $0x474] sm:$0xf0] }
 0x273   : > { %v3743_v53 = vpop.f32.mrf.mxu0  ;;  %v4973_v32 = vor.u32 %v5408_v28, %v4970_v56 }
 0x274   : > { %v3869_v7 = vadd.f32 %v3868_v21, %v3742_v11  ;;  %v3908_v13 = vmul.f32 %v3742_v11, %v3742_v11 }
 0x275   : > { %v3565_v40 = vpop.f32.mrf.mxu2 }
 0x276   : > { %v3939_v34 = vadd.f32 %v3938_v25, %v3908_v13  ;;  %v3566_v22 = vadd.f32 %v3565_v40, %v3477_v31  ;;  %v5412_v25 = vld [vmem:[#allocation2 + $0x470] sm:$0xf0]  ;;  %v5413_v13 = vld [vmem:[#allocation2 + $0x478] sm:$0xf0] }
 0x277   : > { %v3654_v23 = vpop.f32.mrf.mxu3  ;;  %v3481_v0 = vpop.f32.mrf.mxu1  ;;  %v4969_v15 = vor.u32 %v5412_v25, %v4968_v62 }
 0x278   : > { %v3655_v50 = vadd.f32 %v3654_v23, %v3566_v22  ;;  %v3482_v19 = vadd.f32 %v3481_v0, %v6658_v48 }
 0x27a   : > { %v3744_v39 = vadd.f32 %v3743_v53, %v3655_v50  ;;  %3607 = vmatmul.bf16.gmra.mxu2 %v4933_v47 }
 0x27b   : > { %v3746_v16 = vpop.f32.mrf.mxu0 }
 0x27c   : > { %v5578_v36 = vpack.c.bf16 %v3744_v39, %v3742_v11  ;;  %v3870_v33 = vadd.f32 %v3869_v7, %v3744_v39  ;;  %v3909_v60 = vmul.f32 %v3744_v39, %v3744_v39  ;;  %3696 = vmatmul.bf16.gmra.mxu3 %v4937_v52  ;;  %v4976_v7 = vld [vmem:[#allocation2 + $0x458] sm:$0xf] }
 0x27d   : > { %v3568_v2 = vpop.f32.mrf.mxu2 }
 0x27e   : > { %5649 = vst [vmem:[%s6800_s21 + $0x28] sm:$0xff] %v5578_v36   ;;  %v3940_v18 = vadd.f32 %v3939_v34, %v3909_v60  ;;  %3785 = vmatmul.bf16.gmra.mxu0 %v4941_v54  ;;  %v3569_v49 = vadd.f32 %v3568_v2, %v3480_v26  ;;  %v4977_v34 = vor.u32 %v5413_v13, %v4976_v7 }
 0x27f   : > { %v3657_v43 = vpop.f32.mrf.mxu3  ;;  %v3484_v37 = vpop.f32.mrf.mxu1 }
 0x280   : > { %v3658_v21 = vadd.f32 %v3657_v43, %v3569_v49  ;;  %v3485_v29 = vadd.f32 %v3484_v37, %v6668_v44 }
 0x282   : > { %v3747_v17 = vadd.f32 %v3746_v16, %v3658_v21  ;;  %3523 = vmatmul.bf16.gmra.mxu1 %v4965_v4 }
 0x283   : > { %v3748_v6 = vpop.f32.mrf.mxu0 }
 0x284   : > { %v3871_v61 = vadd.f32 %v3870_v33, %v3747_v17  ;;  %v3910_v1 = vmul.f32 %v3747_v17, %v3747_v17 }
 0x285   : > { %v3570_v24 = vpop.f32.mrf.mxu2 }
 0x286   : > { %v3941_v11 = vadd.f32 %v3940_v18, %v3910_v1  ;;  %v3571_v53 = vadd.f32 %v3570_v24, %v3482_v19 }
 0x287   : > { %v3659_v27 = vpop.f32.mrf.mxu3  ;;  %v3486_v31 = vpop.f32.mrf.mxu1 }
 0x288   : > { %v3660_v40 = vadd.f32 %v3659_v27, %v3571_v53  ;;  %v3487_v33 = vadd.f32 %v3486_v31, %v6672_v63 }
 0x28a   : > { %v3749_v45 = vadd.f32 %v3748_v6, %v3660_v40  ;;  %3612 = vmatmul.bf16.gmra.mxu2 %v4969_v15 }
 0x28b   : > { %v3751_v22 = vpop.f32.mrf.mxu0 }
 0x28c   : > { %v5583_v47 = vpack.c.bf16 %v3749_v45, %v3747_v17  ;;  %v3872_v23 = vadd.f32 %v3871_v61, %v3749_v45  ;;  %v3911_v48 = vmul.f32 %v3749_v45, %v3749_v45  ;;  %3701 = vmatmul.bf16.gmra.mxu3 %v4973_v32 }
 0x28d   : > { %v3573_v20 = vpop.f32.mrf.mxu2 }
 0x28e   : > { %5650 = vst [vmem:[%s6800_s21 + $0x30] sm:$0xff] %v5583_v47   ;;  %v3942_v0 = vadd.f32 %v3941_v11, %v3911_v48  ;;  %3790 = vmatmul.bf16.gmra.mxu0 %v4977_v34  ;;  %v3574_v50 = vadd.f32 %v3573_v20, %v3485_v29 }
 0x28f   : > { %v3662_v52 = vpop.f32.mrf.mxu3  ;;  %v3489_v39 = vpop.f32.mrf.mxu1 }
 0x290   : > { %v3663_v54 = vadd.f32 %v3662_v52, %v3574_v50  ;;  %v3490_v6 = vadd.f32 %v3489_v39, %v6687_v35 }
 0x292   : > { %v3752_v16 = vadd.f32 %v3751_v22, %v3663_v54 }
 0x293   : > { %v3753_v3 = vpop.f32.mrf.mxu0 }
 0x294   : > { %v3873_v9 = vadd.f32 %v3872_v23, %v3752_v16  ;;  %v3912_v36 = vmul.f32 %v3752_v16, %v3752_v16 }
 0x295   : > { %v3575_v60 = vpop.f32.mrf.mxu2 }
 0x296   : > { %v3943_v26 = vadd.f32 %v3942_v0, %v3912_v36  ;;  %v3576_v2 = vadd.f32 %v3575_v60, %v3487_v33 }
 0x297   : > { %v3664_v44 = vpop.f32.mrf.mxu3  ;;  %v3491_v18 = vpop.f32.mrf.mxu1 }
 0x298   : > { %v3665_v49 = vadd.f32 %v3664_v44, %v3576_v2  ;;  %v3492_v53 = vadd.f32 %v3491_v18, %v6691_v51 }
 0x29a   : > { %v3754_v4 = vadd.f32 %v3753_v3, %v3665_v49 }
 0x29b   : > { %v3756_v43 = vpop.f32.mrf.mxu0 }
 0x29c   : > { %v5588_v37 = vpack.c.bf16 %v3754_v4, %v3752_v16  ;;  %v3874_v21 = vadd.f32 %v3873_v9, %v3754_v4  ;;  %v3913_v17 = vmul.f32 %v3754_v4, %v3754_v4 }
 0x29d   : > { %v3578_v62 = vpop.f32.mrf.mxu2 }
 0x29e   : > { %5651 = vst [vmem:[%s6800_s21 + $0x38] sm:$0xff] %v5588_v37   ;;  %v3944_v25 = vadd.f32 %v3943_v26, %v3913_v17  ;;  %v3579_v61 = vadd.f32 %v3578_v62, %v3490_v6 }
 0x29f   : > { %v3667_v1 = vpop.f32.mrf.mxu3  ;;  %v3494_v19 = vpop.f32.mrf.mxu1 }
 0x2a0   : > { %v3668_v63 = vadd.f32 %v3667_v1, %v3579_v61  ;;  %v3495_v47 = vadd.f32 %v3494_v19, %v6701_v8 }
 0x2a2   : > { %v3757_v24 = vadd.f32 %v3756_v43, %v3668_v63 }
 0x2a3   : > { %v3758_v28 = vpop.f32.mrf.mxu0 }
 0x2a4   : > { %v3875_v56 = vadd.f32 %v3874_v21, %v3757_v24  ;;  %v3914_v11 = vmul.f32 %v3757_v24, %v3757_v24 }
 0x2a5   : > { %v3580_v15 = vpop.f32.mrf.mxu2 }
 0x2a6   : > { %v3945_v27 = vadd.f32 %v3944_v25, %v3914_v11  ;;  %v3581_v7 = vadd.f32 %v3580_v15, %v3492_v53 }
 0x2a7   : > { %v3669_v13 = vpop.f32.mrf.mxu3  ;;  %v3496_v31 = vpop.f32.mrf.mxu1 }
 0x2a8   : > { %v3670_v35 = vadd.f32 %v3669_v13, %v3581_v7  ;;  %v3497_v16 = vadd.f32 %v3496_v31, %v6705_v14 }
 0x2aa   : > { %v3759_v40 = vadd.f32 %v3758_v28, %v3670_v35 }
 0x2ab   : > { %v3761_v32 = vpop.f32.mrf.mxu0 }
 0x2ac   : > { %v5593_v45 = vpack.c.bf16 %v3759_v40, %v3757_v24  ;;  %v3876_v34 = vadd.f32 %v3875_v56, %v3759_v40  ;;  %v3915_v22 = vmul.f32 %v3759_v40, %v3759_v40 }
 0x2ad   : > { %v3583_v23 = vpop.f32.mrf.mxu2 }
 0x2ae   : > { %5652 = vst [vmem:[%s6800_s21 + $0x40] sm:$0xff] %v5593_v45   ;;  %v3946_v48 = vadd.f32 %v3945_v27, %v3915_v22  ;;  %v3584_v29 = vadd.f32 %v3583_v23, %v3495_v47 }
 0x2af   : > { %v3672_v20 = vpop.f32.mrf.mxu3  ;;  %v3499_v0 = vpop.f32.mrf.mxu1 }
 0x2b0   : > { %v3673_v51 = vadd.f32 %v3672_v20, %v3584_v29  ;;  %v3500_v4 = vadd.f32 %v3499_v0, %v6715_v42 }
 0x2b2   : > { %v3762_v50 = vadd.f32 %v3761_v32, %v3673_v51 }
 0x2b3   : > { %v3763_v52 = vpop.f32.mrf.mxu0 }
 0x2b4   : > { %v3877_v39 = vadd.f32 %v3876_v34, %v3762_v50  ;;  %v3916_v54 = vmul.f32 %v3762_v50, %v3762_v50 }
 0x2b5   : > { %v3585_v3 = vpop.f32.mrf.mxu2 }
 0x2b6   : > { %v3947_v9 = vadd.f32 %v3946_v48, %v3916_v54  ;;  %v3586_v36 = vadd.f32 %v3585_v3, %v3497_v16 }
 0x2b7   : > { %v3674_v33 = vpop.f32.mrf.mxu3  ;;  %v3501_v60 = vpop.f32.mrf.mxu1 }
 0x2b8   : > { %v3675_v8 = vadd.f32 %v3674_v33, %v3586_v36  ;;  %v3502_v19 = vadd.f32 %v3501_v60, %v6719_v58 }
 0x2ba   : > { %v3764_v26 = vadd.f32 %v3763_v52, %v3675_v8 }
 0x2bb   : > { %v3766_v2 = vpop.f32.mrf.mxu0 }
 0x2bc   : > { %v5598_v44 = vpack.c.bf16 %v3764_v26, %v3762_v50  ;;  %v3878_v18 = vadd.f32 %v3877_v39, %v3764_v26  ;;  %v3917_v49 = vmul.f32 %v3764_v26, %v3764_v26 }
 0x2bd   : > { %v3588_v43 = vpop.f32.mrf.mxu2 }
 0x2be   : > { %5653 = vst [vmem:[%s6800_s21 + $0x48] sm:$0xff] %v5598_v44   ;;  %v3948_v37 = vadd.f32 %v3947_v9, %v3917_v49  ;;  %v3589_v21 = vadd.f32 %v3588_v43, %v3500_v4 }
 0x2bf   : > { %v3677_v17 = vpop.f32.mrf.mxu3  ;;  %v3504_v6 = vpop.f32.mrf.mxu1 }
 0x2c0   : > { %v3678_v14 = vadd.f32 %v3677_v17, %v3589_v21  ;;  %v3505_v31 = vadd.f32 %v3504_v6, %v6729_v30 }
 0x2c2   : > { %v3767_v62 = vadd.f32 %v3766_v2, %v3678_v14 }
 0x2c3   : > { %v3768_v25 = vpop.f32.mrf.mxu0 }
 0x2c4   : > { %v3879_v61 = vadd.f32 %v3878_v18, %v3767_v62  ;;  %v3918_v1 = vmul.f32 %v3767_v62, %v3767_v62 }
 0x2c5   : > { %v3590_v63 = vpop.f32.mrf.mxu2 }
 0x2c6   : > { %v3949_v24 = vadd.f32 %v3948_v37, %v3918_v1  ;;  %v3591_v28 = vadd.f32 %v3590_v63, %v3502_v19 }
 0x2c7   : > { %v3679_v56 = vpop.f32.mrf.mxu3  ;;  %v3506_v11 = vpop.f32.mrf.mxu1 }
 0x2c8   : > { %v3680_v42 = vadd.f32 %v3679_v56, %v3591_v28  ;;  %v3507_v29 = vadd.f32 %v3506_v11, %v6733_v5 }
 0x2ca   : > { %v3769_v53 = vadd.f32 %v3768_v25, %v3680_v42 }
 0x2cb   : > { %v3771_v15 = vpop.f32.mrf.mxu0 }
 0x2cc   : > { %v5603_v27 = vpack.c.bf16 %v3769_v53, %v3767_v62  ;;  %v3880_v7 = vadd.f32 %v3879_v61, %v3769_v53  ;;  %v3919_v13 = vmul.f32 %v3769_v53, %v3769_v53 }
 0x2cd   : > { %v3593_v35 = vpop.f32.mrf.mxu2 }
 0x2ce   : > { %5654 = vst [vmem:[%s6800_s21 + $0x50] sm:$0xff] %v5603_v27   ;;  %v3950_v40 = vadd.f32 %v3949_v24, %v3919_v13  ;;  %v3594_v32 = vadd.f32 %v3593_v35, %v3505_v31 }
 0x2cf   : > { %v3682_v45 = vpop.f32.mrf.mxu3  ;;  %v3509_v34 = vpop.f32.mrf.mxu1 }
 0x2d0   : > { %v3683_v58 = vadd.f32 %v3682_v45, %v3594_v32  ;;  %v3510_v36 = vadd.f32 %v3509_v34, %v6743_v59 }
 0x2d2   : > { %v3772_v22 = vadd.f32 %v3771_v15, %v3683_v58 }
 0x2d3   : > { %v3773_v47 = vpop.f32.mrf.mxu0 }
 0x2d4   : > { %v3881_v23 = vadd.f32 %v3880_v7, %v3772_v22  ;;  %v3920_v48 = vmul.f32 %v3772_v22, %v3772_v22 }
 0x2d5   : > { %v3595_v20 = vpop.f32.mrf.mxu2 }
 0x2d6   : > { %v3951_v0 = vadd.f32 %v3950_v40, %v3920_v48  ;;  %v3596_v51 = vadd.f32 %v3595_v20, %v3507_v29 }
 0x2d7   : > { %v3684_v50 = vpop.f32.mrf.mxu3  ;;  %v3511_v52 = vpop.f32.mrf.mxu1 }
 0x2d8   : > { %v3685_v30 = vadd.f32 %v3684_v50, %v3596_v51  ;;  %v3512_v43 = vadd.f32 %v3511_v52, %v6747_v57 }
 0x2da   : > { %v3774_v39 = vadd.f32 %v3773_v47, %v3685_v30 }
 0x2db   : > { %v3776_v54 = vpop.f32.mrf.mxu0 }
 0x2dc   : > { %v5608_v16 = vpack.c.bf16 %v3774_v39, %v3772_v22  ;;  %v3882_v3 = vadd.f32 %v3881_v23, %v3774_v39  ;;  %v3921_v9 = vmul.f32 %v3774_v39, %v3774_v39 }
 0x2dd   : > { %v3598_v33 = vpop.f32.mrf.mxu2 }
 0x2de   : > { %5655 = vst [vmem:[%s6800_s21 + $0x58] sm:$0xff] %v5608_v16   ;;  %v3952_v60 = vadd.f32 %v3951_v0, %v3921_v9  ;;  %v3599_v8 = vadd.f32 %v3598_v33, %v3510_v36 }
 0x2df   : > { %v3687_v26 = vpop.f32.mrf.mxu3  ;;  %v3514_v2 = vpop.f32.mrf.mxu1 }
 0x2e0   : > { %v3688_v5 = vadd.f32 %v3687_v26, %v3599_v8  ;;  %v3515_v63 = vadd.f32 %v3514_v2, %v6757_v55 }
 0x2e2   : > { %v3777_v44 = vadd.f32 %v3776_v54, %v3688_v5 }
 0x2e3   : > { %v3778_v18 = vpop.f32.mrf.mxu0 }
 0x2e4   : > { %v3883_v49 = vadd.f32 %v3882_v3, %v3777_v44  ;;  %v3922_v4 = vmul.f32 %v3777_v44, %v3777_v44 }
 0x2e5   : > { %v3600_v37 = vpop.f32.mrf.mxu2 }
 0x2e6   : > { %v3953_v21 = vadd.f32 %v3952_v60, %v3922_v4  ;;  %v3601_v17 = vadd.f32 %v3600_v37, %v3512_v43 }
 0x2e7   : > { %v3689_v6 = vpop.f32.mrf.mxu3  ;;  %v3516_v59 = vpop.f32.mrf.mxu1 }
 0x2e8   : > { %v3690_v14 = vadd.f32 %v3689_v6, %v3601_v17  ;;  %v3517_v13 = vadd.f32 %v3516_v59, %v6761_v10 }
 0x2ea   : > { %v3779_v62 = vadd.f32 %v3778_v18, %v3690_v14 }
 0x2eb   : > { %v3781_v25 = vpop.f32.mrf.mxu0 }
 0x2ec   : > { %v5613_v61 = vpack.c.bf16 %v3779_v62, %v3777_v44  ;;  %v3884_v1 = vadd.f32 %v3883_v49, %v3779_v62  ;;  %v3923_v19 = vmul.f32 %v3779_v62, %v3779_v62 }
 0x2ed   : > { %v3603_v24 = vpop.f32.mrf.mxu2 }
 0x2ee   : > { %5656 = vst [vmem:[%s6800_s21 + $0x60] sm:$0xff] %v5613_v61   ;;  %v3954_v28 = vadd.f32 %v3953_v21, %v3923_v19  ;;  %v3604_v56 = vadd.f32 %v3603_v24, %v3515_v63 }
 0x2ef   : > { %v3692_v11 = vpop.f32.mrf.mxu3  ;;  %v3519_v15 = vpop.f32.mrf.mxu1 }
 0x2f0   : > { %v3693_v42 = vadd.f32 %v3692_v11, %v3604_v56  ;;  %v3520_v23 = vadd.f32 %v3519_v15, %v6771_v41 }
 0x2f2   : > { %v3782_v57 = vadd.f32 %v3781_v25, %v3693_v42 }
 0x2f3   : > { %v3783_v53 = vpop.f32.mrf.mxu0 }
 0x2f4   : > { %v3885_v27 = vadd.f32 %v3884_v1, %v3782_v57  ;;  %v3924_v7 = vmul.f32 %v3782_v57, %v3782_v57 }
 0x2f5   : > { %v3605_v31 = vpop.f32.mrf.mxu2 }
 0x2f6   : > { %v3955_v35 = vadd.f32 %v3954_v28, %v3924_v7  ;;  %v3606_v40 = vadd.f32 %v3605_v31, %v3517_v13 }
 0x2f7   : > { %v3694_v32 = vpop.f32.mrf.mxu3  ;;  %v3521_v29 = vpop.f32.mrf.mxu1 }
 0x2f8   : > { %v3695_v45 = vadd.f32 %v3694_v32, %v3606_v40  ;;  %v3522_v39 = vadd.f32 %v3521_v29, %v6775_v46 }
 0x2fa   : > { %v3784_v55 = vadd.f32 %v3783_v53, %v3695_v45 }
 0x2fb   : > { %v3786_v34 = vpop.f32.mrf.mxu0 }
 0x2fc   : > { %v5618_v58 = vpack.c.bf16 %v3784_v55, %v3782_v57  ;;  %v3886_v22 = vadd.f32 %v3885_v27, %v3784_v55  ;;  %v3925_v47 = vmul.f32 %v3784_v55, %v3784_v55 }
 0x2fd   : > { %v3608_v48 = vpop.f32.mrf.mxu2 }
 0x2fe   : > { %5657 = vst [vmem:[%s6800_s21 + $0x68] sm:$0xff] %v5618_v58   ;;  %v3956_v20 = vadd.f32 %v3955_v35, %v3925_v47  ;;  %v3609_v0 = vadd.f32 %v3608_v48, %v3520_v23 }
 0x2ff   : > { %v3697_v51 = vpop.f32.mrf.mxu3  ;;  %v3524_v33 = vpop.f32.mrf.mxu1 }
 0x300   : > { %v3698_v50 = vadd.f32 %v3697_v51, %v3609_v0  ;;  %v3525_v5 = vadd.f32 %v3524_v33, %v6783_v38 }
 0x302   : > { %v3787_v10 = vadd.f32 %v3786_v34, %v3698_v50 }
 0x303   : > { %v3788_v54 = vpop.f32.mrf.mxu0 }
 0x304   : > { %v3887_v52 = vadd.f32 %v3886_v22, %v3787_v10  ;;  %v3926_v30 = vmul.f32 %v3787_v10, %v3787_v10 }
 0x305   : > { %v3610_v16 = vpop.f32.mrf.mxu2 }
 0x306   : > { %v3957_v3 = vadd.f32 %v3956_v20, %v3926_v30  ;;  %v3611_v9 = vadd.f32 %v3610_v16, %v3522_v39 }
 0x307   : > { %v3699_v36 = vpop.f32.mrf.mxu3  ;;  %v3526_v37 = vpop.f32.mrf.mxu1 }
 0x308   : > { %v3700_v41 = vadd.f32 %v3699_v36, %v3611_v9  ;;  %v3527_v14 = vadd.f32 %v3526_v37, %v6785_v12 }
 0x30a   : > { %v3789_v60 = vadd.f32 %v3788_v54, %v3700_v41 }
 0x30b   : > { %v3791_v4 = vpop.f32.mrf.mxu0 }
 0x30c   : > { %v5623_v8 = vpack.c.bf16 %v3789_v60, %v3787_v10  ;;  %v3888_v26 = vadd.f32 %v3887_v52, %v3789_v60  ;;  %v3927_v2 = vmul.f32 %v3789_v60, %v3789_v60 }
 0x30d   : > { %v3613_v44 = vpop.f32.mrf.mxu2 }
 0x30e   : > { %5658 = vst [vmem:[%s6800_s21 + $0x70] sm:$0xff] %v5623_v8   ;;  %v3958_v18 = vadd.f32 %v3957_v3, %v3927_v2  ;;  %v3614_v49 = vadd.f32 %v3613_v44, %v3525_v5 }
 0x30f   : > { %v3702_v43 = vpop.f32.mrf.mxu3 }
 0x310   : > { %v3703_v46 = vadd.f32 %v3702_v43, %v3614_v49 }
 0x312   : > { %v3792_v21 = vadd.f32 %v3791_v4, %v3703_v46 }
 0x313   : > { %v3793_v1 = vpop.f32.mrf.mxu0 }
 0x314   : > { %v3889_v17 = vadd.f32 %v3888_v26, %v3792_v21  ;;  %v3928_v6 = vmul.f32 %v3792_v21, %v3792_v21 }
 0x315   : > { %v3615_v59 = vpop.f32.mrf.mxu2 }
 0x316   : > { %v3959_v62 = vadd.f32 %v3958_v18, %v3928_v6  ;;  %v3616_v25 = vadd.f32 %v3615_v59, %v3527_v14 }
 0x317   : > { %v3704_v61 = vpop.f32.mrf.mxu3 }
 0x318   : > { %v3705_v38 = vadd.f32 %v3704_v61, %v3616_v25 }
 0x31a   : > { %v3794_v19 = vadd.f32 %v3793_v1, %v3705_v38 }
 0x31c   : > { %v5628_v63 = vpack.c.bf16 %v3794_v19, %v3792_v21  ;;  %v3890_v24 = vadd.f32 %v3889_v17, %v3794_v19  ;;  %v3929_v28 = vmul.f32 %v3794_v19, %v3794_v19 }
 0x31e   : > { %5659 = vst [vmem:[%s6800_s21 + $0x78] sm:$0xff] %v5628_v63   ;;  %v3891_v56 = vrot.slane %v3890_v24, 4  ;;  %v3960_v11 = vadd.f32 %v3959_v62, %v3929_v28 }
 0x320   : > { %v3892_v42 = vadd.f32 %v3891_v56, %v3890_v24  ;;  %v3961_v57 = vrot.slane %v3960_v11, 4 }
 0x322   : > { %v3893_v53 = vrot.slane %v3892_v42, 2  ;;  %v3962_v15 = vadd.f32 %v3961_v57, %v3960_v11 }
 0x324   : > { %v3894_v12 = vadd.f32 %v3893_v53, %v3892_v42  ;;  %v3963_v27 = vrot.slane %v3962_v15, 2 }
 0x326   : > { %v3895_v7 = vrot.slane %v3894_v12, 1  ;;  %v3964_v13 = vadd.f32 %v3963_v27, %v3962_v15 }
 0x328   : > { %v3896_v31 = vadd.f32 %v3895_v7, %v3894_v12  ;;  %v3965_v35 = vrot.slane %v3964_v13, 1 }
 0x32a   : > { %3897 = vst [vmem:[%s348_s15] sm:$0x1] %v3896_v31  ;;  %v3966_v40 = vadd.f32 %v3965_v35, %v3964_v13 }
 0x32c   : > { %3967 = vst [vmem:[%s348_s15 + $0x1] sm:$0x1] %v3966_v40 }
 0x32d PF: > { %s19_s27 = sadd.s32 1, %s5707_s27  }
 0x32e   : > { %p16_p4 = scmp.ge.s32.totalorder %s19_s27, 4  }
 0x330   :  { %18 = sbr.rel (!%p16_p4) target bundleno = 1 (0x1), region = 105 }

</bundles_post_ra>
